<compile_context>
chip_gen: v5e
topology: v5e:2x2
jax: 0.10.0
libtpu: 0.0.40
codegen_flags: <defaults>
</compile_context>

<pallas_src>
import jax
import jax.numpy as jnp
from jax.experimental import pallas as pl
from jax.experimental.pallas import tpu as pltpu


# Left zero-pad (in sublanes) of the staged images: one full sublane tile, so
# the interior stores into the padded scratch are unmasked / tile-aligned.
_PADL = 8


# -----------------------------------------------------------------------------
# Fused Pallas kernel: conv3x3 + BN + ReLU + conv3x3 + BN + ReLU  (one image)
# -----------------------------------------------------------------------------
def _double_conv_kernel(x_ref, w1_ref, b1_ref, w2_ref, b2_ref, o_ref,
                        xp_ref, h1p_ref, acc1_ref, acc2_ref):
    H = xp_ref.shape[0] - 2
    W = xp_ref.shape[1] - _PADL - 1
    HW = H * W
    d0 = xp_ref.shape[-1]
    d1 = acc1_ref.shape[-1]
    d2 = acc2_ref.shape[-1]

    taps = [(kh, kw) for kh in range(3) for kw in range(3)]

    # ---- stage the image into a zero-padded, channels-last VMEM scratch ----
    # x arrives lane-dense as (d0, H*W); one tiny in-VMEM transpose, then a
    # fully tile-aligned interior store (row offset is a leading dim, column
    # offset is _PADL = one whole sublane tile).
    xp_ref[...] = jnp.zeros(xp_ref.shape, jnp.float32)
    h1p_ref[...] = jnp.zeros(h1p_ref.shape, jnp.float32)
    xt = jnp.transpose(x_ref[0], (1, 0)).reshape(H, W, d0)
    xp_ref[1:H + 1, _PADL:_PADL + W, :] = xt

    # ---- conv1 (BN1 scale pre-folded into w1): 9 accumulated 2-D matmuls ---
    for i, (kh, kw) in enumerate(taps):
        c0 = kw + _PADL - 1                                   # column of tap kw
        xs = xp_ref[kh:kh + H, c0:c0 + W, :]                  # (H, W, d0)
        t = jnp.dot(xs.reshape(HW, d0), w1_ref[kh, kw],
                    preferred_element_type=jnp.float32)       # (HW, d1)
        if i == 0:
            acc1_ref[...] = t
        else:
            acc1_ref[...] += t

    # ---- BN1 bias + ReLU; stage as conv2's zero-padded input ---------------
    h1 = jnp.maximum(acc1_ref[...] + b1_ref[...], 0.0)
    h1p_ref[1:H + 1, _PADL:_PADL + W, :] = h1.reshape(H, W, d1)

    # ---- conv2 (BN2 scale pre-folded into w2) -------------------------------
    for i, (kh, kw) in enumerate(taps):
        c0 = kw + _PADL - 1
        hs = h1p_ref[kh:kh + H, c0:c0 + W, :]                 # (H, W, d1)
        t = jnp.dot(hs.reshape(HW, d1), w2_ref[kh, kw],
                    preferred_element_type=jnp.float32)       # (HW, d2)
        if i == 0:
            acc2_ref[...] = t
        else:
            acc2_ref[...] += t

    # ---- BN2 bias + ReLU; lane-dense (d2, H*W) store ------------------------
    y = jnp.maximum(acc2_ref[...] + b2_ref[...], 0.0)         # (HW, d2)
    o_ref[0] = jnp.transpose(y, (1, 0)).astype(o_ref.dtype)   # (d2, HW)


# -----------------------------------------------------------------------------
# Wrapper (public interface is NCHW, like the PyTorch module)
# -----------------------------------------------------------------------------
def _bn_fold(gamma, beta, mean, var, eps=1e-5):
    scale = gamma / jnp.sqrt(var + eps)
    bias = beta - mean * scale
    return scale, bias


def double_conv_forward(x_nchw, p):
    N, d0, H, W = x_nchw.shape
    d1 = p["w1"].shape[-1]
    d2 = p["w2"].shape[-1]
    HW = H * W
    Wp = W + _PADL + 1

    # Fold eval-mode BN scale into the conv weights (exact); kernel adds bias.
    s1, b1 = _bn_fold(*p["bn1"])
    s2, b2 = _bn_fold(*p["bn2"])
    w1f = (p["w1"] * s1[None, None, None, :]).astype(jnp.float32)  # (3,3,d0,d1)
    w2f = (p["w2"] * s2[None, None, None, :]).astype(jnp.float32)  # (3,3,d1,d2)
    b1 = b1.reshape(1, d1).astype(jnp.float32)
    b2 = b2.reshape(1, d2).astype(jnp.float32)

    # Lane-dense HBM views: pure reshapes, no pad/transpose HBM round trip.
    x_flat = x_nchw.reshape(N, d0, HW)

    flops = 2 * N * 9 * HW * (d0 * d1 + d1 * d2)
    bytes_accessed = 4 * (x_flat.size + w1f.size + w2f.size + b1.size + b2.size
                          + N * d2 * HW)

    out_flat = pl.pallas_call(
        _double_conv_kernel,
        out_shape=jax.ShapeDtypeStruct((N, d2, HW), x_nchw.dtype),
        grid=(N,),
        in_specs=[
            pl.BlockSpec((1, d0, HW), lambda n: (n, 0, 0)),        # one image
            pl.BlockSpec((3, 3, d0, d1), lambda n: (0, 0, 0, 0)),  # resident
            pl.BlockSpec((1, d1), lambda n: (0, 0)),
            pl.BlockSpec((3, 3, d1, d2), lambda n: (0, 0, 0, 0)),  # resident
            pl.BlockSpec((1, d2), lambda n: (0, 0)),
        ],
        out_specs=pl.BlockSpec((1, d2, HW), lambda n: (n, 0, 0)),
        scratch_shapes=[
            pltpu.VMEM((H + 2, Wp, d0), jnp.float32),  # zero-padded conv1 input
            pltpu.VMEM((H + 2, Wp, d1), jnp.float32),  # zero-padded conv2 input
            pltpu.VMEM((HW, d1), jnp.float32),         # conv1 accumulator
            pltpu.VMEM((HW, d2), jnp.float32),         # conv2 accumulator
        ],
        compiler_params=pltpu.CompilerParams(dimension_semantics=("parallel",)),
        cost_estimate=pl.CostEstimate(flops=flops, transcendentals=0,
                                      bytes_accessed=bytes_accessed),
    )(x_flat, w1f, b1, w2f, b2)

    return out_flat.reshape(N, d2, H, W)               # NCHW, pure reshape


# -----------------------------------------------------------------------------
# Parameters (deterministic init)
# -----------------------------------------------------------------------------
def init_params(key, d0, d1, d2):
    ks = jax.random.split(key, 4)
    f32 = jnp.float32

    def conv_w(k, shape):                       # torch OIHW, He init
        fan_in = shape[1] * shape[2] * shape[3]
        return jax.random.normal(k, shape, f32) * (2.0 / fan_in) ** 0.5

    def bn_p(k, c):
        k1, k2, k3, k4 = jax.random.split(k, 4)
        gamma = 1.0 + 0.1 * jax.random.normal(k1, (c,), f32)
        beta = 0.1 * jax.random.normal(k2, (c,), f32)
        mean = 0.1 * jax.random.normal(k3, (c,), f32)
        var = 0.5 + jax.random.uniform(k4, (c,), f32)
        return gamma, beta, mean, var

    w1_t = conv_w(ks[0], (d1, d0, 3, 3))
    w2_t = conv_w(ks[1], (d2, d1, 3, 3))
    return dict(
        # kernel-layout weights: (kh, kw, cin, cout)
        w1=jnp.transpose(w1_t, (2, 3, 1, 0)),
        w2=jnp.transpose(w2_t, (2, 3, 1, 0)),
        bn1=bn_p(ks[2], d1), bn2=bn_p(ks[3], d2),
        # raw torch-layout weights for the pure-JAX reference
        w1_t=w1_t, w2_t=w2_t,
    )


# -----------------------------------------------------------------------------
# Pure-JAX reference (NCHW, mirrors PyTorch forward with eval-mode BN)
# -----------------------------------------------------------------------------
def _conv3x3(x, w):
    return jax.lax.conv_general_dilated(
        x, w, (1, 1), ((1, 1), (1, 1)),
        dimension_numbers=("NCHW", "OIHW", "NCHW"),
        precision=jax.lax.Precision.HIGHEST)


def _bn(x, bn, eps=1e-5):
    gamma, beta, mean, var = (v.reshape(1, -1, 1, 1) for v in bn)
    return gamma * (x - mean) / jnp.sqrt(var + eps) + beta


def double_conv_reference(x, p):
    h = jax.nn.relu(_bn(_conv3x3(x, p["w1_t"]), p["bn1"]))
    return jax.nn.relu(_bn(_conv3x3(h, p["w2_t"]), p["bn2"]))


# -----------------------------------------------------------------------------
if __name__ == "__main__":
    d0, d1, d2 = 4, 8, 16
    N, H, W = 2, 16, 16

    key = jax.random.PRNGKey(0)
    kx, kp = jax.random.split(key)
    x = jax.random.normal(kx, (N, d0, H, W), jnp.float32)
    params = init_params(kp, d0, d1, d2)

    out = jax.jit(lambda a: double_conv_forward(a, params))(x)
    out = jax.block_until_ready(out)

    ref = double_conv_reference(x, params)
    assert out.shape == ref.shape == (N, d2, H, W), out.shape
    err = float(jnp.max(jnp.abs(out - ref)))
    assert jnp.allclose(out, ref, rtol=1e-4, atol=1e-5), err

    print("KERNEL_OK")
</pallas_src>

<mosaic_0001>
module attributes {stable_mosaic.version = 11 : i64} {
  func.func @_double_conv_kernel(%arg0: i32, %arg1: memref<1x4x256xf32, #tpu.memory_space<vmem>>, %arg2: memref<3x3x4x8xf32, #tpu.memory_space<vmem>>, %arg3: memref<1x8xf32, #tpu.memory_space<vmem>>, %arg4: memref<3x3x8x16xf32, #tpu.memory_space<vmem>>, %arg5: memref<1x16xf32, #tpu.memory_space<vmem>>, %arg6: memref<1x16x256xf32, #tpu.memory_space<vmem>>, %arg7: memref<18x25x4xf32, #tpu.memory_space<vmem>>, %arg8: memref<18x25x8xf32, #tpu.memory_space<vmem>>, %arg9: memref<256x8xf32, #tpu.memory_space<vmem>>, %arg10: memref<256x16xf32, #tpu.memory_space<vmem>>) attributes {dimension_semantics = [#tpu.dimension_semantics<parallel>], iteration_bounds = array<i64: 2>, scalar_prefetch = 0 : i64, scratch_operands = 4 : i64, tpu.core_type = #tpu.core_type<tc>, window_params = [{transform_indices = @transform_0, window_bounds = array<i64: 1, 4, 256>}, {pipeline_mode = #tpu.pipeline_mode<synchronous>, transform_indices = @transform_1, window_bounds = array<i64: 3, 3, 4, 8>}, {pipeline_mode = #tpu.pipeline_mode<synchronous>, transform_indices = @transform_2, window_bounds = array<i64: 1, 8>}, {pipeline_mode = #tpu.pipeline_mode<synchronous>, transform_indices = @transform_3, window_bounds = array<i64: 3, 3, 8, 16>}, {pipeline_mode = #tpu.pipeline_mode<synchronous>, transform_indices = @transform_4, window_bounds = array<i64: 1, 16>}, {transform_indices = @transform_5, window_bounds = array<i64: 1, 16, 256>}]} {
    %cst = arith.constant 0.000000e+00 : f32
    %0 = vector.broadcast %cst : f32 to vector<18x25x4xf32>
    %c0 = arith.constant 0 : index
    %c0_0 = arith.constant 0 : index
    %c0_1 = arith.constant 0 : index
    %1 = vector.load %arg7[%c0, %c0_0, %c0_1] : memref<18x25x4xf32, #tpu.memory_space<vmem>>, vector<18x25x4xf32>
    tpu.vector_store %arg7[%c0, %c0_0, %c0_1], %0 {strides = array<i32>} : memref<18x25x4xf32, #tpu.memory_space<vmem>>, vector<18x25x4xf32>,
    %cst_2 = arith.constant 0.000000e+00 : f32
    %2 = vector.broadcast %cst_2 : f32 to vector<18x25x8xf32>
    %c0_3 = arith.constant 0 : index
    %c0_4 = arith.constant 0 : index
    %c0_5 = arith.constant 0 : index
    %3 = vector.load %arg8[%c0_3, %c0_4, %c0_5] : memref<18x25x8xf32, #tpu.memory_space<vmem>>, vector<18x25x8xf32>
    tpu.vector_store %arg8[%c0_3, %c0_4, %c0_5], %2 {strides = array<i32>} : memref<18x25x8xf32, #tpu.memory_space<vmem>>, vector<18x25x8xf32>,
    %c0_6 = arith.constant 0 : index
    %c0_7 = arith.constant 0 : index
    %c0_8 = arith.constant 0 : index
    %4 = vector.load %arg1[%c0_6, %c0_7, %c0_8] : memref<1x4x256xf32, #tpu.memory_space<vmem>>, vector<1x4x256xf32>
    %5 = vector.shape_cast %4 : vector<1x4x256xf32> to vector<4x256xf32>
    %6 = tpu.transpose %5, [1, 0] : vector<4x256xf32> -> vector<256x4xf32>
    %7 = vector.shape_cast %6 : vector<256x4xf32> to vector<16x16x4xf32>
    %c1 = arith.constant 1 : index
    %c8 = arith.constant 8 : index
    %c0_9 = arith.constant 0 : index
    %8 = vector.load %arg7[%c1, %c8, %c0_9] : memref<18x25x4xf32, #tpu.memory_space<vmem>>, vector<16x16x4xf32>
    tpu.vector_store %arg7[%c1, %c8, %c0_9], %7 {strides = array<i32>} : memref<18x25x4xf32, #tpu.memory_space<vmem>>, vector<16x16x4xf32>,
    %c0_10 = arith.constant 0 : index
    %c7 = arith.constant 7 : index
    %c0_11 = arith.constant 0 : index
    %9 = vector.load %arg7[%c0_10, %c7, %c0_11] : memref<18x25x4xf32, #tpu.memory_space<vmem>>, vector<16x16x4xf32>
    %10 = vector.shape_cast %9 : vector<16x16x4xf32> to vector<256x4xf32>
    %c0_12 = arith.constant 0 : index
    %c0_13 = arith.constant 0 : index
    %c0_14 = arith.constant 0 : index
    %c0_15 = arith.constant 0 : index
    %11 = vector.load %arg2[%c0_12, %c0_13, %c0_14, %c0_15] : memref<3x3x4x8xf32, #tpu.memory_space<vmem>>, vector<1x1x4x8xf32>
    %12 = vector.shape_cast %11 : vector<1x1x4x8xf32> to vector<4x8xf32>
    %cst_16 = arith.constant dense<0.000000e+00> : vector<256x8xf32>
    %13 = tpu.matmul %10, %12, %cst_16 {dimension_numbers = #tpu.dot_dimension_numbers<[1], [0], [0], [1], [0, 0, 1, 1], [], []>} : vector<256x4xf32>, vector<4x8xf32>, vector<256x8xf32> -> vector<256x8xf32>
    %c0_17 = arith.constant 0 : index
    %c0_18 = arith.constant 0 : index
    %14 = vector.load %arg9[%c0_17, %c0_18] : memref<256x8xf32, #tpu.memory_space<vmem>>, vector<256x8xf32>
    tpu.vector_store %arg9[%c0_17, %c0_18], %13 {strides = array<i32>} : memref<256x8xf32, #tpu.memory_space<vmem>>, vector<256x8xf32>,
    %c0_19 = arith.constant 0 : index
    %c8_20 = arith.constant 8 : index
    %c0_21 = arith.constant 0 : index
    %15 = vector.load %arg7[%c0_19, %c8_20, %c0_21] : memref<18x25x4xf32, #tpu.memory_space<vmem>>, vector<16x16x4xf32>
    %16 = vector.shape_cast %15 : vector<16x16x4xf32> to vector<256x4xf32>
    %c0_22 = arith.constant 0 : index
    %c1_23 = arith.constant 1 : index
    %c0_24 = arith.constant 0 : index
    %c0_25 = arith.constant 0 : index
    %17 = vector.load %arg2[%c0_22, %c1_23, %c0_24, %c0_25] : memref<3x3x4x8xf32, #tpu.memory_space<vmem>>, vector<1x1x4x8xf32>
    %18 = vector.shape_cast %17 : vector<1x1x4x8xf32> to vector<4x8xf32>
    %cst_26 = arith.constant dense<0.000000e+00> : vector<256x8xf32>
    %19 = tpu.matmul %16, %18, %cst_26 {dimension_numbers = #tpu.dot_dimension_numbers<[1], [0], [0], [1], [0, 0, 1, 1], [], []>} : vector<256x4xf32>, vector<4x8xf32>, vector<256x8xf32> -> vector<256x8xf32>
    %c0_27 = arith.constant 0 : index
    %c0_28 = arith.constant 0 : index
    %20 = vector.load %arg9[%c0_27, %c0_28] : memref<256x8xf32, #tpu.memory_space<vmem>>, vector<256x8xf32>
    %21 = arith.addf %20, %19 : vector<256x8xf32>
    %c0_29 = arith.constant 0 : index
    %c0_30 = arith.constant 0 : index
    %22 = vector.load %arg9[%c0_29, %c0_30] : memref<256x8xf32, #tpu.memory_space<vmem>>, vector<256x8xf32>
    tpu.vector_store %arg9[%c0_29, %c0_30], %21 {strides = array<i32>} : memref<256x8xf32, #tpu.memory_space<vmem>>, vector<256x8xf32>,
    %c0_31 = arith.constant 0 : index
    %c9 = arith.constant 9 : index
    %c0_32 = arith.constant 0 : index
    %23 = vector.load %arg7[%c0_31, %c9, %c0_32] : memref<18x25x4xf32, #tpu.memory_space<vmem>>, vector<16x16x4xf32>
    %24 = vector.shape_cast %23 : vector<16x16x4xf32> to vector<256x4xf32>
    %c0_33 = arith.constant 0 : index
    %c2 = arith.constant 2 : index
    %c0_34 = arith.constant 0 : index
    %c0_35 = arith.constant 0 : index
    %25 = vector.load %arg2[%c0_33, %c2, %c0_34, %c0_35] : memref<3x3x4x8xf32, #tpu.memory_space<vmem>>, vector<1x1x4x8xf32>
    %26 = vector.shape_cast %25 : vector<1x1x4x8xf32> to vector<4x8xf32>
    %cst_36 = arith.constant dense<0.000000e+00> : vector<256x8xf32>
    %27 = tpu.matmul %24, %26, %cst_36 {dimension_numbers = #tpu.dot_dimension_numbers<[1], [0], [0], [1], [0, 0, 1, 1], [], []>} : vector<256x4xf32>, vector<4x8xf32>, vector<256x8xf32> -> vector<256x8xf32>
    %c0_37 = arith.constant 0 : index
    %c0_38 = arith.constant 0 : index
    %28 = vector.load %arg9[%c0_37, %c0_38] : memref<256x8xf32, #tpu.memory_space<vmem>>, vector<256x8xf32>
    %29 = arith.addf %28, %27 : vector<256x8xf32>
    %c0_39 = arith.constant 0 : index
    %c0_40 = arith.constant 0 : index
    %30 = vector.load %arg9[%c0_39, %c0_40] : memref<256x8xf32, #tpu.memory_space<vmem>>, vector<256x8xf32>
    tpu.vector_store %arg9[%c0_39, %c0_40], %29 {strides = array<i32>} : memref<256x8xf32, #tpu.memory_space<vmem>>, vector<256x8xf32>,
    %c1_41 = arith.constant 1 : index
    %c7_42 = arith.constant 7 : index
    %c0_43 = arith.constant 0 : index
    %31 = vector.load %arg7[%c1_41, %c7_42, %c0_43] : memref<18x25x4xf32, #tpu.memory_space<vmem>>, vector<16x16x4xf32>
    %32 = vector.shape_cast %31 : vector<16x16x4xf32> to vector<256x4xf32>
    %c1_44 = arith.constant 1 : index
    %c0_45 = arith.constant 0 : index
    %c0_46 = arith.constant 0 : index
    %c0_47 = arith.constant 0 : index
    %33 = vector.load %arg2[%c1_44, %c0_45, %c0_46, %c0_47] : memref<3x3x4x8xf32, #tpu.memory_space<vmem>>, vector<1x1x4x8xf32>
    %34 = vector.shape_cast %33 : vector<1x1x4x8xf32> to vector<4x8xf32>
    %cst_48 = arith.constant dense<0.000000e+00> : vector<256x8xf32>
    %35 = tpu.matmul %32, %34, %cst_48 {dimension_numbers = #tpu.dot_dimension_numbers<[1], [0], [0], [1], [0, 0, 1, 1], [], []>} : vector<256x4xf32>, vector<4x8xf32>, vector<256x8xf32> -> vector<256x8xf32>
    %c0_49 = arith.constant 0 : index
    %c0_50 = arith.constant 0 : index
    %36 = vector.load %arg9[%c0_49, %c0_50] : memref<256x8xf32, #tpu.memory_space<vmem>>, vector<256x8xf32>
    %37 = arith.addf %36, %35 : vector<256x8xf32>
    %c0_51 = arith.constant 0 : index
    %c0_52 = arith.constant 0 : index
    %38 = vector.load %arg9[%c0_51, %c0_52] : memref<256x8xf32, #tpu.memory_space<vmem>>, vector<256x8xf32>
    tpu.vector_store %arg9[%c0_51, %c0_52], %37 {strides = array<i32>} : memref<256x8xf32, #tpu.memory_space<vmem>>, vector<256x8xf32>,
    %c1_53 = arith.constant 1 : index
    %c8_54 = arith.constant 8 : index
    %c0_55 = arith.constant 0 : index
    %39 = vector.load %arg7[%c1_53, %c8_54, %c0_55] : memref<18x25x4xf32, #tpu.memory_space<vmem>>, vector<16x16x4xf32>
    %40 = vector.shape_cast %39 : vector<16x16x4xf32> to vector<256x4xf32>
    %c1_56 = arith.constant 1 : index
    %c1_57 = arith.constant 1 : index
    %c0_58 = arith.constant 0 : index
    %c0_59 = arith.constant 0 : index
    %41 = vector.load %arg2[%c1_56, %c1_57, %c0_58, %c0_59] : memref<3x3x4x8xf32, #tpu.memory_space<vmem>>, vector<1x1x4x8xf32>
    %42 = vector.shape_cast %41 : vector<1x1x4x8xf32> to vector<4x8xf32>
    %cst_60 = arith.constant dense<0.000000e+00> : vector<256x8xf32>
    %43 = tpu.matmul %40, %42, %cst_60 {dimension_numbers = #tpu.dot_dimension_numbers<[1], [0], [0], [1], [0, 0, 1, 1], [], []>} : vector<256x4xf32>, vector<4x8xf32>, vector<256x8xf32> -> vector<256x8xf32>
    %c0_61 = arith.constant 0 : index
    %c0_62 = arith.constant 0 : index
    %44 = vector.load %arg9[%c0_61, %c0_62] : memref<256x8xf32, #tpu.memory_space<vmem>>, vector<256x8xf32>
    %45 = arith.addf %44, %43 : vector<256x8xf32>
    %c0_63 = arith.constant 0 : index
    %c0_64 = arith.constant 0 : index
    %46 = vector.load %arg9[%c0_63, %c0_64] : memref<256x8xf32, #tpu.memory_space<vmem>>, vector<256x8xf32>
    tpu.vector_store %arg9[%c0_63, %c0_64], %45 {strides = array<i32>} : memref<256x8xf32, #tpu.memory_space<vmem>>, vector<256x8xf32>,
    %c1_65 = arith.constant 1 : index
    %c9_66 = arith.constant 9 : index
    %c0_67 = arith.constant 0 : index
    %47 = vector.load %arg7[%c1_65, %c9_66, %c0_67] : memref<18x25x4xf32, #tpu.memory_space<vmem>>, vector<16x16x4xf32>
    %48 = vector.shape_cast %47 : vector<16x16x4xf32> to vector<256x4xf32>
    %c1_68 = arith.constant 1 : index
    %c2_69 = arith.constant 2 : index
    %c0_70 = arith.constant 0 : index
    %c0_71 = arith.constant 0 : index
    %49 = vector.load %arg2[%c1_68, %c2_69, %c0_70, %c0_71] : memref<3x3x4x8xf32, #tpu.memory_space<vmem>>, vector<1x1x4x8xf32>
    %50 = vector.shape_cast %49 : vector<1x1x4x8xf32> to vector<4x8xf32>
    %cst_72 = arith.constant dense<0.000000e+00> : vector<256x8xf32>
    %51 = tpu.matmul %48, %50, %cst_72 {dimension_numbers = #tpu.dot_dimension_numbers<[1], [0], [0], [1], [0, 0, 1, 1], [], []>} : vector<256x4xf32>, vector<4x8xf32>, vector<256x8xf32> -> vector<256x8xf32>
    %c0_73 = arith.constant 0 : index
    %c0_74 = arith.constant 0 : index
    %52 = vector.load %arg9[%c0_73, %c0_74] : memref<256x8xf32, #tpu.memory_space<vmem>>, vector<256x8xf32>
    %53 = arith.addf %52, %51 : vector<256x8xf32>
    %c0_75 = arith.constant 0 : index
    %c0_76 = arith.constant 0 : index
    %54 = vector.load %arg9[%c0_75, %c0_76] : memref<256x8xf32, #tpu.memory_space<vmem>>, vector<256x8xf32>
    tpu.vector_store %arg9[%c0_75, %c0_76], %53 {strides = array<i32>} : memref<256x8xf32, #tpu.memory_space<vmem>>, vector<256x8xf32>,
    %c2_77 = arith.constant 2 : index
    %c7_78 = arith.constant 7 : index
    %c0_79 = arith.constant 0 : index
    %55 = vector.load %arg7[%c2_77, %c7_78, %c0_79] : memref<18x25x4xf32, #tpu.memory_space<vmem>>, vector<16x16x4xf32>
    %56 = vector.shape_cast %55 : vector<16x16x4xf32> to vector<256x4xf32>
    %c2_80 = arith.constant 2 : index
    %c0_81 = arith.constant 0 : index
    %c0_82 = arith.constant 0 : index
    %c0_83 = arith.constant 0 : index
    %57 = vector.load %arg2[%c2_80, %c0_81, %c0_82, %c0_83] : memref<3x3x4x8xf32, #tpu.memory_space<vmem>>, vector<1x1x4x8xf32>
    %58 = vector.shape_cast %57 : vector<1x1x4x8xf32> to vector<4x8xf32>
    %cst_84 = arith.constant dense<0.000000e+00> : vector<256x8xf32>
    %59 = tpu.matmul %56, %58, %cst_84 {dimension_numbers = #tpu.dot_dimension_numbers<[1], [0], [0], [1], [0, 0, 1, 1], [], []>} : vector<256x4xf32>, vector<4x8xf32>, vector<256x8xf32> -> vector<256x8xf32>
    %c0_85 = arith.constant 0 : index
    %c0_86 = arith.constant 0 : index
    %60 = vector.load %arg9[%c0_85, %c0_86] : memref<256x8xf32, #tpu.memory_space<vmem>>, vector<256x8xf32>
    %61 = arith.addf %60, %59 : vector<256x8xf32>
    %c0_87 = arith.constant 0 : index
    %c0_88 = arith.constant 0 : index
    %62 = vector.load %arg9[%c0_87, %c0_88] : memref<256x8xf32, #tpu.memory_space<vmem>>, vector<256x8xf32>
    tpu.vector_store %arg9[%c0_87, %c0_88], %61 {strides = array<i32>} : memref<256x8xf32, #tpu.memory_space<vmem>>, vector<256x8xf32>,
    %c2_89 = arith.constant 2 : index
    %c8_90 = arith.constant 8 : index
    %c0_91 = arith.constant 0 : index
    %63 = vector.load %arg7[%c2_89, %c8_90, %c0_91] : memref<18x25x4xf32, #tpu.memory_space<vmem>>, vector<16x16x4xf32>
    %64 = vector.shape_cast %63 : vector<16x16x4xf32> to vector<256x4xf32>
    %c2_92 = arith.constant 2 : index
    %c1_93 = arith.constant 1 : index
    %c0_94 = arith.constant 0 : index
    %c0_95 = arith.constant 0 : index
    %65 = vector.load %arg2[%c2_92, %c1_93, %c0_94, %c0_95] : memref<3x3x4x8xf32, #tpu.memory_space<vmem>>, vector<1x1x4x8xf32>
    %66 = vector.shape_cast %65 : vector<1x1x4x8xf32> to vector<4x8xf32>
    %cst_96 = arith.constant dense<0.000000e+00> : vector<256x8xf32>
    %67 = tpu.matmul %64, %66, %cst_96 {dimension_numbers = #tpu.dot_dimension_numbers<[1], [0], [0], [1], [0, 0, 1, 1], [], []>} : vector<256x4xf32>, vector<4x8xf32>, vector<256x8xf32> -> vector<256x8xf32>
    %c0_97 = arith.constant 0 : index
    %c0_98 = arith.constant 0 : index
    %68 = vector.load %arg9[%c0_97, %c0_98] : memref<256x8xf32, #tpu.memory_space<vmem>>, vector<256x8xf32>
    %69 = arith.addf %68, %67 : vector<256x8xf32>
    %c0_99 = arith.constant 0 : index
    %c0_100 = arith.constant 0 : index
    %70 = vector.load %arg9[%c0_99, %c0_100] : memref<256x8xf32, #tpu.memory_space<vmem>>, vector<256x8xf32>
    tpu.vector_store %arg9[%c0_99, %c0_100], %69 {strides = array<i32>} : memref<256x8xf32, #tpu.memory_space<vmem>>, vector<256x8xf32>,
    %c2_101 = arith.constant 2 : index
    %c9_102 = arith.constant 9 : index
    %c0_103 = arith.constant 0 : index
    %71 = vector.load %arg7[%c2_101, %c9_102, %c0_103] : memref<18x25x4xf32, #tpu.memory_space<vmem>>, vector<16x16x4xf32>
    %72 = vector.shape_cast %71 : vector<16x16x4xf32> to vector<256x4xf32>
    %c2_104 = arith.constant 2 : index
    %c2_105 = arith.constant 2 : index
    %c0_106 = arith.constant 0 : index
    %c0_107 = arith.constant 0 : index
    %73 = vector.load %arg2[%c2_104, %c2_105, %c0_106, %c0_107] : memref<3x3x4x8xf32, #tpu.memory_space<vmem>>, vector<1x1x4x8xf32>
    %74 = vector.shape_cast %73 : vector<1x1x4x8xf32> to vector<4x8xf32>
    %cst_108 = arith.constant dense<0.000000e+00> : vector<256x8xf32>
    %75 = tpu.matmul %72, %74, %cst_108 {dimension_numbers = #tpu.dot_dimension_numbers<[1], [0], [0], [1], [0, 0, 1, 1], [], []>} : vector<256x4xf32>, vector<4x8xf32>, vector<256x8xf32> -> vector<256x8xf32>
    %c0_109 = arith.constant 0 : index
    %c0_110 = arith.constant 0 : index
    %76 = vector.load %arg9[%c0_109, %c0_110] : memref<256x8xf32, #tpu.memory_space<vmem>>, vector<256x8xf32>
    %77 = arith.addf %76, %75 : vector<256x8xf32>
    %c0_111 = arith.constant 0 : index
    %c0_112 = arith.constant 0 : index
    %78 = vector.load %arg9[%c0_111, %c0_112] : memref<256x8xf32, #tpu.memory_space<vmem>>, vector<256x8xf32>
    tpu.vector_store %arg9[%c0_111, %c0_112], %77 {strides = array<i32>} : memref<256x8xf32, #tpu.memory_space<vmem>>, vector<256x8xf32>,
    %c0_113 = arith.constant 0 : index
    %c0_114 = arith.constant 0 : index
    %79 = vector.load %arg9[%c0_113, %c0_114] : memref<256x8xf32, #tpu.memory_space<vmem>>, vector<256x8xf32>
    %c0_115 = arith.constant 0 : index
    %c0_116 = arith.constant 0 : index
    %80 = vector.load %arg3[%c0_115, %c0_116] : memref<1x8xf32, #tpu.memory_space<vmem>>, vector<1x8xf32>
    %81 = vector.broadcast %80 : vector<1x8xf32> to vector<256x8xf32>
    %82 = arith.addf %79, %81 : vector<256x8xf32>
    %cst_117 = arith.constant 0.000000e+00 : f32
    %83 = vector.broadcast %cst_117 : f32 to vector<256x8xf32>
    %84 = arith.maximumf %82, %83 : vector<256x8xf32>
    %85 = vector.shape_cast %84 : vector<256x8xf32> to vector<16x16x8xf32>
    %c1_118 = arith.constant 1 : index
    %c8_119 = arith.constant 8 : index
    %c0_120 = arith.constant 0 : index
    %86 = vector.load %arg8[%c1_118, %c8_119, %c0_120] : memref<18x25x8xf32, #tpu.memory_space<vmem>>, vector<16x16x8xf32>
    tpu.vector_store %arg8[%c1_118, %c8_119, %c0_120], %85 {strides = array<i32>} : memref<18x25x8xf32, #tpu.memory_space<vmem>>, vector<16x16x8xf32>,
    %c0_121 = arith.constant 0 : index
    %c7_122 = arith.constant 7 : index
    %c0_123 = arith.constant 0 : index
    %87 = vector.load %arg8[%c0_121, %c7_122, %c0_123] : memref<18x25x8xf32, #tpu.memory_space<vmem>>, vector<16x16x8xf32>
    %88 = vector.shape_cast %87 : vector<16x16x8xf32> to vector<256x8xf32>
    %c0_124 = arith.constant 0 : index
    %c0_125 = arith.constant 0 : index
    %c0_126 = arith.constant 0 : index
    %c0_127 = arith.constant 0 : index
    %89 = vector.load %arg4[%c0_124, %c0_125, %c0_126, %c0_127] : memref<3x3x8x16xf32, #tpu.memory_space<vmem>>, vector<1x1x8x16xf32>
    %90 = vector.shape_cast %89 : vector<1x1x8x16xf32> to vector<8x16xf32>
    %cst_128 = arith.constant dense<0.000000e+00> : vector<256x16xf32>
    %91 = tpu.matmul %88, %90, %cst_128 {dimension_numbers = #tpu.dot_dimension_numbers<[1], [0], [0], [1], [0, 0, 1, 1], [], []>} : vector<256x8xf32>, vector<8x16xf32>, vector<256x16xf32> -> vector<256x16xf32>
    %c0_129 = arith.constant 0 : index
    %c0_130 = arith.constant 0 : index
    %92 = vector.load %arg10[%c0_129, %c0_130] : memref<256x16xf32, #tpu.memory_space<vmem>>, vector<256x16xf32>
    tpu.vector_store %arg10[%c0_129, %c0_130], %91 {strides = array<i32>} : memref<256x16xf32, #tpu.memory_space<vmem>>, vector<256x16xf32>,
    %c0_131 = arith.constant 0 : index
    %c8_132 = arith.constant 8 : index
    %c0_133 = arith.constant 0 : index
    %93 = vector.load %arg8[%c0_131, %c8_132, %c0_133] : memref<18x25x8xf32, #tpu.memory_space<vmem>>, vector<16x16x8xf32>
    %94 = vector.shape_cast %93 : vector<16x16x8xf32> to vector<256x8xf32>
    %c0_134 = arith.constant 0 : index
    %c1_135 = arith.constant 1 : index
    %c0_136 = arith.constant 0 : index
    %c0_137 = arith.constant 0 : index
    %95 = vector.load %arg4[%c0_134, %c1_135, %c0_136, %c0_137] : memref<3x3x8x16xf32, #tpu.memory_space<vmem>>, vector<1x1x8x16xf32>
    %96 = vector.shape_cast %95 : vector<1x1x8x16xf32> to vector<8x16xf32>
    %cst_138 = arith.constant dense<0.000000e+00> : vector<256x16xf32>
    %97 = tpu.matmul %94, %96, %cst_138 {dimension_numbers = #tpu.dot_dimension_numbers<[1], [0], [0], [1], [0, 0, 1, 1], [], []>} : vector<256x8xf32>, vector<8x16xf32>, vector<256x16xf32> -> vector<256x16xf32>
    %c0_139 = arith.constant 0 : index
    %c0_140 = arith.constant 0 : index
    %98 = vector.load %arg10[%c0_139, %c0_140] : memref<256x16xf32, #tpu.memory_space<vmem>>, vector<256x16xf32>
    %99 = arith.addf %98, %97 : vector<256x16xf32>
    %c0_141 = arith.constant 0 : index
    %c0_142 = arith.constant 0 : index
    %100 = vector.load %arg10[%c0_141, %c0_142] : memref<256x16xf32, #tpu.memory_space<vmem>>, vector<256x16xf32>
    tpu.vector_store %arg10[%c0_141, %c0_142], %99 {strides = array<i32>} : memref<256x16xf32, #tpu.memory_space<vmem>>, vector<256x16xf32>,
    %c0_143 = arith.constant 0 : index
    %c9_144 = arith.constant 9 : index
    %c0_145 = arith.constant 0 : index
    %101 = vector.load %arg8[%c0_143, %c9_144, %c0_145] : memref<18x25x8xf32, #tpu.memory_space<vmem>>, vector<16x16x8xf32>
    %102 = vector.shape_cast %101 : vector<16x16x8xf32> to vector<256x8xf32>
    %c0_146 = arith.constant 0 : index
    %c2_147 = arith.constant 2 : index
    %c0_148 = arith.constant 0 : index
    %c0_149 = arith.constant 0 : index
    %103 = vector.load %arg4[%c0_146, %c2_147, %c0_148, %c0_149] : memref<3x3x8x16xf32, #tpu.memory_space<vmem>>, vector<1x1x8x16xf32>
    %104 = vector.shape_cast %103 : vector<1x1x8x16xf32> to vector<8x16xf32>
    %cst_150 = arith.constant dense<0.000000e+00> : vector<256x16xf32>
    %105 = tpu.matmul %102, %104, %cst_150 {dimension_numbers = #tpu.dot_dimension_numbers<[1], [0], [0], [1], [0, 0, 1, 1], [], []>} : vector<256x8xf32>, vector<8x16xf32>, vector<256x16xf32> -> vector<256x16xf32>
    %c0_151 = arith.constant 0 : index
    %c0_152 = arith.constant 0 : index
    %106 = vector.load %arg10[%c0_151, %c0_152] : memref<256x16xf32, #tpu.memory_space<vmem>>, vector<256x16xf32>
    %107 = arith.addf %106, %105 : vector<256x16xf32>
    %c0_153 = arith.constant 0 : index
    %c0_154 = arith.constant 0 : index
    %108 = vector.load %arg10[%c0_153, %c0_154] : memref<256x16xf32, #tpu.memory_space<vmem>>, vector<256x16xf32>
    tpu.vector_store %arg10[%c0_153, %c0_154], %107 {strides = array<i32>} : memref<256x16xf32, #tpu.memory_space<vmem>>, vector<256x16xf32>,
    %c1_155 = arith.constant 1 : index
    %c7_156 = arith.constant 7 : index
    %c0_157 = arith.constant 0 : index
    %109 = vector.load %arg8[%c1_155, %c7_156, %c0_157] : memref<18x25x8xf32, #tpu.memory_space<vmem>>, vector<16x16x8xf32>
    %110 = vector.shape_cast %109 : vector<16x16x8xf32> to vector<256x8xf32>
    %c1_158 = arith.constant 1 : index
    %c0_159 = arith.constant 0 : index
    %c0_160 = arith.constant 0 : index
    %c0_161 = arith.constant 0 : index
    %111 = vector.load %arg4[%c1_158, %c0_159, %c0_160, %c0_161] : memref<3x3x8x16xf32, #tpu.memory_space<vmem>>, vector<1x1x8x16xf32>
    %112 = vector.shape_cast %111 : vector<1x1x8x16xf32> to vector<8x16xf32>
    %cst_162 = arith.constant dense<0.000000e+00> : vector<256x16xf32>
    %113 = tpu.matmul %110, %112, %cst_162 {dimension_numbers = #tpu.dot_dimension_numbers<[1], [0], [0], [1], [0, 0, 1, 1], [], []>} : vector<256x8xf32>, vector<8x16xf32>, vector<256x16xf32> -> vector<256x16xf32>
    %c0_163 = arith.constant 0 : index
    %c0_164 = arith.constant 0 : index
    %114 = vector.load %arg10[%c0_163, %c0_164] : memref<256x16xf32, #tpu.memory_space<vmem>>, vector<256x16xf32>
    %115 = arith.addf %114, %113 : vector<256x16xf32>
    %c0_165 = arith.constant 0 : index
    %c0_166 = arith.constant 0 : index
    %116 = vector.load %arg10[%c0_165, %c0_166] : memref<256x16xf32, #tpu.memory_space<vmem>>, vector<256x16xf32>
    tpu.vector_store %arg10[%c0_165, %c0_166], %115 {strides = array<i32>} : memref<256x16xf32, #tpu.memory_space<vmem>>, vector<256x16xf32>,
    %c1_167 = arith.constant 1 : index
    %c8_168 = arith.constant 8 : index
    %c0_169 = arith.constant 0 : index
    %117 = vector.load %arg8[%c1_167, %c8_168, %c0_169] : memref<18x25x8xf32, #tpu.memory_space<vmem>>, vector<16x16x8xf32>
    %118 = vector.shape_cast %117 : vector<16x16x8xf32> to vector<256x8xf32>
    %c1_170 = arith.constant 1 : index
    %c1_171 = arith.constant 1 : index
    %c0_172 = arith.constant 0 : index
    %c0_173 = arith.constant 0 : index
    %119 = vector.load %arg4[%c1_170, %c1_171, %c0_172, %c0_173] : memref<3x3x8x16xf32, #tpu.memory_space<vmem>>, vector<1x1x8x16xf32>
    %120 = vector.shape_cast %119 : vector<1x1x8x16xf32> to vector<8x16xf32>
    %cst_174 = arith.constant dense<0.000000e+00> : vector<256x16xf32>
    %121 = tpu.matmul %118, %120, %cst_174 {dimension_numbers = #tpu.dot_dimension_numbers<[1], [0], [0], [1], [0, 0, 1, 1], [], []>} : vector<256x8xf32>, vector<8x16xf32>, vector<256x16xf32> -> vector<256x16xf32>
    %c0_175 = arith.constant 0 : index
    %c0_176 = arith.constant 0 : index
    %122 = vector.load %arg10[%c0_175, %c0_176] : memref<256x16xf32, #tpu.memory_space<vmem>>, vector<256x16xf32>
    %123 = arith.addf %122, %121 : vector<256x16xf32>
    %c0_177 = arith.constant 0 : index
    %c0_178 = arith.constant 0 : index
    %124 = vector.load %arg10[%c0_177, %c0_178] : memref<256x16xf32, #tpu.memory_space<vmem>>, vector<256x16xf32>
    tpu.vector_store %arg10[%c0_177, %c0_178], %123 {strides = array<i32>} : memref<256x16xf32, #tpu.memory_space<vmem>>, vector<256x16xf32>,
    %c1_179 = arith.constant 1 : index
    %c9_180 = arith.constant 9 : index
    %c0_181 = arith.constant 0 : index
    %125 = vector.load %arg8[%c1_179, %c9_180, %c0_181] : memref<18x25x8xf32, #tpu.memory_space<vmem>>, vector<16x16x8xf32>
    %126 = vector.shape_cast %125 : vector<16x16x8xf32> to vector<256x8xf32>
    %c1_182 = arith.constant 1 : index
    %c2_183 = arith.constant 2 : index
    %c0_184 = arith.constant 0 : index
    %c0_185 = arith.constant 0 : index
    %127 = vector.load %arg4[%c1_182, %c2_183, %c0_184, %c0_185] : memref<3x3x8x16xf32, #tpu.memory_space<vmem>>, vector<1x1x8x16xf32>
    %128 = vector.shape_cast %127 : vector<1x1x8x16xf32> to vector<8x16xf32>
    %cst_186 = arith.constant dense<0.000000e+00> : vector<256x16xf32>
    %129 = tpu.matmul %126, %128, %cst_186 {dimension_numbers = #tpu.dot_dimension_numbers<[1], [0], [0], [1], [0, 0, 1, 1], [], []>} : vector<256x8xf32>, vector<8x16xf32>, vector<256x16xf32> -> vector<256x16xf32>
    %c0_187 = arith.constant 0 : index
    %c0_188 = arith.constant 0 : index
    %130 = vector.load %arg10[%c0_187, %c0_188] : memref<256x16xf32, #tpu.memory_space<vmem>>, vector<256x16xf32>
    %131 = arith.addf %130, %129 : vector<256x16xf32>
    %c0_189 = arith.constant 0 : index
    %c0_190 = arith.constant 0 : index
    %132 = vector.load %arg10[%c0_189, %c0_190] : memref<256x16xf32, #tpu.memory_space<vmem>>, vector<256x16xf32>
    tpu.vector_store %arg10[%c0_189, %c0_190], %131 {strides = array<i32>} : memref<256x16xf32, #tpu.memory_space<vmem>>, vector<256x16xf32>,
    %c2_191 = arith.constant 2 : index
    %c7_192 = arith.constant 7 : index
    %c0_193 = arith.constant 0 : index
    %133 = vector.load %arg8[%c2_191, %c7_192, %c0_193] : memref<18x25x8xf32, #tpu.memory_space<vmem>>, vector<16x16x8xf32>
    %134 = vector.shape_cast %133 : vector<16x16x8xf32> to vector<256x8xf32>
    %c2_194 = arith.constant 2 : index
    %c0_195 = arith.constant 0 : index
    %c0_196 = arith.constant 0 : index
    %c0_197 = arith.constant 0 : index
    %135 = vector.load %arg4[%c2_194, %c0_195, %c0_196, %c0_197] : memref<3x3x8x16xf32, #tpu.memory_space<vmem>>, vector<1x1x8x16xf32>
    %136 = vector.shape_cast %135 : vector<1x1x8x16xf32> to vector<8x16xf32>
    %cst_198 = arith.constant dense<0.000000e+00> : vector<256x16xf32>
    %137 = tpu.matmul %134, %136, %cst_198 {dimension_numbers = #tpu.dot_dimension_numbers<[1], [0], [0], [1], [0, 0, 1, 1], [], []>} : vector<256x8xf32>, vector<8x16xf32>, vector<256x16xf32> -> vector<256x16xf32>
    %c0_199 = arith.constant 0 : index
    %c0_200 = arith.constant 0 : index
    %138 = vector.load %arg10[%c0_199, %c0_200] : memref<256x16xf32, #tpu.memory_space<vmem>>, vector<256x16xf32>
    %139 = arith.addf %138, %137 : vector<256x16xf32>
    %c0_201 = arith.constant 0 : index
    %c0_202 = arith.constant 0 : index
    %140 = vector.load %arg10[%c0_201, %c0_202] : memref<256x16xf32, #tpu.memory_space<vmem>>, vector<256x16xf32>
    tpu.vector_store %arg10[%c0_201, %c0_202], %139 {strides = array<i32>} : memref<256x16xf32, #tpu.memory_space<vmem>>, vector<256x16xf32>,
    %c2_203 = arith.constant 2 : index
    %c8_204 = arith.constant 8 : index
    %c0_205 = arith.constant 0 : index
    %141 = vector.load %arg8[%c2_203, %c8_204, %c0_205] : memref<18x25x8xf32, #tpu.memory_space<vmem>>, vector<16x16x8xf32>
    %142 = vector.shape_cast %141 : vector<16x16x8xf32> to vector<256x8xf32>
    %c2_206 = arith.constant 2 : index
    %c1_207 = arith.constant 1 : index
    %c0_208 = arith.constant 0 : index
    %c0_209 = arith.constant 0 : index
    %143 = vector.load %arg4[%c2_206, %c1_207, %c0_208, %c0_209] : memref<3x3x8x16xf32, #tpu.memory_space<vmem>>, vector<1x1x8x16xf32>
    %144 = vector.shape_cast %143 : vector<1x1x8x16xf32> to vector<8x16xf32>
    %cst_210 = arith.constant dense<0.000000e+00> : vector<256x16xf32>
    %145 = tpu.matmul %142, %144, %cst_210 {dimension_numbers = #tpu.dot_dimension_numbers<[1], [0], [0], [1], [0, 0, 1, 1], [], []>} : vector<256x8xf32>, vector<8x16xf32>, vector<256x16xf32> -> vector<256x16xf32>
    %c0_211 = arith.constant 0 : index
    %c0_212 = arith.constant 0 : index
    %146 = vector.load %arg10[%c0_211, %c0_212] : memref<256x16xf32, #tpu.memory_space<vmem>>, vector<256x16xf32>
    %147 = arith.addf %146, %145 : vector<256x16xf32>
    %c0_213 = arith.constant 0 : index
    %c0_214 = arith.constant 0 : index
    %148 = vector.load %arg10[%c0_213, %c0_214] : memref<256x16xf32, #tpu.memory_space<vmem>>, vector<256x16xf32>
    tpu.vector_store %arg10[%c0_213, %c0_214], %147 {strides = array<i32>} : memref<256x16xf32, #tpu.memory_space<vmem>>, vector<256x16xf32>,
    %c2_215 = arith.constant 2 : index
    %c9_216 = arith.constant 9 : index
    %c0_217 = arith.constant 0 : index
    %149 = vector.load %arg8[%c2_215, %c9_216, %c0_217] : memref<18x25x8xf32, #tpu.memory_space<vmem>>, vector<16x16x8xf32>
    %150 = vector.shape_cast %149 : vector<16x16x8xf32> to vector<256x8xf32>
    %c2_218 = arith.constant 2 : index
    %c2_219 = arith.constant 2 : index
    %c0_220 = arith.constant 0 : index
    %c0_221 = arith.constant 0 : index
    %151 = vector.load %arg4[%c2_218, %c2_219, %c0_220, %c0_221] : memref<3x3x8x16xf32, #tpu.memory_space<vmem>>, vector<1x1x8x16xf32>
    %152 = vector.shape_cast %151 : vector<1x1x8x16xf32> to vector<8x16xf32>
    %cst_222 = arith.constant dense<0.000000e+00> : vector<256x16xf32>
    %153 = tpu.matmul %150, %152, %cst_222 {dimension_numbers = #tpu.dot_dimension_numbers<[1], [0], [0], [1], [0, 0, 1, 1], [], []>} : vector<256x8xf32>, vector<8x16xf32>, vector<256x16xf32> -> vector<256x16xf32>
    %c0_223 = arith.constant 0 : index
    %c0_224 = arith.constant 0 : index
    %154 = vector.load %arg10[%c0_223, %c0_224] : memref<256x16xf32, #tpu.memory_space<vmem>>, vector<256x16xf32>
    %155 = arith.addf %154, %153 : vector<256x16xf32>
    %c0_225 = arith.constant 0 : index
    %c0_226 = arith.constant 0 : index
    %156 = vector.load %arg10[%c0_225, %c0_226] : memref<256x16xf32, #tpu.memory_space<vmem>>, vector<256x16xf32>
    tpu.vector_store %arg10[%c0_225, %c0_226], %155 {strides = array<i32>} : memref<256x16xf32, #tpu.memory_space<vmem>>, vector<256x16xf32>,
    %c0_227 = arith.constant 0 : index
    %c0_228 = arith.constant 0 : index
    %157 = vector.load %arg10[%c0_227, %c0_228] : memref<256x16xf32, #tpu.memory_space<vmem>>, vector<256x16xf32>
    %c0_229 = arith.constant 0 : index
    %c0_230 = arith.constant 0 : index
    %158 = vector.load %arg5[%c0_229, %c0_230] : memref<1x16xf32, #tpu.memory_space<vmem>>, vector<1x16xf32>
    %159 = vector.broadcast %158 : vector<1x16xf32> to vector<256x16xf32>
    %160 = arith.addf %157, %159 : vector<256x16xf32>
    %cst_231 = arith.constant 0.000000e+00 : f32
    %161 = vector.broadcast %cst_231 : f32 to vector<256x16xf32>
    %162 = arith.maximumf %160, %161 : vector<256x16xf32>
    %163 = tpu.transpose %162, [1, 0] : vector<256x16xf32> -> vector<16x256xf32>
    %c0_232 = arith.constant 0 : index
    %c0_233 = arith.constant 0 : index
    %c0_234 = arith.constant 0 : index
    %164 = vector.load %arg6[%c0_232, %c0_233, %c0_234] : memref<1x16x256xf32, #tpu.memory_space<vmem>>, vector<1x16x256xf32>
    %165 = vector.shape_cast %164 : vector<1x16x256xf32> to vector<16x256xf32>
    %166 = vector.shape_cast %163 : vector<16x256xf32> to vector<1x16x256xf32>
    tpu.vector_store %arg6[%c0_232, %c0_233, %c0_234], %166 {strides = array<i32>} : memref<1x16x256xf32, #tpu.memory_space<vmem>>, vector<1x16x256xf32>,
    return
  }
  func.func @transform_0(%arg0: i32) -> (i32, i32, i32) {
    %c0_i32 = arith.constant 0 : i32
    %c0_i32_0 = arith.constant 0 : i32
    %c0_i32_1 = arith.constant 0 : i32
    return %arg0, %c0_i32, %c0_i32_0 : i32, i32, i32
  }
  func.func @transform_1(%arg0: i32) -> (i32, i32, i32, i32) {
    %c0_i32 = arith.constant 0 : i32
    %c0_i32_0 = arith.constant 0 : i32
    %c0_i32_1 = arith.constant 0 : i32
    %c0_i32_2 = arith.constant 0 : i32
    %c0_i32_3 = arith.constant 0 : i32
    return %c0_i32, %c0_i32_0, %c0_i32_1, %c0_i32_2 : i32, i32, i32, i32
  }
  func.func @transform_2(%arg0: i32) -> (i32, i32) {
    %c0_i32 = arith.constant 0 : i32
    %c0_i32_0 = arith.constant 0 : i32
    %c0_i32_1 = arith.constant 0 : i32
    return %c0_i32, %c0_i32_0 : i32, i32
  }
  func.func @transform_3(%arg0: i32) -> (i32, i32, i32, i32) {
    %c0_i32 = arith.constant 0 : i32
    %c0_i32_0 = arith.constant 0 : i32
    %c0_i32_1 = arith.constant 0 : i32
    %c0_i32_2 = arith.constant 0 : i32
    %c0_i32_3 = arith.constant 0 : i32
    return %c0_i32, %c0_i32_0, %c0_i32_1, %c0_i32_2 : i32, i32, i32, i32
  }
  func.func @transform_4(%arg0: i32) -> (i32, i32) {
    %c0_i32 = arith.constant 0 : i32
    %c0_i32_0 = arith.constant 0 : i32
    %c0_i32_1 = arith.constant 0 : i32
    return %c0_i32, %c0_i32_0 : i32, i32
  }
  func.func @transform_5(%arg0: i32) -> (i32, i32, i32) {
    %c0_i32 = arith.constant 0 : i32
    %c0_i32_0 = arith.constant 0 : i32
    %c0_i32_1 = arith.constant 0 : i32
    return %arg0, %c0_i32, %c0_i32_0 : i32, i32, i32
  }
}

</mosaic_0001>

<bundles_post_ra>
// kernel: _lambda_.1
= control target key start
LH: loop header
LB: loop body
LE: loop exit
PB: predicated region body
PF: predicated region fallthrough
CT: control target
= control target key end

     0   :  { %s7503_s18 = smov 0   ;;  %s10205_s0 = inlined_call_operand.vmem [shape: f32[2,4,256], index: 0, kind: input, shape index: {}]   ;;  %s10206_s1 = inlined_call_operand.vmem [shape: f32[3,3,4,8], index: 1, kind: input, shape index: {}]   ;;  %s10207_s2 = inlined_call_operand.vmem [shape: f32[1,8], index: 2, kind: input, shape index: {}]   ;;  %s10208_s3 = inlined_call_operand.vmem [shape: f32[3,3,8,16], index: 3, kind: input, shape index: {}]   ;;  %s10209_s4 = inlined_call_operand.vmem [shape: f32[1,16], index: 4, kind: input, shape index: {}]   ;;  %s10210_s5 = inlined_call_operand.vmem [shape: f32[2,16,256], index: 5, kind: output, shape index: {}]  }
   0x1 LB: > { %s6836_s19 = sadd.s32 4294967295, %s7470_s18   ;;  %p6840_p0 = scmp.ge.s32.totalorder %s7470_s18, 1  ;;  %s7470_s18 = sphi %s7503_s18, %s15_s18  }
   0x2   : > { %p187_p1 = scmp.lt.s32.totalorder %s7470_s18, 3 }
   0x4   : > { %p188_p2 = pnand %p6840_p0, %p187_p1 }
   0x6   : > { %191 = sbr.rel (%p188_p2) target bundleno = 1809 (0x711), region = 40 }
   0xb   : > { %p215_p3 = scmp.lt.s32.totalorder %s6836_s19, 1  ;;  %v509_v2 = vld [vmem:[%s10206_s1] sm:$0xf]  ;;  %vm606_vm0 = vcmask 1043456   ;;  %v6878_v3 = vld [vmem:[%s10206_s1 + $0x4] sm:$0xf] }
   0xc   : > { %vm225_vm1 = vcmask 31744   ;;  %6845 = vmatpush.msk.msra.mxu0 %vm606_vm0, %v509_v2  ;;  %6879 = vmatpush.msk.msra.mxu1 %vm606_vm0, %v6878_v3  ;;  %v10211_v4 = vmov 0.0   ;;  %vm229_vm2 = vcmask 24576   ;;  %vm299_vm3 = vcmask 64512   ;;  %v6980_v42 = vld [vmem:[%s10206_s1 + $0x10] sm:$0xf] }
   0xd   : > { %s10242_s19 = smov (!%p215_p3, %s6836_s19), 1  ;;  %226 = vst.msk [vmem:[#allocation2] sm:$0xff] %vm225_vm1, %v10211_v4  ;;  %7450 = vmatpush.msk.msra.mxu2 %vm606_vm0, %v509_v2  ;;  %7451 = vmatpush.msk.msra.mxu3 %vm606_vm0, %v6878_v3  ;;  %v7014_v43 = vld [vmem:[%s10206_s1 + $0x14] sm:$0xf]  ;;  %v6912_v53 = vld [vmem:[%s10206_s1 + $0x8] sm:$0xf] }
   0xe   : > { %s7448_s20 = sshll.u32 %s10242_s19, 3  ;;  %227 = vst.msk [vmem:[#allocation2 + $0x8] sm:$0xff] %vm225_vm1, %v10211_v4  ;;  %6981 = vmatpush.msk.msrb.mxu0 %vm606_vm0, %v6980_v42  ;;  %7015 = vmatpush.msk.msrb.mxu1 %vm606_vm0, %v7014_v43  ;;  %v6946_v62 = vld [vmem:[%s10206_s1 + $0xc] sm:$0xf]  ;;  %vm303_vm4 = vcmask 57344   ;;  %vm3867_vm5 = vcmask 130048  }
   0xf   : > { %s219_s23 = scalar_lea.vmem %s10205_s0, %s7448_s20  ;;  %228 = vst.msk [vmem:[#allocation2 + $0x10] sm:$0xff] %vm225_vm1, %v10211_v4  ;;  %6913 = vmatpush.msk.msrb.mxu2 %vm606_vm0, %v6912_v53  ;;  %6947 = vmatpush.msk.msrb.mxu3 %vm606_vm0, %v6946_v62  ;;  %s7449_s20 = sshll.u32 %s10242_s19, 5 }
  0x10   : > { %v373_v0 = vld [vmem:[%s219_s23] sm:$0xff]  ;;  %231 = vst.msk [vmem:[#allocation2 + $0x20] sm:$0xff] %vm225_vm1, %v10211_v4  ;;  %s10189_s23 = scalar_lea.vmem %s10210_s5, %s7449_s20 }
  0x11   : > { %375 = vst [vmem:[#allocation1] ss:$2 sm:$0xff] %v373_v0 }
  0x12   : > { %232 = vst.msk [vmem:[#allocation2 + $0x28] sm:$0xff] %vm225_vm1, %v10211_v4 }
  0x13   : > { %233 = vst.msk [vmem:[#allocation2 + $0x30] sm:$0xff] %vm225_vm1, %v10211_v4 }
  0x14   : > { %235 = vst.msk [vmem:[#allocation2 + $0x40] sm:$0xff] %vm225_vm1, %v10211_v4 }
  0x15   : > { %236 = vst.msk [vmem:[#allocation2 + $0x48] sm:$0xff] %vm225_vm1, %v10211_v4  ;;  %v477_v5 = vld [vmem:[#allocation2 + $0x7] sm:$0xff] }
  0x16   : > { %237 = vst.msk [vmem:[#allocation2 + $0x50] sm:$0xff] %vm225_vm1, %v10211_v4  ;;  %6846 = vmatmul.msk.f32.vlgmr.msra.gmra.mxu0 %vm225_vm1, %v477_v5  ;;  %v755_v6 = vld [vmem:[#allocation2 + $0x8] sm:$0xff]  ;;  %v756_v9 = vld [vmem:[#allocation2 + $0x10] sm:$0xff] }
  0x17   : > { %239 = vst.msk [vmem:[#allocation2 + $0x60] sm:$0xff] %vm225_vm1, %v10211_v4  ;;  %6880 = vmatmul.msk.f32.vlgmr.msra.gmra.mxu1 %vm225_vm1, %v755_v6  ;;  %v478_v8 = vld [vmem:[#allocation2 + $0xf] sm:$0xff] }
  0x18   : > { %v376_v1 = vld.sshfl [vmem:[#allocation1] sm:$0xff pattern:$0x75316420]  ;;  %240 = vst.msk [vmem:[#allocation2 + $0x68] sm:$0xff] %vm225_vm1, %v10211_v4 }
  0x19   : > { %380 = vxpose.xlu0.b32.start.end [1/1] (short) %v376_v1, 128  ;;  %241 = vst.msk [vmem:[#allocation2 + $0x70] sm:$0xff] %vm225_vm1, %v10211_v4  ;;  %v377_v7 = vld.sshfl [vmem:[#allocation1 + $0x8] sm:$0xff pattern:$0x75316420] }
  0x1a   : > { %243 = vst.msk [vmem:[#allocation2 + $0x80] sm:$0xff] %vm225_vm1, %v10211_v4 }
  0x1b   : > { %244 = vst.msk [vmem:[#allocation2 + $0x88] sm:$0xff] %vm225_vm1, %v10211_v4 }
  0x1c   : > { %245 = vst.msk [vmem:[#allocation2 + $0x90] sm:$0xff] %vm225_vm1, %v10211_v4 }
  0x1d   : > { %247 = vst.msk [vmem:[#allocation2 + $0xa0] sm:$0xff] %vm225_vm1, %v10211_v4 }
  0x1e   : > { %248 = vst.msk [vmem:[#allocation2 + $0xa8] sm:$0xff] %vm225_vm1, %v10211_v4  ;;  %6847 = vmatmul.msk.f32.gmra.mxu0 %vm225_vm1, %v478_v8 }
  0x1f   : > { %249 = vst.msk [vmem:[#allocation2 + $0xb0] sm:$0xff] %vm225_vm1, %v10211_v4  ;;  %6881 = vmatmul.msk.f32.gmra.mxu1 %vm225_vm1, %v756_v9 }
  0x20   : > { %251 = vst.msk [vmem:[#allocation2 + $0xc0] sm:$0xff] %vm225_vm1, %v10211_v4 }
  0x21   : > { %252 = vst.msk [vmem:[#allocation2 + $0xc8] sm:$0xff] %vm225_vm1, %v10211_v4 }
  0x22   : > { %253 = vst.msk [vmem:[#allocation2 + $0xd0] sm:$0xff] %vm225_vm1, %v10211_v4 }
  0x23   : > { %255 = vst.msk [vmem:[#allocation2 + $0xe0] sm:$0xff] %vm225_vm1, %v10211_v4 }
  0x24   : > { %256 = vst.msk [vmem:[#allocation2 + $0xe8] sm:$0xff] %vm225_vm1, %v10211_v4 }
  0x25   : > { %257 = vst.msk [vmem:[#allocation2 + $0xf0] sm:$0xff] %vm225_vm1, %v10211_v4 }
  0x26   : > { %259 = vst.msk [vmem:[#allocation2 + $0x100] sm:$0xff] %vm225_vm1, %v10211_v4 }
  0x27   : > { %260 = vst.msk [vmem:[#allocation2 + $0x108] sm:$0xff] %vm225_vm1, %v10211_v4 }
  0x28   : > { %261 = vst.msk [vmem:[#allocation2 + $0x110] sm:$0xff] %vm225_vm1, %v10211_v4 }
  0x29   : > { %263 = vst.msk [vmem:[#allocation2 + $0x120] sm:$0xff] %vm225_vm1, %v10211_v4 }
  0x2a   : > { %264 = vst.msk [vmem:[#allocation2 + $0x128] sm:$0xff] %vm225_vm1, %v10211_v4 }
  0x2b   : > { %265 = vst.msk [vmem:[#allocation2 + $0x130] sm:$0xff] %vm225_vm1, %v10211_v4 }
  0x2c   : > { %267 = vst.msk [vmem:[#allocation2 + $0x140] sm:$0xff] %vm225_vm1, %v10211_v4 }
  0x2d   : > { %268 = vst.msk [vmem:[#allocation2 + $0x148] sm:$0xff] %vm225_vm1, %v10211_v4 }
  0x2e   : > { %269 = vst.msk [vmem:[#allocation2 + $0x150] sm:$0xff] %vm225_vm1, %v10211_v4 }
  0x2f   : > { %271 = vst.msk [vmem:[#allocation2 + $0x160] sm:$0xff] %vm225_vm1, %v10211_v4 }
  0x30   : > { %272 = vst.msk [vmem:[#allocation2 + $0x168] sm:$0xff] %vm225_vm1, %v10211_v4 }
  0x31   : > { %273 = vst.msk [vmem:[#allocation2 + $0x170] sm:$0xff] %vm225_vm1, %v10211_v4 }
  0x32   : > { %275 = vst.msk [vmem:[#allocation2 + $0x180] sm:$0xff] %vm225_vm1, %v10211_v4 }
  0x33   : > { %276 = vst.msk [vmem:[#allocation2 + $0x188] sm:$0xff] %vm225_vm1, %v10211_v4 }
  0x34   : > { %277 = vst.msk [vmem:[#allocation2 + $0x190] sm:$0xff] %vm225_vm1, %v10211_v4 }
  0x35   : > { %279 = vst.msk [vmem:[#allocation2 + $0x1a0] sm:$0xff] %vm225_vm1, %v10211_v4 }
  0x36   : > { %280 = vst.msk [vmem:[#allocation2 + $0x1a8] sm:$0xff] %vm225_vm1, %v10211_v4 }
  0x37   : > { %281 = vst.msk [vmem:[#allocation2 + $0x1b0] sm:$0xff] %vm225_vm1, %v10211_v4 }
  0x38   : > { %283 = vst.msk [vmem:[#allocation2 + $0x1c0] sm:$0xff] %vm225_vm1, %v10211_v4 }
  0x39   : > { %284 = vst.msk [vmem:[#allocation2 + $0x1c8] sm:$0xff] %vm225_vm1, %v10211_v4 }
  0x3a   : > { %285 = vst.msk [vmem:[#allocation2 + $0x1d0] sm:$0xff] %vm225_vm1, %v10211_v4 }
  0x3b   : > { %287 = vst.msk [vmem:[#allocation2 + $0x1e0] sm:$0xff] %vm225_vm1, %v10211_v4 }
  0x3c   : > { %288 = vst.msk [vmem:[#allocation2 + $0x1e8] sm:$0xff] %vm225_vm1, %v10211_v4 }
  0x3d   : > { %289 = vst.msk [vmem:[#allocation2 + $0x1f0] sm:$0xff] %vm225_vm1, %v10211_v4 }
  0x3e   : > { %291 = vst.msk [vmem:[#allocation2 + $0x200] sm:$0xff] %vm225_vm1, %v10211_v4 }
  0x3f   : > { %292 = vst.msk [vmem:[#allocation2 + $0x208] sm:$0xff] %vm225_vm1, %v10211_v4 }
  0x40   : > { %293 = vst.msk [vmem:[#allocation2 + $0x210] sm:$0xff] %vm225_vm1, %v10211_v4 }
  0x41   : > { %295 = vst.msk [vmem:[#allocation2 + $0x220] sm:$0xff] %vm225_vm1, %v10211_v4 }
  0x42   : > { %296 = vst.msk [vmem:[#allocation2 + $0x228] sm:$0xff] %vm225_vm1, %v10211_v4 }
  0x43   : > { %297 = vst.msk [vmem:[#allocation2 + $0x230] sm:$0xff] %vm225_vm1, %v10211_v4 }
  0x44   : > { %234 = vst.msk [vmem:[#allocation2 + $0x38] sm:$0x1] %vm229_vm2, %v10211_v4 }
  0x45   : > { %230 = vst.msk [vmem:[#allocation2 + $0x18] sm:$0x1] %vm229_vm2, %v10211_v4 }
  0x46   : > { %238 = vst.msk [vmem:[#allocation2 + $0x58] sm:$0x1] %vm229_vm2, %v10211_v4 }
  0x47   : > { %242 = vst.msk [vmem:[#allocation2 + $0x78] sm:$0x1] %vm229_vm2, %v10211_v4 }
  0x48   : > { %246 = vst.msk [vmem:[#allocation2 + $0x98] sm:$0x1] %vm229_vm2, %v10211_v4 }
  0x49   : > { %250 = vst.msk [vmem:[#allocation2 + $0xb8] sm:$0x1] %vm229_vm2, %v10211_v4 }
  0x4a   : > { %254 = vst.msk [vmem:[#allocation2 + $0xd8] sm:$0x1] %vm229_vm2, %v10211_v4 }
  0x4b   : > { %258 = vst.msk [vmem:[#allocation2 + $0xf8] sm:$0x1] %vm229_vm2, %v10211_v4 }
  0x4c   : > { %262 = vst.msk [vmem:[#allocation2 + $0x118] sm:$0x1] %vm229_vm2, %v10211_v4 }
  0x4d   : > { %266 = vst.msk [vmem:[#allocation2 + $0x138] sm:$0x1] %vm229_vm2, %v10211_v4 }
  0x4e   : > { %270 = vst.msk [vmem:[#allocation2 + $0x158] sm:$0x1] %vm229_vm2, %v10211_v4 }
  0x4f   : > { %274 = vst.msk [vmem:[#allocation2 + $0x178] sm:$0x1] %vm229_vm2, %v10211_v4 }
  0x50   : > { %278 = vst.msk [vmem:[#allocation2 + $0x198] sm:$0x1] %vm229_vm2, %v10211_v4 }
  0x51   : > { %282 = vst.msk [vmem:[#allocation2 + $0x1b8] sm:$0x1] %vm229_vm2, %v10211_v4 }
  0x52   : > { %286 = vst.msk [vmem:[#allocation2 + $0x1d8] sm:$0x1] %vm229_vm2, %v10211_v4 }
  0x53   : > { %290 = vst.msk [vmem:[#allocation2 + $0x1f8] sm:$0x1] %vm229_vm2, %v10211_v4 }
  0x54   : > { %294 = vst.msk [vmem:[#allocation2 + $0x218] sm:$0x1] %vm229_vm2, %v10211_v4 }
  0x55   : > { %298 = vst.msk [vmem:[#allocation2 + $0x238] sm:$0x1] %vm229_vm2, %v10211_v4 }
  0x56   : > { %300 = vst.msk [vmem:[#allocation3] sm:$0xff] %vm299_vm3, %v10211_v4 }
  0x57   : > { %301 = vst.msk [vmem:[#allocation3 + $0x8] sm:$0xff] %vm299_vm3, %v10211_v4 }
  0x58   : > { %302 = vst.msk [vmem:[#allocation3 + $0x10] sm:$0xff] %vm299_vm3, %v10211_v4 }
  0x59   : > { %305 = vst.msk [vmem:[#allocation3 + $0x20] sm:$0xff] %vm299_vm3, %v10211_v4 }
  0x5a   : > { %306 = vst.msk [vmem:[#allocation3 + $0x28] sm:$0xff] %vm299_vm3, %v10211_v4 }
  0x5b   : > { %307 = vst.msk [vmem:[#allocation3 + $0x30] sm:$0xff] %vm299_vm3, %v10211_v4 }
  0x5c   : > { %309 = vst.msk [vmem:[#allocation3 + $0x40] sm:$0xff] %vm299_vm3, %v10211_v4 }
  0x5d   : > { %310 = vst.msk [vmem:[#allocation3 + $0x48] sm:$0xff] %vm299_vm3, %v10211_v4 }
  0x5e   : > { %311 = vst.msk [vmem:[#allocation3 + $0x50] sm:$0xff] %vm299_vm3, %v10211_v4 }
  0x5f   : > { %313 = vst.msk [vmem:[#allocation3 + $0x60] sm:$0xff] %vm299_vm3, %v10211_v4 }
  0x60   : > { %314 = vst.msk [vmem:[#allocation3 + $0x68] sm:$0xff] %vm299_vm3, %v10211_v4 }
  0x61   : > { %315 = vst.msk [vmem:[#allocation3 + $0x70] sm:$0xff] %vm299_vm3, %v10211_v4 }
  0x62   : > { %317 = vst.msk [vmem:[#allocation3 + $0x80] sm:$0xff] %vm299_vm3, %v10211_v4 }
  0x63   : > { %318 = vst.msk [vmem:[#allocation3 + $0x88] sm:$0xff] %vm299_vm3, %v10211_v4 }
  0x64   : > { %319 = vst.msk [vmem:[#allocation3 + $0x90] sm:$0xff] %vm299_vm3, %v10211_v4 }
  0x65   : > { %321 = vst.msk [vmem:[#allocation3 + $0xa0] sm:$0xff] %vm299_vm3, %v10211_v4 }
  0x66   : > { %322 = vst.msk [vmem:[#allocation3 + $0xa8] sm:$0xff] %vm299_vm3, %v10211_v4 }
  0x67   : > { %323 = vst.msk [vmem:[#allocation3 + $0xb0] sm:$0xff] %vm299_vm3, %v10211_v4 }
  0x68   : > { %325 = vst.msk [vmem:[#allocation3 + $0xc0] sm:$0xff] %vm299_vm3, %v10211_v4 }
  0x69   : > { %326 = vst.msk [vmem:[#allocation3 + $0xc8] sm:$0xff] %vm299_vm3, %v10211_v4 }
  0x6a   : > { %327 = vst.msk [vmem:[#allocation3 + $0xd0] sm:$0xff] %vm299_vm3, %v10211_v4 }
  0x6b   : > { %329 = vst.msk [vmem:[#allocation3 + $0xe0] sm:$0xff] %vm299_vm3, %v10211_v4 }
  0x6c   : > { %330 = vst.msk [vmem:[#allocation3 + $0xe8] sm:$0xff] %vm299_vm3, %v10211_v4 }
  0x6d   : > { %331 = vst.msk [vmem:[#allocation3 + $0xf0] sm:$0xff] %vm299_vm3, %v10211_v4 }
  0x6e   : > { %333 = vst.msk [vmem:[#allocation3 + $0x100] sm:$0xff] %vm299_vm3, %v10211_v4 }
  0x6f   : > { %334 = vst.msk [vmem:[#allocation3 + $0x108] sm:$0xff] %vm299_vm3, %v10211_v4 }
  0x70   : > { %335 = vst.msk [vmem:[#allocation3 + $0x110] sm:$0xff] %vm299_vm3, %v10211_v4 }
  0x71   : > { %337 = vst.msk [vmem:[#allocation3 + $0x120] sm:$0xff] %vm299_vm3, %v10211_v4 }
  0x72   : > { %338 = vst.msk [vmem:[#allocation3 + $0x128] sm:$0xff] %vm299_vm3, %v10211_v4 }
  0x73   : > { %339 = vst.msk [vmem:[#allocation3 + $0x130] sm:$0xff] %vm299_vm3, %v10211_v4 }
  0x74   : > { %341 = vst.msk [vmem:[#allocation3 + $0x140] sm:$0xff] %vm299_vm3, %v10211_v4 }
  0x75   : > { %342 = vst.msk [vmem:[#allocation3 + $0x148] sm:$0xff] %vm299_vm3, %v10211_v4 }
  0x76   : > { %343 = vst.msk [vmem:[#allocation3 + $0x150] sm:$0xff] %vm299_vm3, %v10211_v4 }
  0x77   : > { %345 = vst.msk [vmem:[#allocation3 + $0x160] sm:$0xff] %vm299_vm3, %v10211_v4 }
  0x78   : > { %346 = vst.msk [vmem:[#allocation3 + $0x168] sm:$0xff] %vm299_vm3, %v10211_v4 }
  0x79   : > { %347 = vst.msk [vmem:[#allocation3 + $0x170] sm:$0xff] %vm299_vm3, %v10211_v4 }
  0x7a   : > { %349 = vst.msk [vmem:[#allocation3 + $0x180] sm:$0xff] %vm299_vm3, %v10211_v4 }
  0x7b   : > { %350 = vst.msk [vmem:[#allocation3 + $0x188] sm:$0xff] %vm299_vm3, %v10211_v4 }
  0x7c   : > { %351 = vst.msk [vmem:[#allocation3 + $0x190] sm:$0xff] %vm299_vm3, %v10211_v4 }
  0x7d   : > { %353 = vst.msk [vmem:[#allocation3 + $0x1a0] sm:$0xff] %vm299_vm3, %v10211_v4 }
  0x7e   : > { %354 = vst.msk [vmem:[#allocation3 + $0x1a8] sm:$0xff] %vm299_vm3, %v10211_v4 }
  0x7f   : > { %355 = vst.msk [vmem:[#allocation3 + $0x1b0] sm:$0xff] %vm299_vm3, %v10211_v4 }
  0x80   : > { %357 = vst.msk [vmem:[#allocation3 + $0x1c0] sm:$0xff] %vm299_vm3, %v10211_v4 }
  0x81   : > { %358 = vst.msk [vmem:[#allocation3 + $0x1c8] sm:$0xff] %vm299_vm3, %v10211_v4 }
  0x82   : > { %359 = vst.msk [vmem:[#allocation3 + $0x1d0] sm:$0xff] %vm299_vm3, %v10211_v4 }
  0x83   : > { %361 = vst.msk [vmem:[#allocation3 + $0x1e0] sm:$0xff] %vm299_vm3, %v10211_v4 }
  0x84   : > { %362 = vst.msk [vmem:[#allocation3 + $0x1e8] sm:$0xff] %vm299_vm3, %v10211_v4 }
  0x85   : > { %363 = vst.msk [vmem:[#allocation3 + $0x1f0] sm:$0xff] %vm299_vm3, %v10211_v4 }
  0x86   : > { %365 = vst.msk [vmem:[#allocation3 + $0x200] sm:$0xff] %vm299_vm3, %v10211_v4 }
  0x87   : > { %366 = vst.msk [vmem:[#allocation3 + $0x208] sm:$0xff] %vm299_vm3, %v10211_v4 }
  0x88   : > { %367 = vst.msk [vmem:[#allocation3 + $0x210] sm:$0xff] %vm299_vm3, %v10211_v4 }
  0x89   : > { %369 = vst.msk [vmem:[#allocation3 + $0x220] sm:$0xff] %vm299_vm3, %v10211_v4 }
  0x8a   : > { %370 = vst.msk [vmem:[#allocation3 + $0x228] sm:$0xff] %vm299_vm3, %v10211_v4 }
  0x8b   : > { %371 = vst.msk [vmem:[#allocation3 + $0x230] sm:$0xff] %vm299_vm3, %v10211_v4 }
  0x93   : > { %v627_v41 = vpop.f32.mrf.mxu0 }
  0x94   : > { %723 = vst.msk [vmem:[#allocation4] sm:$0xff] %vm299_vm3, %v627_v41  ;;  %v905_v57 = vpop.f32.mrf.mxu1 }
  0x99   : > { %412 = vxpose.xlu0.b32.start.end [1/1] (short) %v377_v7, 128 }
  0x9b   : > { %v630_v63 = vpop.f32.mrf.mxu0  ;;  %v1001_v3 = vld [vmem:[#allocation4] sm:$0xff] }
  0x9c   : > { %v908_v0 = vpop.f32.mrf.mxu1  ;;  %v1033_v8 = vadd.f32 %v1001_v3, %v905_v57  ;;  %724 = vst.msk [vmem:[#allocation4 + $0x8] sm:$0xff] %vm299_vm3, %v630_v63 }
  0x9e   : > { %1065 = vst.msk [vmem:[#allocation4] sm:$0xff] %vm299_vm3, %v1033_v8 }
  0xbd   : > { %v396_v10 = vpop.trf.xlu0 }
  0xbe   : > { %445 = vst.msk [vmem:[#allocation2 + $0x28] sm:$0xff] %vm225_vm1, %v396_v10 }
  0xc5   : > { %v397_v11 = vpop.trf.xlu0  ;;  %v7658_v12 = vld [vmem:[#allocation2 + $0x27] sm:$0xff] }
  0xc6   : > { %v7660_v13 = vld [vmem:[#allocation2 + $0x28] sm:$0xff]  ;;  %446 = vst.msk [vmem:[#allocation2 + $0x30] sm:$0xff] %vm225_vm1, %v397_v11  ;;  %6848 = vmatmul.msk.f32.gmra.mxu0 %vm225_vm1, %v7658_v12 }
  0xc7   : > { %6882 = vmatmul.msk.f32.gmra.mxu1 %vm225_vm1, %v7660_v13 }
  0xcd   : > { %v398_v14 = vpop.trf.xlu0  ;;  %v7681_v15 = vld [vmem:[#allocation2 + $0x2f] sm:$0xff] }
  0xce   : > { %v7683_v16 = vld [vmem:[#allocation2 + $0x30] sm:$0xff]  ;;  %447 = vst.msk [vmem:[#allocation2 + $0x48] sm:$0xff] %vm225_vm1, %v398_v14  ;;  %6849 = vmatmul.msk.f32.gmra.mxu0 %vm225_vm1, %v7681_v15 }
  0xcf   : > { %6883 = vmatmul.msk.f32.gmra.mxu1 %vm225_vm1, %v7683_v16  ;;  %v7878_v61 = vld [vmem:[#allocation2 + $0x29] sm:$0xff]  ;;  %v7904_v2 = vld [vmem:[#allocation2 + $0x31] sm:$0xff] }
  0xd5   : > { %v399_v17 = vpop.trf.xlu0  ;;  %v7694_v18 = vld [vmem:[#allocation2 + $0x47] sm:$0xff] }
  0xd6   : > { %v7696_v19 = vld [vmem:[#allocation2 + $0x48] sm:$0xff]  ;;  %448 = vst.msk [vmem:[#allocation2 + $0x50] sm:$0xff] %vm225_vm1, %v399_v17  ;;  %6850 = vmatmul.msk.f32.gmra.mxu0 %vm225_vm1, %v7694_v18 }
  0xd7   : > { %6884 = vmatmul.msk.f32.gmra.mxu1 %vm225_vm1, %v7696_v19 }
  0xdd   : > { %v400_v20 = vpop.trf.xlu0  ;;  %v7703_v21 = vld [vmem:[#allocation2 + $0x4f] sm:$0xff] }
  0xde   : > { %v7705_v22 = vld [vmem:[#allocation2 + $0x50] sm:$0xff]  ;;  %449 = vst.msk [vmem:[#allocation2 + $0x68] sm:$0xff] %vm225_vm1, %v400_v20  ;;  %6851 = vmatmul.msk.f32.gmra.mxu0 %vm225_vm1, %v7703_v21 }
  0xdf   : > { %6885 = vmatmul.msk.f32.gmra.mxu1 %vm225_vm1, %v7705_v22  ;;  %v7926_v9 = vld [vmem:[#allocation2 + $0x49] sm:$0xff]  ;;  %v7943_v14 = vld [vmem:[#allocation2 + $0x51] sm:$0xff] }
  0xe5   : > { %v401_v23 = vpop.trf.xlu0  ;;  %v7712_v24 = vld [vmem:[#allocation2 + $0x67] sm:$0xff] }
  0xe6   : > { %v7714_v25 = vld [vmem:[#allocation2 + $0x68] sm:$0xff]  ;;  %450 = vst.msk [vmem:[#allocation2 + $0x70] sm:$0xff] %vm225_vm1, %v401_v23  ;;  %6852 = vmatmul.msk.f32.gmra.mxu0 %vm225_vm1, %v7712_v24 }
  0xe7   : > { %6886 = vmatmul.msk.f32.gmra.mxu1 %vm225_vm1, %v7714_v25 }
  0xed   : > { %v402_v26 = vpop.trf.xlu0  ;;  %v7721_v27 = vld [vmem:[#allocation2 + $0x6f] sm:$0xff] }
  0xee   : > { %v7723_v28 = vld [vmem:[#allocation2 + $0x70] sm:$0xff]  ;;  %451 = vst.msk [vmem:[#allocation2 + $0x88] sm:$0xff] %vm225_vm1, %v402_v26  ;;  %6853 = vmatmul.msk.f32.gmra.mxu0 %vm225_vm1, %v7721_v27 }
  0xef   : > { %6887 = vmatmul.msk.f32.gmra.mxu1 %vm225_vm1, %v7723_v28 }
  0xf5   : > { %v403_v29 = vpop.trf.xlu0  ;;  %v7730_v30 = vld [vmem:[#allocation2 + $0x87] sm:$0xff] }
  0xf6   : > { %v7732_v31 = vld [vmem:[#allocation2 + $0x88] sm:$0xff]  ;;  %452 = vst.msk [vmem:[#allocation2 + $0x90] sm:$0xff] %vm225_vm1, %v403_v29  ;;  %6854 = vmatmul.msk.f32.gmra.mxu0 %vm225_vm1, %v7730_v30 }
  0xf7   : > { %6888 = vmatmul.msk.f32.gmra.mxu1 %vm225_vm1, %v7732_v31 }
  0xfd   : > { %v404_v32 = vpop.trf.xlu0  ;;  %v7739_v33 = vld [vmem:[#allocation2 + $0x8f] sm:$0xff] }
  0xfe   : > { %v7741_v34 = vld [vmem:[#allocation2 + $0x90] sm:$0xff]  ;;  %453 = vst.msk [vmem:[#allocation2 + $0xa8] sm:$0xff] %vm225_vm1, %v404_v32  ;;  %6855 = vmatmul.msk.f32.gmra.mxu0 %vm225_vm1, %v7739_v33 }
  0xff   : > { %6889 = vmatmul.msk.f32.gmra.mxu1 %vm225_vm1, %v7741_v34 }
 0x105   : > { %v405_v35 = vpop.trf.xlu0  ;;  %v7748_v36 = vld [vmem:[#allocation2 + $0xa7] sm:$0xff] }
 0x106   : > { %v7750_v37 = vld [vmem:[#allocation2 + $0xa8] sm:$0xff]  ;;  %454 = vst.msk [vmem:[#allocation2 + $0xb0] sm:$0xff] %vm225_vm1, %v405_v35  ;;  %6856 = vmatmul.msk.f32.gmra.mxu0 %vm225_vm1, %v7748_v36 }
 0x107   : > { %6890 = vmatmul.msk.f32.gmra.mxu1 %vm225_vm1, %v7750_v37  ;;  %v7962_v35 = vld [vmem:[#allocation2 + $0x69] sm:$0xff] }
 0x10d   : > { %v406_v38 = vpop.trf.xlu0  ;;  %v488_v39 = vld [vmem:[#allocation2 + $0xaf] sm:$0xff] }
 0x10e   : > { %v7757_v40 = vld [vmem:[#allocation2 + $0xb0] sm:$0xff]  ;;  %455 = vst.msk [vmem:[#allocation2 + $0xc8] sm:$0xff] %vm225_vm1, %v406_v38  ;;  %6857 = vmatmul.msk.f32.gmra.mxu0 %vm225_vm1, %v488_v39 }
 0x10f   : > { %6891 = vmatmul.msk.f32.gmra.mxu1 %vm225_vm1, %v7757_v40 }
 0x115   : > { %v407_v44 = vpop.trf.xlu0  ;;  %v489_v45 = vld [vmem:[#allocation2 + $0xc7] sm:$0xff] }
 0x116   : > { %v7780_v46 = vld [vmem:[#allocation2 + $0xc8] sm:$0xff]  ;;  %456 = vst.msk [vmem:[#allocation2 + $0xd0] sm:$0xff] %vm225_vm1, %v407_v44  ;;  %6858 = vmatmul.msk.f32.gmra.mxu0 %vm225_vm1, %v489_v45 }
 0x117   : > { %6892 = vmatmul.msk.f32.gmra.mxu1 %vm225_vm1, %v7780_v46 }
 0x11d   : > { %v408_v47 = vpop.trf.xlu0  ;;  %v490_v48 = vld [vmem:[#allocation2 + $0xcf] sm:$0xff] }
 0x11e   : > { %v7802_v49 = vld [vmem:[#allocation2 + $0xd0] sm:$0xff]  ;;  %457 = vst.msk [vmem:[#allocation2 + $0xe8] sm:$0xff] %vm225_vm1, %v408_v47  ;;  %6859 = vmatmul.msk.f32.gmra.mxu0 %vm225_vm1, %v490_v48 }
 0x11f   : > { %6893 = vmatmul.msk.f32.gmra.mxu1 %vm225_vm1, %v7802_v49  ;;  %v7981_v48 = vld [vmem:[#allocation2 + $0x71] sm:$0xff] }
 0x125   : > { %v409_v50 = vpop.trf.xlu0  ;;  %v491_v51 = vld [vmem:[#allocation2 + $0xe7] sm:$0xff] }
 0x126   : > { %v7822_v52 = vld [vmem:[#allocation2 + $0xe8] sm:$0xff]  ;;  %458 = vst.msk [vmem:[#allocation2 + $0xf0] sm:$0xff] %vm225_vm1, %v409_v50  ;;  %6860 = vmatmul.msk.f32.gmra.mxu0 %vm225_vm1, %v491_v51 }
 0x127   : > { %6894 = vmatmul.msk.f32.gmra.mxu1 %vm225_vm1, %v7822_v52 }
 0x12d   : > { %v410_v54 = vpop.trf.xlu0  ;;  %v492_v55 = vld [vmem:[#allocation2 + $0xef] sm:$0xff] }
 0x12e   : > { %v7846_v56 = vld [vmem:[#allocation2 + $0xf0] sm:$0xff]  ;;  %459 = vst.msk [vmem:[#allocation2 + $0x108] sm:$0xff] %vm225_vm1, %v410_v54  ;;  %6861 = vmatmul.msk.f32.gmra.mxu0 %vm225_vm1, %v492_v55 }
 0x12f   : > { %6895 = vmatmul.msk.f32.gmra.mxu1 %vm225_vm1, %v7846_v56 }
 0x135   : > { %v411_v58 = vpop.trf.xlu0  ;;  %v7868_v59 = vld [vmem:[#allocation2 + $0x107] sm:$0xff] }
 0x136   : > { %v7870_v60 = vld [vmem:[#allocation2 + $0x108] sm:$0xff]  ;;  %6862 = vmatmul.msk.f32.vlgmr.msra.gmra.mxu2 %vm225_vm1, %v7868_v59  ;;  %6982 = vmatmul.msk.f32.vlgmr.msrb.gmra.mxu0 %vm225_vm1, %v7660_v13  ;;  %460 = vst.msk [vmem:[#allocation2 + $0x110] sm:$0xff] %vm225_vm1, %v411_v58 }
 0x137   : > { %6896 = vmatmul.msk.f32.vlgmr.msra.gmra.mxu3 %vm225_vm1, %v7870_v60  ;;  %7016 = vmatmul.msk.f32.vlgmr.msrb.gmra.mxu1 %vm225_vm1, %v7878_v61  ;;  %v7998_v58 = vld [vmem:[#allocation2 + $0x89] sm:$0xff] }
 0x13d   : > { %v428_v1 = vpop.trf.xlu0  ;;  %v7954_v17 = vld [vmem:[#allocation2 + $0x110] sm:$0xff] }
 0x13e   : > { %6983 = vmatmul.msk.f32.gmra.mxu0 %vm225_vm1, %v7683_v16  ;;  %461 = vst.msk [vmem:[#allocation2 + $0x128] sm:$0xff] %vm225_vm1, %v428_v1  ;;  %v7952_v16 = vld [vmem:[#allocation2 + $0x10f] sm:$0xff] }
 0x13f   : > { %7017 = vmatmul.msk.f32.gmra.mxu1 %vm225_vm1, %v7904_v2  ;;  %6863 = vmatmul.msk.f32.gmra.mxu2 %vm225_vm1, %v7952_v16 }
 0x140   : > { %6897 = vmatmul.msk.f32.gmra.mxu3 %vm225_vm1, %v7954_v17 }
 0x143   : > { %v633_v5 = vpop.f32.mrf.mxu0 }
 0x144   : > { %v911_v6 = vpop.f32.mrf.mxu1  ;;  %725 = vst.msk [vmem:[#allocation4 + $0x10] sm:$0xff] %vm299_vm3, %v633_v5 }
 0x145   : > { %v429_v7 = vpop.trf.xlu0  ;;  %v7970_v39 = vld [vmem:[#allocation2 + $0x127] sm:$0xff] }
 0x146   : > { %6984 = vmatmul.msk.f32.gmra.mxu0 %vm225_vm1, %v7696_v19  ;;  %462 = vst.msk [vmem:[#allocation2 + $0x130] sm:$0xff] %vm225_vm1, %v429_v7  ;;  %v1002_v19 = vld [vmem:[#allocation4 + $0x8] sm:$0xff] }
 0x147   : > { %7018 = vmatmul.msk.f32.gmra.mxu1 %vm225_vm1, %v7926_v9  ;;  %v1034_v23 = vadd.f32 %v1002_v19, %v908_v0  ;;  %v7972_v41 = vld [vmem:[#allocation2 + $0x128] sm:$0xff]  ;;  %6864 = vmatmul.msk.f32.gmra.mxu2 %vm225_vm1, %v7970_v39 }
 0x148   : > { %6898 = vmatmul.msk.f32.gmra.mxu3 %vm225_vm1, %v7972_v41 }
 0x149   : > { %1066 = vst.msk [vmem:[#allocation4 + $0x8] sm:$0xff] %vm299_vm3, %v1034_v23 }
 0x14b   : > { %v636_v10 = vpop.f32.mrf.mxu0  ;;  %v1003_v26 = vld [vmem:[#allocation4 + $0x10] sm:$0xff] }
 0x14c   : > { %v914_v11 = vpop.f32.mrf.mxu1  ;;  %726 = vst.msk [vmem:[#allocation4 + $0x18] sm:$0xff] %vm299_vm3, %v636_v10  ;;  %v1035_v32 = vadd.f32 %v1003_v26, %v911_v6  ;;  %v8015_v6 = vld [vmem:[#allocation2 + $0x91] sm:$0xff] }
 0x14d   : > { %v430_v13 = vpop.trf.xlu0  ;;  %v7988_v50 = vld [vmem:[#allocation2 + $0x12f] sm:$0xff] }
 0x14e   : > { %6985 = vmatmul.msk.f32.gmra.mxu0 %vm225_vm1, %v7705_v22  ;;  %463 = vst.msk [vmem:[#allocation2 + $0x148] sm:$0xff] %vm225_vm1, %v430_v13  ;;  %v7990_v51 = vld [vmem:[#allocation2 + $0x130] sm:$0xff] }
 0x14f   : > { %7019 = vmatmul.msk.f32.gmra.mxu1 %vm225_vm1, %v7943_v14  ;;  %1067 = vst.msk [vmem:[#allocation4 + $0x10] sm:$0xff] %vm299_vm3, %v1035_v32  ;;  %6865 = vmatmul.msk.f32.gmra.mxu2 %vm225_vm1, %v7988_v50 }
 0x150   : > { %6899 = vmatmul.msk.f32.gmra.mxu3 %vm225_vm1, %v7990_v51 }
 0x153   : > { %v639_v20 = vpop.f32.mrf.mxu0  ;;  %v1004_v38 = vld [vmem:[#allocation4 + $0x18] sm:$0xff] }
 0x154   : > { %v917_v22 = vpop.f32.mrf.mxu1  ;;  %727 = vst.msk [vmem:[#allocation4 + $0x20] sm:$0xff] %vm299_vm3, %v639_v20  ;;  %v1036_v42 = vadd.f32 %v1004_v38, %v914_v11  ;;  %v8032_v20 = vld [vmem:[#allocation2 + $0xa9] sm:$0xff] }
 0x155   : > { %v431_v29 = vpop.trf.xlu0  ;;  %v8005_v62 = vld [vmem:[#allocation2 + $0x147] sm:$0xff] }
 0x156   : > { %464 = vst.msk [vmem:[#allocation2 + $0x150] sm:$0xff] %vm225_vm1, %v431_v29  ;;  %6986 = vmatmul.msk.f32.gmra.mxu0 %vm225_vm1, %v7714_v25  ;;  %v8007_v63 = vld [vmem:[#allocation2 + $0x148] sm:$0xff] }
 0x157   : > { %7020 = vmatmul.msk.f32.gmra.mxu1 %vm225_vm1, %v7962_v35  ;;  %1068 = vst.msk [vmem:[#allocation4 + $0x18] sm:$0xff] %vm299_vm3, %v1036_v42  ;;  %6866 = vmatmul.msk.f32.gmra.mxu2 %vm225_vm1, %v8005_v62  ;;  %v8049_v42 = vld [vmem:[#allocation2 + $0xb1] sm:$0xff] }
 0x158   : > { %6900 = vmatmul.msk.f32.gmra.mxu3 %vm225_vm1, %v8007_v63 }
 0x15b   : > { %v1005_v43 = vld [vmem:[#allocation4 + $0x20] sm:$0xff]  ;;  %v642_v25 = vpop.f32.mrf.mxu0 }
 0x15c   : > { %v920_v44 = vpop.f32.mrf.mxu1  ;;  %v1037_v45 = vadd.f32 %v1005_v43, %v917_v22  ;;  %728 = vst.msk [vmem:[#allocation4 + $0x28] sm:$0xff] %vm299_vm3, %v642_v25 }
 0x15d   : > { %v432_v47 = vpop.trf.xlu0  ;;  %v8022_v7 = vld [vmem:[#allocation2 + $0x14f] sm:$0xff] }
 0x15e   : > { %1069 = vst.msk [vmem:[#allocation4 + $0x20] sm:$0xff] %vm299_vm3, %v1037_v45  ;;  %6987 = vmatmul.msk.f32.gmra.mxu0 %vm225_vm1, %v7723_v28  ;;  %v8024_v8 = vld [vmem:[#allocation2 + $0x150] sm:$0xff] }
 0x15f   : > { %465 = vst.msk [vmem:[#allocation2 + $0x168] sm:$0xff] %vm225_vm1, %v432_v47  ;;  %7021 = vmatmul.msk.f32.gmra.mxu1 %vm225_vm1, %v7981_v48  ;;  %6867 = vmatmul.msk.f32.gmra.mxu2 %vm225_vm1, %v8022_v7 }
 0x160   : > { %6901 = vmatmul.msk.f32.gmra.mxu3 %vm225_vm1, %v8024_v8 }
 0x163   : > { %v1006_v53 = vld [vmem:[#allocation4 + $0x28] sm:$0xff]  ;;  %v645_v54 = vpop.f32.mrf.mxu0 }
 0x164   : > { %v923_v55 = vpop.f32.mrf.mxu1  ;;  %v1038_v57 = vadd.f32 %v1006_v53, %v920_v44  ;;  %729 = vst.msk [vmem:[#allocation4 + $0x30] sm:$0xff] %vm299_vm3, %v645_v54  ;;  %v8066_v54 = vld [vmem:[#allocation2 + $0xc9] sm:$0xff] }
 0x165   : > { %v433_v28 = vpop.trf.xlu0 }
 0x166   : > { %1070 = vst.msk [vmem:[#allocation4 + $0x28] sm:$0xff] %vm299_vm3, %v1038_v57  ;;  %6988 = vmatmul.msk.f32.gmra.mxu0 %vm225_vm1, %v7732_v31  ;;  %v8039_v22 = vld [vmem:[#allocation2 + $0x167] sm:$0xff] }
 0x167   : > { %466 = vst.msk [vmem:[#allocation2 + $0x170] sm:$0xff] %vm225_vm1, %v433_v28  ;;  %7022 = vmatmul.msk.f32.gmra.mxu1 %vm225_vm1, %v7998_v58  ;;  %v8041_v23 = vld [vmem:[#allocation2 + $0x168] sm:$0xff]  ;;  %6868 = vmatmul.msk.f32.gmra.mxu2 %vm225_vm1, %v8039_v22 }
 0x168   : > { %6902 = vmatmul.msk.f32.gmra.mxu3 %vm225_vm1, %v8041_v23 }
 0x16b   : > { %v1007_v0 = vld [vmem:[#allocation4 + $0x30] sm:$0xff]  ;;  %v648_v1 = vpop.f32.mrf.mxu0 }
 0x16c   : > { %v926_v3 = vpop.f32.mrf.mxu1  ;;  %v1039_v5 = vadd.f32 %v1007_v0, %v923_v55  ;;  %730 = vst.msk [vmem:[#allocation4 + $0x38] sm:$0xff] %vm299_vm3, %v648_v1 }
 0x16d   : > { %v434_v31 = vpop.trf.xlu0 }
 0x16e   : > { %1071 = vst.msk [vmem:[#allocation4 + $0x30] sm:$0xff] %vm299_vm3, %v1039_v5  ;;  %6989 = vmatmul.msk.f32.gmra.mxu0 %vm225_vm1, %v7741_v34  ;;  %v8056_v43 = vld [vmem:[#allocation2 + $0x16f] sm:$0xff] }
 0x16f   : > { %467 = vst.msk [vmem:[#allocation2 + $0x188] sm:$0xff] %vm225_vm1, %v434_v31  ;;  %7023 = vmatmul.msk.f32.gmra.mxu1 %vm225_vm1, %v8015_v6  ;;  %v8058_v25 = vld [vmem:[#allocation2 + $0x170] sm:$0xff]  ;;  %6869 = vmatmul.msk.f32.gmra.mxu2 %vm225_vm1, %v8056_v43 }
 0x170   : > { %6903 = vmatmul.msk.f32.gmra.mxu3 %vm225_vm1, %v8058_v25  ;;  %v8083_v5 = vld [vmem:[#allocation2 + $0xd1] sm:$0xff] }
 0x173   : > { %v1008_v10 = vld [vmem:[#allocation4 + $0x38] sm:$0xff]  ;;  %v651_v11 = vpop.f32.mrf.mxu0 }
 0x174   : > { %v929_v13 = vpop.f32.mrf.mxu1  ;;  %v1040_v19 = vadd.f32 %v1008_v10, %v926_v3  ;;  %731 = vst.msk [vmem:[#allocation4 + $0x40] sm:$0xff] %vm299_vm3, %v651_v11 }
 0x175   : > { %v435_v34 = vpop.trf.xlu0 }
 0x176   : > { %1072 = vst.msk [vmem:[#allocation4 + $0x38] sm:$0xff] %vm299_vm3, %v1040_v19  ;;  %6990 = vmatmul.msk.f32.gmra.mxu0 %vm225_vm1, %v7750_v37  ;;  %v8073_v55 = vld [vmem:[#allocation2 + $0x187] sm:$0xff] }
 0x177   : > { %468 = vst.msk [vmem:[#allocation2 + $0x190] sm:$0xff] %vm225_vm1, %v435_v34  ;;  %7024 = vmatmul.msk.f32.gmra.mxu1 %vm225_vm1, %v8032_v20  ;;  %v8075_v57 = vld [vmem:[#allocation2 + $0x188] sm:$0xff]  ;;  %6870 = vmatmul.msk.f32.gmra.mxu2 %vm225_vm1, %v8073_v55 }
 0x178   : > { %6904 = vmatmul.msk.f32.gmra.mxu3 %vm225_vm1, %v8075_v57 }
 0x17b   : > { %v1009_v26 = vld [vmem:[#allocation4 + $0x40] sm:$0xff]  ;;  %v654_v29 = vpop.f32.mrf.mxu0 }
 0x17c   : > { %v932_v32 = vpop.f32.mrf.mxu1  ;;  %v1041_v38 = vadd.f32 %v1009_v26, %v929_v13  ;;  %732 = vst.msk [vmem:[#allocation4 + $0x48] sm:$0xff] %vm299_vm3, %v654_v29  ;;  %v8100_v26 = vld [vmem:[#allocation2 + $0xe9] sm:$0xff] }
 0x17d   : > { %v436_v37 = vpop.trf.xlu0 }
 0x17e   : > { %1073 = vst.msk [vmem:[#allocation4 + $0x40] sm:$0xff] %vm299_vm3, %v1041_v38  ;;  %6991 = vmatmul.msk.f32.gmra.mxu0 %vm225_vm1, %v7757_v40  ;;  %v8090_v31 = vld [vmem:[#allocation2 + $0x18f] sm:$0xff] }
 0x17f   : > { %469 = vst.msk [vmem:[#allocation2 + $0x1a8] sm:$0xff] %vm225_vm1, %v436_v37  ;;  %7025 = vmatmul.msk.f32.gmra.mxu1 %vm225_vm1, %v8049_v42  ;;  %v8092_v10 = vld [vmem:[#allocation2 + $0x190] sm:$0xff]  ;;  %6871 = vmatmul.msk.f32.gmra.mxu2 %vm225_vm1, %v8090_v31 }
 0x180   : > { %6905 = vmatmul.msk.f32.gmra.mxu3 %vm225_vm1, %v8092_v10 }
 0x183   : > { %v1010_v44 = vld [vmem:[#allocation4 + $0x48] sm:$0xff]  ;;  %v657_v45 = vpop.f32.mrf.mxu0 }
 0x184   : > { %v935_v47 = vpop.f32.mrf.mxu1  ;;  %v1042_v53 = vadd.f32 %v1010_v44, %v932_v32  ;;  %733 = vst.msk [vmem:[#allocation4 + $0x50] sm:$0xff] %vm299_vm3, %v657_v45 }
 0x185   : > { %v437_v40 = vpop.trf.xlu0 }
 0x186   : > { %1074 = vst.msk [vmem:[#allocation4 + $0x48] sm:$0xff] %vm299_vm3, %v1042_v53  ;;  %6992 = vmatmul.msk.f32.gmra.mxu0 %vm225_vm1, %v7780_v46  ;;  %v8107_v29 = vld [vmem:[#allocation2 + $0x1a7] sm:$0xff] }
 0x187   : > { %470 = vst.msk [vmem:[#allocation2 + $0x1b0] sm:$0xff] %vm225_vm1, %v437_v40  ;;  %7026 = vmatmul.msk.f32.gmra.mxu1 %vm225_vm1, %v8066_v54  ;;  %v8109_v32 = vld [vmem:[#allocation2 + $0x1a8] sm:$0xff]  ;;  %6872 = vmatmul.msk.f32.gmra.mxu2 %vm225_vm1, %v8107_v29 }
 0x188   : > { %6906 = vmatmul.msk.f32.gmra.mxu3 %vm225_vm1, %v8109_v32 }
 0x18b   : > { %v1011_v28 = vld [vmem:[#allocation4 + $0x50] sm:$0xff]  ;;  %v660_v0 = vpop.f32.mrf.mxu0 }
 0x18c   : > { %v938_v1 = vpop.f32.mrf.mxu1  ;;  %v1043_v3 = vadd.f32 %v1011_v28, %v935_v47  ;;  %734 = vst.msk [vmem:[#allocation4 + $0x58] sm:$0xff] %vm299_vm3, %v660_v0 }
 0x18d   : > { %v438_v46 = vpop.trf.xlu0 }
 0x18e   : > { %1075 = vst.msk [vmem:[#allocation4 + $0x50] sm:$0xff] %vm299_vm3, %v1043_v3  ;;  %6993 = vmatmul.msk.f32.gmra.mxu0 %vm225_vm1, %v7802_v49  ;;  %v8124_v53 = vld [vmem:[#allocation2 + $0x1af] sm:$0xff] }
 0x18f   : > { %471 = vst.msk [vmem:[#allocation2 + $0x1c8] sm:$0xff] %vm225_vm1, %v438_v46  ;;  %7027 = vmatmul.msk.f32.gmra.mxu1 %vm225_vm1, %v8083_v5  ;;  %v8126_v40 = vld [vmem:[#allocation2 + $0x1b0] sm:$0xff]  ;;  %6873 = vmatmul.msk.f32.gmra.mxu2 %vm225_vm1, %v8124_v53 }
 0x190   : > { %6907 = vmatmul.msk.f32.gmra.mxu3 %vm225_vm1, %v8126_v40 }
 0x193   : > { %v1012_v11 = vld [vmem:[#allocation4 + $0x58] sm:$0xff]  ;;  %v663_v13 = vpop.f32.mrf.mxu0 }
 0x194   : > { %v1044_v19 = vadd.f32 %v1012_v11, %v938_v1  ;;  %735 = vst.msk [vmem:[#allocation4 + $0x60] sm:$0xff] %vm299_vm3, %v663_v13  ;;  %v941_v34 = vpop.f32.mrf.mxu1 }
 0x195   : > { %v439_v49 = vpop.trf.xlu0 }
 0x196   : > { %1076 = vst.msk [vmem:[#allocation4 + $0x58] sm:$0xff] %vm299_vm3, %v1044_v19  ;;  %6994 = vmatmul.msk.f32.gmra.mxu0 %vm225_vm1, %v7822_v52  ;;  %v8117_v52 = vld [vmem:[#allocation2 + $0xf1] sm:$0xff]  ;;  %v8141_v46 = vld [vmem:[#allocation2 + $0x1c7] sm:$0xff] }
 0x197   : > { %472 = vst.msk [vmem:[#allocation2 + $0x1d0] sm:$0xff] %vm225_vm1, %v439_v49  ;;  %7028 = vmatmul.msk.f32.gmra.mxu1 %vm225_vm1, %v8100_v26  ;;  %v8143_v11 = vld [vmem:[#allocation2 + $0x1c8] sm:$0xff]  ;;  %6874 = vmatmul.msk.f32.gmra.mxu2 %vm225_vm1, %v8141_v46 }
 0x198   : > { %6908 = vmatmul.msk.f32.gmra.mxu3 %vm225_vm1, %v8143_v11 }
 0x19b   : > { %v1013_v38 = vld [vmem:[#allocation4 + $0x60] sm:$0xff]  ;;  %v666_v37 = vpop.f32.mrf.mxu0 }
 0x19c   : > { %v1045_v44 = vadd.f32 %v1013_v38, %v941_v34  ;;  %736 = vst.msk [vmem:[#allocation4 + $0x68] sm:$0xff] %vm299_vm3, %v666_v37  ;;  %v944_v47 = vpop.f32.mrf.mxu1  ;;  %v8155_v38 = vld [vmem:[#allocation2 + $0x111] sm:$0xff] }
 0x19d   : > { %v440_v45 = vpop.trf.xlu0 }
 0x19e   : > { %1077 = vst.msk [vmem:[#allocation4 + $0x60] sm:$0xff] %vm299_vm3, %v1045_v44  ;;  %6995 = vmatmul.msk.f32.gmra.mxu0 %vm225_vm1, %v7846_v56  ;;  %v8134_v56 = vld [vmem:[#allocation2 + $0x109] sm:$0xff] }
 0x19f   : > { %473 = vst.msk [vmem:[#allocation2 + $0x1e8] sm:$0xff] %vm225_vm1, %v440_v45  ;;  %7029 = vmatmul.msk.f32.gmra.mxu1 %vm225_vm1, %v8117_v52  ;;  %v506_v37 = vld [vmem:[#allocation2 + $0x1cf] sm:$0xff] }
 0x1a0   : > { %v8161_v44 = vld [vmem:[#allocation2 + $0x1d0] sm:$0xff]  ;;  %6875 = vmatmul.msk.f32.gmra.mxu2 %vm225_vm1, %v506_v37 }
 0x1a1   : > { %6909 = vmatmul.msk.f32.gmra.mxu3 %vm225_vm1, %v8161_v44 }
 0x1a3   : > { %v1014_v28 = vld [vmem:[#allocation4 + $0x68] sm:$0xff]  ;;  %v669_v0 = vpop.f32.mrf.mxu0 }
 0x1a4   : > { %v1046_v1 = vadd.f32 %v1014_v28, %v944_v47  ;;  %737 = vst.msk [vmem:[#allocation4 + $0x70] sm:$0xff] %vm299_vm3, %v669_v0  ;;  %v947_v13 = vpop.f32.mrf.mxu1  ;;  %v7082_v28 = vld [vmem:[%s10206_s1 + $0x1c] sm:$0xf] }
 0x1a5   : > { %v441_v3 = vpop.trf.xlu0  ;;  %7083 = vmatpush.msk.msra.mxu3 %vm606_vm0, %v7082_v28 }
 0x1a6   : > { %1078 = vst.msk [vmem:[#allocation4 + $0x68] sm:$0xff] %vm299_vm3, %v1046_v1  ;;  %6996 = vmatmul.msk.f32.gmra.mxu0 %vm225_vm1, %v7870_v60  ;;  %v7048_v60 = vld [vmem:[%s10206_s1 + $0x18] sm:$0xf] }
 0x1a7   : > { %474 = vst.msk [vmem:[#allocation2 + $0x1f0] sm:$0xff] %vm225_vm1, %v441_v3  ;;  %7030 = vmatmul.msk.f32.gmra.mxu1 %vm225_vm1, %v8134_v56  ;;  %7049 = vmatpush.msk.msra.mxu2 %vm606_vm0, %v7048_v60  ;;  %v507_v3 = vld [vmem:[#allocation2 + $0x1e7] sm:$0xff]  ;;  %v8187_v60 = vld [vmem:[#allocation2 + $0x131] sm:$0xff] }
 0x1a8   : > { %6876 = vmatmul.msk.f32.gmra.mxu2 %vm225_vm1, %v507_v3  ;;  %v7116_v3 = vld [vmem:[%s10206_s1 + $0x20] sm:$0xf] }
 0x1a9   : > { %7117 = vmatpush.msk.msra.mxu0 %vm606_vm0, %v7116_v3 }
 0x1ab   : > { %v1015_v19 = vld [vmem:[#allocation4 + $0x70] sm:$0xff]  ;;  %v672_v34 = vpop.f32.mrf.mxu0 }
 0x1ac   : > { %v1047_v49 = vadd.f32 %v1015_v19, %v947_v13  ;;  %738 = vst.msk [vmem:[#allocation4 + $0x78] sm:$0xff] %vm299_vm3, %v672_v34  ;;  %v950_v45 = vpop.f32.mrf.mxu1  ;;  %v8179_v13 = vld [vmem:[#allocation2 + $0x1e8] sm:$0xff] }
 0x1ad   : > { %6910 = vmatmul.msk.f32.gmra.mxu3 %vm225_vm1, %v8179_v13 }
 0x1ae   : > { %1079 = vst.msk [vmem:[#allocation4 + $0x70] sm:$0xff] %vm299_vm3, %v1047_v49  ;;  %6997 = vmatmul.msk.f32.gmra.mxu0 %vm225_vm1, %v7954_v17  ;;  %v8173_v17 = vld [vmem:[#allocation2 + $0x129] sm:$0xff] }
 0x1af   : > { %7031 = vmatmul.msk.f32.gmra.mxu1 %vm225_vm1, %v8155_v38  ;;  %v8193_v49 = vld [vmem:[#allocation2 + $0x1f0] sm:$0xff] }
 0x1b3   : > { %v1016_v47 = vld [vmem:[#allocation4 + $0x78] sm:$0xff]  ;;  %v8169_v1 = vpop.f32.mrf.mxu0 }
 0x1b4   : > { %v1048_v0 = vadd.f32 %v1016_v47, %v950_v45 }
 0x1b5   : > { %6911 = vmatmul.msk.f32.gmra.mxu3 %vm225_vm1, %v8193_v49 }
 0x1b6   : > { %1080 = vst.msk [vmem:[#allocation4 + $0x78] sm:$0xff] %vm299_vm3, %v1048_v0  ;;  %6998 = vmatmul.msk.f32.gmra.mxu0 %vm225_vm1, %v7972_v41  ;;  %v508_v41 = vld [vmem:[#allocation2 + $0x1ef] sm:$0xff] }
 0x1b7   : > { %7032 = vmatmul.msk.f32.gmra.mxu1 %vm225_vm1, %v8173_v17  ;;  %6877 = vmatmul.msk.f32.gmra.mxu2 %vm225_vm1, %v508_v41  ;;  %v8201_v0 = vld [vmem:[#allocation2 + $0x149] sm:$0xff]  ;;  %v8216_v41 = vld [vmem:[#allocation2 + $0x151] sm:$0xff] }
 0x1b9   : > { %v675_v19 = vpop.f32.mrf.mxu2 }
 0x1ba   : > { %739 = vst.msk [vmem:[#allocation4 + $0x80] sm:$0xff] %vm299_vm3, %v675_v19  ;;  %v953_v37 = vpop.f32.mrf.mxu3 }
 0x1bb   : > { %v8185_v34 = vpop.f32.mrf.mxu0 }
 0x1bd   : > { %6948 = vmatmul.msk.f32.vlgmr.msrb.gmra.mxu3 %vm225_vm1, %v7658_v12 }
 0x1be   : > { %6999 = vmatmul.msk.f32.gmra.mxu0 %vm225_vm1, %v7990_v51  ;;  %v1097_v51 = vld [vmem:[#allocation2 + $0x9] sm:$0xff] }
 0x1bf   : > { %7033 = vmatmul.msk.f32.gmra.mxu1 %vm225_vm1, %v8187_v60  ;;  %6914 = vmatmul.msk.f32.vlgmr.msrb.gmra.mxu2 %vm225_vm1, %v1097_v51 }
 0x1c1   : > { %v1017_v45 = vld [vmem:[#allocation4 + $0x80] sm:$0xff] }
 0x1c2   : > { %v1049_v47 = vadd.f32 %v1017_v45, %v953_v37  ;;  %v678_v45 = vpop.f32.mrf.mxu2 }
 0x1c3   : > { %v8199_v28 = vpop.f32.mrf.mxu0  ;;  %v956_v12 = vpop.f32.mrf.mxu3  ;;  %740 = vst.msk [vmem:[#allocation4 + $0x88] sm:$0xff] %vm299_vm3, %v678_v45 }
 0x1c4   : > { %1081 = vst.msk [vmem:[#allocation4 + $0x80] sm:$0xff] %vm299_vm3, %v1049_v47  ;;  %v8227_v47 = vld [vmem:[#allocation2 + $0x169] sm:$0xff] }
 0x1c5   : > { %6949 = vmatmul.msk.f32.gmra.mxu3 %vm225_vm1, %v7681_v15 }
 0x1c6   : > { %7000 = vmatmul.msk.f32.gmra.mxu0 %vm225_vm1, %v8007_v63  ;;  %v1098_v63 = vld [vmem:[#allocation2 + $0x11] sm:$0xff] }
 0x1c7   : > { %7034 = vmatmul.msk.f32.gmra.mxu1 %vm225_vm1, %v8201_v0  ;;  %6915 = vmatmul.msk.f32.gmra.mxu2 %vm225_vm1, %v1098_v63  ;;  %v8240_v63 = vld [vmem:[#allocation2 + $0x171] sm:$0xff] }
 0x1ca   : > { %v681_v51 = vpop.f32.mrf.mxu2 }
 0x1cb   : > { %v8214_v19 = vpop.f32.mrf.mxu0  ;;  %v959_v3 = vpop.f32.mrf.mxu3  ;;  %741 = vst.msk [vmem:[#allocation4 + $0x90] sm:$0xff] %vm299_vm3, %v681_v51 }
 0x1cd   : > { %6950 = vmatmul.msk.f32.gmra.mxu3 %vm225_vm1, %v7694_v18 }
 0x1ce   : > { %7001 = vmatmul.msk.f32.gmra.mxu0 %vm225_vm1, %v8024_v8  ;;  %v1018_v8 = vld [vmem:[#allocation4 + $0x88] sm:$0xff] }
 0x1cf   : > { %7035 = vmatmul.msk.f32.gmra.mxu1 %vm225_vm1, %v8216_v41  ;;  %6916 = vmatmul.msk.f32.gmra.mxu2 %vm225_vm1, %v7878_v61  ;;  %v1050_v45 = vadd.f32 %v1018_v8, %v956_v12  ;;  %v8254_v8 = vld [vmem:[#allocation2 + $0x189] sm:$0xff] }
 0x1d1   : > { %1082 = vst.msk [vmem:[#allocation4 + $0x88] sm:$0xff] %vm299_vm3, %v1050_v45 }
 0x1d2   : > { %v1019_v61 = vld [vmem:[#allocation4 + $0x90] sm:$0xff] }
 0x1d3   : > { %v8225_v37 = vpop.f32.mrf.mxu0  ;;  %v962_v12 = vpop.f32.mrf.mxu3  ;;  %v1051_v51 = vadd.f32 %v1019_v61, %v959_v3  ;;  %v8270_v61 = vld [vmem:[#allocation2 + $0x191] sm:$0xff] }
 0x1d5   : > { %6951 = vmatmul.msk.f32.gmra.mxu3 %vm225_vm1, %v7703_v21  ;;  %1083 = vst.msk [vmem:[#allocation4 + $0x90] sm:$0xff] %vm299_vm3, %v1051_v51 }
 0x1d6   : > { %7002 = vmatmul.msk.f32.gmra.mxu0 %vm225_vm1, %v8041_v23  ;;  %v684_v23 = vpop.f32.mrf.mxu2 }
 0x1d7   : > { %7036 = vmatmul.msk.f32.gmra.mxu1 %vm225_vm1, %v8227_v47  ;;  %6917 = vmatmul.msk.f32.gmra.mxu2 %vm225_vm1, %v7904_v2  ;;  %742 = vst.msk [vmem:[#allocation4 + $0x98] sm:$0xff] %vm299_vm3, %v684_v23  ;;  %v8268_v2 = vpop.f32.mrf.mxu1 }
 0x1db   : > { %v8238_v15 = vpop.f32.mrf.mxu0  ;;  %v965_v45 = vpop.f32.mrf.mxu3 }
 0x1dd   : > { %6952 = vmatmul.msk.f32.gmra.mxu3 %vm225_vm1, %v7712_v24 }
 0x1de   : > { %7003 = vmatmul.msk.f32.gmra.mxu0 %vm225_vm1, %v8058_v25  ;;  %v1020_v25 = vld [vmem:[#allocation4 + $0x98] sm:$0xff]  ;;  %v687_v3 = vpop.f32.mrf.mxu2 }
 0x1df   : > { %7037 = vmatmul.msk.f32.gmra.mxu1 %vm225_vm1, %v8240_v63  ;;  %6918 = vmatmul.msk.f32.gmra.mxu2 %vm225_vm1, %v7926_v9  ;;  %743 = vst.msk [vmem:[#allocation4 + $0xa0] sm:$0xff] %vm299_vm3, %v687_v3  ;;  %v8286_v3 = vpop.f32.mrf.mxu1 }
 0x1e3   : > { %v8252_v18 = vpop.f32.mrf.mxu0  ;;  %v968_v51 = vpop.f32.mrf.mxu3 }
 0x1e5   : > { %6953 = vmatmul.msk.f32.gmra.mxu3 %vm225_vm1, %v7721_v27 }
 0x1e6   : > { %7004 = vmatmul.msk.f32.gmra.mxu0 %vm225_vm1, %v8075_v57  ;;  %v1052_v57 = vadd.f32 %v1020_v25, %v962_v12  ;;  %v1021_v23 = vld [vmem:[#allocation4 + $0xa0] sm:$0xff]  ;;  %v690_v12 = vpop.f32.mrf.mxu2  ;;  %v8284_v25 = vld [vmem:[#allocation2 + $0x1a9] sm:$0xff] }
 0x1e7   : > { %7038 = vmatmul.msk.f32.gmra.mxu1 %vm225_vm1, %v8254_v8  ;;  %6919 = vmatmul.msk.f32.gmra.mxu2 %vm225_vm1, %v7943_v14  ;;  %744 = vst.msk [vmem:[#allocation4 + $0xa8] sm:$0xff] %vm299_vm3, %v690_v12  ;;  %v8300_v12 = vld [vmem:[#allocation2 + $0x1b1] sm:$0xff] }
 0x1e8   : > { %1084 = vst.msk [vmem:[#allocation4 + $0x98] sm:$0xff] %vm299_vm3, %v1052_v57 }
 0x1e9   : > { %10219 = vst [vmem:[#allocation7_spill] sm:$0xff] %v8300_v12 }
 0x1eb   : > { %v8266_v21 = vpop.f32.mrf.mxu0 }
 0x1ed   : > { %6954 = vmatmul.msk.f32.gmra.mxu3 %vm225_vm1, %v7730_v30 }
 0x1ee   : > { %7005 = vmatmul.msk.f32.gmra.mxu0 %vm225_vm1, %v8092_v10  ;;  %v1053_v10 = vadd.f32 %v1021_v23, %v965_v45  ;;  %v1022_v57 = vld [vmem:[#allocation4 + $0xa8] sm:$0xff]  ;;  %v693_v45 = vpop.f32.mrf.mxu2  ;;  %v971_v23 = vpop.f32.mrf.mxu3 }
 0x1ef   : > { %7039 = vmatmul.msk.f32.gmra.mxu1 %vm225_vm1, %v8270_v61  ;;  %6920 = vmatmul.msk.f32.gmra.mxu2 %vm225_vm1, %v7962_v35  ;;  %v1054_v4 = vadd.f32 %v1022_v57, %v968_v51  ;;  %745 = vst.msk [vmem:[#allocation4 + $0xb0] sm:$0xff] %vm299_vm3, %v693_v45  ;;  %v8316_v45 = vld [vmem:[#allocation2 + $0x1c9] sm:$0xff] }
 0x1f0   : > { %1085 = vst.msk [vmem:[#allocation4 + $0xa0] sm:$0xff] %vm299_vm3, %v1053_v10 }
 0x1f1   : > { %1086 = vst.msk [vmem:[#allocation4 + $0xa8] sm:$0xff] %vm299_vm3, %v1054_v4 }
 0x1f2   : > { %10221 = vst [vmem:[#allocation9_spill] sm:$0xff] %v8316_v45 }
 0x1f3   : > { %v8282_v24 = vpop.f32.mrf.mxu0 }
 0x1f5   : > { %6955 = vmatmul.msk.f32.gmra.mxu3 %vm225_vm1, %v7739_v33 }
 0x1f6   : > { %7006 = vmatmul.msk.f32.gmra.mxu0 %vm225_vm1, %v8109_v32  ;;  %v8307_v32 = vpop.f32.mrf.mxu1  ;;  %v1023_v51 = vld [vmem:[#allocation4 + $0xb0] sm:$0xff]  ;;  %v696_v10 = vpop.f32.mrf.mxu2 }
 0x1f7   : > { %7040 = vmatmul.msk.f32.gmra.mxu1 %vm225_vm1, %v8284_v25  ;;  %6921 = vmatmul.msk.f32.gmra.mxu2 %vm225_vm1, %v7981_v48  ;;  %v974_v57 = vpop.f32.mrf.mxu3  ;;  %746 = vst.msk [vmem:[#allocation4 + $0xb8] sm:$0xff] %vm299_vm3, %v696_v10 }
 0x1fb   : > { %v8298_v27 = vpop.f32.mrf.mxu0 }
 0x1fc   : > { %10218 = vst [vmem:[#allocation6_spill] sm:$0xff] %v8298_v27 }
 0x1fd   : > { %6956 = vmatmul.msk.f32.gmra.mxu3 %vm225_vm1, %v7748_v36  ;;  %v442_v36 = vpop.trf.xlu0 }
 0x1fe   : > { %7007 = vmatmul.msk.f32.gmra.mxu0 %vm225_vm1, %v8126_v40  ;;  %v1055_v40 = vadd.f32 %v1023_v51, %v971_v23  ;;  %v8324_v4 = vpop.f32.mrf.mxu1  ;;  %v1024_v23 = vld [vmem:[#allocation4 + $0xb8] sm:$0xff]  ;;  %v699_v51 = vpop.f32.mrf.mxu2  ;;  %475 = vst.msk [vmem:[#allocation2 + $0x208] sm:$0xff] %vm225_vm1, %v442_v36 }
 0x1ff   : > { %7041 = vmatmul.msk.f32.gmra.mxu1 %vm225_vm1, %v8300_v12  ;;  %6922 = vmatmul.msk.f32.gmra.mxu2 %vm225_vm1, %v7998_v58  ;;  %v977_v10 = vpop.f32.mrf.mxu3  ;;  %747 = vst.msk [vmem:[#allocation4 + $0xc0] sm:$0xff] %vm299_vm3, %v699_v51 }
 0x200   : > { %1087 = vst.msk [vmem:[#allocation4 + $0xb0] sm:$0xff] %vm299_vm3, %v1055_v40  ;;  %v1448_v40 = vld [vmem:[#allocation2 + $0xaf] sm:$0xff] }
 0x203   : > { %v8314_v30 = vpop.f32.mrf.mxu0 }
 0x204   : > { %10220 = vst [vmem:[#allocation8_spill] sm:$0xff] %v8314_v30  ;;  %v8332_v30 = vld [vmem:[#allocation2 + $0x1d1] sm:$0xff] }
 0x205   : > { %10223 = vst [vmem:[#allocation11_spill] sm:$0xff] %v8332_v30  ;;  %6957 = vmatmul.msk.f32.gmra.mxu3 %vm225_vm1, %v1448_v40  ;;  %v443_v40 = vpop.trf.xlu0 }
 0x206   : > { %7008 = vmatmul.msk.f32.gmra.mxu0 %vm225_vm1, %v8143_v11  ;;  %v1056_v11 = vadd.f32 %v1024_v23, %v974_v57  ;;  %v8346_v57 = vpop.f32.mrf.mxu1  ;;  %v1025_v23 = vld [vmem:[#allocation4 + $0xc0] sm:$0xff]  ;;  %476 = vst.msk [vmem:[#allocation2 + $0x210] sm:$0xff] %vm225_vm1, %v443_v40  ;;  %v1811_v40 = vld [vmem:[#allocation2 + $0x208] sm:$0xff] }
 0x207   : > { %7042 = vmatmul.msk.f32.gmra.mxu1 %vm225_vm1, %v8316_v45  ;;  %6923 = vmatmul.msk.f32.gmra.mxu2 %vm225_vm1, %v8015_v6  ;;  %v980_v51 = vpop.f32.mrf.mxu3  ;;  %v8348_v45 = vld [vmem:[#allocation2 + $0x1e9] sm:$0xff] }
 0x208   : > { %1088 = vst.msk [vmem:[#allocation4 + $0xb8] sm:$0xff] %vm299_vm3, %v1056_v11  ;;  %v1449_v11 = vld [vmem:[#allocation2 + $0xc7] sm:$0xff] }
 0x209   : > { %10225 = vst [vmem:[#allocation13_spill] sm:$0xff] %v8348_v45 }
 0x20b   : > { %v8330_v33 = vpop.f32.mrf.mxu0 }
 0x20c   : > { %10222 = vst [vmem:[#allocation10_spill] sm:$0xff] %v8330_v33 }
 0x20d   : > { %6958 = vmatmul.msk.f32.gmra.mxu3 %vm225_vm1, %v1449_v11 }
 0x20e   : > { %7009 = vmatmul.msk.f32.gmra.mxu0 %vm225_vm1, %v8161_v44  ;;  %v702_v44 = vpop.f32.mrf.mxu2 }
 0x20f   : > { %7043 = vmatmul.msk.f32.gmra.mxu1 %vm225_vm1, %v8332_v30  ;;  %v1057_v30 = vadd.f32 %v1025_v23, %v977_v10  ;;  %748 = vst.msk [vmem:[#allocation4 + $0xc8] sm:$0xff] %vm299_vm3, %v702_v44  ;;  %6924 = vmatmul.msk.f32.gmra.mxu2 %vm225_vm1, %v8032_v20  ;;  %v983_v44 = vpop.f32.mrf.mxu3 }
 0x211   : > { %1089 = vst.msk [vmem:[#allocation4 + $0xc0] sm:$0xff] %vm299_vm3, %v1057_v30  ;;  %v1450_v30 = vld [vmem:[#allocation2 + $0xcf] sm:$0xff] }
 0x213   : > { %v8343_v33 = vpop.f32.mrf.mxu0 }
 0x214   : > { %10224 = vst [vmem:[#allocation12_spill] sm:$0xff] %v8343_v33  ;;  %v8364_v33 = vpop.f32.mrf.mxu1 }
 0x215   : > { %6959 = vmatmul.msk.f32.gmra.mxu3 %vm225_vm1, %v1450_v30  ;;  %v1812_v30 = vld [vmem:[#allocation2 + $0x210] sm:$0xff] }
 0x216   : > { %7010 = vmatmul.msk.f32.gmra.mxu0 %vm225_vm1, %v8179_v13  ;;  %v1026_v10 = vld [vmem:[#allocation4 + $0xc8] sm:$0xff]  ;;  %v705_v23 = vpop.f32.mrf.mxu2  ;;  %v8362_v13 = vld [vmem:[#allocation2 + $0x1f1] sm:$0xff] }
 0x217   : > { %7044 = vmatmul.msk.f32.gmra.mxu1 %vm225_vm1, %v8348_v45  ;;  %10227 = vst [vmem:[#allocation15_spill] sm:$0xff] %v8362_v13  ;;  %v1058_v45 = vadd.f32 %v1026_v10, %v980_v51  ;;  %6925 = vmatmul.msk.f32.gmra.mxu2 %vm225_vm1, %v8049_v42 }
 0x218   : > { %749 = vst.msk [vmem:[#allocation4 + $0xd0] sm:$0xff] %vm299_vm3, %v705_v23  ;;  %v986_v23 = vpop.f32.mrf.mxu3 }
 0x219   : > { %1090 = vst.msk [vmem:[#allocation4 + $0xc8] sm:$0xff] %vm299_vm3, %v1058_v45 }
 0x21b   : > { %v8359_v36 = vpop.f32.mrf.mxu0 }
 0x21c   : > { %10226 = vst [vmem:[#allocation14_spill] sm:$0xff] %v8359_v36 }
 0x21e   : > { %7011 = vmatmul.msk.f32.gmra.mxu0 %vm225_vm1, %v8193_v49  ;;  %v708_v10 = vpop.f32.mrf.mxu2  ;;  %v1451_v49 = vld [vmem:[#allocation2 + $0xe7] sm:$0xff] }
 0x21f   : > { %7045 = vmatmul.msk.f32.gmra.mxu1 %vm225_vm1, %v8362_v13  ;;  %v1027_v51 = vld [vmem:[#allocation4 + $0xd0] sm:$0xff]  ;;  %750 = vst.msk [vmem:[#allocation4 + $0xd8] sm:$0xff] %vm299_vm3, %v708_v10  ;;  %6926 = vmatmul.msk.f32.gmra.mxu2 %vm225_vm1, %v8066_v54 }
 0x220   : > { %v1059_v36 = vadd.f32 %v1027_v51, %v983_v44  ;;  %6960 = vmatmul.msk.f32.gmra.mxu3 %vm225_vm1, %v1451_v49  ;;  %v989_v27 = vpop.f32.mrf.mxu3 }
 0x222   : > { %1091 = vst.msk [vmem:[#allocation4 + $0xd0] sm:$0xff] %vm299_vm3, %v1059_v36  ;;  %v1452_v36 = vld [vmem:[#allocation2 + $0xef] sm:$0xff] }
 0x223   : > { %v8375_v11 = vpop.f32.mrf.mxu0 }
 0x224   : > { %10228 = vst [vmem:[#allocation16_spill] sm:$0xff] %v8375_v11 }
 0x226   : > { %7012 = vmatmul.msk.f32.gmra.mxu0 %vm225_vm1, %v1811_v40  ;;  %v1028_v11 = vld [vmem:[#allocation4 + $0xd8] sm:$0xff]  ;;  %v711_v13 = vpop.f32.mrf.mxu2 }
 0x227   : > { %v1060_v12 = vadd.f32 %v1028_v11, %v986_v23  ;;  %751 = vst.msk [vmem:[#allocation4 + $0xe0] sm:$0xff] %vm299_vm3, %v711_v13  ;;  %6927 = vmatmul.msk.f32.gmra.mxu2 %vm225_vm1, %v8083_v5 }
 0x228   : > { %6961 = vmatmul.msk.f32.gmra.mxu3 %vm225_vm1, %v1452_v36  ;;  %v992_v10 = vpop.f32.mrf.mxu3 }
 0x229   : > { %1092 = vst.msk [vmem:[#allocation4 + $0xd8] sm:$0xff] %vm299_vm3, %v1060_v12 }
 0x22b   : > { %v8383_v45 = vpop.f32.mrf.mxu0 }
 0x22e   : > { %7013 = vmatmul.msk.f32.gmra.mxu0 %vm225_vm1, %v1812_v30  ;;  %v1029_v40 = vld [vmem:[#allocation4 + $0xe0] sm:$0xff]  ;;  %v714_v51 = vpop.f32.mrf.mxu2 }
 0x22f   : > { %v1061_v49 = vadd.f32 %v1029_v40, %v989_v27  ;;  %752 = vst.msk [vmem:[#allocation4 + $0xe8] sm:$0xff] %vm299_vm3, %v714_v51  ;;  %6928 = vmatmul.msk.f32.gmra.mxu2 %vm225_vm1, %v8100_v26 }
 0x230   : > { %6962 = vmatmul.msk.f32.gmra.mxu3 %vm225_vm1, %v7868_v59  ;;  %v995_v23 = vpop.f32.mrf.mxu3 }
 0x231   : > { %1093 = vst.msk [vmem:[#allocation4 + $0xe0] sm:$0xff] %vm299_vm3, %v1061_v49 }
 0x233   : > { %v8391_v44 = vpop.f32.mrf.mxu0 }
 0x236   : > { %7118 = vmatmul.msk.f32.vlgmr.msra.gmra.mxu0 %vm225_vm1, %v7926_v9  ;;  %v1030_v13 = vld [vmem:[#allocation4 + $0xe8] sm:$0xff]  ;;  %v717_v11 = vpop.f32.mrf.mxu2 }
 0x237   : > { %v1062_v30 = vadd.f32 %v1030_v13, %v992_v10  ;;  %753 = vst.msk [vmem:[#allocation4 + $0xf0] sm:$0xff] %vm299_vm3, %v717_v11  ;;  %6929 = vmatmul.msk.f32.gmra.mxu2 %vm225_vm1, %v8117_v52  ;;  %v1343_v10 = vld [vmem:[#allocation4] sm:$0xff] }
 0x238   : > { %6963 = vmatmul.msk.f32.gmra.mxu3 %vm225_vm1, %v7952_v16  ;;  %v998_v36 = vpop.f32.mrf.mxu3 }
 0x239   : > { %1094 = vst.msk [vmem:[#allocation4 + $0xe8] sm:$0xff] %vm299_vm3, %v1062_v30 }
 0x23b   : > { %v8401_v12 = vpop.f32.mrf.mxu0 }
 0x23e   : > { %7119 = vmatmul.msk.f32.gmra.mxu0 %vm225_vm1, %v7943_v14  ;;  %v1031_v9 = vld [vmem:[#allocation4 + $0xf0] sm:$0xff]  ;;  %v720_v27 = vpop.f32.mrf.mxu2 }
 0x23f   : > { %v1063_v40 = vadd.f32 %v1031_v9, %v995_v23  ;;  %754 = vst.msk [vmem:[#allocation4 + $0xf8] sm:$0xff] %vm299_vm3, %v720_v27  ;;  %6930 = vmatmul.msk.f32.gmra.mxu2 %vm225_vm1, %v8134_v56  ;;  %v1344_v56 = vld [vmem:[#allocation4 + $0x8] sm:$0xff] }
 0x240   : > { %6964 = vmatmul.msk.f32.gmra.mxu3 %vm225_vm1, %v7970_v39  ;;  %v1589_v49 = vpop.f32.mrf.mxu3 }
 0x241   : > { %1095 = vst.msk [vmem:[#allocation4 + $0xf0] sm:$0xff] %vm299_vm3, %v1063_v40 }
 0x243   : > { %v8411_v59 = vpop.f32.mrf.mxu0 }
 0x246   : > { %7120 = vmatmul.msk.f32.gmra.mxu0 %vm225_vm1, %v7962_v35  ;;  %v1032_v16 = vld [vmem:[#allocation4 + $0xf8] sm:$0xff]  ;;  %v1247_v51 = vpop.f32.mrf.mxu2 }
 0x247   : > { %v1064_v13 = vadd.f32 %v1032_v16, %v998_v36  ;;  %v1375_v11 = vadd.f32 %v1343_v10, %v1247_v51  ;;  %6931 = vmatmul.msk.f32.gmra.mxu2 %vm225_vm1, %v8155_v38  ;;  %v3657_v38 = vld [vmem:[%s10208_s3] sm:$0xff] }
 0x248   : > { %6965 = vmatmul.msk.f32.gmra.mxu3 %vm225_vm1, %v7988_v50  ;;  %v1592_v23 = vpop.f32.mrf.mxu3  ;;  %3769 = vmatpush.msra.mxu1 %v3657_v38 }
 0x249   : > { %1096 = vst.msk [vmem:[#allocation4 + $0xf8] sm:$0xff] %vm299_vm3, %v1064_v13 }
 0x24a   : > { %1407 = vst.msk [vmem:[#allocation4] sm:$0xff] %vm299_vm3, %v1375_v11 }
 0x24b   : > { %v8421_v14 = vpop.f32.mrf.mxu0 }
 0x24e   : > { %7121 = vmatmul.msk.f32.gmra.mxu0 %vm225_vm1, %v7981_v48  ;;  %v1250_v39 = vpop.f32.mrf.mxu2 }
 0x24f   : > { %v1376_v30 = vadd.f32 %v1344_v56, %v1250_v39  ;;  %6932 = vmatmul.msk.f32.gmra.mxu2 %vm225_vm1, %v8173_v17 }
 0x250   : > { %6966 = vmatmul.msk.f32.gmra.mxu3 %vm225_vm1, %v8005_v62  ;;  %v1595_v36 = vpop.f32.mrf.mxu3 }
 0x251   : > { %v1685_v48 = vld [vmem:[#allocation4] sm:$0xff]  ;;  %1408 = vst.msk [vmem:[#allocation4 + $0x8] sm:$0xff] %vm299_vm3, %v1376_v30 }
 0x252   : > { %v1717_v9 = vadd.f32 %v1685_v48, %v1589_v49  ;;  %v1346_v49 = vld [vmem:[#allocation4 + $0x18] sm:$0xff]  ;;  %v1347_v48 = vld [vmem:[#allocation4 + $0x20] sm:$0xff] }
 0x253   : > { %v8431_v35 = vpop.f32.mrf.mxu0 }
 0x254   : > { %1749 = vst.msk [vmem:[#allocation4] sm:$0xff] %vm299_vm3, %v1717_v9 }
 0x256   : > { %7122 = vmatmul.msk.f32.gmra.mxu0 %vm225_vm1, %v7998_v58  ;;  %v1253_v27 = vpop.f32.mrf.mxu2  ;;  %v1345_v58 = vld [vmem:[#allocation4 + $0x10] sm:$0xff] }
 0x257   : > { %v1377_v40 = vadd.f32 %v1345_v58, %v1253_v27  ;;  %6933 = vmatmul.msk.f32.gmra.mxu2 %vm225_vm1, %v8187_v60 }
 0x258   : > { %v1686_v17 = vld [vmem:[#allocation4 + $0x8] sm:$0xff]  ;;  %6967 = vmatmul.msk.f32.gmra.mxu3 %vm225_vm1, %v8022_v7  ;;  %v1598_v13 = vpop.f32.mrf.mxu3 }
 0x259   : > { %v1718_v16 = vadd.f32 %v1686_v17, %v1592_v23  ;;  %1409 = vst.msk [vmem:[#allocation4 + $0x10] sm:$0xff] %vm299_vm3, %v1377_v40  ;;  %v8461_v23 = vpop.f32.mrf.mxu1 }
 0x25b   : > { %v8441_v50 = vpop.f32.mrf.mxu0  ;;  %v2027_v62 = vld [vmem:[#allocation4] sm:$0xff]  ;;  %1750 = vst.msk [vmem:[#allocation4 + $0x8] sm:$0xff] %vm299_vm3, %v1718_v16  ;;  %v1348_v16 = vld [vmem:[#allocation4 + $0x28] sm:$0xff] }
 0x25c   : > { %v2059_v51 = vadd.f32 %v2027_v62, %v8169_v1 }
 0x25e   : > { %7123 = vmatmul.msk.f32.gmra.mxu0 %vm225_vm1, %v8015_v6  ;;  %2091 = vst.msk [vmem:[#allocation4] sm:$0xff] %vm299_vm3, %v2059_v51  ;;  %v1256_v6 = vpop.f32.mrf.mxu2 }
 0x25f   : > { %v1378_v11 = vadd.f32 %v1346_v49, %v1256_v6  ;;  %6934 = vmatmul.msk.f32.gmra.mxu2 %vm225_vm1, %v8201_v0 }
 0x260   : > { %v1687_v39 = vld [vmem:[#allocation4 + $0x10] sm:$0xff]  ;;  %6968 = vmatmul.msk.f32.gmra.mxu3 %vm225_vm1, %v8039_v22  ;;  %v1601_v9 = vpop.f32.mrf.mxu3 }
 0x261   : > { %v1719_v56 = vadd.f32 %v1687_v39, %v1595_v36  ;;  %1410 = vst.msk [vmem:[#allocation4 + $0x18] sm:$0xff] %vm299_vm3, %v1378_v11  ;;  %v8485_v36 = vpop.f32.mrf.mxu1  ;;  %v1349_v11 = vld [vmem:[#allocation4 + $0x30] sm:$0xff] }
 0x262   : > { %v2028_v60 = vld [vmem:[#allocation4 + $0x8] sm:$0xff] }
 0x263   : > { %v8455_v10 = vpop.f32.mrf.mxu0  ;;  %v2060_v7 = vadd.f32 %v2028_v60, %v8185_v34  ;;  %1751 = vst.msk [vmem:[#allocation4 + $0x10] sm:$0xff] %vm299_vm3, %v1719_v56 }
 0x265   : > { %2092 = vst.msk [vmem:[#allocation4 + $0x8] sm:$0xff] %vm299_vm3, %v2060_v7 }
 0x266   : > { %7124 = vmatmul.msk.f32.gmra.mxu0 %vm225_vm1, %v8032_v20  ;;  %v2369_v20 = vld [vmem:[#allocation4] sm:$0xff]  ;;  %v1259_v30 = vpop.f32.mrf.mxu2 }
 0x267   : > { %v2401_v38 = vadd.f32 %v2369_v20, %v8268_v2  ;;  %v1379_v27 = vadd.f32 %v1347_v48, %v1259_v30  ;;  %6935 = vmatmul.msk.f32.gmra.mxu2 %vm225_vm1, %v8216_v41  ;;  %v1350_v48 = vld [vmem:[#allocation4 + $0x38] sm:$0xff] }
 0x268   : > { %v1688_v34 = vld [vmem:[#allocation4 + $0x18] sm:$0xff]  ;;  %6969 = vmatmul.msk.f32.gmra.mxu3 %vm225_vm1, %v8056_v43 }
 0x269   : > { %2433 = vst.msk [vmem:[#allocation4] sm:$0xff] %vm299_vm3, %v2401_v38  ;;  %v1720_v0 = vadd.f32 %v1688_v34, %v1598_v13  ;;  %v8503_v56 = vpop.f32.mrf.mxu1 }
 0x26a   : > { %1411 = vst.msk [vmem:[#allocation4 + $0x20] sm:$0xff] %vm299_vm3, %v1379_v27  ;;  %v2029_v22 = vld [vmem:[#allocation4 + $0x10] sm:$0xff] }
 0x26b   : > { %v8469_v1 = vpop.f32.mrf.mxu0  ;;  %v2061_v58 = vadd.f32 %v2029_v22, %v8199_v28  ;;  %1752 = vst.msk [vmem:[#allocation4 + $0x18] sm:$0xff] %vm299_vm3, %v1720_v0  ;;  %v1604_v28 = vpop.f32.mrf.mxu3 }
 0x26d   : > { %2093 = vst.msk [vmem:[#allocation4 + $0x10] sm:$0xff] %vm299_vm3, %v2061_v58  ;;  %v1351_v58 = vld [vmem:[#allocation4 + $0x40] sm:$0xff] }
 0x26e   : > { %7125 = vmatmul.msk.f32.gmra.mxu0 %vm225_vm1, %v8049_v42  ;;  %v2370_v42 = vld [vmem:[#allocation4 + $0x8] sm:$0xff]  ;;  %v1262_v17 = vpop.f32.mrf.mxu2 }
 0x26f   : > { %v2402_v40 = vadd.f32 %v2370_v42, %v8286_v3  ;;  %v1380_v62 = vadd.f32 %v1348_v16, %v1262_v17  ;;  %6936 = vmatmul.msk.f32.gmra.mxu2 %vm225_vm1, %v8227_v47 }
 0x270   : > { %6970 = vmatmul.msk.f32.gmra.mxu3 %vm225_vm1, %v8073_v55 }
 0x271   : > { %2434 = vst.msk [vmem:[#allocation4 + $0x8] sm:$0xff] %vm299_vm3, %v2402_v40  ;;  %v1689_v41 = vld [vmem:[#allocation4 + $0x20] sm:$0xff] }
 0x272   : > { %v1721_v43 = vadd.f32 %v1689_v41, %v1601_v9  ;;  %1412 = vst.msk [vmem:[#allocation4 + $0x28] sm:$0xff] %vm299_vm3, %v1380_v62  ;;  %v2030_v51 = vld [vmem:[#allocation4 + $0x18] sm:$0xff]  ;;  %v1352_v41 = vld [vmem:[#allocation4 + $0x48] sm:$0xff] }
 0x273   : > { %v8483_v2 = vpop.f32.mrf.mxu0  ;;  %v2062_v6 = vadd.f32 %v2030_v51, %v8214_v19  ;;  %v1607_v39 = vpop.f32.mrf.mxu3  ;;  %v3162_v51 = vld [vmem:[#allocation2 + $0x109] sm:$0xff] }
 0x274   : > { %1753 = vst.msk [vmem:[#allocation4 + $0x20] sm:$0xff] %vm299_vm3, %v1721_v43 }
 0x275   : > { %2094 = vst.msk [vmem:[#allocation4 + $0x18] sm:$0xff] %vm299_vm3, %v2062_v6 }
 0x276   : > { %7126 = vmatmul.msk.f32.gmra.mxu0 %vm225_vm1, %v8066_v54  ;;  %v2371_v54 = vld [vmem:[#allocation4 + $0x10] sm:$0xff]  ;;  %v1265_v13 = vpop.f32.mrf.mxu2 }
 0x277   : > { %v2403_v49 = vadd.f32 %v2371_v54, %v8307_v32  ;;  %v1381_v19 = vadd.f32 %v1349_v11, %v1265_v13  ;;  %6937 = vmatmul.msk.f32.gmra.mxu2 %vm225_vm1, %v8240_v63  ;;  %v8522_v63 = vpop.f32.mrf.mxu1 }
 0x278   : > { %6971 = vmatmul.msk.f32.gmra.mxu3 %vm225_vm1, %v8090_v31 }
 0x279   : > { %2435 = vst.msk [vmem:[#allocation4 + $0x10] sm:$0xff] %vm299_vm3, %v2403_v49  ;;  %v1690_v47 = vld [vmem:[#allocation4 + $0x28] sm:$0xff] }
 0x27a   : > { %v1722_v55 = vadd.f32 %v1690_v47, %v1604_v28  ;;  %1413 = vst.msk [vmem:[#allocation4 + $0x30] sm:$0xff] %vm299_vm3, %v1381_v19  ;;  %v1353_v19 = vld [vmem:[#allocation4 + $0x50] sm:$0xff] }
 0x27b   : > { %v8499_v3 = vpop.f32.mrf.mxu0  ;;  %v2031_v60 = vld [vmem:[#allocation4 + $0x20] sm:$0xff]  ;;  %v1610_v9 = vpop.f32.mrf.mxu3  ;;  %v3163_v47 = vld [vmem:[#allocation2 + $0x111] sm:$0xff] }
 0x27c   : > { %v2063_v7 = vadd.f32 %v2031_v60, %v8225_v37  ;;  %1754 = vst.msk [vmem:[#allocation4 + $0x28] sm:$0xff] %vm299_vm3, %v1722_v55 }
 0x27e   : > { %7127 = vmatmul.msk.f32.gmra.mxu0 %vm225_vm1, %v8083_v5  ;;  %v2372_v5 = vld [vmem:[#allocation4 + $0x18] sm:$0xff]  ;;  %2095 = vst.msk [vmem:[#allocation4 + $0x20] sm:$0xff] %vm299_vm3, %v2063_v7  ;;  %v1268_v30 = vpop.f32.mrf.mxu2  ;;  %v1466_v7 = vld [vmem:[#allocation2 + $0x1cf] sm:$0xff] }
 0x27f   : > { %v2404_v20 = vadd.f32 %v2372_v5, %v8324_v4  ;;  %v1382_v38 = vadd.f32 %v1350_v48, %v1268_v30  ;;  %6938 = vmatmul.msk.f32.gmra.mxu2 %vm225_vm1, %v8254_v8  ;;  %v8539_v17 = vpop.f32.mrf.mxu1 }
 0x280   : > { %6972 = vmatmul.msk.f32.gmra.mxu3 %vm225_vm1, %v8107_v29 }
 0x281   : > { %2436 = vst.msk [vmem:[#allocation4 + $0x18] sm:$0xff] %vm299_vm3, %v2404_v20  ;;  %v1691_v37 = vld [vmem:[#allocation4 + $0x30] sm:$0xff] }
 0x282   : > { %v1723_v31 = vadd.f32 %v1691_v37, %v1607_v39  ;;  %1414 = vst.msk [vmem:[#allocation4 + $0x38] sm:$0xff] %vm299_vm3, %v1382_v38  ;;  %v1354_v38 = vld [vmem:[#allocation4 + $0x58] sm:$0xff] }
 0x283   : > { %v8515_v32 = vpop.f32.mrf.mxu0  ;;  %v2032_v27 = vld [vmem:[#allocation4 + $0x28] sm:$0xff]  ;;  %v1613_v42 = vpop.f32.mrf.mxu3 }
 0x284   : > { %v2064_v34 = vadd.f32 %v2032_v27, %v8238_v15  ;;  %1755 = vst.msk [vmem:[#allocation4 + $0x30] sm:$0xff] %vm299_vm3, %v1723_v31  ;;  %v3164_v31 = vld [vmem:[#allocation2 + $0x129] sm:$0xff] }
 0x285   : > { %v2373_v4 = vld [vmem:[#allocation4 + $0x20] sm:$0xff]  ;;  %v8578_v27 = vld [vmem:[#allocation2 + $0x209] sm:$0xff] }
 0x286   : > { %7128 = vmatmul.msk.f32.gmra.mxu0 %vm225_vm1, %v8100_v26  ;;  %2096 = vst.msk [vmem:[#allocation4 + $0x28] sm:$0xff] %vm299_vm3, %v2064_v34  ;;  %v2405_v0 = vadd.f32 %v2373_v4, %v8346_v57  ;;  %v1271_v22 = vpop.f32.mrf.mxu2  ;;  %7046 = vmatmul.msk.f32.gmra.mxu1 %vm225_vm1, %v8578_v27 }
 0x287   : > { %v1383_v40 = vadd.f32 %v1351_v58, %v1271_v22  ;;  %6939 = vmatmul.msk.f32.gmra.mxu2 %vm225_vm1, %v8270_v61  ;;  %v8562_v13 = vpop.f32.mrf.mxu1  ;;  %v1467_v22 = vld [vmem:[#allocation2 + $0x1e7] sm:$0xff] }
 0x288   : > { %2437 = vst.msk [vmem:[#allocation4 + $0x20] sm:$0xff] %vm299_vm3, %v2405_v0  ;;  %6973 = vmatmul.msk.f32.gmra.mxu3 %vm225_vm1, %v8124_v53  ;;  %v10230_v58 = vld [vmem:[#allocation6_spill] sm:$0xff] }
 0x289   : > { %v1692_v15 = vld [vmem:[#allocation4 + $0x38] sm:$0xff]  ;;  %1415 = vst.msk [vmem:[#allocation4 + $0x40] sm:$0xff] %vm299_vm3, %v1383_v40 }
 0x28a   : > { %v1724_v8 = vadd.f32 %v1692_v15, %v1610_v9  ;;  %v10231_v40 = vld [vmem:[#allocation9_spill] sm:$0xff] }
 0x28b   : > { %v8531_v26 = vpop.f32.mrf.mxu0  ;;  %v2033_v29 = vld [vmem:[#allocation4 + $0x30] sm:$0xff]  ;;  %v1616_v43 = vpop.f32.mrf.mxu3 }
 0x28c   : > { %v2065_v16 = vadd.f32 %v2033_v29, %v8252_v18  ;;  %1756 = vst.msk [vmem:[#allocation4 + $0x38] sm:$0xff] %vm299_vm3, %v1724_v8 }
 0x28d   : > { %v2374_v57 = vld [vmem:[#allocation4 + $0x28] sm:$0xff] }
 0x28e   : > { %7129 = vmatmul.msk.f32.gmra.mxu0 %vm225_vm1, %v8117_v52  ;;  %2097 = vst.msk [vmem:[#allocation4 + $0x30] sm:$0xff] %vm299_vm3, %v2065_v16  ;;  %v2406_v28 = vadd.f32 %v2374_v57, %v8364_v33  ;;  %v1274_v62 = vpop.f32.mrf.mxu2  ;;  %v1355_v16 = vld [vmem:[#allocation4 + $0x60] sm:$0xff] }
 0x28f   : > { %v1384_v18 = vadd.f32 %v1352_v41, %v1274_v62  ;;  %6940 = vmatmul.msk.f32.gmra.mxu2 %vm225_vm1, %v8284_v25  ;;  %v8594_v62 = vld [vmem:[#allocation2 + $0x211] sm:$0xff] }
 0x290   : > { %2438 = vst.msk [vmem:[#allocation4 + $0x28] sm:$0xff] %vm299_vm3, %v2406_v28  ;;  %v1693_v61 = vld [vmem:[#allocation4 + $0x40] sm:$0xff]  ;;  %6974 = vmatmul.msk.f32.gmra.mxu3 %vm225_vm1, %v8141_v46  ;;  %v3165_v28 = vld [vmem:[#allocation2 + $0x131] sm:$0xff]  ;;  %7047 = vmatmul.msk.f32.gmra.mxu1 %vm225_vm1, %v8594_v62 }
 0x291   : > { %v1725_v6 = vadd.f32 %v1693_v61, %v1613_v42  ;;  %1416 = vst.msk [vmem:[#allocation4 + $0x48] sm:$0xff] %vm299_vm3, %v1384_v18 }
 0x293   : > { %v8547_v52 = vpop.f32.mrf.mxu0  ;;  %v2034_v53 = vld [vmem:[#allocation4 + $0x38] sm:$0xff]  ;;  %1757 = vst.msk [vmem:[#allocation4 + $0x40] sm:$0xff] %vm299_vm3, %v1725_v6  ;;  %v1468_v6 = vld [vmem:[#allocation2 + $0x1ef] sm:$0xff] }
 0x294   : > { %v2066_v54 = vadd.f32 %v2034_v53, %v8266_v21  ;;  %v1619_v21 = vpop.f32.mrf.mxu3  ;;  %v10232_v53 = vld [vmem:[#allocation8_spill] sm:$0xff] }
 0x295   : > { %v2375_v49 = vld [vmem:[#allocation4 + $0x30] sm:$0xff] }
 0x296   : > { %7130 = vmatmul.msk.f32.gmra.mxu0 %vm225_vm1, %v3162_v51  ;;  %2098 = vst.msk [vmem:[#allocation4 + $0x38] sm:$0xff] %vm299_vm3, %v2066_v54  ;;  %v2407_v11 = vadd.f32 %v2375_v49, %v8461_v23  ;;  %v1277_v39 = vpop.f32.mrf.mxu2  ;;  %v10229_v23 = vld [vmem:[#allocation7_spill] sm:$0xff] }
 0x297   : > { %v1385_v55 = vadd.f32 %v1353_v19, %v1277_v39  ;;  %6941 = vmatmul.msk.f32.gmra.mxu2 %vm225_vm1, %v10229_v23  ;;  %v10233_v49 = vld [vmem:[#allocation11_spill] sm:$0xff] }
 0x298   : > { %2439 = vst.msk [vmem:[#allocation4 + $0x30] sm:$0xff] %vm299_vm3, %v2407_v11  ;;  %v1694_v25 = vld [vmem:[#allocation4 + $0x48] sm:$0xff]  ;;  %6975 = vmatmul.msk.f32.gmra.mxu3 %vm225_vm1, %v1466_v7 }
 0x299   : > { %v1726_v46 = vadd.f32 %v1694_v25, %v1616_v43  ;;  %1417 = vst.msk [vmem:[#allocation4 + $0x50] sm:$0xff] %vm299_vm3, %v1385_v55  ;;  %v3166_v55 = vld [vmem:[#allocation2 + $0x149] sm:$0xff] }
 0x29a   : > { %v2035_v60 = vld [vmem:[#allocation4 + $0x40] sm:$0xff] }
 0x29b   : > { %v8560_v33 = vpop.f32.mrf.mxu0  ;;  %v2067_v5 = vadd.f32 %v2035_v60, %v8282_v24  ;;  %1758 = vst.msk [vmem:[#allocation4 + $0x48] sm:$0xff] %vm299_vm3, %v1726_v46  ;;  %v8580_v24 = vpop.f32.mrf.mxu1  ;;  %v1469_v60 = vld [vmem:[#allocation2 + $0x207] sm:$0xff] }
 0x29c   : > { %v1622_v37 = vpop.f32.mrf.mxu3 }
 0x29d   : > { %v2376_v20 = vld [vmem:[#allocation4 + $0x38] sm:$0xff]  ;;  %2099 = vst.msk [vmem:[#allocation4 + $0x40] sm:$0xff] %vm299_vm3, %v2067_v5 }
 0x29e   : > { %7131 = vmatmul.msk.f32.gmra.mxu0 %vm225_vm1, %v3163_v47  ;;  %v2408_v48 = vadd.f32 %v2376_v20, %v8485_v36  ;;  %v1280_v9 = vpop.f32.mrf.mxu2 }
 0x29f   : > { %v1386_v34 = vadd.f32 %v1354_v38, %v1280_v9  ;;  %6942 = vmatmul.msk.f32.gmra.mxu2 %vm225_vm1, %v10231_v40  ;;  %v10235_v9 = vld [vmem:[#allocation13_spill] sm:$0xff] }
 0x2a0   : > { %2440 = vst.msk [vmem:[#allocation4 + $0x38] sm:$0xff] %vm299_vm3, %v2408_v48  ;;  %v1695_v4 = vld [vmem:[#allocation4 + $0x50] sm:$0xff]  ;;  %6976 = vmatmul.msk.f32.gmra.mxu3 %vm225_vm1, %v1467_v22 }
 0x2a1   : > { %v1727_v0 = vadd.f32 %v1695_v4, %v1619_v21  ;;  %1418 = vst.msk [vmem:[#allocation4 + $0x58] sm:$0xff] %vm299_vm3, %v1386_v34  ;;  %v1356_v21 = vld [vmem:[#allocation4 + $0x68] sm:$0xff]  ;;  %v1357_v34 = vld [vmem:[#allocation4 + $0x70] sm:$0xff] }
 0x2a2   : > { %v2036_v36 = vld [vmem:[#allocation4 + $0x48] sm:$0xff] }
 0x2a3   : > { %v8575_v30 = vpop.f32.mrf.mxu0  ;;  %v2068_v42 = vadd.f32 %v2036_v36, %v10230_v58  ;;  %1759 = vst.msk [vmem:[#allocation4 + $0x50] sm:$0xff] %vm299_vm3, %v1727_v0  ;;  %v8602_v18 = vpop.f32.mrf.mxu1  ;;  %v3167_v0 = vld [vmem:[#allocation2 + $0x151] sm:$0xff] }
 0x2a4   : > { %v2377_v15 = vld [vmem:[#allocation4 + $0x40] sm:$0xff]  ;;  %v1625_v57 = vpop.f32.mrf.mxu3  ;;  %v1470_v58 = vld [vmem:[#allocation2 + $0x20f] sm:$0xff] }
 0x2a5   : > { %2100 = vst.msk [vmem:[#allocation4 + $0x48] sm:$0xff] %vm299_vm3, %v2068_v42  ;;  %v2409_v8 = vadd.f32 %v2377_v15, %v8503_v56  ;;  %v10236_v15 = vld [vmem:[#allocation12_spill] sm:$0xff] }
 0x2a6   : > { %7132 = vmatmul.msk.f32.gmra.mxu0 %vm225_vm1, %v3164_v31  ;;  %v1283_v29 = vpop.f32.mrf.mxu2 }
 0x2a7   : > { %v1387_v41 = vadd.f32 %v1355_v16, %v1283_v29  ;;  %2441 = vst.msk [vmem:[#allocation4 + $0x40] sm:$0xff] %vm299_vm3, %v2409_v8  ;;  %6943 = vmatmul.msk.f32.gmra.mxu2 %vm225_vm1, %v10233_v49 }
 0x2a8   : > { %v1696_v51 = vld [vmem:[#allocation4 + $0x58] sm:$0xff]  ;;  %6977 = vmatmul.msk.f32.gmra.mxu3 %vm225_vm1, %v1468_v6 }
 0x2a9   : > { %v1728_v56 = vadd.f32 %v1696_v51, %v1622_v37  ;;  %1419 = vst.msk [vmem:[#allocation4 + $0x60] sm:$0xff] %vm299_vm3, %v1387_v41  ;;  %v1358_v51 = vld [vmem:[#allocation4 + $0x78] sm:$0xff] }
 0x2aa   : > { %v2037_v61 = vld [vmem:[#allocation4 + $0x50] sm:$0xff] }
 0x2ab   : > { %v8596_v43 = vpop.f32.mrf.mxu0  ;;  %v2069_v54 = vadd.f32 %v2037_v61, %v10232_v53  ;;  %1760 = vst.msk [vmem:[#allocation4 + $0x58] sm:$0xff] %vm299_vm3, %v1728_v56  ;;  %v8617_v20 = vpop.f32.mrf.mxu1  ;;  %v3168_v61 = vld [vmem:[#allocation2 + $0x169] sm:$0xff] }
 0x2ac   : > { %v2378_v11 = vld [vmem:[#allocation4 + $0x48] sm:$0xff]  ;;  %v1628_v47 = vpop.f32.mrf.mxu3 }
 0x2ad   : > { %2101 = vst.msk [vmem:[#allocation4 + $0x50] sm:$0xff] %vm299_vm3, %v2069_v54  ;;  %v2410_v39 = vadd.f32 %v2378_v11, %v8522_v63  ;;  %v10234_v63 = vld [vmem:[#allocation10_spill] sm:$0xff] }
 0x2ae   : > { %7133 = vmatmul.msk.f32.gmra.mxu0 %vm225_vm1, %v3165_v28  ;;  %v1286_v19 = vpop.f32.mrf.mxu2  ;;  %v2466_v11 = vld [vmem:[#allocation2 + $0x47] sm:$0xff] }
 0x2af   : > { %v1388_v25 = vadd.f32 %v1356_v21, %v1286_v19  ;;  %2442 = vst.msk [vmem:[#allocation4 + $0x48] sm:$0xff] %vm299_vm3, %v2410_v39  ;;  %6944 = vmatmul.msk.f32.gmra.mxu2 %vm225_vm1, %v10235_v9  ;;  %v2808_v39 = vld [vmem:[#allocation2 + $0x48] sm:$0xff]  ;;  %v10238_v19 = vld [vmem:[#allocation14_spill] sm:$0xff] }
 0x2b0   : > { %v1697_v46 = vld [vmem:[#allocation4 + $0x60] sm:$0xff]  ;;  %6978 = vmatmul.msk.f32.gmra.mxu3 %vm225_vm1, %v1469_v60 }
 0x2b1   : > { %v1729_v7 = vadd.f32 %v1697_v46, %v1625_v57  ;;  %1420 = vst.msk [vmem:[#allocation4 + $0x68] sm:$0xff] %vm299_vm3, %v1388_v25  ;;  %v1359_v46 = vld [vmem:[#allocation4 + $0x80] sm:$0xff] }
 0x2b2   : > { %v2038_v23 = vld [vmem:[#allocation4 + $0x58] sm:$0xff] }
 0x2b3   : > { %v8615_v5 = vpop.f32.mrf.mxu0  ;;  %v2070_v48 = vadd.f32 %v2038_v23, %v10234_v63  ;;  %1761 = vst.msk [vmem:[#allocation4 + $0x60] sm:$0xff] %vm299_vm3, %v1729_v7  ;;  %v8636_v57 = vpop.f32.mrf.mxu1  ;;  %v3169_v7 = vld [vmem:[#allocation2 + $0x171] sm:$0xff] }
 0x2b4   : > { %v2379_v38 = vld [vmem:[#allocation4 + $0x50] sm:$0xff]  ;;  %v1631_v4 = vpop.f32.mrf.mxu3 }
 0x2b5   : > { %2102 = vst.msk [vmem:[#allocation4 + $0x58] sm:$0xff] %vm299_vm3, %v2070_v48  ;;  %v2411_v37 = vadd.f32 %v2379_v38, %v8539_v17  ;;  %v10237_v17 = vld [vmem:[#allocation15_spill] sm:$0xff] }
 0x2b6   : > { %7134 = vmatmul.msk.f32.gmra.mxu0 %vm225_vm1, %v3166_v55  ;;  %v1289_v31 = vpop.f32.mrf.mxu2 }
 0x2b7   : > { %v1389_v36 = vadd.f32 %v1357_v34, %v1289_v31  ;;  %2443 = vst.msk [vmem:[#allocation4 + $0x50] sm:$0xff] %vm299_vm3, %v2411_v37  ;;  %6945 = vmatmul.msk.f32.gmra.mxu2 %vm225_vm1, %v10237_v17  ;;  %v2467_v37 = vld [vmem:[#allocation2 + $0x4f] sm:$0xff] }
 0x2b8   : > { %v1698_v22 = vld [vmem:[#allocation4 + $0x68] sm:$0xff]  ;;  %6979 = vmatmul.msk.f32.gmra.mxu3 %vm225_vm1, %v1470_v58  ;;  %v2809_v31 = vld [vmem:[#allocation2 + $0x50] sm:$0xff] }
 0x2b9   : > { %v1730_v42 = vadd.f32 %v1698_v22, %v1628_v47  ;;  %1421 = vst.msk [vmem:[#allocation4 + $0x70] sm:$0xff] %vm299_vm3, %v1389_v36  ;;  %v10239_v34 = vld [vmem:[#allocation16_spill] sm:$0xff]  ;;  %v1360_v22 = vld [vmem:[#allocation4 + $0x88] sm:$0xff] }
 0x2ba   : > { %v2039_v40 = vld [vmem:[#allocation4 + $0x60] sm:$0xff] }
 0x2bb   : > { %v2071_v8 = vadd.f32 %v2039_v40, %v10236_v15  ;;  %1762 = vst.msk [vmem:[#allocation4 + $0x68] sm:$0xff] %vm299_vm3, %v1730_v42  ;;  %v8634_v29 = vpop.f32.mrf.mxu0  ;;  %v8651_v23 = vpop.f32.mrf.mxu1  ;;  %v3170_v42 = vld [vmem:[#allocation2 + $0x189] sm:$0xff] }
 0x2bc   : > { %v2380_v16 = vld [vmem:[#allocation4 + $0x58] sm:$0xff]  ;;  %v1634_v56 = vpop.f32.mrf.mxu3 }
 0x2bd   : > { %2103 = vst.msk [vmem:[#allocation4 + $0x60] sm:$0xff] %vm299_vm3, %v2071_v8  ;;  %v2412_v28 = vadd.f32 %v2380_v16, %v8562_v13 }
 0x2be   : > { %7135 = vmatmul.msk.f32.gmra.mxu0 %vm225_vm1, %v3167_v0  ;;  %v1292_v41 = vpop.f32.mrf.mxu2 }
 0x2bf   : > { %v1390_v6 = vadd.f32 %v1358_v51, %v1292_v41  ;;  %2444 = vst.msk [vmem:[#allocation4 + $0x58] sm:$0xff] %vm299_vm3, %v2412_v28  ;;  %7050 = vmatmul.msk.f32.vlgmr.msra.gmra.mxu2 %vm225_vm1, %v2466_v11  ;;  %v2468_v41 = vld [vmem:[#allocation2 + $0x67] sm:$0xff] }
 0x2c0   : > { %v1699_v53 = vld [vmem:[#allocation4 + $0x70] sm:$0xff]  ;;  %7084 = vmatmul.msk.f32.vlgmr.msra.gmra.mxu3 %vm225_vm1, %v2808_v39 }
 0x2c1   : > { %v1731_v54 = vadd.f32 %v1699_v53, %v1631_v4  ;;  %1422 = vst.msk [vmem:[#allocation4 + $0x78] sm:$0xff] %vm299_vm3, %v1390_v6  ;;  %v1361_v53 = vld [vmem:[#allocation4 + $0x90] sm:$0xff] }
 0x2c2   : > { %v2040_v49 = vld [vmem:[#allocation4 + $0x68] sm:$0xff] }
 0x2c3   : > { %v2072_v21 = vadd.f32 %v2040_v49, %v10238_v19  ;;  %1763 = vst.msk [vmem:[#allocation4 + $0x70] sm:$0xff] %vm299_vm3, %v1731_v54  ;;  %v8648_v47 = vpop.f32.mrf.mxu0  ;;  %v8666_v17 = vpop.f32.mrf.mxu1  ;;  %v3171_v49 = vld [vmem:[#allocation2 + $0x191] sm:$0xff] }
 0x2c4   : > { %v2381_v13 = vld [vmem:[#allocation4 + $0x60] sm:$0xff]  ;;  %v1637_v60 = vpop.f32.mrf.mxu3 }
 0x2c5   : > { %2104 = vst.msk [vmem:[#allocation4 + $0x68] sm:$0xff] %vm299_vm3, %v2072_v21  ;;  %v2413_v55 = vadd.f32 %v2381_v13, %v8580_v24  ;;  %v2469_v13 = vld [vmem:[#allocation2 + $0x6f] sm:$0xff] }
 0x2c6   : > { %7136 = vmatmul.msk.f32.gmra.mxu0 %vm225_vm1, %v3168_v61  ;;  %v1295_v25 = vpop.f32.mrf.mxu2 }
 0x2c7   : > { %v1391_v63 = vadd.f32 %v1359_v46, %v1295_v25  ;;  %2445 = vst.msk [vmem:[#allocation4 + $0x60] sm:$0xff] %vm299_vm3, %v2413_v55  ;;  %7051 = vmatmul.msk.f32.gmra.mxu2 %vm225_vm1, %v2467_v37  ;;  %v2811_v55 = vld [vmem:[#allocation2 + $0x70] sm:$0xff] }
 0x2c8   : > { %v1700_v48 = vld [vmem:[#allocation4 + $0x78] sm:$0xff]  ;;  %7085 = vmatmul.msk.f32.gmra.mxu3 %vm225_vm1, %v2809_v31 }
 0x2c9   : > { %v1732_v9 = vadd.f32 %v1700_v48, %v1634_v56  ;;  %1423 = vst.msk [vmem:[#allocation4 + $0x80] sm:$0xff] %vm299_vm3, %v1391_v63  ;;  %v1362_v63 = vld [vmem:[#allocation4 + $0x98] sm:$0xff] }
 0x2ca   : > { %v2041_v38 = vld [vmem:[#allocation4 + $0x70] sm:$0xff] }
 0x2cb   : > { %v2073_v24 = vadd.f32 %v2041_v38, %v10239_v34  ;;  %1764 = vst.msk [vmem:[#allocation4 + $0x78] sm:$0xff] %vm299_vm3, %v1732_v9  ;;  %v8662_v15 = vpop.f32.mrf.mxu0  ;;  %v8680_v25 = vpop.f32.mrf.mxu1  ;;  %v3172_v9 = vld [vmem:[#allocation2 + $0x1a9] sm:$0xff] }
 0x2cc   : > { %v2382_v4 = vld [vmem:[#allocation4 + $0x68] sm:$0xff]  ;;  %v1640_v58 = vpop.f32.mrf.mxu3 }
 0x2cd   : > { %2105 = vst.msk [vmem:[#allocation4 + $0x70] sm:$0xff] %vm299_vm3, %v2073_v24  ;;  %v2414_v0 = vadd.f32 %v2382_v4, %v8602_v18  ;;  %v2810_v18 = vld [vmem:[#allocation2 + $0x68] sm:$0xff] }
 0x2ce   : > { %7137 = vmatmul.msk.f32.gmra.mxu0 %vm225_vm1, %v3169_v7  ;;  %v1298_v36 = vpop.f32.mrf.mxu2  ;;  %v2470_v34 = vld [vmem:[#allocation2 + $0x87] sm:$0xff] }
 0x2cf   : > { %v1392_v40 = vadd.f32 %v1360_v22, %v1298_v36  ;;  %2446 = vst.msk [vmem:[#allocation4 + $0x68] sm:$0xff] %vm299_vm3, %v2414_v0  ;;  %7052 = vmatmul.msk.f32.gmra.mxu2 %vm225_vm1, %v2468_v41  ;;  %v2812_v24 = vld [vmem:[#allocation2 + $0x88] sm:$0xff] }
 0x2d0   : > { %v1701_v8 = vld [vmem:[#allocation4 + $0x80] sm:$0xff]  ;;  %7086 = vmatmul.msk.f32.gmra.mxu3 %vm225_vm1, %v2810_v18  ;;  %v2471_v18 = vld [vmem:[#allocation2 + $0x8f] sm:$0xff] }
 0x2d1   : > { %v1733_v16 = vadd.f32 %v1701_v8, %v1637_v60  ;;  %1424 = vst.msk [vmem:[#allocation4 + $0x88] sm:$0xff] %vm299_vm3, %v1392_v40  ;;  %v3173_v8 = vld [vmem:[#allocation2 + $0x1b1] sm:$0xff] }
 0x2d2   : > { %v2042_v28 = vld [vmem:[#allocation4 + $0x78] sm:$0xff] }
 0x2d3   : > { %v2074_v51 = vadd.f32 %v2042_v28, %v8383_v45  ;;  %1765 = vst.msk [vmem:[#allocation4 + $0x80] sm:$0xff] %vm299_vm3, %v1733_v16  ;;  %v8678_v19 = vpop.f32.mrf.mxu0  ;;  %v8697_v36 = vpop.f32.mrf.mxu1 }
 0x2d4   : > { %v2383_v56 = vld [vmem:[#allocation4 + $0x70] sm:$0xff]  ;;  %v1643_v54 = vpop.f32.mrf.mxu3 }
 0x2d5   : > { %2106 = vst.msk [vmem:[#allocation4 + $0x78] sm:$0xff] %vm299_vm3, %v2074_v51  ;;  %v2415_v61 = vadd.f32 %v2383_v56, %v8617_v20  ;;  %v2813_v51 = vld [vmem:[#allocation2 + $0x90] sm:$0xff] }
 0x2d6   : > { %7138 = vmatmul.msk.f32.gmra.mxu0 %vm225_vm1, %v3170_v42  ;;  %v1301_v6 = vpop.f32.mrf.mxu2  ;;  %v1363_v42 = vld [vmem:[#allocation4 + $0xa0] sm:$0xff] }
 0x2d7   : > { %v1393_v11 = vadd.f32 %v1361_v53, %v1301_v6  ;;  %2447 = vst.msk [vmem:[#allocation4 + $0x70] sm:$0xff] %vm299_vm3, %v2415_v61  ;;  %7053 = vmatmul.msk.f32.gmra.mxu2 %vm225_vm1, %v2469_v13 }
 0x2d8   : > { %v1702_v45 = vld [vmem:[#allocation4 + $0x88] sm:$0xff]  ;;  %7087 = vmatmul.msk.f32.gmra.mxu3 %vm225_vm1, %v2811_v55 }
 0x2d9   : > { %v1734_v39 = vadd.f32 %v1702_v45, %v1640_v58  ;;  %1425 = vst.msk [vmem:[#allocation4 + $0x90] sm:$0xff] %vm299_vm3, %v1393_v11  ;;  %v3174_v11 = vld [vmem:[#allocation2 + $0x1c9] sm:$0xff] }
 0x2da   : > { %v2043_v21 = vld [vmem:[#allocation4 + $0x80] sm:$0xff] }
 0x2db   : > { %v2075_v20 = vadd.f32 %v2043_v21, %v8391_v44  ;;  %1766 = vst.msk [vmem:[#allocation4 + $0x88] sm:$0xff] %vm299_vm3, %v1734_v39  ;;  %v2333_v45 = vpop.f32.mrf.mxu1  ;;  %v2472_v55 = vld [vmem:[#allocation2 + $0xa7] sm:$0xff] }
 0x2dc   : > { %v2384_v46 = vld [vmem:[#allocation4 + $0x78] sm:$0xff]  ;;  %v1646_v48 = vpop.f32.mrf.mxu3 }
 0x2dd   : > { %2107 = vst.msk [vmem:[#allocation4 + $0x80] sm:$0xff] %vm299_vm3, %v2075_v20  ;;  %v2416_v60 = vadd.f32 %v2384_v46, %v8636_v57  ;;  %v8695_v57 = vpop.f32.mrf.mxu0  ;;  %v2814_v20 = vld [vmem:[#allocation2 + $0xa8] sm:$0xff] }
 0x2de   : > { %7139 = vmatmul.msk.f32.gmra.mxu0 %vm225_vm1, %v3171_v49  ;;  %v1304_v7 = vpop.f32.mrf.mxu2 }
 0x2df   : > { %v1394_v38 = vadd.f32 %v1362_v63, %v1304_v7  ;;  %2448 = vst.msk [vmem:[#allocation4 + $0x78] sm:$0xff] %vm299_vm3, %v2416_v60  ;;  %7054 = vmatmul.msk.f32.gmra.mxu2 %vm225_vm1, %v2470_v34  ;;  %v1365_v63 = vld [vmem:[#allocation4 + $0xb0] sm:$0xff] }
 0x2e0   : > { %v1703_v44 = vld [vmem:[#allocation4 + $0x90] sm:$0xff]  ;;  %7088 = vmatmul.msk.f32.gmra.mxu3 %vm225_vm1, %v2812_v24 }
 0x2e1   : > { %v1735_v37 = vadd.f32 %v1703_v44, %v1643_v54  ;;  %1426 = vst.msk [vmem:[#allocation4 + $0x98] sm:$0xff] %vm299_vm3, %v1394_v38  ;;  %v1364_v54 = vld [vmem:[#allocation4 + $0xa8] sm:$0xff] }
 0x2e2   : > { %v2044_v31 = vld [vmem:[#allocation4 + $0x88] sm:$0xff] }
 0x2e3   : > { %v2076_v4 = vadd.f32 %v2044_v31, %v8401_v12  ;;  %1767 = vst.msk [vmem:[#allocation4 + $0x90] sm:$0xff] %vm299_vm3, %v1735_v37  ;;  %v2336_v37 = vpop.f32.mrf.mxu1  ;;  %v2473_v24 = vld [vmem:[#allocation2 + $0xaf] sm:$0xff] }
 0x2e4   : > { %v2385_v0 = vld [vmem:[#allocation4 + $0x80] sm:$0xff]  ;;  %v1649_v40 = vpop.f32.mrf.mxu3 }
 0x2e5   : > { %2108 = vst.msk [vmem:[#allocation4 + $0x88] sm:$0xff] %vm299_vm3, %v2076_v4  ;;  %v2417_v22 = vadd.f32 %v2385_v0, %v8651_v23  ;;  %v8709_v61 = vpop.f32.mrf.mxu0  ;;  %v2815_v4 = vld [vmem:[#allocation2 + $0xb0] sm:$0xff] }
 0x2e6   : > { %7140 = vmatmul.msk.f32.gmra.mxu0 %vm225_vm1, %v3172_v9  ;;  %v1307_v58 = vpop.f32.mrf.mxu2  ;;  %v3175_v9 = vld [vmem:[#allocation2 + $0x1d1] sm:$0xff] }
 0x2e7   : > { %v1395_v12 = vadd.f32 %v1363_v42, %v1307_v58  ;;  %2449 = vst.msk [vmem:[#allocation4 + $0x80] sm:$0xff] %vm299_vm3, %v2417_v22  ;;  %7055 = vmatmul.msk.f32.gmra.mxu2 %vm225_vm1, %v2471_v18  ;;  %v1366_v42 = vld [vmem:[#allocation4 + $0xb8] sm:$0xff]  ;;  %v2474_v18 = vld [vmem:[#allocation2 + $0xc7] sm:$0xff] }
 0x2e8   : > { %v1704_v16 = vld [vmem:[#allocation4 + $0x98] sm:$0xff]  ;;  %7089 = vmatmul.msk.f32.gmra.mxu3 %vm225_vm1, %v2813_v51  ;;  %v2816_v51 = vld [vmem:[#allocation2 + $0xc8] sm:$0xff] }
 0x2e9   : > { %v1736_v28 = vadd.f32 %v1704_v16, %v1646_v48  ;;  %1427 = vst.msk [vmem:[#allocation4 + $0xa0] sm:$0xff] %vm299_vm3, %v1395_v12 }
 0x2ea   : > { %v2045_v41 = vld [vmem:[#allocation4 + $0x90] sm:$0xff] }
 0x2eb   : > { %v2077_v56 = vadd.f32 %v2045_v41, %v8411_v59  ;;  %1768 = vst.msk [vmem:[#allocation4 + $0x98] sm:$0xff] %vm299_vm3, %v1736_v28 }
 0x2ec   : > { %v2386_v23 = vld [vmem:[#allocation4 + $0x88] sm:$0xff]  ;;  %v1652_v49 = vpop.f32.mrf.mxu3 }
 0x2ed   : > { %2109 = vst.msk [vmem:[#allocation4 + $0x90] sm:$0xff] %vm299_vm3, %v2077_v56  ;;  %v2418_v6 = vadd.f32 %v2386_v23, %v8666_v17  ;;  %v8721_v44 = vpop.f32.mrf.mxu0  ;;  %v2339_v56 = vpop.f32.mrf.mxu1 }
 0x2ee   : > { %7141 = vmatmul.msk.f32.gmra.mxu0 %vm225_vm1, %v3173_v8  ;;  %v1310_v53 = vpop.f32.mrf.mxu2  ;;  %v3176_v8 = vld [vmem:[#allocation2 + $0x1e9] sm:$0xff] }
 0x2ef   : > { %v1396_v39 = vadd.f32 %v1364_v54, %v1310_v53  ;;  %2450 = vst.msk [vmem:[#allocation4 + $0x88] sm:$0xff] %vm299_vm3, %v2418_v6  ;;  %7056 = vmatmul.msk.f32.gmra.mxu2 %vm225_vm1, %v2472_v55  ;;  %v1367_v54 = vld [vmem:[#allocation4 + $0xc0] sm:$0xff]  ;;  %v2817_v55 = vld [vmem:[#allocation2 + $0xd0] sm:$0xff] }
 0x2f0   : > { %v1705_v59 = vld [vmem:[#allocation4 + $0xa0] sm:$0xff]  ;;  %7090 = vmatmul.msk.f32.gmra.mxu3 %vm225_vm1, %v2814_v20 }
 0x2f1   : > { %v1737_v21 = vadd.f32 %v1705_v59, %v1649_v40  ;;  %1428 = vst.msk [vmem:[#allocation4 + $0xa8] sm:$0xff] %vm299_vm3, %v1396_v39 }
 0x2f2   : > { %v2046_v13 = vld [vmem:[#allocation4 + $0x98] sm:$0xff] }
 0x2f3   : > { %v2078_v46 = vadd.f32 %v2046_v13, %v8421_v14  ;;  %1769 = vst.msk [vmem:[#allocation4 + $0xa0] sm:$0xff] %vm299_vm3, %v1737_v21  ;;  %v2475_v13 = vld [vmem:[#allocation2 + $0xcf] sm:$0xff] }
 0x2f4   : > { %v2387_v17 = vld [vmem:[#allocation4 + $0x90] sm:$0xff]  ;;  %v1655_v48 = vpop.f32.mrf.mxu3 }
 0x2f5   : > { %2110 = vst.msk [vmem:[#allocation4 + $0x98] sm:$0xff] %vm299_vm3, %v2078_v46  ;;  %v2419_v60 = vadd.f32 %v2387_v17, %v8680_v25  ;;  %v8735_v28 = vpop.f32.mrf.mxu0  ;;  %v2342_v17 = vpop.f32.mrf.mxu1 }
 0x2f6   : > { %7142 = vmatmul.msk.f32.gmra.mxu0 %vm225_vm1, %v3174_v11  ;;  %v1313_v7 = vpop.f32.mrf.mxu2  ;;  %v3177_v11 = vld [vmem:[#allocation2 + $0x1f1] sm:$0xff] }
 0x2f7   : > { %v1397_v38 = vadd.f32 %v1365_v63, %v1313_v7  ;;  %2451 = vst.msk [vmem:[#allocation4 + $0x90] sm:$0xff] %vm299_vm3, %v2419_v60  ;;  %7057 = vmatmul.msk.f32.gmra.mxu2 %vm225_vm1, %v2473_v24  ;;  %v1368_v63 = vld [vmem:[#allocation4 + $0xc8] sm:$0xff] }
 0x2f8   : > { %v1706_v14 = vld [vmem:[#allocation4 + $0xa8] sm:$0xff]  ;;  %7091 = vmatmul.msk.f32.gmra.mxu3 %vm225_vm1, %v2815_v4 }
 0x2f9   : > { %v1738_v31 = vadd.f32 %v1706_v14, %v1652_v49  ;;  %1429 = vst.msk [vmem:[#allocation4 + $0xb0] sm:$0xff] %vm299_vm3, %v1397_v38 }
 0x2fa   : > { %v2047_v34 = vld [vmem:[#allocation4 + $0xa0] sm:$0xff] }
 0x2fb   : > { %v2079_v25 = vadd.f32 %v2047_v34, %v8431_v35  ;;  %1770 = vst.msk [vmem:[#allocation4 + $0xa8] sm:$0xff] %vm299_vm3, %v1738_v31  ;;  %v2476_v31 = vld [vmem:[#allocation2 + $0xe7] sm:$0xff] }
 0x2fc   : > { %v2388_v0 = vld [vmem:[#allocation4 + $0x98] sm:$0xff]  ;;  %v1658_v40 = vpop.f32.mrf.mxu3  ;;  %v2818_v34 = vld [vmem:[#allocation2 + $0xe8] sm:$0xff] }
 0x2fd   : > { %2111 = vst.msk [vmem:[#allocation4 + $0xa0] sm:$0xff] %vm299_vm3, %v2079_v25  ;;  %v2420_v22 = vadd.f32 %v2388_v0, %v8697_v36  ;;  %v1369_v0 = vld [vmem:[#allocation4 + $0xd0] sm:$0xff] }
 0x2fe   : > { %7143 = vmatmul.msk.f32.gmra.mxu0 %vm225_vm1, %v3175_v9  ;;  %v1316_v58 = vpop.f32.mrf.mxu2 }
 0x2ff   : > { %v1398_v12 = vadd.f32 %v1366_v42, %v1316_v58  ;;  %2452 = vst.msk [vmem:[#allocation4 + $0x98] sm:$0xff] %vm299_vm3, %v2420_v22  ;;  %7058 = vmatmul.msk.f32.gmra.mxu2 %vm225_vm1, %v2474_v18  ;;  %v2345_v58 = vpop.f32.mrf.mxu1 }
 0x300   : > { %v1707_v35 = vld [vmem:[#allocation4 + $0xb0] sm:$0xff]  ;;  %7092 = vmatmul.msk.f32.gmra.mxu3 %vm225_vm1, %v2816_v51  ;;  %v1370_v51 = vld [vmem:[#allocation4 + $0xd8] sm:$0xff] }
 0x301   : > { %v1739_v16 = vadd.f32 %v1707_v35, %v1655_v48  ;;  %1430 = vst.msk [vmem:[#allocation4 + $0xb8] sm:$0xff] %vm299_vm3, %v1398_v12  ;;  %v2477_v12 = vld [vmem:[#allocation2 + $0xef] sm:$0xff] }
 0x302   : > { %v2048_v41 = vld [vmem:[#allocation4 + $0xa8] sm:$0xff]  ;;  %v2819_v35 = vld [vmem:[#allocation2 + $0xf0] sm:$0xff] }
 0x303   : > { %v2080_v36 = vadd.f32 %v2048_v41, %v8441_v50  ;;  %1771 = vst.msk [vmem:[#allocation4 + $0xb0] sm:$0xff] %vm299_vm3, %v1739_v16 }
 0x304   : > { %v2389_v23 = vld [vmem:[#allocation4 + $0xa0] sm:$0xff]  ;;  %v1661_v49 = vpop.f32.mrf.mxu3 }
 0x305   : > { %2112 = vst.msk [vmem:[#allocation4 + $0xa8] sm:$0xff] %vm299_vm3, %v2080_v36  ;;  %v2421_v6 = vadd.f32 %v2389_v23, %v2333_v45  ;;  %v8747_v45 = vpop.f32.mrf.mxu0 }
 0x306   : > { %7144 = vmatmul.msk.f32.gmra.mxu0 %vm225_vm1, %v3176_v8  ;;  %v1319_v53 = vpop.f32.mrf.mxu2 }
 0x307   : > { %v1399_v39 = vadd.f32 %v1367_v54, %v1319_v53  ;;  %2453 = vst.msk [vmem:[#allocation4 + $0xa0] sm:$0xff] %vm299_vm3, %v2421_v6  ;;  %7059 = vmatmul.msk.f32.gmra.mxu2 %vm225_vm1, %v2475_v13  ;;  %v1371_v13 = vld [vmem:[#allocation4 + $0xe0] sm:$0xff] }
 0x308   : > { %v1708_v50 = vld [vmem:[#allocation4 + $0xb8] sm:$0xff]  ;;  %7093 = vmatmul.msk.f32.gmra.mxu3 %vm225_vm1, %v2817_v55 }
 0x309   : > { %v1740_v59 = vadd.f32 %v1708_v50, %v1658_v40  ;;  %1431 = vst.msk [vmem:[#allocation4 + $0xc0] sm:$0xff] %vm299_vm3, %v1399_v39 }
 0x30a   : > { %v2049_v21 = vld [vmem:[#allocation4 + $0xb0] sm:$0xff] }
 0x30b   : > { %v2081_v20 = vadd.f32 %v2049_v21, %v8455_v10  ;;  %1772 = vst.msk [vmem:[#allocation4 + $0xb8] sm:$0xff] %vm299_vm3, %v1740_v59 }
 0x30c   : > { %v2390_v46 = vld [vmem:[#allocation4 + $0xa8] sm:$0xff]  ;;  %v1664_v48 = vpop.f32.mrf.mxu3 }
 0x30d   : > { %2113 = vst.msk [vmem:[#allocation4 + $0xb0] sm:$0xff] %vm299_vm3, %v2081_v20  ;;  %v2422_v60 = vadd.f32 %v2390_v46, %v2336_v37 }
 0x30e   : > { %7145 = vmatmul.msk.f32.gmra.mxu0 %vm225_vm1, %v3177_v11  ;;  %v1322_v7 = vpop.f32.mrf.mxu2  ;;  %v2820_v11 = vld [vmem:[#allocation2 + $0x108] sm:$0xff] }
 0x30f   : > { %v1400_v9 = vadd.f32 %v1368_v63, %v1322_v7  ;;  %2454 = vst.msk [vmem:[#allocation4 + $0xa8] sm:$0xff] %vm299_vm3, %v2422_v60  ;;  %7060 = vmatmul.msk.f32.gmra.mxu2 %vm225_vm1, %v2476_v31  ;;  %v2479_v7 = vld [vmem:[#allocation2 + $0x10f] sm:$0xff] }
 0x310   : > { %v1709_v10 = vld [vmem:[#allocation4 + $0xc0] sm:$0xff]  ;;  %7094 = vmatmul.msk.f32.gmra.mxu3 %vm225_vm1, %v2818_v34  ;;  %v2821_v63 = vld [vmem:[#allocation2 + $0x110] sm:$0xff]  ;;  %v1372_v31 = vld [vmem:[#allocation4 + $0xe8] sm:$0xff] }
 0x311   : > { %v1741_v38 = vadd.f32 %v1709_v10, %v1661_v49  ;;  %1432 = vst.msk [vmem:[#allocation4 + $0xc8] sm:$0xff] %vm299_vm3, %v1400_v9  ;;  %v2478_v49 = vld [vmem:[#allocation2 + $0x107] sm:$0xff] }
 0x312   : > { %v2050_v14 = vld [vmem:[#allocation4 + $0xb8] sm:$0xff] }
 0x313   : > { %v2082_v24 = vadd.f32 %v2050_v14, %v8469_v1  ;;  %1773 = vst.msk [vmem:[#allocation4 + $0xc0] sm:$0xff] %vm299_vm3, %v1741_v38 }
 0x314   : > { %v2391_v37 = vld [vmem:[#allocation4 + $0xb0] sm:$0xff]  ;;  %v1667_v22 = vpop.f32.mrf.mxu3 }
 0x315   : > { %2114 = vst.msk [vmem:[#allocation4 + $0xb8] sm:$0xff] %vm299_vm3, %v2082_v24  ;;  %v2423_v4 = vadd.f32 %v2391_v37, %v2339_v56 }
 0x316   : > { %7146 = vmatmul.msk.f32.gmra.mxu0 %vm225_vm1, %v8578_v27  ;;  %v8761_v27 = vpop.f32.mrf.mxu0  ;;  %v1325_v25 = vpop.f32.mrf.mxu2 }
 0x317   : > { %v1401_v42 = vadd.f32 %v1369_v0, %v1325_v25  ;;  %2455 = vst.msk [vmem:[#allocation4 + $0xb0] sm:$0xff] %vm299_vm3, %v2423_v4  ;;  %7061 = vmatmul.msk.f32.gmra.mxu2 %vm225_vm1, %v2477_v12  ;;  %v2480_v25 = vld [vmem:[#allocation2 + $0x127] sm:$0xff]  ;;  %v1373_v12 = vld [vmem:[#allocation4 + $0xf0] sm:$0xff] }
 0x318   : > { %v1710_v1 = vld [vmem:[#allocation4 + $0xc8] sm:$0xff]  ;;  %7095 = vmatmul.msk.f32.gmra.mxu3 %vm225_vm1, %v2819_v35 }
 0x319   : > { %v1742_v40 = vadd.f32 %v1710_v1, %v1664_v48  ;;  %1433 = vst.msk [vmem:[#allocation4 + $0xd0] sm:$0xff] %vm299_vm3, %v1401_v42  ;;  %v2822_v0 = vld [vmem:[#allocation2 + $0x128] sm:$0xff] }
 0x31a   : > { %v2051_v8 = vld [vmem:[#allocation4 + $0xc0] sm:$0xff] }
 0x31b   : > { %v2083_v16 = vadd.f32 %v2051_v8, %v8483_v2  ;;  %1774 = vst.msk [vmem:[#allocation4 + $0xc8] sm:$0xff] %vm299_vm3, %v1742_v40  ;;  %v2348_v2 = vpop.f32.mrf.mxu1 }
 0x31c   : > { %v2392_v41 = vld [vmem:[#allocation4 + $0xb8] sm:$0xff]  ;;  %v1670_v56 = vpop.f32.mrf.mxu3 }
 0x31d   : > { %2115 = vst.msk [vmem:[#allocation4 + $0xc0] sm:$0xff] %vm299_vm3, %v2083_v16 }
 0x31e   : > { %7147 = vmatmul.msk.f32.gmra.mxu0 %vm225_vm1, %v8594_v62  ;;  %v2424_v62 = vadd.f32 %v2392_v41, %v2342_v17  ;;  %v1328_v18 = vpop.f32.mrf.mxu2  ;;  %v8772_v36 = vpop.f32.mrf.mxu0 }
 0x31f   : > { %v1402_v23 = vadd.f32 %v1370_v51, %v1328_v18  ;;  %7062 = vmatmul.msk.f32.gmra.mxu2 %vm225_vm1, %v2478_v49  ;;  %v2481_v51 = vld [vmem:[#allocation2 + $0x12f] sm:$0xff]  ;;  %v1374_v49 = vld [vmem:[#allocation4 + $0xf8] sm:$0xff] }
 0x320   : > { %2456 = vst.msk [vmem:[#allocation4 + $0xb8] sm:$0xff] %vm299_vm3, %v2424_v62  ;;  %v1711_v6 = vld [vmem:[#allocation4 + $0xd0] sm:$0xff]  ;;  %7096 = vmatmul.msk.f32.gmra.mxu3 %vm225_vm1, %v2820_v11 }
 0x321   : > { %v1743_v53 = vadd.f32 %v1711_v6, %v1667_v22  ;;  %1434 = vst.msk [vmem:[#allocation4 + $0xd8] sm:$0xff] %vm299_vm3, %v1402_v23 }
 0x322   : > { %v2052_v54 = vld [vmem:[#allocation4 + $0xc8] sm:$0xff] }
 0x323   : > { %v2084_v39 = vadd.f32 %v2052_v54, %v8499_v3  ;;  %1775 = vst.msk [vmem:[#allocation4 + $0xd0] sm:$0xff] %vm299_vm3, %v1743_v53  ;;  %v2351_v48 = vpop.f32.mrf.mxu1 }
 0x324   : > { %v2393_v50 = vld [vmem:[#allocation4 + $0xc0] sm:$0xff]  ;;  %v1673_v55 = vpop.f32.mrf.mxu3 }
 0x325   : > { %2116 = vst.msk [vmem:[#allocation4 + $0xc8] sm:$0xff] %vm299_vm3, %v2084_v39  ;;  %v2425_v59 = vadd.f32 %v2393_v50, %v2345_v58 }
 0x326   : > { %v1331_v21 = vpop.f32.mrf.mxu2  ;;  %v8782_v60 = vpop.f32.mrf.mxu0 }
 0x327   : > { %v1403_v20 = vadd.f32 %v1371_v13, %v1331_v21  ;;  %2457 = vst.msk [vmem:[#allocation4 + $0xc0] sm:$0xff] %vm299_vm3, %v2425_v59  ;;  %7063 = vmatmul.msk.f32.gmra.mxu2 %vm225_vm1, %v2479_v7 }
 0x328   : > { %v1712_v46 = vld [vmem:[#allocation4 + $0xd8] sm:$0xff]  ;;  %7097 = vmatmul.msk.f32.gmra.mxu3 %vm225_vm1, %v2821_v63 }
 0x329   : > { %v1744_v17 = vadd.f32 %v1712_v46, %v1670_v56  ;;  %1435 = vst.msk [vmem:[#allocation4 + $0xe0] sm:$0xff] %vm299_vm3, %v1403_v20  ;;  %v2823_v56 = vld [vmem:[#allocation2 + $0x130] sm:$0xff]  ;;  %v2824_v20 = vld [vmem:[#allocation2 + $0x148] sm:$0xff] }
 0x32a   : > { %v2053_v3 = vld [vmem:[#allocation4 + $0xd0] sm:$0xff] }
 0x32b   : > { %v2085_v9 = vadd.f32 %v2053_v3, %v8515_v32  ;;  %1776 = vst.msk [vmem:[#allocation4 + $0xd8] sm:$0xff] %vm299_vm3, %v1744_v17  ;;  %v2354_v1 = vpop.f32.mrf.mxu1  ;;  %v3180_v17 = vld [vmem:[#allocation2 + $0x229] sm:$0xff] }
 0x32c   : > { %v2394_v10 = vld [vmem:[#allocation4 + $0xc8] sm:$0xff]  ;;  %v1676_v34 = vpop.f32.mrf.mxu3  ;;  %7148 = vmatmul.msk.f32.gmra.mxu0 %vm225_vm1, %v3180_v17 }
 0x32d   : > { %2117 = vst.msk [vmem:[#allocation4 + $0xd0] sm:$0xff] %vm299_vm3, %v2085_v9  ;;  %v2426_v38 = vadd.f32 %v2394_v10, %v2348_v2  ;;  %v3625_v3 = vld [vmem:[#allocation3 + $0x7] sm:$0xff] }
 0x32e   : > { %v1334_v14 = vpop.f32.mrf.mxu2  ;;  %v8794_v58 = vpop.f32.mrf.mxu0  ;;  %7150 = vmatmul.msk.f32.vlgmr.msra.gmra.mxu1 %vm299_vm3, %v3625_v3  ;;  %v2712_v9 = vld [vmem:[#allocation4] sm:$0xff] }
 0x32f   : > { %v1404_v24 = vadd.f32 %v1372_v31, %v1334_v14  ;;  %2458 = vst.msk [vmem:[#allocation4 + $0xc8] sm:$0xff] %vm299_vm3, %v2426_v38  ;;  %7064 = vmatmul.msk.f32.gmra.mxu2 %vm225_vm1, %v2480_v25  ;;  %v3181_v25 = vld [vmem:[#allocation2 + $0x231] sm:$0xff] }
 0x330   : > { %v1713_v37 = vld [vmem:[#allocation4 + $0xe0] sm:$0xff]  ;;  %7098 = vmatmul.msk.f32.gmra.mxu3 %vm225_vm1, %v2822_v0  ;;  %v3626_v0 = vld [vmem:[#allocation3 + $0xf] sm:$0xff] }
 0x331   : > { %v1745_v4 = vadd.f32 %v1713_v37, %v1673_v55  ;;  %1436 = vst.msk [vmem:[#allocation4 + $0xe8] sm:$0xff] %vm299_vm3, %v1404_v24  ;;  %v2482_v55 = vld [vmem:[#allocation2 + $0x147] sm:$0xff]  ;;  %v2483_v37 = vld [vmem:[#allocation2 + $0x14f] sm:$0xff] }
 0x332   : > { %v2054_v32 = vld [vmem:[#allocation4 + $0xd8] sm:$0xff] }
 0x333   : > { %v2086_v22 = vadd.f32 %v2054_v32, %v8531_v26  ;;  %1777 = vst.msk [vmem:[#allocation4 + $0xe0] sm:$0xff] %vm299_vm3, %v1745_v4  ;;  %v7182_v26 = vld [vmem:[%s10208_s3 + $0x8] sm:$0xff]  ;;  %v2357_v50 = vpop.f32.mrf.mxu1  ;;  %v2825_v4 = vld [vmem:[#allocation2 + $0x150] sm:$0xff] }
 0x334   : > { %v2395_v42 = vld [vmem:[#allocation4 + $0xd0] sm:$0xff]  ;;  %v1679_v35 = vpop.f32.mrf.mxu3  ;;  %4045 = vmatpush.msrb.mxu2 %v7182_v26  ;;  %7149 = vmatmul.msk.f32.gmra.mxu0 %vm225_vm1, %v3181_v25 }
 0x335   : > { %2118 = vst.msk [vmem:[#allocation4 + $0xd8] sm:$0xff] %vm299_vm3, %v2086_v22  ;;  %v2427_v40 = vadd.f32 %v2395_v42, %v2351_v48  ;;  %v7248_v42 = vld [vmem:[%s10208_s3 + $0x18] sm:$0xff] }
 0x336   : > { %v1337_v8 = vpop.f32.mrf.mxu2  ;;  %v8809_v2 = vpop.f32.mrf.mxu0  ;;  %7151 = vmatmul.msk.f32.gmra.mxu1 %vm299_vm3, %v3626_v0  ;;  %4723 = vmatpush.msrb.mxu0 %v7248_v42  ;;  %v2716_v0 = vld [vmem:[#allocation4 + $0x20] sm:$0xff] }
 0x337   : > { %v1405_v16 = vadd.f32 %v1373_v12, %v1337_v8  ;;  %2459 = vst.msk [vmem:[#allocation4 + $0xd0] sm:$0xff] %vm299_vm3, %v2427_v40  ;;  %7065 = vmatmul.msk.f32.gmra.mxu2 %vm225_vm1, %v2481_v51  ;;  %v2713_v40 = vld [vmem:[#allocation4 + $0x8] sm:$0xff] }
 0x338   : > { %v1714_v41 = vld [vmem:[#allocation4 + $0xe8] sm:$0xff]  ;;  %7099 = vmatmul.msk.f32.gmra.mxu3 %vm225_vm1, %v2823_v56 }
 0x339   : > { %v1746_v62 = vadd.f32 %v1714_v41, %v1676_v34  ;;  %1437 = vst.msk [vmem:[#allocation4 + $0xf0] sm:$0xff] %vm299_vm3, %v1405_v16  ;;  %v2826_v51 = vld [vmem:[#allocation2 + $0x168] sm:$0xff] }
 0x33a   : > { %v2055_v18 = vld [vmem:[#allocation4 + $0xe0] sm:$0xff] }
 0x33b   : > { %v2087_v23 = vadd.f32 %v2055_v18, %v8547_v52  ;;  %1778 = vst.msk [vmem:[#allocation4 + $0xe8] sm:$0xff] %vm299_vm3, %v1746_v62  ;;  %v7215_v52 = vld [vmem:[%s10208_s3 + $0x10] sm:$0xff]  ;;  %v2360_v34 = vpop.f32.mrf.mxu1 }
 0x33c   : > { %v2396_v6 = vld [vmem:[#allocation4 + $0xd8] sm:$0xff]  ;;  %v1682_v11 = vpop.f32.mrf.mxu3  ;;  %4384 = vmatpush.msrb.mxu3 %v7215_v52  ;;  %v2484_v18 = vld [vmem:[#allocation2 + $0x167] sm:$0xff] }
 0x33d   : > { %2119 = vst.msk [vmem:[#allocation4 + $0xe0] sm:$0xff] %vm299_vm3, %v2087_v23  ;;  %v2428_v53 = vadd.f32 %v2396_v6, %v2354_v1  ;;  %v10240_v6 = vmov 0.0  }
 0x33e   : > { %v1340_v54 = vpop.f32.mrf.mxu2  ;;  %304 = vst.msk [vmem:[#allocation3 + $0x18] sm:$0x1] %vm303_vm4, %v10240_v6 }
 0x33f   : > { %v1406_v39 = vadd.f32 %v1374_v49, %v1340_v54  ;;  %2460 = vst.msk [vmem:[#allocation4 + $0xd8] sm:$0xff] %vm299_vm3, %v2428_v53  ;;  %7066 = vmatmul.msk.f32.gmra.mxu2 %vm225_vm1, %v2482_v55  ;;  %v7281_v54 = vld [vmem:[%s10208_s3 + $0x20] sm:$0xff] }
 0x340   : > { %v1715_v59 = vld [vmem:[#allocation4 + $0xf0] sm:$0xff]  ;;  %7100 = vmatmul.msk.f32.gmra.mxu3 %vm225_vm1, %v2824_v20  ;;  %5062 = vmatpush.msrb.mxu1 %v7281_v54  ;;  %308 = vst.msk [vmem:[#allocation3 + $0x38] sm:$0x1] %vm303_vm4, %v10240_v6 }
 0x341   : > { %v1747_v21 = vadd.f32 %v1715_v59, %v1679_v35  ;;  %1438 = vst.msk [vmem:[#allocation4 + $0xf8] sm:$0xff] %vm299_vm3, %v1406_v39 }
 0x342   : > { %v2056_v13 = vld [vmem:[#allocation4 + $0xe8] sm:$0xff]  ;;  %312 = vst.msk [vmem:[#allocation3 + $0x58] sm:$0x1] %vm303_vm4, %v10240_v6 }
 0x343   : > { %v2088_v46 = vadd.f32 %v2056_v13, %v8560_v33  ;;  %1779 = vst.msk [vmem:[#allocation4 + $0xf0] sm:$0xff] %vm299_vm3, %v1747_v21  ;;  %v8823_v33 = vpop.f32.mrf.mxu0  ;;  %v2363_v41 = vpop.f32.mrf.mxu1  ;;  %v2485_v21 = vld [vmem:[#allocation2 + $0x16f] sm:$0xff] }
 0x344   : > { %v2397_v7 = vld [vmem:[#allocation4 + $0xe0] sm:$0xff]  ;;  %v2958_v10 = vpop.f32.mrf.mxu3  ;;  %v2827_v13 = vld [vmem:[#allocation2 + $0x170] sm:$0xff]  ;;  %316 = vst.msk [vmem:[#allocation3 + $0x78] sm:$0x1] %vm303_vm4, %v10240_v6 }
 0x345   : > { %2120 = vst.msk [vmem:[#allocation4 + $0xe8] sm:$0xff] %vm299_vm3, %v2088_v46  ;;  %v2429_v63 = vadd.f32 %v2397_v7, %v2357_v50 }
 0x346   : > { %v2616_v48 = vpop.f32.mrf.mxu2  ;;  %320 = vst.msk [vmem:[#allocation3 + $0x98] sm:$0x1] %vm303_vm4, %v10240_v6 }
 0x347   : > { %v2744_v38 = vadd.f32 %v2712_v9, %v2616_v48  ;;  %2461 = vst.msk [vmem:[#allocation4 + $0xe0] sm:$0xff] %vm299_vm3, %v2429_v63  ;;  %7067 = vmatmul.msk.f32.gmra.mxu2 %vm225_vm1, %v2483_v37  ;;  %v2715_v63 = vld [vmem:[#allocation4 + $0x18] sm:$0xff] }
 0x348   : > { %v1716_v14 = vld [vmem:[#allocation4 + $0xf8] sm:$0xff]  ;;  %7101 = vmatmul.msk.f32.gmra.mxu3 %vm225_vm1, %v2825_v4  ;;  %324 = vst.msk [vmem:[#allocation3 + $0xb8] sm:$0x1] %vm303_vm4, %v10240_v6 }
 0x349   : > { %v1748_v31 = vadd.f32 %v1716_v14, %v1682_v11  ;;  %2776 = vst.msk [vmem:[#allocation4] sm:$0xff] %vm299_vm3, %v2744_v38  ;;  %v8877_v38 = vld [vmem:[%s10207_s2] ss:$0 sm:$0xff] }
 0x34a   : > { %v2057_v24 = vld [vmem:[#allocation4 + $0xf0] sm:$0xff]  ;;  %328 = vst.msk [vmem:[#allocation3 + $0xd8] sm:$0x1] %vm303_vm4, %v10240_v6 }
 0x34b   : > { %v2089_v32 = vadd.f32 %v2057_v24, %v8575_v30  ;;  %1780 = vst.msk [vmem:[#allocation4 + $0xf8] sm:$0xff] %vm299_vm3, %v1748_v31  ;;  %v8838_v16 = vpop.f32.mrf.mxu0  ;;  %v2366_v46 = vpop.f32.mrf.mxu1  ;;  %v2486_v31 = vld [vmem:[#allocation2 + $0x187] sm:$0xff] }
 0x34c   : > { %v2398_v22 = vld [vmem:[#allocation4 + $0xe8] sm:$0xff]  ;;  %v2961_v8 = vpop.f32.mrf.mxu3  ;;  %332 = vst.msk [vmem:[#allocation3 + $0xf8] sm:$0x1] %vm303_vm4, %v10240_v6 }
 0x34d   : > { %2121 = vst.msk [vmem:[#allocation4 + $0xf0] sm:$0xff] %vm299_vm3, %v2089_v32  ;;  %v2430_v30 = vadd.f32 %v2398_v22, %v2360_v34  ;;  %v2828_v34 = vld [vmem:[#allocation2 + $0x188] sm:$0xff] }
 0x34e   : > { %v2619_v1 = vpop.f32.mrf.mxu2  ;;  %336 = vst.msk [vmem:[#allocation3 + $0x118] sm:$0x1] %vm303_vm4, %v10240_v6 }
 0x34f   : > { %v2745_v12 = vadd.f32 %v2713_v40, %v2619_v1  ;;  %2462 = vst.msk [vmem:[#allocation4 + $0xe8] sm:$0xff] %vm299_vm3, %v2430_v30  ;;  %7068 = vmatmul.msk.f32.gmra.mxu2 %vm225_vm1, %v2484_v18  ;;  %v2717_v18 = vld [vmem:[#allocation4 + $0x28] sm:$0xff] }
 0x350   : > { %v3054_v35 = vld [vmem:[#allocation4] sm:$0xff]  ;;  %7102 = vmatmul.msk.f32.gmra.mxu3 %vm225_vm1, %v2826_v51  ;;  %340 = vst.msk [vmem:[#allocation3 + $0x138] sm:$0x1] %vm303_vm4, %v10240_v6 }
 0x351   : > { %v3086_v26 = vadd.f32 %v3054_v35, %v2958_v10  ;;  %2777 = vst.msk [vmem:[#allocation4 + $0x8] sm:$0xff] %vm299_vm3, %v2745_v12  ;;  %v2829_v12 = vld [vmem:[#allocation2 + $0x190] sm:$0xff] }
 0x352   : > { %v2058_v62 = vld [vmem:[#allocation4 + $0xf8] sm:$0xff]  ;;  %344 = vst.msk [vmem:[#allocation3 + $0x158] sm:$0x1] %vm303_vm4, %v10240_v6 }
 0x353   : > { %v2090_v56 = vadd.f32 %v2058_v62, %v8596_v43  ;;  %3118 = vst.msk [vmem:[#allocation4] sm:$0xff] %vm299_vm3, %v3086_v26  ;;  %v2714_v43 = vld [vmem:[#allocation4 + $0x10] sm:$0xff]  ;;  %v8860_v20 = vpop.f32.mrf.mxu0 }
 0x354   : > { %v2399_v23 = vld [vmem:[#allocation4 + $0xf0] sm:$0xff]  ;;  %v2964_v11 = vpop.f32.mrf.mxu3  ;;  %348 = vst.msk [vmem:[#allocation3 + $0x178] sm:$0x1] %vm303_vm4, %v10240_v6 }
 0x355   : > { %v2431_v53 = vadd.f32 %v2399_v23, %v2363_v41  ;;  %2122 = vst.msk [vmem:[#allocation4 + $0xf8] sm:$0xff] %vm299_vm3, %v2090_v56 }
 0x356   : > { %v2622_v49 = vpop.f32.mrf.mxu2  ;;  %352 = vst.msk [vmem:[#allocation3 + $0x198] sm:$0x1] %vm303_vm4, %v10240_v6 }
 0x357   : > { %2463 = vst.msk [vmem:[#allocation4 + $0xf0] sm:$0xff] %vm299_vm3, %v2431_v53  ;;  %v2746_v39 = vadd.f32 %v2714_v43, %v2622_v49  ;;  %7069 = vmatmul.msk.f32.gmra.mxu2 %vm225_vm1, %v2485_v21 }
 0x358   : > { %v3055_v52 = vld [vmem:[#allocation4 + $0x8] sm:$0xff]  ;;  %7103 = vmatmul.msk.f32.gmra.mxu3 %vm225_vm1, %v2827_v13  ;;  %356 = vst.msk [vmem:[#allocation3 + $0x1b8] sm:$0x1] %vm303_vm4, %v10240_v6  ;;  %v2718_v13 = vld [vmem:[#allocation4 + $0x30] sm:$0xff] }
 0x359   : > { %v3087_v50 = vadd.f32 %v3055_v52, %v2961_v8  ;;  %2778 = vst.msk [vmem:[#allocation4 + $0x10] sm:$0xff] %vm299_vm3, %v2746_v39  ;;  %v2487_v8 = vld [vmem:[#allocation2 + $0x18f] sm:$0xff] }
 0x35a   : > { %v3396_v59 = vld [vmem:[#allocation4] sm:$0xff]  ;;  %360 = vst.msk [vmem:[#allocation3 + $0x1d8] sm:$0x1] %vm303_vm4, %v10240_v6  ;;  %v2830_v39 = vld [vmem:[#allocation2 + $0x1a8] sm:$0xff] }
 0x35b   : > { %v3428_v55 = vadd.f32 %v3396_v59, %v8615_v5  ;;  %3119 = vst.msk [vmem:[#allocation4 + $0x8] sm:$0xff] %vm299_vm3, %v3087_v50  ;;  %v8888_v4 = vpop.f32.mrf.mxu0 }
 0x35c   : > { %v2400_v17 = vld [vmem:[#allocation4 + $0xf8] sm:$0xff]  ;;  %v2967_v48 = vpop.f32.mrf.mxu3  ;;  %364 = vst.msk [vmem:[#allocation3 + $0x1f8] sm:$0x1] %vm303_vm4, %v10240_v6 }
 0x35d   : > { %v2432_v3 = vadd.f32 %v2400_v17, %v2366_v46  ;;  %3460 = vst.msk [vmem:[#allocation4] sm:$0xff] %vm299_vm3, %v3428_v55 }
 0x35e   : > { %v2625_v7 = vpop.f32.mrf.mxu2  ;;  %368 = vst.msk [vmem:[#allocation3 + $0x218] sm:$0x1] %vm303_vm4, %v10240_v6 }
 0x35f   : > { %2464 = vst.msk [vmem:[#allocation4 + $0xf8] sm:$0xff] %vm299_vm3, %v2432_v3  ;;  %v2747_v5 = vadd.f32 %v2715_v63, %v2625_v7  ;;  %7070 = vmatmul.msk.f32.gmra.mxu2 %vm225_vm1, %v2486_v31 }
 0x360   : > { %v3056_v9 = vld [vmem:[#allocation4 + $0x10] sm:$0xff]  ;;  %7104 = vmatmul.msk.f32.gmra.mxu3 %vm225_vm1, %v2828_v34  ;;  %372 = vst.msk [vmem:[#allocation3 + $0x238] sm:$0x1] %vm303_vm4, %v10240_v6  ;;  %v2719_v34 = vld [vmem:[#allocation4 + $0x38] sm:$0xff] }
 0x361   : > { %v3088_v10 = vadd.f32 %v3056_v9, %v2964_v11  ;;  %2779 = vst.msk [vmem:[#allocation4 + $0x18] sm:$0xff] %vm299_vm3, %v2747_v5  ;;  %v2488_v11 = vld [vmem:[#allocation2 + $0x1a7] sm:$0xff]  ;;  %v2489_v5 = vld [vmem:[#allocation2 + $0x1af] sm:$0xff] }
 0x362   : > { %v3397_v14 = vld [vmem:[#allocation4 + $0x8] sm:$0xff]  ;;  %v2831_v9 = vld [vmem:[#allocation2 + $0x1b0] sm:$0xff] }
 0x363   : > { %v3429_v24 = vadd.f32 %v3397_v14, %v8634_v29  ;;  %3120 = vst.msk [vmem:[#allocation4 + $0x10] sm:$0xff] %vm299_vm3, %v3088_v10 }
 0x364   : > { %v3492_v37 = vld [vmem:[#allocation4] sm:$0xff]  ;;  %v2970_v22 = vpop.f32.mrf.mxu3 }
 0x365   : > { %3461 = vst.msk [vmem:[#allocation4 + $0x8] sm:$0xff] %vm299_vm3, %v3429_v24  ;;  %v3528_v32 = vadd.f32 %v8877_v38, %v3492_v37 }
 0x366   : > { %v2628_v25 = vpop.f32.mrf.mxu2 }
 0x367   : > { %v2748_v29 = vadd.f32 %v2716_v0, %v2628_v25  ;;  %v3560_v42 = vmax.f32 %v3528_v32, 0.0  ;;  %7071 = vmatmul.msk.f32.gmra.mxu2 %vm225_vm1, %v2487_v8 }
 0x368   : > { %v3057_v30 = vld [vmem:[#allocation4 + $0x18] sm:$0xff]  ;;  %7105 = vmatmul.msk.f32.gmra.mxu3 %vm225_vm1, %v2829_v12 }
 0x369   : > { %v3089_v1 = vadd.f32 %v3057_v30, %v2967_v48  ;;  %2780 = vst.msk [vmem:[#allocation4 + $0x20] sm:$0xff] %vm299_vm3, %v2748_v29  ;;  %v2490_v29 = vld [vmem:[#allocation2 + $0x1c7] sm:$0xff] }
 0x36a   : > { %v3398_v40 = vld [vmem:[#allocation4 + $0x10] sm:$0xff]  ;;  %3593 = vst.msk [vmem:[#allocation3 + $0x28] sm:$0xff] %vm299_vm3, %v3560_v42  ;;  %v2832_v42 = vld [vmem:[#allocation2 + $0x1c8] sm:$0xff] }
 0x36b   : > { %v3430_v35 = vadd.f32 %v3398_v40, %v8648_v47  ;;  %3121 = vst.msk [vmem:[#allocation4 + $0x18] sm:$0xff] %vm299_vm3, %v3089_v1  ;;  %v8909_v47 = vpop.f32.mrf.mxu0 }
 0x36c   : > { %v3493_v26 = vld [vmem:[#allocation4 + $0x8] sm:$0xff]  ;;  %v2973_v51 = vpop.f32.mrf.mxu3 }
 0x36d   : > { %3462 = vst.msk [vmem:[#allocation4 + $0x10] sm:$0xff] %vm299_vm3, %v3430_v35  ;;  %v3529_v41 = vadd.f32 %v8877_v38, %v3493_v26  ;;  %v2720_v35 = vld [vmem:[#allocation4 + $0x40] sm:$0xff] }
 0x36e   : > { %v2631_v62 = vpop.f32.mrf.mxu2 }
 0x36f   : > { %v2749_v56 = vadd.f32 %v2717_v18, %v2631_v62  ;;  %v3561_v23 = vmax.f32 %v3529_v41, 0.0  ;;  %7072 = vmatmul.msk.f32.gmra.mxu2 %vm225_vm1, %v2488_v11 }
 0x370   : > { %v3058_v53 = vld [vmem:[#allocation4 + $0x20] sm:$0xff]  ;;  %7106 = vmatmul.msk.f32.gmra.mxu3 %vm225_vm1, %v2830_v39 }
 0x371   : > { %v3090_v54 = vadd.f32 %v3058_v53, %v2970_v22  ;;  %2781 = vst.msk [vmem:[#allocation4 + $0x28] sm:$0xff] %vm299_vm3, %v2749_v56  ;;  %v3627_v49 = vld [vmem:[#allocation3 + $0x27] sm:$0xff]  ;;  %v2833_v53 = vld [vmem:[#allocation2 + $0x1d0] sm:$0xff] }
 0x372   : > { %v3399_v43 = vld [vmem:[#allocation4 + $0x18] sm:$0xff]  ;;  %7152 = vmatmul.msk.f32.gmra.mxu1 %vm299_vm3, %v3627_v49  ;;  %7249 = vmatmul.msk.f32.vlgmr.msrb.gmra.mxu0 %vm299_vm3, %v3627_v49  ;;  %3594 = vst.msk [vmem:[#allocation3 + $0x30] sm:$0xff] %vm299_vm3, %v3561_v23  ;;  %v2491_v23 = vld [vmem:[#allocation2 + $0x1cf] sm:$0xff] }
 0x373   : > { %v3431_v52 = vadd.f32 %v3399_v43, %v8662_v15  ;;  %3122 = vst.msk [vmem:[#allocation4 + $0x20] sm:$0xff] %vm299_vm3, %v3090_v54  ;;  %v8929_v3 = vpop.f32.mrf.mxu0 }
 0x374   : > { %v3494_v50 = vld [vmem:[#allocation4 + $0x10] sm:$0xff]  ;;  %v2976_v55 = vpop.f32.mrf.mxu3 }
 0x375   : > { %3463 = vst.msk [vmem:[#allocation4 + $0x18] sm:$0xff] %vm299_vm3, %v3431_v52  ;;  %v3530_v59 = vadd.f32 %v8877_v38, %v3494_v50  ;;  %v2721_v52 = vld [vmem:[#allocation4 + $0x48] sm:$0xff] }
 0x376   : > { %v2634_v21 = vpop.f32.mrf.mxu2 }
 0x377   : > { %v2750_v15 = vadd.f32 %v2718_v13, %v2634_v21  ;;  %v3562_v46 = vmax.f32 %v3530_v59, 0.0  ;;  %7073 = vmatmul.msk.f32.gmra.mxu2 %vm225_vm1, %v2489_v5 }
 0x378   : > { %v3059_v17 = vld [vmem:[#allocation4 + $0x28] sm:$0xff]  ;;  %7107 = vmatmul.msk.f32.gmra.mxu3 %vm225_vm1, %v2831_v9  ;;  %v2722_v9 = vld [vmem:[#allocation4 + $0x50] sm:$0xff] }
 0x379   : > { %v3091_v7 = vadd.f32 %v3059_v17, %v2973_v51  ;;  %2782 = vst.msk [vmem:[#allocation4 + $0x30] sm:$0xff] %vm299_vm3, %v2750_v15  ;;  %v3628_v63 = vld [vmem:[#allocation3 + $0x2f] sm:$0xff] }
 0x37a   : > { %v3400_v48 = vld [vmem:[#allocation4 + $0x20] sm:$0xff]  ;;  %7153 = vmatmul.msk.f32.gmra.mxu1 %vm299_vm3, %v3628_v63  ;;  %7250 = vmatmul.msk.f32.gmra.mxu0 %vm299_vm3, %v3628_v63  ;;  %3595 = vst.msk [vmem:[#allocation3 + $0x48] sm:$0xff] %vm299_vm3, %v3562_v46  ;;  %v2834_v17 = vld [vmem:[#allocation2 + $0x1e8] sm:$0xff] }
 0x37b   : > { %v3432_v6 = vadd.f32 %v3400_v48, %v8678_v19  ;;  %3123 = vst.msk [vmem:[#allocation4 + $0x28] sm:$0xff] %vm299_vm3, %v3091_v7  ;;  %v8945_v30 = vpop.f32.mrf.mxu0  ;;  %v2492_v46 = vld [vmem:[#allocation2 + $0x1e7] sm:$0xff] }
 0x37c   : > { %v3495_v10 = vld [vmem:[#allocation4 + $0x18] sm:$0xff]  ;;  %v2979_v24 = vpop.f32.mrf.mxu3 }
 0x37d   : > { %3464 = vst.msk [vmem:[#allocation4 + $0x20] sm:$0xff] %vm299_vm3, %v3432_v6  ;;  %v3531_v14 = vadd.f32 %v8877_v38, %v3495_v10 }
 0x37e   : > { %v2637_v31 = vpop.f32.mrf.mxu2 }
 0x37f   : > { %v2751_v37 = vadd.f32 %v2719_v34, %v2637_v31  ;;  %v3563_v32 = vmax.f32 %v3531_v14, 0.0  ;;  %7074 = vmatmul.msk.f32.gmra.mxu2 %vm225_vm1, %v2490_v29 }
 0x380   : > { %v3060_v25 = vld [vmem:[#allocation4 + $0x30] sm:$0xff]  ;;  %7108 = vmatmul.msk.f32.gmra.mxu3 %vm225_vm1, %v2832_v42  ;;  %v2723_v42 = vld [vmem:[#allocation4 + $0x58] sm:$0xff] }
 0x381   : > { %v3092_v0 = vadd.f32 %v3060_v25, %v2976_v55  ;;  %2783 = vst.msk [vmem:[#allocation4 + $0x38] sm:$0xff] %vm299_vm3, %v2751_v37  ;;  %v3629_v19 = vld [vmem:[#allocation3 + $0x47] sm:$0xff]  ;;  %v2835_v25 = vld [vmem:[#allocation2 + $0x1f0] sm:$0xff] }
 0x382   : > { %v3401_v22 = vld [vmem:[#allocation4 + $0x28] sm:$0xff]  ;;  %7154 = vmatmul.msk.f32.gmra.mxu1 %vm299_vm3, %v3629_v19  ;;  %7251 = vmatmul.msk.f32.gmra.mxu0 %vm299_vm3, %v3629_v19  ;;  %3596 = vst.msk [vmem:[#allocation3 + $0x50] sm:$0xff] %vm299_vm3, %v3563_v32 }
 0x383   : > { %v3433_v1 = vadd.f32 %v3401_v22, %v8695_v57  ;;  %3124 = vst.msk [vmem:[#allocation4 + $0x30] sm:$0xff] %vm299_vm3, %v3092_v0  ;;  %v8961_v43 = vpop.f32.mrf.mxu0  ;;  %v2493_v32 = vld [vmem:[#allocation2 + $0x1ef] sm:$0xff] }
 0x384   : > { %v3496_v40 = vld [vmem:[#allocation4 + $0x20] sm:$0xff]  ;;  %v2982_v26 = vpop.f32.mrf.mxu3 }
 0x385   : > { %3465 = vst.msk [vmem:[#allocation4 + $0x28] sm:$0xff] %vm299_vm3, %v3433_v1  ;;  %v3532_v8 = vadd.f32 %v8877_v38, %v3496_v40 }
 0x386   : > { %v2640_v12 = vpop.f32.mrf.mxu2 }
 0x387   : > { %v2752_v41 = vadd.f32 %v2720_v35, %v2640_v12  ;;  %v3564_v62 = vmax.f32 %v3532_v8, 0.0  ;;  %7075 = vmatmul.msk.f32.gmra.mxu2 %vm225_vm1, %v2491_v23 }
 0x388   : > { %v3061_v18 = vld [vmem:[#allocation4 + $0x38] sm:$0xff]  ;;  %7109 = vmatmul.msk.f32.gmra.mxu3 %vm225_vm1, %v2833_v53  ;;  %v2724_v53 = vld [vmem:[#allocation4 + $0x60] sm:$0xff] }
 0x389   : > { %v3093_v51 = vadd.f32 %v3061_v18, %v2979_v24  ;;  %2784 = vst.msk [vmem:[#allocation4 + $0x40] sm:$0xff] %vm299_vm3, %v2752_v41  ;;  %v3630_v57 = vld [vmem:[#allocation3 + $0x4f] sm:$0xff] }
 0x38a   : > { %v3402_v56 = vld [vmem:[#allocation4 + $0x30] sm:$0xff]  ;;  %7155 = vmatmul.msk.f32.gmra.mxu1 %vm299_vm3, %v3630_v57  ;;  %7252 = vmatmul.msk.f32.gmra.mxu0 %vm299_vm3, %v3630_v57  ;;  %3597 = vst.msk [vmem:[#allocation3 + $0x68] sm:$0xff] %vm299_vm3, %v3564_v62  ;;  %v2494_v62 = vld [vmem:[#allocation2 + $0x207] sm:$0xff] }
 0x38b   : > { %v3434_v54 = vadd.f32 %v3402_v56, %v8709_v61  ;;  %3125 = vst.msk [vmem:[#allocation4 + $0x38] sm:$0xff] %vm299_vm3, %v3093_v51  ;;  %v8975_v10 = vpop.f32.mrf.mxu0  ;;  %v2836_v18 = vld [vmem:[#allocation2 + $0x208] sm:$0xff] }
 0x38c   : > { %v3497_v49 = vld [vmem:[#allocation4 + $0x28] sm:$0xff]  ;;  %v2985_v50 = vpop.f32.mrf.mxu3 }
 0x38d   : > { %3466 = vst.msk [vmem:[#allocation4 + $0x30] sm:$0xff] %vm299_vm3, %v3434_v54  ;;  %v3533_v11 = vadd.f32 %v8877_v38, %v3497_v49 }
 0x38e   : > { %v2643_v39 = vpop.f32.mrf.mxu2 }
 0x38f   : > { %v2753_v59 = vadd.f32 %v2721_v52, %v2643_v39  ;;  %v3565_v21 = vmax.f32 %v3533_v11, 0.0  ;;  %7076 = vmatmul.msk.f32.gmra.mxu2 %vm225_vm1, %v2492_v46 }
 0x390   : > { %v3062_v13 = vld [vmem:[#allocation4 + $0x40] sm:$0xff]  ;;  %7110 = vmatmul.msk.f32.gmra.mxu3 %vm225_vm1, %v2834_v17  ;;  %v2725_v17 = vld [vmem:[#allocation4 + $0x68] sm:$0xff] }
 0x391   : > { %v3094_v61 = vadd.f32 %v3062_v13, %v2982_v26  ;;  %2785 = vst.msk [vmem:[#allocation4 + $0x48] sm:$0xff] %vm299_vm3, %v2753_v59  ;;  %v3631_v55 = vld [vmem:[#allocation3 + $0x67] sm:$0xff]  ;;  %v2495_v59 = vld [vmem:[#allocation2 + $0x20f] sm:$0xff] }
 0x392   : > { %v3403_v15 = vld [vmem:[#allocation4 + $0x38] sm:$0xff]  ;;  %7156 = vmatmul.msk.f32.gmra.mxu1 %vm299_vm3, %v3631_v55  ;;  %7253 = vmatmul.msk.f32.gmra.mxu0 %vm299_vm3, %v3631_v55  ;;  %3598 = vst.msk [vmem:[#allocation3 + $0x70] sm:$0xff] %vm299_vm3, %v3565_v21  ;;  %v2837_v21 = vld [vmem:[#allocation2 + $0x210] sm:$0xff] }
 0x393   : > { %v3435_v7 = vadd.f32 %v3403_v15, %v8721_v44  ;;  %3126 = vst.msk [vmem:[#allocation4 + $0x40] sm:$0xff] %vm299_vm3, %v3094_v61  ;;  %v8987_v35 = vpop.f32.mrf.mxu0 }
 0x394   : > { %v3498_v63 = vld [vmem:[#allocation4 + $0x30] sm:$0xff]  ;;  %v2988_v6 = vpop.f32.mrf.mxu3 }
 0x395   : > { %3467 = vst.msk [vmem:[#allocation4 + $0x38] sm:$0xff] %vm299_vm3, %v3435_v7  ;;  %v3534_v48 = vadd.f32 %v8877_v38, %v3498_v63 }
 0x396   : > { %v2646_v5 = vpop.f32.mrf.mxu2 }
 0x397   : > { %v2754_v14 = vadd.f32 %v2722_v9, %v2646_v5  ;;  %v3566_v31 = vmax.f32 %v3534_v48, 0.0  ;;  %7077 = vmatmul.msk.f32.gmra.mxu2 %vm225_vm1, %v2493_v32  ;;  %v2496_v9 = vld [vmem:[#allocation2 + $0x227] sm:$0xff] }
 0x398   : > { %v3063_v34 = vld [vmem:[#allocation4 + $0x48] sm:$0xff]  ;;  %7111 = vmatmul.msk.f32.gmra.mxu3 %vm225_vm1, %v2835_v25  ;;  %v2726_v25 = vld [vmem:[#allocation4 + $0x70] sm:$0xff] }
 0x399   : > { %v3095_v44 = vadd.f32 %v3063_v34, %v2985_v50  ;;  %2786 = vst.msk [vmem:[#allocation4 + $0x50] sm:$0xff] %vm299_vm3, %v2754_v14  ;;  %v3632_v24 = vld [vmem:[#allocation3 + $0x6f] sm:$0xff] }
 0x39a   : > { %v3404_v37 = vld [vmem:[#allocation4 + $0x40] sm:$0xff]  ;;  %7157 = vmatmul.msk.f32.gmra.mxu1 %vm299_vm3, %v3632_v24  ;;  %7254 = vmatmul.msk.f32.gmra.mxu0 %vm299_vm3, %v3632_v24  ;;  %3599 = vst.msk [vmem:[#allocation3 + $0x88] sm:$0xff] %vm299_vm3, %v3566_v31 }
 0x39b   : > { %v3436_v0 = vadd.f32 %v3404_v37, %v8735_v28  ;;  %3127 = vst.msk [vmem:[#allocation4 + $0x48] sm:$0xff] %vm299_vm3, %v3095_v44  ;;  %v9003_v13 = vpop.f32.mrf.mxu0 }
 0x39c   : > { %v3499_v19 = vld [vmem:[#allocation4 + $0x38] sm:$0xff]  ;;  %v2991_v1 = vpop.f32.mrf.mxu3 }
 0x39d   : > { %3468 = vst.msk [vmem:[#allocation4 + $0x40] sm:$0xff] %vm299_vm3, %v3436_v0  ;;  %v3535_v22 = vadd.f32 %v8877_v38, %v3499_v19 }
 0x39e   : > { %v2649_v29 = vpop.f32.mrf.mxu2 }
 0x39f   : > { %v2755_v40 = vadd.f32 %v2723_v42, %v2649_v29  ;;  %v3567_v8 = vmax.f32 %v3535_v22, 0.0  ;;  %7078 = vmatmul.msk.f32.gmra.mxu2 %vm225_vm1, %v2494_v62  ;;  %v2839_v42 = vld [vmem:[#allocation2 + $0x230] sm:$0xff]  ;;  %v2727_v62 = vld [vmem:[#allocation4 + $0x78] sm:$0xff] }
 0x3a0   : > { %v3064_v12 = vld [vmem:[#allocation4 + $0x50] sm:$0xff]  ;;  %7112 = vmatmul.msk.f32.gmra.mxu3 %vm225_vm1, %v2836_v18 }
 0x3a1   : > { %v3096_v28 = vadd.f32 %v3064_v12, %v2988_v6  ;;  %2787 = vst.msk [vmem:[#allocation4 + $0x58] sm:$0xff] %vm299_vm3, %v2755_v40  ;;  %v3633_v26 = vld [vmem:[#allocation3 + $0x87] sm:$0xff] }
 0x3a2   : > { %v3405_v41 = vld [vmem:[#allocation4 + $0x48] sm:$0xff]  ;;  %7158 = vmatmul.msk.f32.gmra.mxu1 %vm299_vm3, %v3633_v26  ;;  %7255 = vmatmul.msk.f32.gmra.mxu0 %vm299_vm3, %v3633_v26  ;;  %3600 = vst.msk [vmem:[#allocation3 + $0x90] sm:$0xff] %vm299_vm3, %v3567_v8 }
 0x3a3   : > { %v3437_v51 = vadd.f32 %v3405_v41, %v8747_v45  ;;  %3128 = vst.msk [vmem:[#allocation4 + $0x50] sm:$0xff] %vm299_vm3, %v3096_v28  ;;  %v2838_v6 = vld [vmem:[#allocation2 + $0x228] sm:$0xff]  ;;  %v9019_v24 = vpop.f32.mrf.mxu0 }
 0x3a4   : > { %v3500_v57 = vld [vmem:[#allocation4 + $0x40] sm:$0xff]  ;;  %v2994_v54 = vpop.f32.mrf.mxu3 }
 0x3a5   : > { %3469 = vst.msk [vmem:[#allocation4 + $0x48] sm:$0xff] %vm299_vm3, %v3437_v51  ;;  %v3536_v56 = vadd.f32 %v8877_v38, %v3500_v57 }
 0x3a6   : > { %v2652_v23 = vpop.f32.mrf.mxu2 }
 0x3a7   : > { %v2756_v49 = vadd.f32 %v2724_v53, %v2652_v23  ;;  %v3568_v11 = vmax.f32 %v3536_v56, 0.0  ;;  %7079 = vmatmul.msk.f32.gmra.mxu2 %vm225_vm1, %v2495_v59  ;;  %v4239_v53 = vld [vmem:[#allocation3 + $0x9] sm:$0xff] }
 0x3a8   : > { %v3065_v39 = vld [vmem:[#allocation4 + $0x58] sm:$0xff]  ;;  %7113 = vmatmul.msk.f32.gmra.mxu3 %vm225_vm1, %v2837_v21  ;;  %v2728_v21 = vld [vmem:[#allocation4 + $0x80] sm:$0xff] }
 0x3a9   : > { %v3097_v52 = vadd.f32 %v3065_v39, %v2991_v1  ;;  %2788 = vst.msk [vmem:[#allocation4 + $0x60] sm:$0xff] %vm299_vm3, %v2756_v49  ;;  %v3634_v45 = vld [vmem:[#allocation3 + $0x8f] sm:$0xff] }
 0x3aa   : > { %v3406_v50 = vld [vmem:[#allocation4 + $0x50] sm:$0xff]  ;;  %7159 = vmatmul.msk.f32.gmra.mxu1 %vm299_vm3, %v3634_v45  ;;  %7256 = vmatmul.msk.f32.gmra.mxu0 %vm299_vm3, %v3634_v45  ;;  %3601 = vst.msk [vmem:[#allocation3 + $0xa8] sm:$0xff] %vm299_vm3, %v3568_v11 }
 0x3ab   : > { %v3438_v61 = vadd.f32 %v3406_v50, %v8761_v27  ;;  %3129 = vst.msk [vmem:[#allocation4 + $0x58] sm:$0xff] %vm299_vm3, %v3097_v52  ;;  %v9033_v51 = vpop.f32.mrf.mxu0  ;;  %v3771_v11 = vpop.f32.mrf.mxu1 }
 0x3ac   : > { %v3501_v55 = vld [vmem:[#allocation4 + $0x48] sm:$0xff]  ;;  %v2997_v7 = vpop.f32.mrf.mxu3  ;;  %3868 = vst.msk [vmem:[#allocation5] sm:$0xff] %vm3867_vm5, %v3771_v11 }
 0x3ad   : > { %3470 = vst.msk [vmem:[#allocation4 + $0x50] sm:$0xff] %vm299_vm3, %v3438_v61  ;;  %v3537_v15 = vadd.f32 %v8877_v38, %v3501_v55 }
 0x3ae   : > { %v2655_v46 = vpop.f32.mrf.mxu2 }
 0x3af   : > { %v2757_v63 = vadd.f32 %v2725_v17, %v2655_v46  ;;  %v3569_v48 = vmax.f32 %v3537_v15, 0.0  ;;  %7080 = vmatmul.msk.f32.gmra.mxu2 %vm225_vm1, %v2496_v9  ;;  %v4240_v17 = vld [vmem:[#allocation3 + $0x11] sm:$0xff] }
 0x3b0   : > { %v3066_v5 = vld [vmem:[#allocation4 + $0x60] sm:$0xff]  ;;  %7114 = vmatmul.msk.f32.gmra.mxu3 %vm225_vm1, %v2838_v6 }
 0x3b1   : > { %v3098_v27 = vadd.f32 %v3066_v5, %v2994_v54  ;;  %2789 = vst.msk [vmem:[#allocation4 + $0x68] sm:$0xff] %vm299_vm3, %v2757_v63  ;;  %v3635_v14 = vld [vmem:[#allocation3 + $0xa7] sm:$0xff] }
 0x3b2   : > { %v3407_v31 = vld [vmem:[#allocation4 + $0x58] sm:$0xff]  ;;  %7160 = vmatmul.msk.f32.gmra.mxu1 %vm299_vm3, %v3635_v14  ;;  %7257 = vmatmul.msk.f32.gmra.mxu0 %vm299_vm3, %v3635_v14  ;;  %3602 = vst.msk [vmem:[#allocation3 + $0xb0] sm:$0xff] %vm299_vm3, %v3569_v48 }
 0x3b3   : > { %v3439_v34 = vadd.f32 %v3407_v31, %v8772_v36  ;;  %3130 = vst.msk [vmem:[#allocation4 + $0x60] sm:$0xff] %vm299_vm3, %v3098_v27  ;;  %v2497_v36 = vld [vmem:[#allocation2 + $0x22f] sm:$0xff]  ;;  %v3774_v5 = vpop.f32.mrf.mxu1 }
 0x3b4   : > { %v3502_v44 = vld [vmem:[#allocation4 + $0x50] sm:$0xff]  ;;  %v3000_v0 = vpop.f32.mrf.mxu3  ;;  %3869 = vst.msk [vmem:[#allocation5 + $0x8] sm:$0xff] %vm3867_vm5, %v3774_v5  ;;  %v2732_v5 = vld [vmem:[#allocation4 + $0xa0] sm:$0xff] }
 0x3b5   : > { %3471 = vst.msk [vmem:[#allocation4 + $0x58] sm:$0xff] %vm299_vm3, %v3439_v34  ;;  %v3538_v37 = vadd.f32 %v8877_v38, %v3502_v44  ;;  %v2729_v34 = vld [vmem:[#allocation4 + $0x88] sm:$0xff] }
 0x3b6   : > { %v2658_v32 = vpop.f32.mrf.mxu2 }
 0x3b7   : > { %v2758_v19 = vadd.f32 %v2726_v25, %v2658_v32  ;;  %v3570_v22 = vmax.f32 %v3538_v37, 0.0  ;;  %7081 = vmatmul.msk.f32.gmra.mxu2 %vm225_vm1, %v2497_v36 }
 0x3b8   : > { %v3067_v29 = vld [vmem:[#allocation4 + $0x68] sm:$0xff]  ;;  %7115 = vmatmul.msk.f32.gmra.mxu3 %vm225_vm1, %v2839_v42 }
 0x3b9   : > { %v3099_v1 = vadd.f32 %v3067_v29, %v2997_v7  ;;  %2790 = vst.msk [vmem:[#allocation4 + $0x70] sm:$0xff] %vm299_vm3, %v2758_v19  ;;  %v3636_v40 = vld [vmem:[#allocation3 + $0xaf] sm:$0xff]  ;;  %v9046_v7 = vpop.f32.mrf.mxu0 }
 0x3ba   : > { %v3408_v8 = vld [vmem:[#allocation4 + $0x60] sm:$0xff]  ;;  %7161 = vmatmul.msk.f32.gmra.mxu1 %vm299_vm3, %v3636_v40  ;;  %7258 = vmatmul.msk.f32.gmra.mxu0 %vm299_vm3, %v3636_v40  ;;  %3603 = vst.msk [vmem:[#allocation3 + $0xc8] sm:$0xff] %vm299_vm3, %v3570_v22  ;;  %v9062_v22 = vld [vmem:[#allocation3 + $0x28] sm:$0xff] }
 0x3bb   : > { %v3440_v12 = vadd.f32 %v3408_v8, %v8782_v60  ;;  %3131 = vst.msk [vmem:[#allocation4 + $0x68] sm:$0xff] %vm299_vm3, %v3099_v1  ;;  %v3900_v60 = vld [vmem:[#allocation3 + $0x8] sm:$0xff] }
 0x3bc   : > { %v3503_v28 = vld [vmem:[#allocation4 + $0x58] sm:$0xff]  ;;  %v3003_v18 = vpop.f32.mrf.mxu3  ;;  %v4241_v29 = vld [vmem:[#allocation3 + $0x29] sm:$0xff] }
 0x3bd   : > { %3472 = vst.msk [vmem:[#allocation4 + $0x60] sm:$0xff] %vm299_vm3, %v3440_v12  ;;  %v3539_v26 = vadd.f32 %v8877_v38, %v3503_v28  ;;  %v2730_v12 = vld [vmem:[#allocation4 + $0x90] sm:$0xff] }
 0x3be   : > { %v2661_v41 = vpop.f32.mrf.mxu2 }
 0x3bf   : > { %v2759_v57 = vadd.f32 %v2727_v62, %v2661_v41  ;;  %v3571_v56 = vmax.f32 %v3539_v26, 0.0  ;;  %7183 = vmatmul.msk.f32.vlgmr.msrb.gmra.mxu2 %vm299_vm3, %v3900_v60 }
 0x3c0   : > { %v3068_v23 = vld [vmem:[#allocation4 + $0x70] sm:$0xff]  ;;  %7216 = vmatmul.msk.f32.vlgmr.msrb.gmra.mxu3 %vm299_vm3, %v4239_v53 }
 0x3c1   : > { %v3100_v54 = vadd.f32 %v3068_v23, %v3000_v0  ;;  %2791 = vst.msk [vmem:[#allocation4 + $0x78] sm:$0xff] %vm299_vm3, %v2759_v57  ;;  %v3637_v49 = vld [vmem:[#allocation3 + $0xc7] sm:$0xff]  ;;  %v9065_v36 = vpop.f32.mrf.mxu0  ;;  %v4242_v23 = vld [vmem:[#allocation3 + $0x31] sm:$0xff] }
 0x3c2   : > { %v3409_v39 = vld [vmem:[#allocation4 + $0x68] sm:$0xff]  ;;  %7162 = vmatmul.msk.f32.gmra.mxu1 %vm299_vm3, %v3637_v49  ;;  %7259 = vmatmul.msk.f32.gmra.mxu0 %vm299_vm3, %v3637_v49  ;;  %3604 = vst.msk [vmem:[#allocation3 + $0xd0] sm:$0xff] %vm299_vm3, %v3571_v56  ;;  %v9077_v56 = vld [vmem:[#allocation3 + $0x30] sm:$0xff] }
 0x3c3   : > { %v3441_v52 = vadd.f32 %v3409_v39, %v8794_v58  ;;  %3132 = vst.msk [vmem:[#allocation4 + $0x70] sm:$0xff] %vm299_vm3, %v3100_v54  ;;  %v3901_v58 = vld [vmem:[#allocation3 + $0x10] sm:$0xff]  ;;  %v2731_v39 = vld [vmem:[#allocation4 + $0x98] sm:$0xff] }
 0x3c4   : > { %v3504_v45 = vld [vmem:[#allocation4 + $0x60] sm:$0xff]  ;;  %v3006_v61 = vpop.f32.mrf.mxu3 }
 0x3c5   : > { %3473 = vst.msk [vmem:[#allocation4 + $0x68] sm:$0xff] %vm299_vm3, %v3441_v52  ;;  %v3540_v50 = vadd.f32 %v8877_v38, %v3504_v45 }
 0x3c6   : > { %v2664_v59 = vpop.f32.mrf.mxu2 }
 0x3c7   : > { %v2760_v55 = vadd.f32 %v2728_v21, %v2664_v59  ;;  %v3572_v15 = vmax.f32 %v3540_v50, 0.0  ;;  %7184 = vmatmul.msk.f32.gmra.mxu2 %vm299_vm3, %v3901_v58 }
 0x3c8   : > { %v3069_v46 = vld [vmem:[#allocation4 + $0x78] sm:$0xff]  ;;  %7217 = vmatmul.msk.f32.gmra.mxu3 %vm299_vm3, %v4240_v17 }
 0x3c9   : > { %v3101_v63 = vadd.f32 %v3069_v46, %v3003_v18  ;;  %2792 = vst.msk [vmem:[#allocation4 + $0x80] sm:$0xff] %vm299_vm3, %v2760_v55  ;;  %v3638_v48 = vld [vmem:[#allocation3 + $0xcf] sm:$0xff]  ;;  %v9085_v53 = vpop.f32.mrf.mxu0 }
 0x3ca   : > { %v3410_v9 = vld [vmem:[#allocation4 + $0x70] sm:$0xff]  ;;  %7163 = vmatmul.msk.f32.gmra.mxu1 %vm299_vm3, %v3638_v48  ;;  %7260 = vmatmul.msk.f32.gmra.mxu0 %vm299_vm3, %v3638_v48  ;;  %3605 = vst.msk [vmem:[#allocation3 + $0xe8] sm:$0xff] %vm299_vm3, %v3572_v15  ;;  %v9092_v55 = vld [vmem:[#allocation3 + $0x48] sm:$0xff] }
 0x3cb   : > { %v3442_v6 = vadd.f32 %v3410_v9, %v8809_v2  ;;  %3133 = vst.msk [vmem:[#allocation4 + $0x78] sm:$0xff] %vm299_vm3, %v3101_v63  ;;  %v4243_v15 = vld [vmem:[#allocation3 + $0x49] sm:$0xff] }
 0x3cc   : > { %v3505_v27 = vld [vmem:[#allocation4 + $0x68] sm:$0xff]  ;;  %v3009_v44 = vpop.f32.mrf.mxu3 }
 0x3cd   : > { %3474 = vst.msk [vmem:[#allocation4 + $0x70] sm:$0xff] %vm299_vm3, %v3442_v6  ;;  %v3541_v14 = vadd.f32 %v8877_v38, %v3505_v27 }
 0x3ce   : > { %v2667_v31 = vpop.f32.mrf.mxu2 }
 0x3cf   : > { %v2761_v37 = vadd.f32 %v2729_v34, %v2667_v31  ;;  %v3573_v32 = vmax.f32 %v3541_v14, 0.0  ;;  %7185 = vmatmul.msk.f32.gmra.mxu2 %vm299_vm3, %v9062_v22 }
 0x3d0   : > { %v3070_v25 = vld [vmem:[#allocation4 + $0x80] sm:$0xff]  ;;  %7218 = vmatmul.msk.f32.gmra.mxu3 %vm299_vm3, %v4241_v29 }
 0x3d1   : > { %v3102_v2 = vadd.f32 %v3070_v25, %v3006_v61  ;;  %2793 = vst.msk [vmem:[#allocation4 + $0x88] sm:$0xff] %vm299_vm3, %v2761_v37  ;;  %v3639_v0 = vld [vmem:[#allocation3 + $0xe7] sm:$0xff]  ;;  %v9101_v17 = vpop.f32.mrf.mxu0  ;;  %v4244_v37 = vld [vmem:[#allocation3 + $0x51] sm:$0xff] }
 0x3d2   : > { %v3411_v19 = vld [vmem:[#allocation4 + $0x78] sm:$0xff]  ;;  %7164 = vmatmul.msk.f32.gmra.mxu1 %vm299_vm3, %v3639_v0  ;;  %7261 = vmatmul.msk.f32.gmra.mxu0 %vm299_vm3, %v3639_v0  ;;  %3606 = vst.msk [vmem:[#allocation3 + $0xf0] sm:$0xff] %vm299_vm3, %v3573_v32 }
 0x3d3   : > { %v3443_v42 = vadd.f32 %v3411_v19, %v8823_v33  ;;  %3134 = vst.msk [vmem:[#allocation4 + $0x80] sm:$0xff] %vm299_vm3, %v3102_v2  ;;  %v2733_v19 = vld [vmem:[#allocation4 + $0xa8] sm:$0xff] }
 0x3d4   : > { %v3506_v1 = vld [vmem:[#allocation4 + $0x70] sm:$0xff]  ;;  %v3012_v28 = vpop.f32.mrf.mxu3 }
 0x3d5   : > { %3475 = vst.msk [vmem:[#allocation4 + $0x78] sm:$0xff] %vm299_vm3, %v3443_v42  ;;  %v3542_v40 = vadd.f32 %v8877_v38, %v3506_v1 }
 0x3d6   : > { %v2670_v8 = vpop.f32.mrf.mxu2 }
 0x3d7   : > { %v2762_v26 = vadd.f32 %v2730_v12, %v2670_v8  ;;  %v3574_v41 = vmax.f32 %v3542_v40, 0.0  ;;  %7186 = vmatmul.msk.f32.gmra.mxu2 %vm299_vm3, %v9077_v56 }
 0x3d8   : > { %v3071_v62 = vld [vmem:[#allocation4 + $0x88] sm:$0xff]  ;;  %7219 = vmatmul.msk.f32.gmra.mxu3 %vm299_vm3, %v4242_v23 }
 0x3d9   : > { %v3103_v18 = vadd.f32 %v3071_v62, %v3009_v44  ;;  %2794 = vst.msk [vmem:[#allocation4 + $0x90] sm:$0xff] %vm299_vm3, %v2762_v26  ;;  %v3640_v33 = vld [vmem:[#allocation3 + $0xef] sm:$0xff] }
 0x3da   : > { %v3412_v57 = vld [vmem:[#allocation4 + $0x80] sm:$0xff]  ;;  %7165 = vmatmul.msk.f32.gmra.mxu1 %vm299_vm3, %v3640_v33  ;;  %7262 = vmatmul.msk.f32.gmra.mxu0 %vm299_vm3, %v3640_v33  ;;  %3607 = vst.msk [vmem:[#allocation3 + $0x108] sm:$0xff] %vm299_vm3, %v3574_v41  ;;  %v9107_v44 = vld [vmem:[#allocation3 + $0x50] sm:$0xff]  ;;  %v9123_v41 = vld [vmem:[#allocation3 + $0x68] sm:$0xff] }
 0x3db   : > { %v3444_v60 = vadd.f32 %v3412_v57, %v8838_v16  ;;  %3135 = vst.msk [vmem:[#allocation4 + $0x88] sm:$0xff] %vm299_vm3, %v3103_v18  ;;  %v4245_v62 = vld [vmem:[#allocation3 + $0x69] sm:$0xff] }
 0x3dc   : > { %v3507_v54 = vld [vmem:[#allocation4 + $0x78] sm:$0xff]  ;;  %v3015_v52 = vpop.f32.mrf.mxu3 }
 0x3dd   : > { %3476 = vst.msk [vmem:[#allocation4 + $0x80] sm:$0xff] %vm299_vm3, %v3444_v60  ;;  %v3543_v49 = vadd.f32 %v8877_v38, %v3507_v54  ;;  %v2734_v60 = vld [vmem:[#allocation4 + $0xb0] sm:$0xff] }
 0x3de   : > { %v2673_v11 = vpop.f32.mrf.mxu2 }
 0x3df   : > { %v2763_v45 = vadd.f32 %v2731_v39, %v2673_v11  ;;  %v3575_v50 = vmax.f32 %v3543_v49, 0.0  ;;  %7187 = vmatmul.msk.f32.gmra.mxu2 %vm299_vm3, %v9092_v55 }
 0x3e0   : > { %v3072_v16 = vld [vmem:[#allocation4 + $0x90] sm:$0xff]  ;;  %7220 = vmatmul.msk.f32.gmra.mxu3 %vm299_vm3, %v4243_v15 }
 0x3e1   : > { %v3104_v59 = vadd.f32 %v3072_v16, %v3012_v28  ;;  %2795 = vst.msk [vmem:[#allocation4 + $0x98] sm:$0xff] %vm299_vm3, %v2763_v45  ;;  %v3641_v21 = vld [vmem:[#allocation3 + $0x107] sm:$0xff] }
 0x3e2   : > { %v3413_v61 = vld [vmem:[#allocation4 + $0x88] sm:$0xff]  ;;  %7166 = vmatmul.msk.f32.gmra.mxu1 %vm299_vm3, %v3641_v21  ;;  %7263 = vmatmul.msk.f32.gmra.mxu0 %vm299_vm3, %v3641_v21  ;;  %3608 = vst.msk [vmem:[#allocation3 + $0x110] sm:$0xff] %vm299_vm3, %v3575_v50  ;;  %v4246_v21 = vld [vmem:[#allocation3 + $0x71] sm:$0xff] }
 0x3e3   : > { %v3445_v46 = vadd.f32 %v3413_v61, %v8860_v20  ;;  %3136 = vst.msk [vmem:[#allocation4 + $0x90] sm:$0xff] %vm299_vm3, %v3104_v59  ;;  %v9139_v59 = vld [vmem:[#allocation3 + $0x70] sm:$0xff] }
 0x3e4   : > { %v3508_v58 = vld [vmem:[#allocation4 + $0x80] sm:$0xff]  ;;  %v3018_v9 = vpop.f32.mrf.mxu3 }
 0x3e5   : > { %3477 = vst.msk [vmem:[#allocation4 + $0x88] sm:$0xff] %vm299_vm3, %v3445_v46  ;;  %v3544_v63 = vadd.f32 %v8877_v38, %v3508_v58 }
 0x3e6   : > { %v2676_v48 = vpop.f32.mrf.mxu2 }
 0x3e7   : > { %v2764_v6 = vadd.f32 %v2732_v5, %v2676_v48  ;;  %v3576_v27 = vmax.f32 %v3544_v63, 0.0  ;;  %7188 = vmatmul.msk.f32.gmra.mxu2 %vm299_vm3, %v9107_v44  ;;  %v2735_v63 = vld [vmem:[#allocation4 + $0xb8] sm:$0xff] }
 0x3e8   : > { %v3073_v20 = vld [vmem:[#allocation4 + $0x98] sm:$0xff]  ;;  %7221 = vmatmul.msk.f32.gmra.mxu3 %vm299_vm3, %v4244_v37  ;;  %v4247_v37 = vld [vmem:[#allocation3 + $0x89] sm:$0xff] }
 0x3e9   : > { %v3105_v14 = vadd.f32 %v3073_v20, %v3015_v52  ;;  %2796 = vst.msk [vmem:[#allocation4 + $0xa0] sm:$0xff] %vm299_vm3, %v2764_v6  ;;  %v3642_v31 = vld [vmem:[#allocation3 + $0x10f] sm:$0xff] }
 0x3ea   : > { %v3414_v34 = vld [vmem:[#allocation4 + $0x90] sm:$0xff]  ;;  %7167 = vmatmul.msk.f32.gmra.mxu1 %vm299_vm3, %v3642_v31  ;;  %7264 = vmatmul.msk.f32.gmra.mxu0 %vm299_vm3, %v3642_v31  ;;  %3609 = vst.msk [vmem:[#allocation3 + $0x128] sm:$0xff] %vm299_vm3, %v3576_v27 }
 0x3eb   : > { %v3446_v32 = vadd.f32 %v3414_v34, %v8888_v4  ;;  %3137 = vst.msk [vmem:[#allocation4 + $0x98] sm:$0xff] %vm299_vm3, %v3105_v14  ;;  %v9155_v34 = vld [vmem:[#allocation3 + $0x88] sm:$0xff] }
 0x3ec   : > { %v3509_v25 = vld [vmem:[#allocation4 + $0x88] sm:$0xff]  ;;  %v3021_v29 = vpop.f32.mrf.mxu3 }
 0x3ed   : > { %3478 = vst.msk [vmem:[#allocation4 + $0x90] sm:$0xff] %vm299_vm3, %v3446_v32  ;;  %v3545_v2 = vadd.f32 %v8877_v38, %v3509_v25 }
 0x3ee   : > { %v2679_v0 = vpop.f32.mrf.mxu2 }
 0x3ef   : > { %v2765_v42 = vadd.f32 %v2733_v19, %v2679_v0  ;;  %v3777_v1 = vpop.f32.mrf.mxu1  ;;  %v9117_v40 = vpop.f32.mrf.mxu0  ;;  %v3577_v4 = vmax.f32 %v3545_v2, 0.0  ;;  %7189 = vmatmul.msk.f32.gmra.mxu2 %vm299_vm3, %v9123_v41  ;;  %v2736_v19 = vld [vmem:[#allocation4 + $0xc0] sm:$0xff] }
 0x3f0   : > { %v3074_v8 = vld [vmem:[#allocation4 + $0xa0] sm:$0xff]  ;;  %3870 = vst.msk [vmem:[#allocation5 + $0x10] sm:$0xff] %vm3867_vm5, %v3777_v1  ;;  %7222 = vmatmul.msk.f32.gmra.mxu3 %vm299_vm3, %v4245_v62  ;;  %v9171_v62 = vld [vmem:[#allocation3 + $0x90] sm:$0xff] }
 0x3f1   : > { %v3106_v12 = vadd.f32 %v3074_v8, %v3018_v9  ;;  %2797 = vst.msk [vmem:[#allocation4 + $0xa8] sm:$0xff] %vm299_vm3, %v2765_v42  ;;  %v3643_v28 = vld [vmem:[#allocation3 + $0x127] sm:$0xff] }
 0x3f2   : > { %v3415_v26 = vld [vmem:[#allocation4 + $0x98] sm:$0xff]  ;;  %7168 = vmatmul.msk.f32.gmra.mxu1 %vm299_vm3, %v3643_v28  ;;  %7265 = vmatmul.msk.f32.gmra.mxu0 %vm299_vm3, %v3643_v28  ;;  %3610 = vst.msk [vmem:[#allocation3 + $0x130] sm:$0xff] %vm299_vm3, %v3577_v4 }
 0x3f3   : > { %v3447_v18 = vadd.f32 %v3415_v26, %v8909_v47  ;;  %3138 = vst.msk [vmem:[#allocation4 + $0xa0] sm:$0xff] %vm299_vm3, %v3106_v12 }
 0x3f4   : > { %v3510_v33 = vld [vmem:[#allocation4 + $0x90] sm:$0xff]  ;;  %v3024_v54 = vpop.f32.mrf.mxu3 }
 0x3f5   : > { %3479 = vst.msk [vmem:[#allocation4 + $0x98] sm:$0xff] %vm299_vm3, %v3447_v18  ;;  %v3546_v57 = vadd.f32 %v8877_v38, %v3510_v33  ;;  %v4248_v18 = vld [vmem:[#allocation3 + $0x91] sm:$0xff] }
 0x3f6   : > { %v2682_v23 = vpop.f32.mrf.mxu2 }
 0x3f7   : > { %v2766_v49 = vadd.f32 %v2734_v60, %v2682_v23  ;;  %v3780_v11 = vpop.f32.mrf.mxu1  ;;  %v9133_v39 = vpop.f32.mrf.mxu0  ;;  %v3578_v47 = vmax.f32 %v3546_v57, 0.0  ;;  %7190 = vmatmul.msk.f32.gmra.mxu2 %vm299_vm3, %v9139_v59 }
 0x3f8   : > { %v3075_v52 = vld [vmem:[#allocation4 + $0xa8] sm:$0xff]  ;;  %3871 = vst.msk [vmem:[#allocation5 + $0x18] sm:$0xff] %vm3867_vm5, %v3780_v11  ;;  %7223 = vmatmul.msk.f32.gmra.mxu3 %vm299_vm3, %v4246_v21 }
 0x3f9   : > { %v3107_v45 = vadd.f32 %v3075_v52, %v3021_v29  ;;  %2798 = vst.msk [vmem:[#allocation4 + $0xb0] sm:$0xff] %vm299_vm3, %v2766_v49  ;;  %v3644_v50 = vld [vmem:[#allocation3 + $0x12f] sm:$0xff] }
 0x3fa   : > { %v3416_v16 = vld [vmem:[#allocation4 + $0xa0] sm:$0xff]  ;;  %7169 = vmatmul.msk.f32.gmra.mxu1 %vm299_vm3, %v3644_v50  ;;  %7266 = vmatmul.msk.f32.gmra.mxu0 %vm299_vm3, %v3644_v50  ;;  %3611 = vst.msk [vmem:[#allocation3 + $0x148] sm:$0xff] %vm299_vm3, %v3578_v47 }
 0x3fb   : > { %v3448_v61 = vadd.f32 %v3416_v16, %v8929_v3  ;;  %3139 = vst.msk [vmem:[#allocation4 + $0xa8] sm:$0xff] %vm299_vm3, %v3107_v45 }
 0x3fc   : > { %v3511_v15 = vld [vmem:[#allocation4 + $0x98] sm:$0xff]  ;;  %v3027_v48 = vpop.f32.mrf.mxu3 }
 0x3fd   : > { %3480 = vst.msk [vmem:[#allocation4 + $0xa0] sm:$0xff] %vm299_vm3, %v3448_v61  ;;  %v3547_v46 = vadd.f32 %v8877_v38, %v3511_v15  ;;  %v4249_v61 = vld [vmem:[#allocation3 + $0xa9] sm:$0xff] }
 0x3fe   : > { %v2685_v58 = vpop.f32.mrf.mxu2 }
 0x3ff   : > { %v2767_v5 = vadd.f32 %v2735_v63, %v2685_v58  ;;  %v3783_v9 = vpop.f32.mrf.mxu1  ;;  %v9149_v6 = vpop.f32.mrf.mxu0  ;;  %v3579_v3 = vmax.f32 %v3547_v46, 0.0  ;;  %7191 = vmatmul.msk.f32.gmra.mxu2 %vm299_vm3, %v9155_v34  ;;  %v9199_v58 = vld [vmem:[%s10207_s2] ss:$0 sm:$0xff] }
 0x400   : > { %v3076_v27 = vld [vmem:[#allocation4 + $0xb0] sm:$0xff]  ;;  %3872 = vst.msk [vmem:[#allocation5 + $0x20] sm:$0xff] %vm3867_vm5, %v3783_v9  ;;  %7224 = vmatmul.msk.f32.gmra.mxu3 %vm299_vm3, %v4247_v37 }
 0x401   : > { %v3108_v20 = vadd.f32 %v3076_v27, %v3024_v54  ;;  %2799 = vst.msk [vmem:[#allocation4 + $0xb8] sm:$0xff] %vm299_vm3, %v2767_v5  ;;  %v3645_v14 = vld [vmem:[#allocation3 + $0x147] sm:$0xff]  ;;  %v2738_v5 = vld [vmem:[#allocation4 + $0xd0] sm:$0xff] }
 0x402   : > { %v3417_v31 = vld [vmem:[#allocation4 + $0xa8] sm:$0xff]  ;;  %7170 = vmatmul.msk.f32.gmra.mxu1 %vm299_vm3, %v3645_v14  ;;  %7267 = vmatmul.msk.f32.gmra.mxu0 %vm299_vm3, %v3645_v14  ;;  %3612 = vst.msk [vmem:[#allocation3 + $0x150] sm:$0xff] %vm299_vm3, %v3579_v3 }
 0x403   : > { %v3449_v32 = vadd.f32 %v3417_v31, %v8945_v30  ;;  %3140 = vst.msk [vmem:[#allocation4 + $0xb0] sm:$0xff] %vm299_vm3, %v3108_v20  ;;  %v2737_v54 = vld [vmem:[#allocation4 + $0xc8] sm:$0xff] }
 0x404   : > { %v3512_v25 = vld [vmem:[#allocation4 + $0xa0] sm:$0xff]  ;;  %v3030_v29 = vpop.f32.mrf.mxu3 }
 0x405   : > { %3481 = vst.msk [vmem:[#allocation4 + $0xa8] sm:$0xff] %vm299_vm3, %v3449_v32  ;;  %v3548_v2 = vadd.f32 %v8877_v38, %v3512_v25  ;;  %v9208_v25 = vld [vmem:[#allocation3 + $0xb0] sm:$0xff] }
 0x406   : > { %v2688_v0 = vpop.f32.mrf.mxu2 }
 0x407   : > { %v2768_v42 = vadd.f32 %v2736_v19, %v2688_v0  ;;  %v3786_v1 = vpop.f32.mrf.mxu1  ;;  %v9165_v4 = vpop.f32.mrf.mxu0  ;;  %v3580_v30 = vmax.f32 %v3548_v2, 0.0  ;;  %7192 = vmatmul.msk.f32.gmra.mxu2 %vm299_vm3, %v9171_v62  ;;  %v4250_v2 = vld [vmem:[#allocation3 + $0xb1] sm:$0xff] }
 0x408   : > { %v3077_v8 = vld [vmem:[#allocation4 + $0xb8] sm:$0xff]  ;;  %3873 = vst.msk [vmem:[#allocation5 + $0x28] sm:$0xff] %vm3867_vm5, %v3786_v1  ;;  %7225 = vmatmul.msk.f32.gmra.mxu3 %vm299_vm3, %v4248_v18 }
 0x409   : > { %v3109_v12 = vadd.f32 %v3077_v8, %v3027_v48  ;;  %2800 = vst.msk [vmem:[#allocation4 + $0xc0] sm:$0xff] %vm299_vm3, %v2768_v42  ;;  %v3646_v28 = vld [vmem:[#allocation3 + $0x14f] sm:$0xff]  ;;  %v2739_v1 = vld [vmem:[#allocation4 + $0xd8] sm:$0xff] }
 0x40a   : > { %v3418_v26 = vld [vmem:[#allocation4 + $0xb0] sm:$0xff]  ;;  %7171 = vmatmul.msk.f32.gmra.mxu1 %vm299_vm3, %v3646_v28  ;;  %7268 = vmatmul.msk.f32.gmra.mxu0 %vm299_vm3, %v3646_v28  ;;  %3613 = vst.msk [vmem:[#allocation3 + $0x168] sm:$0xff] %vm299_vm3, %v3580_v30 }
 0x40b   : > { %v3450_v33 = vadd.f32 %v3418_v26, %v8961_v43  ;;  %3141 = vst.msk [vmem:[#allocation4 + $0xb8] sm:$0xff] %vm299_vm3, %v3109_v12 }
 0x40c   : > { %v3513_v57 = vld [vmem:[#allocation4 + $0xa8] sm:$0xff]  ;;  %v3033_v49 = vpop.f32.mrf.mxu3 }
 0x40d   : > { %3482 = vst.msk [vmem:[#allocation4 + $0xb0] sm:$0xff] %vm299_vm3, %v3450_v33  ;;  %v3549_v23 = vadd.f32 %v8877_v38, %v3513_v57  ;;  %v9187_v38 = vld [vmem:[#allocation3 + $0xa8] sm:$0xff] }
 0x40e   : > { %v2691_v60 = vpop.f32.mrf.mxu2 }
 0x40f   : > { %v2769_v11 = vadd.f32 %v2737_v54, %v2691_v60  ;;  %v3789_v47 = vpop.f32.mrf.mxu1  ;;  %v9181_v52 = vpop.f32.mrf.mxu0  ;;  %v3581_v43 = vmax.f32 %v3549_v23, 0.0  ;;  %7193 = vmatmul.msk.f32.gmra.mxu2 %vm299_vm3, %v9187_v38  ;;  %v9224_v23 = vld [vmem:[#allocation3 + $0xc8] sm:$0xff] }
 0x410   : > { %v3078_v45 = vld [vmem:[#allocation4 + $0xc0] sm:$0xff]  ;;  %3874 = vst.msk [vmem:[#allocation5 + $0x30] sm:$0xff] %vm3867_vm5, %v3789_v47  ;;  %7226 = vmatmul.msk.f32.gmra.mxu3 %vm299_vm3, %v4249_v61  ;;  %v4251_v60 = vld [vmem:[#allocation3 + $0xc9] sm:$0xff] }
 0x411   : > { %v3110_v50 = vadd.f32 %v3078_v45, %v3030_v29  ;;  %2801 = vst.msk [vmem:[#allocation4 + $0xc8] sm:$0xff] %vm299_vm3, %v2769_v11  ;;  %v3647_v16 = vld [vmem:[#allocation3 + $0x167] sm:$0xff] }
 0x412   : > { %v3419_v21 = vld [vmem:[#allocation4 + $0xb8] sm:$0xff]  ;;  %7172 = vmatmul.msk.f32.gmra.mxu1 %vm299_vm3, %v3647_v16  ;;  %7269 = vmatmul.msk.f32.gmra.mxu0 %vm299_vm3, %v3647_v16  ;;  %3614 = vst.msk [vmem:[#allocation3 + $0x170] sm:$0xff] %vm299_vm3, %v3581_v43  ;;  %v2740_v43 = vld [vmem:[#allocation4 + $0xe0] sm:$0xff] }
 0x413   : > { %v3451_v15 = vadd.f32 %v3419_v21, %v8975_v10  ;;  %3142 = vst.msk [vmem:[#allocation4 + $0xc0] sm:$0xff] %vm299_vm3, %v3110_v50 }
 0x414   : > { %v3514_v46 = vld [vmem:[#allocation4 + $0xb0] sm:$0xff]  ;;  %v3036_v10 = vpop.f32.mrf.mxu3 }
 0x415   : > { %3483 = vst.msk [vmem:[#allocation4 + $0xb8] sm:$0xff] %vm299_vm3, %v3451_v15  ;;  %v3550_v63 = vadd.f32 %v9199_v58, %v3514_v46 }
 0x416   : > { %v2694_v48 = vpop.f32.mrf.mxu2 }
 0x417   : > { %v2770_v9 = vadd.f32 %v2738_v5, %v2694_v48  ;;  %v3792_v3 = vpop.f32.mrf.mxu1  ;;  %v9202_v27 = vpop.f32.mrf.mxu0  ;;  %v3582_v20 = vmax.f32 %v3550_v63, 0.0  ;;  %7194 = vmatmul.msk.f32.gmra.mxu2 %vm299_vm3, %v9208_v25  ;;  %v9240_v48 = vld [vmem:[#allocation3 + $0xd0] sm:$0xff] }
 0x418   : > { %v3079_v14 = vld [vmem:[#allocation4 + $0xc8] sm:$0xff]  ;;  %3875 = vst.msk [vmem:[#allocation5 + $0x38] sm:$0xff] %vm3867_vm5, %v3792_v3  ;;  %7227 = vmatmul.msk.f32.gmra.mxu3 %vm299_vm3, %v4250_v2  ;;  %v4252_v5 = vld [vmem:[#allocation3 + $0xd1] sm:$0xff] }
 0x419   : > { %v3111_v31 = vadd.f32 %v3079_v14, %v3033_v49  ;;  %2802 = vst.msk [vmem:[#allocation4 + $0xd0] sm:$0xff] %vm299_vm3, %v2770_v9  ;;  %v3648_v37 = vld [vmem:[#allocation3 + $0x16f] sm:$0xff] }
 0x41a   : > { %v3420_v32 = vld [vmem:[#allocation4 + $0xc0] sm:$0xff]  ;;  %7173 = vmatmul.msk.f32.gmra.mxu1 %vm299_vm3, %v3648_v37  ;;  %7270 = vmatmul.msk.f32.gmra.mxu0 %vm299_vm3, %v3648_v37  ;;  %3615 = vst.msk [vmem:[#allocation3 + $0x188] sm:$0xff] %vm299_vm3, %v3582_v20 }
 0x41b   : > { %v3452_v0 = vadd.f32 %v3420_v32, %v8987_v35  ;;  %3143 = vst.msk [vmem:[#allocation4 + $0xc8] sm:$0xff] %vm299_vm3, %v3111_v31  ;;  %v7314_v20 = vld [vmem:[%s10208_s3 + $0x28] sm:$0xff]  ;;  %v2741_v31 = vld [vmem:[#allocation4 + $0xe8] sm:$0xff] }
 0x41c   : > { %v3515_v19 = vld [vmem:[#allocation4 + $0xb8] sm:$0xff]  ;;  %v3039_v30 = vpop.f32.mrf.mxu3  ;;  %5401 = vmatpush.msra.mxu2 %v7314_v20 }
 0x41d   : > { %3484 = vst.msk [vmem:[#allocation4 + $0xc0] sm:$0xff] %vm299_vm3, %v3452_v0  ;;  %v3551_v29 = vadd.f32 %v9199_v58, %v3515_v19 }
 0x41e   : > { %v2697_v42 = vpop.f32.mrf.mxu2 }
 0x41f   : > { %v2771_v8 = vadd.f32 %v2739_v1, %v2697_v42  ;;  %v3795_v12 = vpop.f32.mrf.mxu1  ;;  %v9218_v28 = vpop.f32.mrf.mxu0  ;;  %v3583_v35 = vmax.f32 %v3551_v29, 0.0  ;;  %7195 = vmatmul.msk.f32.gmra.mxu2 %vm299_vm3, %v9224_v23 }
 0x420   : > { %v3080_v26 = vld [vmem:[#allocation4 + $0xd0] sm:$0xff]  ;;  %3876 = vst.msk [vmem:[#allocation5 + $0x40] sm:$0xff] %vm3867_vm5, %v3795_v12  ;;  %7228 = vmatmul.msk.f32.gmra.mxu3 %vm299_vm3, %v4251_v60 }
 0x421   : > { %v3112_v18 = vadd.f32 %v3080_v26, %v3036_v10  ;;  %2803 = vst.msk [vmem:[#allocation4 + $0xd8] sm:$0xff] %vm299_vm3, %v2771_v8  ;;  %v3649_v33 = vld [vmem:[#allocation3 + $0x187] sm:$0xff] }
 0x422   : > { %v3421_v57 = vld [vmem:[#allocation4 + $0xc8] sm:$0xff]  ;;  %7174 = vmatmul.msk.f32.gmra.mxu1 %vm299_vm3, %v3649_v33  ;;  %7271 = vmatmul.msk.f32.gmra.mxu0 %vm299_vm3, %v3649_v33  ;;  %3616 = vst.msk [vmem:[#allocation3 + $0x190] sm:$0xff] %vm299_vm3, %v3583_v35 }
 0x423   : > { %v3453_v54 = vadd.f32 %v3421_v57, %v9003_v13  ;;  %3144 = vst.msk [vmem:[#allocation4 + $0xd0] sm:$0xff] %vm299_vm3, %v3112_v18  ;;  %v4253_v8 = vld [vmem:[#allocation3 + $0xe9] sm:$0xff] }
 0x424   : > { %v3516_v49 = vld [vmem:[#allocation4 + $0xc0] sm:$0xff]  ;;  %v3042_v45 = vpop.f32.mrf.mxu3  ;;  %v7347_v18 = vld [vmem:[%s10208_s3 + $0x30] sm:$0xff]  ;;  %v2742_v57 = vld [vmem:[#allocation4 + $0xf0] sm:$0xff] }
 0x425   : > { %3485 = vst.msk [vmem:[#allocation4 + $0xc8] sm:$0xff] %vm299_vm3, %v3453_v54  ;;  %v3552_v11 = vadd.f32 %v9199_v58, %v3516_v49  ;;  %5741 = vmatpush.msra.mxu3 %v7347_v18 }
 0x426   : > { %v2700_v47 = vpop.f32.mrf.mxu2 }
 0x427   : > { %v2772_v50 = vadd.f32 %v2740_v43, %v2700_v47  ;;  %v3798_v16 = vpop.f32.mrf.mxu1  ;;  %v9234_v21 = vpop.f32.mrf.mxu0  ;;  %v3584_v13 = vmax.f32 %v3552_v11, 0.0  ;;  %7196 = vmatmul.msk.f32.gmra.mxu2 %vm299_vm3, %v9240_v48 }
 0x428   : > { %v3081_v61 = vld [vmem:[#allocation4 + $0xd8] sm:$0xff]  ;;  %3877 = vst.msk [vmem:[#allocation5 + $0x48] sm:$0xff] %vm3867_vm5, %v3798_v16  ;;  %7229 = vmatmul.msk.f32.gmra.mxu3 %vm299_vm3, %v4252_v5  ;;  %v9278_v16 = vld [vmem:[#allocation3 + $0xf0] sm:$0xff] }
 0x429   : > { %v3113_v15 = vadd.f32 %v3081_v61, %v3039_v30  ;;  %2804 = vst.msk [vmem:[#allocation4 + $0xe0] sm:$0xff] %vm299_vm3, %v2772_v50  ;;  %v3650_v46 = vld [vmem:[#allocation3 + $0x18f] sm:$0xff]  ;;  %v2743_v5 = vld [vmem:[#allocation4 + $0xf8] sm:$0xff] }
 0x42a   : > { %v3422_v63 = vld [vmem:[#allocation4 + $0xd0] sm:$0xff]  ;;  %7175 = vmatmul.msk.f32.gmra.mxu1 %vm299_vm3, %v3650_v46  ;;  %7272 = vmatmul.msk.f32.gmra.mxu0 %vm299_vm3, %v3650_v46  ;;  %3617 = vst.msk [vmem:[#allocation3 + $0x1a8] sm:$0xff] %vm299_vm3, %v3584_v13  ;;  %v9259_v30 = vld [vmem:[#allocation3 + $0xe8] sm:$0xff] }
 0x42b   : > { %v3454_v10 = vadd.f32 %v3422_v63, %v9019_v24  ;;  %3145 = vst.msk [vmem:[#allocation4 + $0xd8] sm:$0xff] %vm299_vm3, %v3113_v15  ;;  %v4254_v13 = vld [vmem:[#allocation3 + $0xf1] sm:$0xff] }
 0x42c   : > { %v3517_v9 = vld [vmem:[#allocation4 + $0xc8] sm:$0xff]  ;;  %v3045_v37 = vpop.f32.mrf.mxu3 }
 0x42d   : > { %3486 = vst.msk [vmem:[#allocation4 + $0xd0] sm:$0xff] %vm299_vm3, %v3454_v10  ;;  %v3553_v3 = vadd.f32 %v9199_v58, %v3517_v9 }
 0x42e   : > { %v2703_v14 = vpop.f32.mrf.mxu2 }
 0x42f   : > { %v2773_v24 = vadd.f32 %v2741_v31, %v2703_v14  ;;  %v3801_v32 = vpop.f32.mrf.mxu1  ;;  %v9253_v2 = vpop.f32.mrf.mxu0  ;;  %v3585_v0 = vmax.f32 %v3553_v3, 0.0  ;;  %7197 = vmatmul.msk.f32.gmra.mxu2 %vm299_vm3, %v9259_v30 }
 0x430   : > { %v3082_v19 = vld [vmem:[#allocation4 + $0xe0] sm:$0xff]  ;;  %3878 = vst.msk [vmem:[#allocation5 + $0x50] sm:$0xff] %vm3867_vm5, %v3801_v32  ;;  %7230 = vmatmul.msk.f32.gmra.mxu3 %vm299_vm3, %v4253_v8  ;;  %v9294_v32 = vld [vmem:[#allocation3 + $0x108] sm:$0xff] }
 0x431   : > { %v3114_v29 = vadd.f32 %v3082_v19, %v3042_v45  ;;  %2805 = vst.msk [vmem:[#allocation4 + $0xe8] sm:$0xff] %vm299_vm3, %v2773_v24  ;;  %v3651_v42 = vld [vmem:[#allocation3 + $0x1a7] sm:$0xff] }
 0x432   : > { %v3423_v1 = vld [vmem:[#allocation4 + $0xd8] sm:$0xff]  ;;  %7176 = vmatmul.msk.f32.gmra.mxu1 %vm299_vm3, %v3651_v42  ;;  %7273 = vmatmul.msk.f32.gmra.mxu0 %vm299_vm3, %v3651_v42  ;;  %3618 = vst.msk [vmem:[#allocation3 + $0x1b0] sm:$0xff] %vm299_vm3, %v3585_v0  ;;  %v4255_v0 = vld [vmem:[#allocation3 + $0x109] sm:$0xff] }
 0x433   : > { %v3455_v12 = vadd.f32 %v3423_v1, %v9033_v51  ;;  %3146 = vst.msk [vmem:[#allocation4 + $0xe0] sm:$0xff] %vm299_vm3, %v3114_v29  ;;  %v7380_v29 = vld [vmem:[%s10208_s3 + $0x38] sm:$0xff] }
 0x434   : > { %v3518_v35 = vld [vmem:[#allocation4 + $0xd0] sm:$0xff]  ;;  %v3048_v60 = vpop.f32.mrf.mxu3  ;;  %6080 = vmatpush.msra.mxu0 %v7380_v29 }
 0x435   : > { %3487 = vst.msk [vmem:[#allocation4 + $0xd8] sm:$0xff] %vm299_vm3, %v3455_v12  ;;  %v3554_v26 = vadd.f32 %v9199_v58, %v3518_v35  ;;  %v4143_v12 = vld [vmem:[#allocation5] sm:$0xff] }
 0x436   : > { %v2706_v33 = vpop.f32.mrf.mxu2 }
 0x437   : > { %v2774_v51 = vadd.f32 %v2742_v57, %v2706_v33  ;;  %v3804_v54 = vpop.f32.mrf.mxu1  ;;  %v9272_v49 = vpop.f32.mrf.mxu0  ;;  %v3586_v11 = vmax.f32 %v3554_v26, 0.0  ;;  %7198 = vmatmul.msk.f32.gmra.mxu2 %vm299_vm3, %v9278_v16 }
 0x438   : > { %v3083_v47 = vld [vmem:[#allocation4 + $0xe8] sm:$0xff]  ;;  %3879 = vst.msk [vmem:[#allocation5 + $0x58] sm:$0xff] %vm3867_vm5, %v3804_v54  ;;  %7231 = vmatmul.msk.f32.gmra.mxu3 %vm299_vm3, %v4254_v13 }
 0x439   : > { %v3115_v43 = vadd.f32 %v3083_v47, %v3045_v37  ;;  %2806 = vst.msk [vmem:[#allocation4 + $0xf0] sm:$0xff] %vm299_vm3, %v2774_v51  ;;  %v3652_v45 = vld [vmem:[#allocation3 + $0x1af] sm:$0xff] }
 0x43a   : > { %v3424_v50 = vld [vmem:[#allocation4 + $0xe0] sm:$0xff]  ;;  %7177 = vmatmul.msk.f32.gmra.mxu1 %vm299_vm3, %v3652_v45  ;;  %7274 = vmatmul.msk.f32.gmra.mxu0 %vm299_vm3, %v3652_v45  ;;  %3619 = vst.msk [vmem:[#allocation3 + $0x1c8] sm:$0xff] %vm299_vm3, %v3586_v11  ;;  %v9313_v11 = vld [vmem:[#allocation3 + $0x110] sm:$0xff]  ;;  %v7413_v45 = vld [vmem:[%s10208_s3 + $0x40] sm:$0xff] }
 0x43b   : > { %v3456_v61 = vadd.f32 %v3424_v50, %v9046_v7  ;;  %3147 = vst.msk [vmem:[#allocation4 + $0xe8] sm:$0xff] %vm299_vm3, %v3115_v43  ;;  %v4256_v47 = vld [vmem:[#allocation3 + $0x111] sm:$0xff]  ;;  %6419 = vmatpush.msra.mxu1 %v7413_v45 }
 0x43c   : > { %v3519_v15 = vld [vmem:[#allocation4 + $0xd8] sm:$0xff]  ;;  %v3051_v10 = vpop.f32.mrf.mxu3 }
 0x43d   : > { %3488 = vst.msk [vmem:[#allocation4 + $0xe0] sm:$0xff] %vm299_vm3, %v3456_v61  ;;  %v3555_v46 = vadd.f32 %v9199_v58, %v3519_v15  ;;  %v4144_v15 = vld [vmem:[#allocation5 + $0x8] sm:$0xff] }
 0x43e   : > { %v2709_v63 = vpop.f32.mrf.mxu2 }
 0x43f   : > { %v2775_v9 = vadd.f32 %v2743_v5, %v2709_v63  ;;  %v3807_v3 = vpop.f32.mrf.mxu1  ;;  %v9288_v20 = vpop.f32.mrf.mxu0  ;;  %v3587_v7 = vmax.f32 %v3555_v46, 0.0  ;;  %7199 = vmatmul.msk.f32.gmra.mxu2 %vm299_vm3, %v9294_v32 }
 0x440   : > { %v3084_v14 = vld [vmem:[#allocation4 + $0xf0] sm:$0xff]  ;;  %3880 = vst.msk [vmem:[#allocation5 + $0x60] sm:$0xff] %vm3867_vm5, %v3807_v3  ;;  %7232 = vmatmul.msk.f32.gmra.mxu3 %vm299_vm3, %v4255_v0 }
 0x441   : > { %v3116_v31 = vadd.f32 %v3084_v14, %v3048_v60  ;;  %2807 = vst.msk [vmem:[#allocation4 + $0xf8] sm:$0xff] %vm299_vm3, %v2775_v9  ;;  %v3653_v37 = vld [vmem:[#allocation3 + $0x1c7] sm:$0xff] }
 0x442   : > { %v3425_v24 = vld [vmem:[#allocation4 + $0xe8] sm:$0xff]  ;;  %7178 = vmatmul.msk.f32.gmra.mxu1 %vm299_vm3, %v3653_v37  ;;  %7275 = vmatmul.msk.f32.gmra.mxu0 %vm299_vm3, %v3653_v37  ;;  %3620 = vst.msk [vmem:[#allocation3 + $0x1d0] sm:$0xff] %vm299_vm3, %v3587_v7 }
 0x443   : > { %v3457_v19 = vadd.f32 %v3425_v24, %v9065_v36  ;;  %3148 = vst.msk [vmem:[#allocation4 + $0xf0] sm:$0xff] %vm299_vm3, %v3116_v31  ;;  %v9330_v14 = vld [vmem:[#allocation3 + $0x128] sm:$0xff] }
 0x444   : > { %v3520_v42 = vld [vmem:[#allocation4 + $0xe0] sm:$0xff]  ;;  %v4386_v36 = vpop.f32.mrf.mxu3  ;;  %v4257_v31 = vld [vmem:[#allocation3 + $0x129] sm:$0xff] }
 0x445   : > { %3489 = vst.msk [vmem:[#allocation4 + $0xe8] sm:$0xff] %vm299_vm3, %v3457_v19  ;;  %v3556_v1 = vadd.f32 %v9199_v58, %v3520_v42  ;;  %v4145_v42 = vld [vmem:[#allocation5 + $0x10] sm:$0xff] }
 0x446   : > { %v4047_v8 = vpop.f32.mrf.mxu2 }
 0x447   : > { %v3810_v35 = vpop.f32.mrf.mxu1  ;;  %v4175_v26 = vadd.f32 %v4143_v12, %v4047_v8  ;;  %v3588_v18 = vmax.f32 %v3556_v1, 0.0  ;;  %v9309_v60 = vpop.f32.mrf.mxu0  ;;  %7200 = vmatmul.msk.f32.gmra.mxu2 %vm299_vm3, %v9313_v11 }
 0x448   : > { %v3085_v33 = vld [vmem:[#allocation4 + $0xf8] sm:$0xff]  ;;  %3881 = vst.msk [vmem:[#allocation5 + $0x68] sm:$0xff] %vm3867_vm5, %v3810_v35  ;;  %7233 = vmatmul.msk.f32.gmra.mxu3 %vm299_vm3, %v4256_v47 }
 0x449   : > { %v3117_v57 = vadd.f32 %v3085_v33, %v3051_v10  ;;  %4207 = vst.msk [vmem:[#allocation5] sm:$0xff] %vm3867_vm5, %v4175_v26  ;;  %v3654_v51 = vld [vmem:[#allocation3 + $0x1cf] sm:$0xff] }
 0x44a   : > { %v3426_v54 = vld [vmem:[#allocation4 + $0xf0] sm:$0xff]  ;;  %7179 = vmatmul.msk.f32.gmra.mxu1 %vm299_vm3, %v3654_v51  ;;  %7276 = vmatmul.msk.f32.gmra.mxu0 %vm299_vm3, %v3654_v51  ;;  %3621 = vst.msk [vmem:[#allocation3 + $0x1e8] sm:$0xff] %vm299_vm3, %v3588_v18 }
 0x44b   : > { %v3458_v43 = vadd.f32 %v3426_v54, %v9085_v53  ;;  %3149 = vst.msk [vmem:[#allocation4 + $0xf8] sm:$0xff] %vm299_vm3, %v3117_v57  ;;  %v9346_v18 = vld [vmem:[#allocation3 + $0x130] sm:$0xff] }
 0x44c   : > { %v3521_v50 = vld [vmem:[#allocation4 + $0xe8] sm:$0xff]  ;;  %v4389_v53 = vpop.f32.mrf.mxu3  ;;  %v4258_v33 = vld [vmem:[#allocation3 + $0x131] sm:$0xff] }
 0x44d   : > { %3490 = vst.msk [vmem:[#allocation4 + $0xf0] sm:$0xff] %vm299_vm3, %v3458_v43  ;;  %v3557_v13 = vadd.f32 %v9199_v58, %v3521_v50  ;;  %v4146_v50 = vld [vmem:[#allocation5 + $0x18] sm:$0xff] }
 0x44e   : > { %v4050_v61 = vpop.f32.mrf.mxu2 }
 0x44f   : > { %v3813_v46 = vpop.f32.mrf.mxu1  ;;  %v4176_v63 = vadd.f32 %v4144_v15, %v4050_v61  ;;  %v3589_v5 = vmax.f32 %v3557_v13, 0.0  ;;  %v9335_v24 = vpop.f32.mrf.mxu0  ;;  %7201 = vmatmul.msk.f32.gmra.mxu2 %vm299_vm3, %v9330_v14 }
 0x450   : > { %v4482_v10 = vld [vmem:[#allocation5] sm:$0xff]  ;;  %3882 = vst.msk [vmem:[#allocation5 + $0x70] sm:$0xff] %vm3867_vm5, %v3813_v46  ;;  %7234 = vmatmul.msk.f32.gmra.mxu3 %vm299_vm3, %v4257_v31 }
 0x451   : > { %v4514_v9 = vadd.f32 %v4482_v10, %v4386_v36  ;;  %4208 = vst.msk [vmem:[#allocation5 + $0x8] sm:$0xff] %vm3867_vm5, %v4176_v63  ;;  %v3655_v3 = vld [vmem:[#allocation3 + $0x1e7] sm:$0xff] }
 0x452   : > { %v3427_v7 = vld [vmem:[#allocation4 + $0xf8] sm:$0xff]  ;;  %7180 = vmatmul.msk.f32.gmra.mxu1 %vm299_vm3, %v3655_v3  ;;  %7277 = vmatmul.msk.f32.gmra.mxu0 %vm299_vm3, %v3655_v3  ;;  %3622 = vst.msk [vmem:[#allocation3 + $0x1f0] sm:$0xff] %vm299_vm3, %v3589_v5  ;;  %v4259_v5 = vld [vmem:[#allocation3 + $0x149] sm:$0xff] }
 0x453   : > { %v3459_v37 = vadd.f32 %v3427_v7, %v9101_v17  ;;  %4546 = vst.msk [vmem:[#allocation5] sm:$0xff] %vm3867_vm5, %v4514_v9  ;;  %v4147_v7 = vld [vmem:[#allocation5 + $0x20] sm:$0xff] }
 0x454   : > { %v3522_v0 = vld [vmem:[#allocation4 + $0xf0] sm:$0xff]  ;;  %v4392_v1 = vpop.f32.mrf.mxu3 }
 0x455   : > { %3491 = vst.msk [vmem:[#allocation4 + $0xf8] sm:$0xff] %vm299_vm3, %v3459_v37  ;;  %v3558_v19 = vadd.f32 %v9199_v58, %v3522_v0 }
 0x456   : > { %v4053_v29 = vpop.f32.mrf.mxu2 }
 0x457   : > { %v3816_v8 = vpop.f32.mrf.mxu1  ;;  %v4177_v12 = vadd.f32 %v4145_v42, %v4053_v29  ;;  %v3590_v17 = vmax.f32 %v3558_v19, 0.0  ;;  %7202 = vmatmul.msk.f32.gmra.mxu2 %vm299_vm3, %v9346_v18  ;;  %v9354_v47 = vpop.f32.mrf.mxu0 }
 0x458   : > { %v4483_v36 = vld [vmem:[#allocation5 + $0x8] sm:$0xff]  ;;  %3883 = vst.msk [vmem:[#allocation5 + $0x78] sm:$0xff] %vm3867_vm5, %v3816_v8  ;;  %7235 = vmatmul.msk.f32.gmra.mxu3 %vm299_vm3, %v4258_v33 }
 0x459   : > { %v4515_v35 = vadd.f32 %v4483_v36, %v4389_v53  ;;  %4209 = vst.msk [vmem:[#allocation5 + $0x10] sm:$0xff] %vm3867_vm5, %v4177_v12  ;;  %v3656_v26 = vld [vmem:[#allocation3 + $0x1ef] sm:$0xff] }
 0x45a   : > { %7181 = vmatmul.msk.f32.gmra.mxu1 %vm299_vm3, %v3656_v26  ;;  %7278 = vmatmul.msk.f32.gmra.mxu0 %vm299_vm3, %v3656_v26  ;;  %3623 = vst.msk [vmem:[#allocation3 + $0x208] sm:$0xff] %vm299_vm3, %v3590_v17  ;;  %v4821_v57 = vld [vmem:[#allocation5] sm:$0xff]  ;;  %v4148_v36 = vld [vmem:[#allocation5 + $0x28] sm:$0xff] }
 0x45b   : > { %4547 = vst.msk [vmem:[#allocation5 + $0x8] sm:$0xff] %vm3867_vm5, %v4515_v35  ;;  %v4853_v51 = vadd.f32 %v4821_v57, %v9117_v40 }
 0x45c   : > { %v3523_v54 = vld [vmem:[#allocation4 + $0xf8] sm:$0xff]  ;;  %v4395_v13 = vpop.f32.mrf.mxu3 }
 0x45d   : > { %v3559_v43 = vadd.f32 %v9199_v58, %v3523_v54  ;;  %4885 = vst.msk [vmem:[#allocation5] sm:$0xff] %vm3867_vm5, %v4853_v51  ;;  %v9363_v58 = vld [vmem:[#allocation3 + $0x148] sm:$0xff] }
 0x45e   : > { %v4056_v45 = vpop.f32.mrf.mxu2  ;;  %v4261_v54 = vld [vmem:[#allocation3 + $0x169] sm:$0xff] }
 0x45f   : > { %v3819_v61 = vpop.f32.mrf.mxu1  ;;  %v4178_v15 = vadd.f32 %v4146_v50, %v4056_v45  ;;  %v3591_v53 = vmax.f32 %v3559_v43, 0.0  ;;  %7203 = vmatmul.msk.f32.gmra.mxu2 %vm299_vm3, %v9363_v58  ;;  %v9372_v31 = vpop.f32.mrf.mxu0 }
 0x460   : > { %v4484_v46 = vld [vmem:[#allocation5 + $0x10] sm:$0xff]  ;;  %3884 = vst.msk [vmem:[#allocation5 + $0x80] sm:$0xff] %vm3867_vm5, %v3819_v61  ;;  %7236 = vmatmul.msk.f32.gmra.mxu3 %vm299_vm3, %v4259_v5 }
 0x461   : > { %v4516_v63 = vadd.f32 %v4484_v46, %v4392_v1  ;;  %4210 = vst.msk [vmem:[#allocation5 + $0x18] sm:$0xff] %vm3867_vm5, %v4178_v15  ;;  %v4608_v40 = vld [vmem:[#allocation3 + $0x207] sm:$0xff]  ;;  %v4260_v1 = vld [vmem:[#allocation3 + $0x151] sm:$0xff] }
 0x462   : > { %7279 = vmatmul.msk.f32.gmra.mxu0 %vm299_vm3, %v4608_v40  ;;  %7282 = vmatmul.msk.f32.vlgmr.msrb.gmra.mxu1 %vm299_vm3, %v9062_v22  ;;  %3624 = vst.msk [vmem:[#allocation3 + $0x210] sm:$0xff] %vm299_vm3, %v3591_v53  ;;  %v4822_v10 = vld [vmem:[#allocation5 + $0x8] sm:$0xff] }
 0x463   : > { %4548 = vst.msk [vmem:[#allocation5 + $0x10] sm:$0xff] %vm3867_vm5, %v4516_v63  ;;  %v4854_v9 = vadd.f32 %v4822_v10, %v9133_v39  ;;  %v9379_v39 = vld [vmem:[#allocation3 + $0x150] sm:$0xff] }
 0x464   : > { %v4398_v22 = vpop.f32.mrf.mxu3  ;;  %v4262_v63 = vld [vmem:[#allocation3 + $0x171] sm:$0xff] }
 0x465   : > { %4886 = vst.msk [vmem:[#allocation5 + $0x8] sm:$0xff] %vm3867_vm5, %v4854_v9 }
 0x466   : > { %v4059_v3 = vpop.f32.mrf.mxu2 }
 0x467   : > { %v3822_v37 = vpop.f32.mrf.mxu1  ;;  %v4179_v0 = vadd.f32 %v4147_v7, %v4059_v3  ;;  %7204 = vmatmul.msk.f32.gmra.mxu2 %vm299_vm3, %v9379_v39  ;;  %v9388_v51 = vpop.f32.mrf.mxu0  ;;  %v4150_v3 = vld [vmem:[#allocation5 + $0x38] sm:$0xff] }
 0x468   : > { %v4485_v19 = vld [vmem:[#allocation5 + $0x18] sm:$0xff]  ;;  %3885 = vst.msk [vmem:[#allocation5 + $0x88] sm:$0xff] %vm3867_vm5, %v3822_v37  ;;  %7237 = vmatmul.msk.f32.gmra.mxu3 %vm299_vm3, %v4260_v1 }
 0x469   : > { %v4517_v29 = vadd.f32 %v4485_v19, %v4395_v13  ;;  %4211 = vst.msk [vmem:[#allocation5 + $0x20] sm:$0xff] %vm3867_vm5, %v4179_v0  ;;  %v4609_v42 = vld [vmem:[#allocation3 + $0x20f] sm:$0xff] }
 0x46a   : > { %7280 = vmatmul.msk.f32.gmra.mxu0 %vm299_vm3, %v4609_v42  ;;  %7283 = vmatmul.msk.f32.gmra.mxu1 %vm299_vm3, %v9077_v56  ;;  %v4823_v8 = vld [vmem:[#allocation5 + $0x10] sm:$0xff] }
 0x46b   : > { %4549 = vst.msk [vmem:[#allocation5 + $0x18] sm:$0xff] %vm3867_vm5, %v4517_v29  ;;  %v4855_v12 = vadd.f32 %v4823_v8, %v9149_v6  ;;  %v9395_v6 = vld [vmem:[#allocation3 + $0x168] sm:$0xff]  ;;  %v4149_v13 = vld [vmem:[#allocation5 + $0x30] sm:$0xff] }
 0x46c   : > { %v4401_v35 = vpop.f32.mrf.mxu3  ;;  %v4263_v19 = vld [vmem:[#allocation3 + $0x189] sm:$0xff] }
 0x46d   : > { %4887 = vst.msk [vmem:[#allocation5 + $0x10] sm:$0xff] %vm3867_vm5, %v4855_v12  ;;  %v4151_v12 = vld [vmem:[#allocation5 + $0x40] sm:$0xff] }
 0x46e   : > { %v4062_v17 = vpop.f32.mrf.mxu2 }
 0x46f   : > { %v3825_v26 = vpop.f32.mrf.mxu1  ;;  %v4180_v56 = vadd.f32 %v4148_v36, %v4062_v17  ;;  %7205 = vmatmul.msk.f32.gmra.mxu2 %vm299_vm3, %v9395_v6  ;;  %v9412_v5 = vpop.f32.mrf.mxu0 }
 0x470   : > { %v4486_v33 = vld [vmem:[#allocation5 + $0x20] sm:$0xff]  ;;  %3886 = vst.msk [vmem:[#allocation5 + $0x90] sm:$0xff] %vm3867_vm5, %v3825_v26  ;;  %7238 = vmatmul.msk.f32.gmra.mxu3 %vm299_vm3, %v4261_v54 }
 0x471   : > { %v4518_v57 = vadd.f32 %v4486_v33, %v4398_v22  ;;  %4212 = vst.msk [vmem:[#allocation5 + $0x28] sm:$0xff] %vm3867_vm5, %v4180_v56  ;;  %v4264_v56 = vld [vmem:[#allocation3 + $0x191] sm:$0xff] }
 0x472   : > { %7284 = vmatmul.msk.f32.gmra.mxu1 %vm299_vm3, %v9092_v55  ;;  %7381 = vmatmul.msk.f32.vlgmr.msra.gmra.mxu0 %vm299_vm3, %v9092_v55  ;;  %v4824_v43 = vld [vmem:[#allocation5 + $0x18] sm:$0xff] }
 0x473   : > { %4550 = vst.msk [vmem:[#allocation5 + $0x20] sm:$0xff] %vm3867_vm5, %v4518_v57  ;;  %v4856_v45 = vadd.f32 %v4824_v43, %v9165_v4  ;;  %v9409_v4 = vld [vmem:[#allocation3 + $0x170] sm:$0xff]  ;;  %v4152_v43 = vld [vmem:[#allocation5 + $0x48] sm:$0xff] }
 0x474   : > { %v4404_v61 = vpop.f32.mrf.mxu3 }
 0x475   : > { %4888 = vst.msk [vmem:[#allocation5 + $0x18] sm:$0xff] %vm3867_vm5, %v4856_v45 }
 0x476   : > { %v4065_v50 = vpop.f32.mrf.mxu2 }
 0x477   : > { %v3828_v15 = vpop.f32.mrf.mxu1  ;;  %v4181_v55 = vadd.f32 %v4149_v13, %v4065_v50  ;;  %7206 = vmatmul.msk.f32.gmra.mxu2 %vm299_vm3, %v9409_v4  ;;  %v9432_v1 = vpop.f32.mrf.mxu0 }
 0x478   : > { %v4487_v53 = vld [vmem:[#allocation5 + $0x28] sm:$0xff]  ;;  %3887 = vst.msk [vmem:[#allocation5 + $0x98] sm:$0xff] %vm3867_vm5, %v3828_v15  ;;  %7239 = vmatmul.msk.f32.gmra.mxu3 %vm299_vm3, %v4262_v63 }
 0x479   : > { %v4519_v46 = vadd.f32 %v4487_v53, %v4401_v35  ;;  %4213 = vst.msk [vmem:[#allocation5 + $0x30] sm:$0xff] %vm3867_vm5, %v4181_v55  ;;  %v4265_v55 = vld [vmem:[#allocation3 + $0x1a9] sm:$0xff] }
 0x47a   : > { %7285 = vmatmul.msk.f32.gmra.mxu1 %vm299_vm3, %v9107_v44  ;;  %7382 = vmatmul.msk.f32.gmra.mxu0 %vm299_vm3, %v9107_v44  ;;  %v4825_v40 = vld [vmem:[#allocation5 + $0x20] sm:$0xff] }
 0x47b   : > { %4551 = vst.msk [vmem:[#allocation5 + $0x28] sm:$0xff] %vm3867_vm5, %v4519_v46  ;;  %v4857_v10 = vadd.f32 %v4825_v40, %v9181_v52  ;;  %v9425_v52 = vld [vmem:[#allocation3 + $0x188] sm:$0xff]  ;;  %v4153_v40 = vld [vmem:[#allocation5 + $0x50] sm:$0xff] }
 0x47c   : > { %v4407_v44 = vpop.f32.mrf.mxu3 }
 0x47d   : > { %4889 = vst.msk [vmem:[#allocation5 + $0x20] sm:$0xff] %vm3867_vm5, %v4857_v10 }
 0x47e   : > { %v4068_v9 = vpop.f32.mrf.mxu2 }
 0x47f   : > { %v3831_v7 = vpop.f32.mrf.mxu1  ;;  %v4182_v22 = vadd.f32 %v4150_v3, %v4068_v9  ;;  %7207 = vmatmul.msk.f32.gmra.mxu2 %vm299_vm3, %v9425_v52  ;;  %v9449_v50 = vpop.f32.mrf.mxu0 }
 0x480   : > { %v4488_v37 = vld [vmem:[#allocation5 + $0x30] sm:$0xff]  ;;  %3888 = vst.msk [vmem:[#allocation5 + $0xa0] sm:$0xff] %vm3867_vm5, %v3831_v7  ;;  %7240 = vmatmul.msk.f32.gmra.mxu3 %vm299_vm3, %v4263_v19 }
 0x481   : > { %v4520_v0 = vadd.f32 %v4488_v37, %v4404_v61  ;;  %4214 = vst.msk [vmem:[#allocation5 + $0x38] sm:$0xff] %vm3867_vm5, %v4182_v22  ;;  %v4266_v22 = vld [vmem:[#allocation3 + $0x1b1] sm:$0xff] }
 0x482   : > { %7286 = vmatmul.msk.f32.gmra.mxu1 %vm299_vm3, %v9123_v41  ;;  %7383 = vmatmul.msk.f32.gmra.mxu0 %vm299_vm3, %v9123_v41  ;;  %v4826_v29 = vld [vmem:[#allocation5 + $0x28] sm:$0xff] }
 0x483   : > { %4552 = vst.msk [vmem:[#allocation5 + $0x30] sm:$0xff] %vm3867_vm5, %v4520_v0  ;;  %v4858_v42 = vadd.f32 %v4826_v29, %v9202_v27  ;;  %v9441_v27 = vld [vmem:[#allocation3 + $0x190] sm:$0xff]  ;;  %v4154_v29 = vld [vmem:[#allocation5 + $0x58] sm:$0xff] }
 0x484   : > { %v4410_v41 = vpop.f32.mrf.mxu3 }
 0x485   : > { %4890 = vst.msk [vmem:[#allocation5 + $0x28] sm:$0xff] %vm3867_vm5, %v4858_v42 }
 0x486   : > { %v4071_v8 = vpop.f32.mrf.mxu2 }
 0x487   : > { %v3834_v17 = vpop.f32.mrf.mxu1  ;;  %v4183_v36 = vadd.f32 %v4151_v12, %v4071_v8  ;;  %7208 = vmatmul.msk.f32.gmra.mxu2 %vm299_vm3, %v9441_v27 }
 0x488   : > { %v4489_v35 = vld [vmem:[#allocation5 + $0x38] sm:$0xff]  ;;  %3889 = vst.msk [vmem:[#allocation5 + $0xa8] sm:$0xff] %vm3867_vm5, %v3834_v17  ;;  %7241 = vmatmul.msk.f32.gmra.mxu3 %vm299_vm3, %v4264_v56  ;;  %v4267_v17 = vld [vmem:[#allocation3 + $0x1c9] sm:$0xff] }
 0x489   : > { %v4521_v26 = vadd.f32 %v4489_v35, %v4407_v44  ;;  %4215 = vst.msk [vmem:[#allocation5 + $0x40] sm:$0xff] %vm3867_vm5, %v4183_v36  ;;  %v9466_v44 = vpop.f32.mrf.mxu0 }
 0x48a   : > { %7287 = vmatmul.msk.f32.gmra.mxu1 %vm299_vm3, %v9139_v59  ;;  %7384 = vmatmul.msk.f32.gmra.mxu0 %vm299_vm3, %v9139_v59  ;;  %v4827_v33 = vld [vmem:[#allocation5 + $0x30] sm:$0xff] }
 0x48b   : > { %4553 = vst.msk [vmem:[#allocation5 + $0x38] sm:$0xff] %vm3867_vm5, %v4521_v26  ;;  %v4859_v57 = vadd.f32 %v4827_v33, %v9218_v28  ;;  %v9457_v28 = vld [vmem:[#allocation3 + $0x1a8] sm:$0xff]  ;;  %v4155_v33 = vld [vmem:[#allocation5 + $0x60] sm:$0xff] }
 0x48c   : > { %v4413_v45 = vpop.f32.mrf.mxu3 }
 0x48d   : > { %4891 = vst.msk [vmem:[#allocation5 + $0x30] sm:$0xff] %vm3867_vm5, %v4859_v57 }
 0x48e   : > { %v4074_v54 = vpop.f32.mrf.mxu2 }
 0x48f   : > { %v3837_v59 = vpop.f32.mrf.mxu1  ;;  %v4184_v13 = vadd.f32 %v4152_v43, %v4074_v54  ;;  %7209 = vmatmul.msk.f32.gmra.mxu2 %vm299_vm3, %v9457_v28 }
 0x490   : > { %v4490_v61 = vld [vmem:[#allocation5 + $0x40] sm:$0xff]  ;;  %3890 = vst.msk [vmem:[#allocation5 + $0xb0] sm:$0xff] %vm3867_vm5, %v3837_v59  ;;  %7242 = vmatmul.msk.f32.gmra.mxu3 %vm299_vm3, %v4265_v55  ;;  %v4268_v59 = vld [vmem:[#allocation3 + $0x1d1] sm:$0xff] }
 0x491   : > { %v4522_v15 = vadd.f32 %v4490_v61, %v4410_v41  ;;  %4216 = vst.msk [vmem:[#allocation5 + $0x48] sm:$0xff] %vm3867_vm5, %v4184_v13  ;;  %v9489_v35 = vpop.f32.mrf.mxu0 }
 0x492   : > { %7288 = vmatmul.msk.f32.gmra.mxu1 %vm299_vm3, %v9155_v34  ;;  %7385 = vmatmul.msk.f32.gmra.mxu0 %vm299_vm3, %v9155_v34  ;;  %v4828_v53 = vld [vmem:[#allocation5 + $0x38] sm:$0xff] }
 0x493   : > { %4554 = vst.msk [vmem:[#allocation5 + $0x40] sm:$0xff] %vm3867_vm5, %v4522_v15  ;;  %v4860_v46 = vadd.f32 %v4828_v53, %v9234_v21  ;;  %v9473_v21 = vld [vmem:[#allocation3 + $0x1b0] sm:$0xff]  ;;  %v4156_v53 = vld [vmem:[#allocation5 + $0x68] sm:$0xff] }
 0x494   : > { %v4416_v10 = vpop.f32.mrf.mxu3 }
 0x495   : > { %4892 = vst.msk [vmem:[#allocation5 + $0x38] sm:$0xff] %vm3867_vm5, %v4860_v46 }
 0x496   : > { %v4077_v63 = vpop.f32.mrf.mxu2 }
 0x497   : > { %v3840_v9 = vpop.f32.mrf.mxu1  ;;  %v4185_v34 = vadd.f32 %v4153_v40, %v4077_v63  ;;  %7210 = vmatmul.msk.f32.gmra.mxu2 %vm299_vm3, %v9473_v21 }
 0x498   : > { %v4491_v3 = vld [vmem:[#allocation5 + $0x48] sm:$0xff]  ;;  %3891 = vst.msk [vmem:[#allocation5 + $0xb8] sm:$0xff] %vm3867_vm5, %v3840_v9  ;;  %7243 = vmatmul.msk.f32.gmra.mxu3 %vm299_vm3, %v4266_v22  ;;  %v4157_v22 = vld [vmem:[#allocation5 + $0x70] sm:$0xff] }
 0x499   : > { %v4523_v7 = vadd.f32 %v4491_v3, %v4413_v45  ;;  %4217 = vst.msk [vmem:[#allocation5 + $0x50] sm:$0xff] %vm3867_vm5, %v4185_v34  ;;  %v9510_v15 = vpop.f32.mrf.mxu0  ;;  %v4269_v9 = vld [vmem:[#allocation3 + $0x1e9] sm:$0xff] }
 0x49a   : > { %7289 = vmatmul.msk.f32.gmra.mxu1 %vm299_vm3, %v9171_v62  ;;  %7386 = vmatmul.msk.f32.gmra.mxu0 %vm299_vm3, %v9171_v62  ;;  %v4829_v37 = vld [vmem:[#allocation5 + $0x40] sm:$0xff] }
 0x49b   : > { %4555 = vst.msk [vmem:[#allocation5 + $0x48] sm:$0xff] %vm3867_vm5, %v4523_v7  ;;  %v4861_v0 = vadd.f32 %v4829_v37, %v9253_v2  ;;  %v9487_v2 = vld [vmem:[#allocation3 + $0x1c8] sm:$0xff] }
 0x49c   : > { %v4419_v42 = vpop.f32.mrf.mxu3 }
 0x49d   : > { %4893 = vst.msk [vmem:[#allocation5 + $0x40] sm:$0xff] %vm3867_vm5, %v4861_v0 }
 0x49e   : > { %v4080_v19 = vpop.f32.mrf.mxu2 }
 0x49f   : > { %v3843_v8 = vpop.f32.mrf.mxu1  ;;  %v4186_v62 = vadd.f32 %v4154_v29, %v4080_v19  ;;  %7211 = vmatmul.msk.f32.gmra.mxu2 %vm299_vm3, %v9487_v2 }
 0x4a0   : > { %v4492_v12 = vld [vmem:[#allocation5 + $0x50] sm:$0xff]  ;;  %3892 = vst.msk [vmem:[#allocation5 + $0xc0] sm:$0xff] %vm3867_vm5, %v3843_v8  ;;  %7244 = vmatmul.msk.f32.gmra.mxu3 %vm299_vm3, %v4267_v17  ;;  %v4158_v17 = vld [vmem:[#allocation5 + $0x78] sm:$0xff] }
 0x4a1   : > { %v4524_v41 = vadd.f32 %v4492_v12, %v4416_v10  ;;  %4218 = vst.msk [vmem:[#allocation5 + $0x58] sm:$0xff] %vm3867_vm5, %v4186_v62  ;;  %v9527_v0 = vpop.f32.mrf.mxu0  ;;  %v4270_v8 = vld [vmem:[#allocation3 + $0x1f1] sm:$0xff] }
 0x4a2   : > { %7290 = vmatmul.msk.f32.gmra.mxu1 %vm299_vm3, %v9187_v38  ;;  %7387 = vmatmul.msk.f32.gmra.mxu0 %vm299_vm3, %v9187_v38  ;;  %v4830_v36 = vld [vmem:[#allocation5 + $0x48] sm:$0xff] }
 0x4a3   : > { %4556 = vst.msk [vmem:[#allocation5 + $0x50] sm:$0xff] %vm3867_vm5, %v4524_v41  ;;  %v4862_v26 = vadd.f32 %v4830_v36, %v9272_v49  ;;  %v9503_v49 = vld [vmem:[#allocation3 + $0x1d0] sm:$0xff] }
 0x4a4   : > { %v4422_v38 = vpop.f32.mrf.mxu3 }
 0x4a5   : > { %4894 = vst.msk [vmem:[#allocation5 + $0x48] sm:$0xff] %vm3867_vm5, %v4862_v26 }
 0x4a6   : > { %v4083_v56 = vpop.f32.mrf.mxu2 }
 0x4a7   : > { %v3846_v57 = vpop.f32.mrf.mxu1  ;;  %v4187_v54 = vadd.f32 %v4155_v33, %v4083_v56  ;;  %7212 = vmatmul.msk.f32.gmra.mxu2 %vm299_vm3, %v9503_v49 }
 0x4a8   : > { %v4493_v43 = vld [vmem:[#allocation5 + $0x58] sm:$0xff]  ;;  %3893 = vst.msk [vmem:[#allocation5 + $0xc8] sm:$0xff] %vm3867_vm5, %v3846_v57  ;;  %7245 = vmatmul.msk.f32.gmra.mxu3 %vm299_vm3, %v4268_v59  ;;  %v5596_v57 = vld [vmem:[#allocation3 + $0x47] sm:$0xff] }
 0x4a9   : > { %v4525_v45 = vadd.f32 %v4493_v43, %v4419_v42  ;;  %4219 = vst.msk [vmem:[#allocation5 + $0x60] sm:$0xff] %vm3867_vm5, %v4187_v54  ;;  %v9544_v33 = vpop.f32.mrf.mxu0  ;;  %v4159_v59 = vld [vmem:[#allocation5 + $0x80] sm:$0xff] }
 0x4aa   : > { %7291 = vmatmul.msk.f32.gmra.mxu1 %vm299_vm3, %v9208_v25  ;;  %7388 = vmatmul.msk.f32.gmra.mxu0 %vm299_vm3, %v9208_v25  ;;  %v4831_v13 = vld [vmem:[#allocation5 + $0x50] sm:$0xff] }
 0x4ab   : > { %4557 = vst.msk [vmem:[#allocation5 + $0x58] sm:$0xff] %vm3867_vm5, %v4525_v45  ;;  %v4863_v61 = vadd.f32 %v4831_v13, %v9288_v20  ;;  %v9519_v20 = vld [vmem:[#allocation3 + $0x1e8] sm:$0xff] }
 0x4ac   : > { %v4425_v25 = vpop.f32.mrf.mxu3 }
 0x4ad   : > { %4895 = vst.msk [vmem:[#allocation5 + $0x50] sm:$0xff] %vm3867_vm5, %v4863_v61 }
 0x4ae   : > { %v4086_v55 = vpop.f32.mrf.mxu2 }
 0x4af   : > { %v3849_v46 = vpop.f32.mrf.mxu1  ;;  %v4188_v63 = vadd.f32 %v4156_v53, %v4086_v55  ;;  %7213 = vmatmul.msk.f32.gmra.mxu2 %vm299_vm3, %v9519_v20 }
 0x4b0   : > { %v4494_v40 = vld [vmem:[#allocation5 + $0x60] sm:$0xff]  ;;  %3894 = vst.msk [vmem:[#allocation5 + $0xd0] sm:$0xff] %vm3867_vm5, %v3849_v46  ;;  %7246 = vmatmul.msk.f32.gmra.mxu3 %vm299_vm3, %v4269_v9  ;;  %v4160_v9 = vld [vmem:[#allocation5 + $0x88] sm:$0xff] }
 0x4b1   : > { %v4526_v10 = vadd.f32 %v4494_v40, %v4422_v38  ;;  %4220 = vst.msk [vmem:[#allocation5 + $0x68] sm:$0xff] %vm3867_vm5, %v4188_v63  ;;  %v9562_v63 = vpop.f32.mrf.mxu0 }
 0x4b2   : > { %7292 = vmatmul.msk.f32.gmra.mxu1 %vm299_vm3, %v9224_v23  ;;  %7389 = vmatmul.msk.f32.gmra.mxu0 %vm299_vm3, %v9224_v23  ;;  %v4832_v34 = vld [vmem:[#allocation5 + $0x58] sm:$0xff] }
 0x4b3   : > { %4558 = vst.msk [vmem:[#allocation5 + $0x60] sm:$0xff] %vm3867_vm5, %v4526_v10  ;;  %v4864_v3 = vadd.f32 %v4832_v34, %v9309_v60  ;;  %v9535_v60 = vld [vmem:[#allocation3 + $0x1f0] sm:$0xff] }
 0x4b4   : > { %v4428_v37 = vpop.f32.mrf.mxu3 }
 0x4b5   : > { %4896 = vst.msk [vmem:[#allocation5 + $0x58] sm:$0xff] %vm3867_vm5, %v4864_v3 }
 0x4b6   : > { %v4089_v7 = vpop.f32.mrf.mxu2 }
 0x4b7   : > { %v3852_v23 = vpop.f32.mrf.mxu1  ;;  %v4189_v19 = vadd.f32 %v4157_v22, %v4089_v7  ;;  %7214 = vmatmul.msk.f32.gmra.mxu2 %vm299_vm3, %v9535_v60 }
 0x4b8   : > { %v4495_v29 = vld [vmem:[#allocation5 + $0x68] sm:$0xff]  ;;  %3895 = vst.msk [vmem:[#allocation5 + $0xd8] sm:$0xff] %vm3867_vm5, %v3852_v23  ;;  %7247 = vmatmul.msk.f32.gmra.mxu3 %vm299_vm3, %v4270_v8  ;;  %v4161_v8 = vld [vmem:[#allocation5 + $0x90] sm:$0xff] }
 0x4b9   : > { %v4527_v42 = vadd.f32 %v4495_v29, %v4425_v25  ;;  %4221 = vst.msk [vmem:[#allocation5 + $0x70] sm:$0xff] %vm3867_vm5, %v4189_v19  ;;  %v5597_v25 = vld [vmem:[#allocation3 + $0x4f] sm:$0xff]  ;;  %v9582_v29 = vpop.f32.mrf.mxu0 }
 0x4ba   : > { %7293 = vmatmul.msk.f32.gmra.mxu1 %vm299_vm3, %v9240_v48  ;;  %7390 = vmatmul.msk.f32.gmra.mxu0 %vm299_vm3, %v9240_v48  ;;  %v4833_v62 = vld [vmem:[#allocation5 + $0x60] sm:$0xff] }
 0x4bb   : > { %4559 = vst.msk [vmem:[#allocation5 + $0x68] sm:$0xff] %vm3867_vm5, %v4527_v42  ;;  %v4865_v12 = vadd.f32 %v4833_v62, %v9335_v24  ;;  %v5256_v24 = vld [vmem:[#allocation3 + $0x29] sm:$0xff] }
 0x4bc   : > { %v4431_v36 = vpop.f32.mrf.mxu3 }
 0x4bd   : > { %4897 = vst.msk [vmem:[#allocation5 + $0x60] sm:$0xff] %vm3867_vm5, %v4865_v12 }
 0x4be   : > { %v4092_v41 = vpop.f32.mrf.mxu2 }
 0x4bf   : > { %v3855_v26 = vpop.f32.mrf.mxu1  ;;  %v4190_v48 = vadd.f32 %v4158_v17, %v4092_v41  ;;  %7315 = vmatmul.msk.f32.vlgmr.msra.gmra.mxu2 %vm299_vm3, %v5256_v24 }
 0x4c0   : > { %v4496_v56 = vld [vmem:[#allocation5 + $0x70] sm:$0xff]  ;;  %3896 = vst.msk [vmem:[#allocation5 + $0xe0] sm:$0xff] %vm3867_vm5, %v3855_v26  ;;  %7348 = vmatmul.msk.f32.vlgmr.msra.gmra.mxu3 %vm299_vm3, %v5596_v57 }
 0x4c1   : > { %v4528_v38 = vadd.f32 %v4496_v56, %v4428_v37  ;;  %4222 = vst.msk [vmem:[#allocation5 + $0x78] sm:$0xff] %vm3867_vm5, %v4190_v48  ;;  %v5598_v37 = vld [vmem:[#allocation3 + $0x67] sm:$0xff]  ;;  %v9599_v57 = vpop.f32.mrf.mxu0 }
 0x4c2   : > { %7294 = vmatmul.msk.f32.gmra.mxu1 %vm299_vm3, %v9259_v30  ;;  %7391 = vmatmul.msk.f32.gmra.mxu0 %vm299_vm3, %v9259_v30  ;;  %v4834_v54 = vld [vmem:[#allocation5 + $0x68] sm:$0xff] }
 0x4c3   : > { %4560 = vst.msk [vmem:[#allocation5 + $0x70] sm:$0xff] %vm3867_vm5, %v4528_v38  ;;  %v4866_v43 = vadd.f32 %v4834_v54, %v9354_v47  ;;  %v5257_v47 = vld [vmem:[#allocation3 + $0x31] sm:$0xff] }
 0x4c4   : > { %v4434_v13 = vpop.f32.mrf.mxu3  ;;  %v4162_v38 = vld [vmem:[#allocation5 + $0x98] sm:$0xff] }
 0x4c5   : > { %4898 = vst.msk [vmem:[#allocation5 + $0x68] sm:$0xff] %vm3867_vm5, %v4866_v43  ;;  %v5160_v43 = vld [vmem:[#allocation5] sm:$0xff] }
 0x4c6   : > { %v4095_v45 = vpop.f32.mrf.mxu2 }
 0x4c7   : > { %v3858_v61 = vpop.f32.mrf.mxu1  ;;  %v4191_v55 = vadd.f32 %v4159_v59, %v4095_v45  ;;  %7316 = vmatmul.msk.f32.gmra.mxu2 %vm299_vm3, %v5257_v47  ;;  %v4163_v47 = vld [vmem:[#allocation5 + $0xa0] sm:$0xff] }
 0x4c8   : > { %v4497_v53 = vld [vmem:[#allocation5 + $0x78] sm:$0xff]  ;;  %3897 = vst.msk [vmem:[#allocation5 + $0xe8] sm:$0xff] %vm3867_vm5, %v3858_v61  ;;  %7349 = vmatmul.msk.f32.gmra.mxu3 %vm299_vm3, %v5597_v25  ;;  %v5600_v61 = vld [vmem:[#allocation3 + $0x87] sm:$0xff] }
 0x4c9   : > { %v4529_v30 = vadd.f32 %v4497_v53, %v4431_v36  ;;  %4223 = vst.msk [vmem:[#allocation5 + $0x80] sm:$0xff] %vm3867_vm5, %v4191_v55  ;;  %v5599_v36 = vld [vmem:[#allocation3 + $0x6f] sm:$0xff] }
 0x4ca   : > { %7295 = vmatmul.msk.f32.gmra.mxu1 %vm299_vm3, %v9278_v16  ;;  %7392 = vmatmul.msk.f32.gmra.mxu0 %vm299_vm3, %v9278_v16  ;;  %v4835_v46 = vld [vmem:[#allocation5 + $0x70] sm:$0xff] }
 0x4cb   : > { %4561 = vst.msk [vmem:[#allocation5 + $0x78] sm:$0xff] %vm3867_vm5, %v4529_v30  ;;  %v4867_v40 = vadd.f32 %v4835_v46, %v9372_v31  ;;  %v9575_v31 = vld [vmem:[#allocation3 + $0x49] sm:$0xff] }
 0x4cc   : > { %v4437_v34 = vpop.f32.mrf.mxu3 }
 0x4cd   : > { %4899 = vst.msk [vmem:[#allocation5 + $0x70] sm:$0xff] %vm3867_vm5, %v4867_v40  ;;  %v5161_v40 = vld [vmem:[#allocation5 + $0x8] sm:$0xff] }
 0x4ce   : > { %v4098_v10 = vpop.f32.mrf.mxu2 }
 0x4cf   : > { %v3861_v3 = vpop.f32.mrf.mxu1  ;;  %v4192_v16 = vadd.f32 %v4160_v9, %v4098_v10  ;;  %7317 = vmatmul.msk.f32.gmra.mxu2 %vm299_vm3, %v9575_v31 }
 0x4d0   : > { %v4498_v7 = vld [vmem:[#allocation5 + $0x80] sm:$0xff]  ;;  %3898 = vst.msk [vmem:[#allocation5 + $0xf0] sm:$0xff] %vm3867_vm5, %v3861_v3  ;;  %7350 = vmatmul.msk.f32.gmra.mxu3 %vm299_vm3, %v5598_v37 }
 0x4d1   : > { %v4530_v22 = vadd.f32 %v4498_v7, %v4434_v13  ;;  %4224 = vst.msk [vmem:[#allocation5 + $0x88] sm:$0xff] %vm3867_vm5, %v4192_v16  ;;  %v5601_v16 = vld [vmem:[#allocation3 + $0x8f] sm:$0xff] }
 0x4d2   : > { %7296 = vmatmul.msk.f32.gmra.mxu1 %vm299_vm3, %v9294_v32  ;;  %7393 = vmatmul.msk.f32.gmra.mxu0 %vm299_vm3, %v9294_v32  ;;  %v4836_v23 = vld [vmem:[#allocation5 + $0x78] sm:$0xff] }
 0x4d3   : > { %4562 = vst.msk [vmem:[#allocation5 + $0x80] sm:$0xff] %vm3867_vm5, %v4530_v22  ;;  %v4868_v19 = vadd.f32 %v4836_v23, %v9388_v51  ;;  %v9591_v51 = vld [vmem:[#allocation3 + $0x51] sm:$0xff]  ;;  %v4164_v23 = vld [vmem:[#allocation5 + $0xa8] sm:$0xff] }
 0x4d4   : > { %v4440_v32 = vpop.f32.mrf.mxu3 }
 0x4d5   : > { %4900 = vst.msk [vmem:[#allocation5 + $0x78] sm:$0xff] %vm3867_vm5, %v4868_v19 }
 0x4d6   : > { %v4101_v42 = vpop.f32.mrf.mxu2 }
 0x4d7   : > { %v3864_v62 = vpop.f32.mrf.mxu1  ;;  %v4193_v12 = vadd.f32 %v4161_v8, %v4101_v42  ;;  %7318 = vmatmul.msk.f32.gmra.mxu2 %vm299_vm3, %v9591_v51  ;;  %v5162_v8 = vld [vmem:[#allocation5 + $0x10] sm:$0xff] }
 0x4d8   : > { %v4499_v41 = vld [vmem:[#allocation5 + $0x88] sm:$0xff]  ;;  %3899 = vst.msk [vmem:[#allocation5 + $0xf8] sm:$0xff] %vm3867_vm5, %v3864_v62  ;;  %7351 = vmatmul.msk.f32.gmra.mxu3 %vm299_vm3, %v5599_v36 }
 0x4d9   : > { %v4531_v17 = vadd.f32 %v4499_v41, %v4437_v34  ;;  %4225 = vst.msk [vmem:[#allocation5 + $0x90] sm:$0xff] %vm3867_vm5, %v4193_v12  ;;  %v9615_v34 = vpop.f32.mrf.mxu0  ;;  %v5602_v41 = vld [vmem:[#allocation3 + $0xa7] sm:$0xff] }
 0x4da   : > { %7297 = vmatmul.msk.f32.gmra.mxu1 %vm299_vm3, %v9313_v11  ;;  %7394 = vmatmul.msk.f32.gmra.mxu0 %vm299_vm3, %v9313_v11  ;;  %v4837_v26 = vld [vmem:[#allocation5 + $0x80] sm:$0xff] }
 0x4db   : > { %4563 = vst.msk [vmem:[#allocation5 + $0x88] sm:$0xff] %vm3867_vm5, %v4531_v17  ;;  %v4869_v48 = vadd.f32 %v4837_v26, %v9412_v5  ;;  %v9607_v5 = vld [vmem:[#allocation3 + $0x69] sm:$0xff] }
 0x4dc   : > { %v4443_v24 = vpop.f32.mrf.mxu3 }
 0x4dd   : > { %4901 = vst.msk [vmem:[#allocation5 + $0x80] sm:$0xff] %vm3867_vm5, %v4869_v48 }
 0x4de   : > { %v4104_v56 = vpop.f32.mrf.mxu2 }
 0x4df   : > { %v4194_v11 = vadd.f32 %v4162_v38, %v4104_v56  ;;  %v5064_v54 = vpop.f32.mrf.mxu1  ;;  %7319 = vmatmul.msk.f32.gmra.mxu2 %vm299_vm3, %v9607_v5  ;;  %v4165_v56 = vld [vmem:[#allocation5 + $0xb0] sm:$0xff] }
 0x4e0   : > { %v4500_v45 = vld [vmem:[#allocation5 + $0x90] sm:$0xff]  ;;  %v5192_v59 = vadd.f32 %v5160_v43, %v5064_v54  ;;  %7352 = vmatmul.msk.f32.gmra.mxu3 %vm299_vm3, %v5600_v61 }
 0x4e1   : > { %v4532_v13 = vadd.f32 %v4500_v45, %v4440_v32  ;;  %4226 = vst.msk [vmem:[#allocation5 + $0x98] sm:$0xff] %vm3867_vm5, %v4194_v11  ;;  %v9639_v36 = vpop.f32.mrf.mxu0  ;;  %v5163_v11 = vld [vmem:[#allocation5 + $0x18] sm:$0xff] }
 0x4e2   : > { %5224 = vst.msk [vmem:[#allocation5] sm:$0xff] %vm3867_vm5, %v5192_v59  ;;  %7298 = vmatmul.msk.f32.gmra.mxu1 %vm299_vm3, %v9330_v14  ;;  %7395 = vmatmul.msk.f32.gmra.mxu0 %vm299_vm3, %v9330_v14  ;;  %v4838_v55 = vld [vmem:[#allocation5 + $0x88] sm:$0xff] }
 0x4e3   : > { %4564 = vst.msk [vmem:[#allocation5 + $0x90] sm:$0xff] %vm3867_vm5, %v4532_v13  ;;  %v4870_v53 = vadd.f32 %v4838_v55, %v9432_v1  ;;  %v9623_v1 = vld [vmem:[#allocation3 + $0x71] sm:$0xff] }
 0x4e4   : > { %v4446_v25 = vpop.f32.mrf.mxu3  ;;  %v5603_v59 = vld [vmem:[#allocation3 + $0xaf] sm:$0xff] }
 0x4e5   : > { %4902 = vst.msk [vmem:[#allocation5 + $0x88] sm:$0xff] %vm3867_vm5, %v4870_v53 }
 0x4e6   : > { %v4107_v30 = vpop.f32.mrf.mxu2 }
 0x4e7   : > { %v4195_v46 = vadd.f32 %v4163_v47, %v4107_v30  ;;  %v5067_v14 = vpop.f32.mrf.mxu1  ;;  %7320 = vmatmul.msk.f32.gmra.mxu2 %vm299_vm3, %v9623_v1  ;;  %v4166_v30 = vld [vmem:[#allocation5 + $0xb8] sm:$0xff] }
 0x4e8   : > { %v4501_v10 = vld [vmem:[#allocation5 + $0x98] sm:$0xff]  ;;  %v5193_v9 = vadd.f32 %v5161_v40, %v5067_v14  ;;  %7353 = vmatmul.msk.f32.gmra.mxu3 %vm299_vm3, %v5601_v16 }
 0x4e9   : > { %v4533_v3 = vadd.f32 %v4501_v10, %v4443_v24  ;;  %4227 = vst.msk [vmem:[#allocation5 + $0xa0] sm:$0xff] %vm3867_vm5, %v4195_v46  ;;  %v9660_v55 = vpop.f32.mrf.mxu0  ;;  %v5164_v46 = vld [vmem:[#allocation5 + $0x20] sm:$0xff] }
 0x4ea   : > { %5225 = vst.msk [vmem:[#allocation5 + $0x8] sm:$0xff] %vm3867_vm5, %v5193_v9  ;;  %7299 = vmatmul.msk.f32.gmra.mxu1 %vm299_vm3, %v9346_v18  ;;  %7396 = vmatmul.msk.f32.gmra.mxu0 %vm299_vm3, %v9346_v18  ;;  %v4839_v7 = vld [vmem:[#allocation5 + $0x90] sm:$0xff]  ;;  %v5604_v9 = vld [vmem:[#allocation3 + $0xc7] sm:$0xff] }
 0x4eb   : > { %4565 = vst.msk [vmem:[#allocation5 + $0x98] sm:$0xff] %vm3867_vm5, %v4533_v3  ;;  %v4871_v22 = vadd.f32 %v4839_v7, %v9449_v50  ;;  %v9637_v50 = vld [vmem:[#allocation3 + $0x89] sm:$0xff] }
 0x4ec   : > { %v4449_v19 = vpop.f32.mrf.mxu3 }
 0x4ed   : > { %4903 = vst.msk [vmem:[#allocation5 + $0x90] sm:$0xff] %vm3867_vm5, %v4871_v22  ;;  %v4167_v22 = vld [vmem:[#allocation5 + $0xc0] sm:$0xff] }
 0x4ee   : > { %v4110_v37 = vpop.f32.mrf.mxu2 }
 0x4ef   : > { %v4196_v42 = vadd.f32 %v4164_v23, %v4110_v37  ;;  %v5070_v18 = vpop.f32.mrf.mxu1  ;;  %7321 = vmatmul.msk.f32.gmra.mxu2 %vm299_vm3, %v9637_v50 }
 0x4f0   : > { %v4502_v32 = vld [vmem:[#allocation5 + $0xa0] sm:$0xff]  ;;  %v5194_v62 = vadd.f32 %v5162_v8, %v5070_v18  ;;  %7354 = vmatmul.msk.f32.gmra.mxu3 %vm299_vm3, %v5602_v41 }
 0x4f1   : > { %v4534_v12 = vadd.f32 %v4502_v32, %v4446_v25  ;;  %4228 = vst.msk [vmem:[#allocation5 + $0xa8] sm:$0xff] %vm3867_vm5, %v4196_v42  ;;  %v9677_v23 = vpop.f32.mrf.mxu0  ;;  %v5165_v42 = vld [vmem:[#allocation5 + $0x28] sm:$0xff] }
 0x4f2   : > { %5226 = vst.msk [vmem:[#allocation5 + $0x10] sm:$0xff] %vm3867_vm5, %v5194_v62  ;;  %7300 = vmatmul.msk.f32.gmra.mxu1 %vm299_vm3, %v9363_v58  ;;  %7397 = vmatmul.msk.f32.gmra.mxu0 %vm299_vm3, %v9363_v58  ;;  %v4840_v17 = vld [vmem:[#allocation5 + $0x98] sm:$0xff]  ;;  %v5605_v62 = vld [vmem:[#allocation3 + $0xcf] sm:$0xff] }
 0x4f3   : > { %4566 = vst.msk [vmem:[#allocation5 + $0xa0] sm:$0xff] %vm3867_vm5, %v4534_v12  ;;  %v4872_v26 = vadd.f32 %v4840_v17, %v9466_v44  ;;  %v9653_v44 = vld [vmem:[#allocation3 + $0x91] sm:$0xff] }
 0x4f4   : > { %v4452_v58 = vpop.f32.mrf.mxu3 }
 0x4f5   : > { %4904 = vst.msk [vmem:[#allocation5 + $0x98] sm:$0xff] %vm3867_vm5, %v4872_v26  ;;  %v4168_v26 = vld [vmem:[#allocation5 + $0xc8] sm:$0xff] }
 0x4f6   : > { %v4113_v48 = vpop.f32.mrf.mxu2 }
 0x4f7   : > { %v4197_v38 = vadd.f32 %v4165_v56, %v4113_v48  ;;  %v5073_v24 = vpop.f32.mrf.mxu1  ;;  %7322 = vmatmul.msk.f32.gmra.mxu2 %vm299_vm3, %v9653_v44 }
 0x4f8   : > { %v4503_v54 = vld [vmem:[#allocation5 + $0xa8] sm:$0xff]  ;;  %v5195_v43 = vadd.f32 %v5163_v11, %v5073_v24  ;;  %7355 = vmatmul.msk.f32.gmra.mxu3 %vm299_vm3, %v5603_v59 }
 0x4f9   : > { %v4535_v45 = vadd.f32 %v4503_v54, %v4449_v19  ;;  %4229 = vst.msk [vmem:[#allocation5 + $0xb0] sm:$0xff] %vm3867_vm5, %v4197_v38  ;;  %v9693_v11 = vpop.f32.mrf.mxu0 }
 0x4fa   : > { %5227 = vst.msk [vmem:[#allocation5 + $0x18] sm:$0xff] %vm3867_vm5, %v5195_v43  ;;  %7301 = vmatmul.msk.f32.gmra.mxu1 %vm299_vm3, %v9379_v39  ;;  %7398 = vmatmul.msk.f32.gmra.mxu0 %vm299_vm3, %v9379_v39  ;;  %v4841_v13 = vld [vmem:[#allocation5 + $0xa0] sm:$0xff] }
 0x4fb   : > { %4567 = vst.msk [vmem:[#allocation5 + $0xa8] sm:$0xff] %vm3867_vm5, %v4535_v45  ;;  %v4873_v61 = vadd.f32 %v4841_v13, %v9489_v35  ;;  %v9669_v35 = vld [vmem:[#allocation3 + $0xa9] sm:$0xff] }
 0x4fc   : > { %v4455_v39 = vpop.f32.mrf.mxu3  ;;  %v5606_v43 = vld [vmem:[#allocation3 + $0xe7] sm:$0xff] }
 0x4fd   : > { %4905 = vst.msk [vmem:[#allocation5 + $0xa0] sm:$0xff] %vm3867_vm5, %v4873_v61  ;;  %v4169_v61 = vld [vmem:[#allocation5 + $0xd0] sm:$0xff] }
 0x4fe   : > { %v4116_v53 = vpop.f32.mrf.mxu2 }
 0x4ff   : > { %v4198_v47 = vadd.f32 %v4166_v30, %v4116_v53  ;;  %v5076_v25 = vpop.f32.mrf.mxu1  ;;  %7323 = vmatmul.msk.f32.gmra.mxu2 %vm299_vm3, %v9669_v35 }
 0x500   : > { %v4504_v14 = vld [vmem:[#allocation5 + $0xb0] sm:$0xff]  ;;  %v5196_v40 = vadd.f32 %v5164_v46, %v5076_v25  ;;  %7356 = vmatmul.msk.f32.gmra.mxu3 %vm299_vm3, %v5604_v9 }
 0x501   : > { %v4536_v10 = vadd.f32 %v4504_v14, %v4452_v58  ;;  %4230 = vst.msk [vmem:[#allocation5 + $0xb8] sm:$0xff] %vm3867_vm5, %v4198_v47  ;;  %v5166_v58 = vld [vmem:[#allocation5 + $0x30] sm:$0xff] }
 0x502   : > { %5228 = vst.msk [vmem:[#allocation5 + $0x20] sm:$0xff] %vm3867_vm5, %v5196_v40  ;;  %7302 = vmatmul.msk.f32.gmra.mxu1 %vm299_vm3, %v9395_v6  ;;  %7399 = vmatmul.msk.f32.gmra.mxu0 %vm299_vm3, %v9395_v6  ;;  %v4842_v3 = vld [vmem:[#allocation5 + $0xa8] sm:$0xff] }
 0x503   : > { %4568 = vst.msk [vmem:[#allocation5 + $0xb0] sm:$0xff] %vm3867_vm5, %v4536_v10  ;;  %v4874_v16 = vadd.f32 %v4842_v3, %v9510_v15  ;;  %v9685_v15 = vld [vmem:[#allocation3 + $0xb1] sm:$0xff]  ;;  %v9717_v10 = vpop.f32.mrf.mxu0 }
 0x504   : > { %v4458_v37 = vpop.f32.mrf.mxu3  ;;  %v5607_v14 = vld [vmem:[#allocation3 + $0xef] sm:$0xff] }
 0x505   : > { %4906 = vst.msk [vmem:[#allocation5 + $0xa8] sm:$0xff] %vm3867_vm5, %v4874_v16  ;;  %v4170_v16 = vld [vmem:[#allocation5 + $0xd8] sm:$0xff] }
 0x506   : > { %v4119_v7 = vpop.f32.mrf.mxu2 }
 0x507   : > { %v4199_v6 = vadd.f32 %v4167_v22, %v4119_v7  ;;  %v5079_v19 = vpop.f32.mrf.mxu1  ;;  %7324 = vmatmul.msk.f32.gmra.mxu2 %vm299_vm3, %v9685_v15 }
 0x508   : > { %v4505_v18 = vld [vmem:[#allocation5 + $0xb8] sm:$0xff]  ;;  %v5197_v8 = vadd.f32 %v5165_v42, %v5079_v19  ;;  %7357 = vmatmul.msk.f32.gmra.mxu3 %vm299_vm3, %v5605_v62 }
 0x509   : > { %v4537_v32 = vadd.f32 %v4505_v18, %v4455_v39  ;;  %4231 = vst.msk [vmem:[#allocation5 + $0xc0] sm:$0xff] %vm3867_vm5, %v4199_v6  ;;  %v5167_v39 = vld [vmem:[#allocation5 + $0x38] sm:$0xff]  ;;  %v5608_v18 = vld [vmem:[#allocation3 + $0x107] sm:$0xff] }
 0x50a   : > { %5229 = vst.msk [vmem:[#allocation5 + $0x28] sm:$0xff] %vm3867_vm5, %v5197_v8  ;;  %7303 = vmatmul.msk.f32.gmra.mxu1 %vm299_vm3, %v9409_v4  ;;  %7400 = vmatmul.msk.f32.gmra.mxu0 %vm299_vm3, %v9409_v4  ;;  %v4843_v12 = vld [vmem:[#allocation5 + $0xb0] sm:$0xff] }
 0x50b   : > { %4569 = vst.msk [vmem:[#allocation5 + $0xb8] sm:$0xff] %vm3867_vm5, %v4537_v32  ;;  %v4875_v41 = vadd.f32 %v4843_v12, %v9527_v0  ;;  %v9701_v0 = vld [vmem:[#allocation3 + $0xc9] sm:$0xff]  ;;  %v9738_v62 = vpop.f32.mrf.mxu0 }
 0x50c   : > { %v4461_v48 = vpop.f32.mrf.mxu3 }
 0x50d   : > { %4907 = vst.msk [vmem:[#allocation5 + $0xb0] sm:$0xff] %vm3867_vm5, %v4875_v41  ;;  %v4171_v41 = vld [vmem:[#allocation5 + $0xe0] sm:$0xff] }
 0x50e   : > { %v4122_v17 = vpop.f32.mrf.mxu2 }
 0x50f   : > { %v4200_v56 = vadd.f32 %v4168_v26, %v4122_v17  ;;  %v5082_v4 = vpop.f32.mrf.mxu1  ;;  %7325 = vmatmul.msk.f32.gmra.mxu2 %vm299_vm3, %v9701_v0 }
 0x510   : > { %v4506_v38 = vld [vmem:[#allocation5 + $0xc0] sm:$0xff]  ;;  %v5198_v24 = vadd.f32 %v5166_v58, %v5082_v4  ;;  %7358 = vmatmul.msk.f32.gmra.mxu3 %vm299_vm3, %v5606_v43 }
 0x511   : > { %v4538_v54 = vadd.f32 %v4506_v38, %v4458_v37  ;;  %4232 = vst.msk [vmem:[#allocation5 + $0xc8] sm:$0xff] %vm3867_vm5, %v4200_v56  ;;  %v5168_v37 = vld [vmem:[#allocation5 + $0x40] sm:$0xff]  ;;  %v5609_v38 = vld [vmem:[#allocation3 + $0x10f] sm:$0xff] }
 0x512   : > { %5230 = vst.msk [vmem:[#allocation5 + $0x30] sm:$0xff] %vm3867_vm5, %v5198_v24  ;;  %7304 = vmatmul.msk.f32.gmra.mxu1 %vm299_vm3, %v9425_v52  ;;  %7401 = vmatmul.msk.f32.gmra.mxu0 %vm299_vm3, %v9425_v52  ;;  %v4844_v45 = vld [vmem:[#allocation5 + $0xb8] sm:$0xff] }
 0x513   : > { %4570 = vst.msk [vmem:[#allocation5 + $0xc0] sm:$0xff] %vm3867_vm5, %v4538_v54  ;;  %v4876_v59 = vadd.f32 %v4844_v45, %v9544_v33  ;;  %v9715_v33 = vld [vmem:[#allocation3 + $0xd1] sm:$0xff]  ;;  %v4172_v45 = vld [vmem:[#allocation5 + $0xe8] sm:$0xff] }
 0x514   : > { %v4464_v53 = vpop.f32.mrf.mxu3 }
 0x515   : > { %4908 = vst.msk [vmem:[#allocation5 + $0xb8] sm:$0xff] %vm3867_vm5, %v4876_v59 }
 0x516   : > { %v4125_v13 = vpop.f32.mrf.mxu2 }
 0x517   : > { %v4201_v30 = vadd.f32 %v4169_v61, %v4125_v13  ;;  %v5085_v52 = vpop.f32.mrf.mxu1  ;;  %7326 = vmatmul.msk.f32.gmra.mxu2 %vm299_vm3, %v9715_v33  ;;  %v9755_v13 = vpop.f32.mrf.mxu0 }
 0x518   : > { %v4507_v47 = vld [vmem:[#allocation5 + $0xc8] sm:$0xff]  ;;  %v5199_v25 = vadd.f32 %v5167_v39, %v5085_v52  ;;  %7359 = vmatmul.msk.f32.gmra.mxu3 %vm299_vm3, %v5607_v14 }
 0x519   : > { %v4539_v46 = vadd.f32 %v4507_v47, %v4461_v48  ;;  %4233 = vst.msk [vmem:[#allocation5 + $0xd0] sm:$0xff] %vm3867_vm5, %v4201_v30  ;;  %v5169_v48 = vld [vmem:[#allocation5 + $0x48] sm:$0xff] }
 0x51a   : > { %5231 = vst.msk [vmem:[#allocation5 + $0x38] sm:$0xff] %vm3867_vm5, %v5199_v25  ;;  %7305 = vmatmul.msk.f32.gmra.mxu1 %vm299_vm3, %v9441_v27  ;;  %7402 = vmatmul.msk.f32.gmra.mxu0 %vm299_vm3, %v9441_v27  ;;  %v4845_v40 = vld [vmem:[#allocation5 + $0xc0] sm:$0xff] }
 0x51b   : > { %4571 = vst.msk [vmem:[#allocation5 + $0xc8] sm:$0xff] %vm3867_vm5, %v4539_v46  ;;  %v4877_v9 = vadd.f32 %v4845_v40, %v9562_v63  ;;  %v9731_v63 = vld [vmem:[#allocation3 + $0xe9] sm:$0xff] }
 0x51c   : > { %v4467_v27 = vpop.f32.mrf.mxu3  ;;  %v5610_v47 = vld [vmem:[#allocation3 + $0x127] sm:$0xff]  ;;  %v4173_v40 = vld [vmem:[#allocation5 + $0xf0] sm:$0xff] }
 0x51d   : > { %4909 = vst.msk [vmem:[#allocation5 + $0xc0] sm:$0xff] %vm3867_vm5, %v4877_v9 }
 0x51e   : > { %v4128_v3 = vpop.f32.mrf.mxu2 }
 0x51f   : > { %v4202_v7 = vadd.f32 %v4170_v16, %v4128_v3  ;;  %v5088_v22 = vpop.f32.mrf.mxu1  ;;  %7327 = vmatmul.msk.f32.gmra.mxu2 %vm299_vm3, %v9731_v63  ;;  %v5171_v16 = vld [vmem:[#allocation5 + $0x58] sm:$0xff] }
 0x520   : > { %v4508_v6 = vld [vmem:[#allocation5 + $0xd0] sm:$0xff]  ;;  %v5200_v19 = vadd.f32 %v5168_v37, %v5088_v22  ;;  %7360 = vmatmul.msk.f32.gmra.mxu3 %vm299_vm3, %v5608_v18  ;;  %v9771_v22 = vpop.f32.mrf.mxu0 }
 0x521   : > { %v4540_v42 = vadd.f32 %v4508_v6, %v4464_v53  ;;  %4234 = vst.msk [vmem:[#allocation5 + $0xd8] sm:$0xff] %vm3867_vm5, %v4202_v7  ;;  %v5170_v53 = vld [vmem:[#allocation5 + $0x50] sm:$0xff] }
 0x522   : > { %5232 = vst.msk [vmem:[#allocation5 + $0x40] sm:$0xff] %vm3867_vm5, %v5200_v19  ;;  %7306 = vmatmul.msk.f32.gmra.mxu1 %vm299_vm3, %v9457_v28  ;;  %7403 = vmatmul.msk.f32.gmra.mxu0 %vm299_vm3, %v9457_v28  ;;  %v4846_v8 = vld [vmem:[#allocation5 + $0xc8] sm:$0xff] }
 0x523   : > { %4572 = vst.msk [vmem:[#allocation5 + $0xd0] sm:$0xff] %vm3867_vm5, %v4540_v42  ;;  %v4878_v32 = vadd.f32 %v4846_v8, %v9582_v29  ;;  %v9747_v29 = vld [vmem:[#allocation3 + $0xf1] sm:$0xff] }
 0x524   : > { %v4470_v28 = vpop.f32.mrf.mxu3  ;;  %v5611_v6 = vld [vmem:[#allocation3 + $0x12f] sm:$0xff]  ;;  %v4174_v8 = vld [vmem:[#allocation5 + $0xf8] sm:$0xff] }
 0x525   : > { %4910 = vst.msk [vmem:[#allocation5 + $0xc8] sm:$0xff] %vm3867_vm5, %v4878_v32 }
 0x526   : > { %v4131_v12 = vpop.f32.mrf.mxu2 }
 0x527   : > { %v4203_v17 = vadd.f32 %v4171_v41, %v4131_v12  ;;  %v5091_v26 = vpop.f32.mrf.mxu1  ;;  %7328 = vmatmul.msk.f32.gmra.mxu2 %vm299_vm3, %v9747_v29  ;;  %v5172_v41 = vld [vmem:[#allocation5 + $0x60] sm:$0xff] }
 0x528   : > { %v4509_v56 = vld [vmem:[#allocation5 + $0xd8] sm:$0xff]  ;;  %v5201_v4 = vadd.f32 %v5169_v48, %v5091_v26  ;;  %7361 = vmatmul.msk.f32.gmra.mxu3 %vm299_vm3, %v5609_v38  ;;  %v5612_v48 = vld [vmem:[#allocation3 + $0x147] sm:$0xff] }
 0x529   : > { %v4541_v58 = vadd.f32 %v4509_v56, %v4467_v27  ;;  %4235 = vst.msk [vmem:[#allocation5 + $0xe0] sm:$0xff] %vm3867_vm5, %v4203_v17 }
 0x52a   : > { %5233 = vst.msk [vmem:[#allocation5 + $0x48] sm:$0xff] %vm3867_vm5, %v5201_v4  ;;  %7307 = vmatmul.msk.f32.gmra.mxu1 %vm299_vm3, %v9473_v21  ;;  %7404 = vmatmul.msk.f32.gmra.mxu0 %vm299_vm3, %v9473_v21  ;;  %v4847_v24 = vld [vmem:[#allocation5 + $0xd0] sm:$0xff]  ;;  %v9795_v4 = vpop.f32.mrf.mxu0 }
 0x52b   : > { %4573 = vst.msk [vmem:[#allocation5 + $0xd8] sm:$0xff] %vm3867_vm5, %v4541_v58  ;;  %v4879_v54 = vadd.f32 %v4847_v24, %v9599_v57  ;;  %v9763_v57 = vld [vmem:[#allocation3 + $0x109] sm:$0xff]  ;;  %v5499_v24 = vld [vmem:[#allocation5] sm:$0xff] }
 0x52c   : > { %v4473_v59 = vpop.f32.mrf.mxu3 }
 0x52d   : > { %4911 = vst.msk [vmem:[#allocation5 + $0xd0] sm:$0xff] %vm3867_vm5, %v4879_v54 }
 0x52e   : > { %v4134_v43 = vpop.f32.mrf.mxu2 }
 0x52f   : > { %v4204_v21 = vadd.f32 %v4172_v45, %v4134_v43  ;;  %v5094_v61 = vpop.f32.mrf.mxu1  ;;  %7329 = vmatmul.msk.f32.gmra.mxu2 %vm299_vm3, %v9763_v57  ;;  %v5173_v43 = vld [vmem:[#allocation5 + $0x68] sm:$0xff] }
 0x530   : > { %v4510_v30 = vld [vmem:[#allocation5 + $0xe0] sm:$0xff]  ;;  %v5202_v52 = vadd.f32 %v5170_v53, %v5094_v61  ;;  %7362 = vmatmul.msk.f32.gmra.mxu3 %vm299_vm3, %v5610_v47  ;;  %v5613_v53 = vld [vmem:[#allocation3 + $0x14f] sm:$0xff] }
 0x531   : > { %v4542_v39 = vadd.f32 %v4510_v30, %v4470_v28  ;;  %4236 = vst.msk [vmem:[#allocation5 + $0xe8] sm:$0xff] %vm3867_vm5, %v4204_v21 }
 0x532   : > { %5234 = vst.msk [vmem:[#allocation5 + $0x50] sm:$0xff] %vm3867_vm5, %v5202_v52  ;;  %7308 = vmatmul.msk.f32.gmra.mxu1 %vm299_vm3, %v9487_v2  ;;  %7405 = vmatmul.msk.f32.gmra.mxu0 %vm299_vm3, %v9487_v2  ;;  %v4848_v25 = vld [vmem:[#allocation5 + $0xd8] sm:$0xff] }
 0x533   : > { %4574 = vst.msk [vmem:[#allocation5 + $0xe0] sm:$0xff] %vm3867_vm5, %v4542_v39  ;;  %v4880_v46 = vadd.f32 %v4848_v25, %v9615_v34  ;;  %v9779_v34 = vld [vmem:[#allocation3 + $0x111] sm:$0xff]  ;;  %v9816_v39 = vpop.f32.mrf.mxu0  ;;  %v5500_v25 = vld [vmem:[#allocation5 + $0x8] sm:$0xff] }
 0x534   : > { %v4476_v9 = vpop.f32.mrf.mxu3 }
 0x535   : > { %4912 = vst.msk [vmem:[#allocation5 + $0xd8] sm:$0xff] %vm3867_vm5, %v4880_v46 }
 0x536   : > { %v4137_v14 = vpop.f32.mrf.mxu2 }
 0x537   : > { %v4205_v3 = vadd.f32 %v4173_v40, %v4137_v14  ;;  %v5097_v2 = vpop.f32.mrf.mxu1  ;;  %7330 = vmatmul.msk.f32.gmra.mxu2 %vm299_vm3, %v9779_v34  ;;  %v5174_v14 = vld [vmem:[#allocation5 + $0x70] sm:$0xff] }
 0x538   : > { %v4511_v27 = vld [vmem:[#allocation5 + $0xe8] sm:$0xff]  ;;  %v5203_v7 = vadd.f32 %v5171_v16, %v5097_v2  ;;  %7363 = vmatmul.msk.f32.gmra.mxu3 %vm299_vm3, %v5611_v6 }
 0x539   : > { %v4543_v37 = vadd.f32 %v4511_v27, %v4473_v59  ;;  %4237 = vst.msk [vmem:[#allocation5 + $0xf0] sm:$0xff] %vm3867_vm5, %v4205_v3  ;;  %v4947_v16 = vld [vmem:[#allocation3 + $0x208] sm:$0xff] }
 0x53a   : > { %5235 = vst.msk [vmem:[#allocation5 + $0x58] sm:$0xff] %vm3867_vm5, %v5203_v7  ;;  %7309 = vmatmul.msk.f32.gmra.mxu1 %vm299_vm3, %v9503_v49  ;;  %7406 = vmatmul.msk.f32.gmra.mxu0 %vm299_vm3, %v9503_v49  ;;  %v4849_v19 = vld [vmem:[#allocation5 + $0xe0] sm:$0xff] }
 0x53b   : > { %4575 = vst.msk [vmem:[#allocation5 + $0xe8] sm:$0xff] %vm3867_vm5, %v4543_v37  ;;  %v4881_v42 = vadd.f32 %v4849_v19, %v9639_v36  ;;  %v9793_v36 = vld [vmem:[#allocation3 + $0x129] sm:$0xff] }
 0x53c   : > { %v4479_v32 = vpop.f32.mrf.mxu3  ;;  %v5614_v27 = vld [vmem:[#allocation3 + $0x167] sm:$0xff]  ;;  %v5501_v19 = vld [vmem:[#allocation5 + $0x10] sm:$0xff] }
 0x53d   : > { %4913 = vst.msk [vmem:[#allocation5 + $0xe0] sm:$0xff] %vm3867_vm5, %v4881_v42 }
 0x53e   : > { %v4140_v18 = vpop.f32.mrf.mxu2 }
 0x53f   : > { %v4206_v12 = vadd.f32 %v4174_v8, %v4140_v18  ;;  %v5100_v49 = vpop.f32.mrf.mxu1  ;;  %7331 = vmatmul.msk.f32.gmra.mxu2 %vm299_vm3, %v9793_v36  ;;  %v9831_v18 = vpop.f32.mrf.mxu0 }
 0x540   : > { %v4512_v28 = vld [vmem:[#allocation5 + $0xf0] sm:$0xff]  ;;  %v5204_v17 = vadd.f32 %v5172_v41, %v5100_v49  ;;  %7364 = vmatmul.msk.f32.gmra.mxu3 %vm299_vm3, %v5612_v48 }
 0x541   : > { %v4544_v26 = vadd.f32 %v4512_v28, %v4476_v9  ;;  %4238 = vst.msk [vmem:[#allocation5 + $0xf8] sm:$0xff] %vm3867_vm5, %v4206_v12 }
 0x542   : > { %5236 = vst.msk [vmem:[#allocation5 + $0x60] sm:$0xff] %vm3867_vm5, %v5204_v17  ;;  %7310 = vmatmul.msk.f32.gmra.mxu1 %vm299_vm3, %v9519_v20  ;;  %7407 = vmatmul.msk.f32.gmra.mxu0 %vm299_vm3, %v9519_v20  ;;  %v4850_v56 = vld [vmem:[#allocation5 + $0xe8] sm:$0xff]  ;;  %v4948_v17 = vld [vmem:[#allocation3 + $0x210] sm:$0xff] }
 0x543   : > { %4576 = vst.msk [vmem:[#allocation5 + $0xf0] sm:$0xff] %vm3867_vm5, %v4544_v26  ;;  %v4882_v58 = vadd.f32 %v4850_v56, %v9660_v55  ;;  %v9809_v55 = vld [vmem:[#allocation3 + $0x131] sm:$0xff] }
 0x544   : > { %v5743_v20 = vpop.f32.mrf.mxu3  ;;  %v5615_v26 = vld [vmem:[#allocation3 + $0x16f] sm:$0xff] }
 0x545   : > { %4914 = vst.msk [vmem:[#allocation5 + $0xe8] sm:$0xff] %vm3867_vm5, %v4882_v58 }
 0x546   : > { %v5403_v38 = vpop.f32.mrf.mxu2 }
 0x547   : > { %v5103_v54 = vpop.f32.mrf.mxu1  ;;  %v5531_v45 = vadd.f32 %v5499_v24, %v5403_v38  ;;  %7332 = vmatmul.msk.f32.gmra.mxu2 %vm299_vm3, %v9809_v55  ;;  %v5502_v38 = vld [vmem:[#allocation5 + $0x18] sm:$0xff] }
 0x548   : > { %v4513_v59 = vld [vmem:[#allocation5 + $0xf8] sm:$0xff]  ;;  %v5205_v21 = vadd.f32 %v5173_v43, %v5103_v54  ;;  %7365 = vmatmul.msk.f32.gmra.mxu3 %vm299_vm3, %v5613_v53  ;;  %v5176_v54 = vld [vmem:[#allocation5 + $0x80] sm:$0xff] }
 0x549   : > { %v4545_v61 = vadd.f32 %v4513_v59, %v4479_v32  ;;  %5563 = vst.msk [vmem:[#allocation5] sm:$0xff] %vm3867_vm5, %v5531_v45  ;;  %v5175_v32 = vld [vmem:[#allocation5 + $0x78] sm:$0xff]  ;;  %v5616_v53 = vld [vmem:[#allocation3 + $0x187] sm:$0xff] }
 0x54a   : > { %5237 = vst.msk [vmem:[#allocation5 + $0x68] sm:$0xff] %vm3867_vm5, %v5205_v21  ;;  %7311 = vmatmul.msk.f32.gmra.mxu1 %vm299_vm3, %v9535_v60  ;;  %7408 = vmatmul.msk.f32.gmra.mxu0 %vm299_vm3, %v9535_v60  ;;  %v4851_v30 = vld [vmem:[#allocation5 + $0xf0] sm:$0xff]  ;;  %v9845_v21 = vpop.f32.mrf.mxu0 }
 0x54b   : > { %4577 = vst.msk [vmem:[#allocation5 + $0xf8] sm:$0xff] %vm3867_vm5, %v4545_v61  ;;  %v4883_v52 = vadd.f32 %v4851_v30, %v9677_v23  ;;  %v9823_v23 = vld [vmem:[#allocation3 + $0x149] sm:$0xff] }
 0x54c   : > { %v5746_v60 = vpop.f32.mrf.mxu3 }
 0x54d   : > { %4915 = vst.msk [vmem:[#allocation5 + $0xf0] sm:$0xff] %vm3867_vm5, %v4883_v52 }
 0x54e   : > { %v5406_v47 = vpop.f32.mrf.mxu2 }
 0x54f   : > { %v5106_v46 = vpop.f32.mrf.mxu1  ;;  %v5532_v40 = vadd.f32 %v5500_v25, %v5406_v47  ;;  %7333 = vmatmul.msk.f32.gmra.mxu2 %vm299_vm3, %v9823_v23  ;;  %v5503_v25 = vld [vmem:[#allocation5 + $0x20] sm:$0xff] }
 0x550   : > { %v5839_v9 = vld [vmem:[#allocation5] sm:$0xff]  ;;  %v5206_v3 = vadd.f32 %v5174_v14, %v5106_v46  ;;  %7366 = vmatmul.msk.f32.gmra.mxu3 %vm299_vm3, %v5614_v27 }
 0x551   : > { %v5871_v2 = vadd.f32 %v5839_v9, %v5743_v20  ;;  %5564 = vst.msk [vmem:[#allocation5 + $0x8] sm:$0xff] %vm3867_vm5, %v5532_v40 }
 0x552   : > { %5238 = vst.msk [vmem:[#allocation5 + $0x70] sm:$0xff] %vm3867_vm5, %v5206_v3  ;;  %7312 = vmatmul.msk.f32.gmra.mxu1 %vm299_vm3, %v4947_v16  ;;  %7409 = vmatmul.msk.f32.gmra.mxu0 %vm299_vm3, %v4947_v16  ;;  %v4852_v7 = vld [vmem:[#allocation5 + $0xf8] sm:$0xff]  ;;  %v9865_v27 = vpop.f32.mrf.mxu0 }
 0x553   : > { %5903 = vst.msk [vmem:[#allocation5] sm:$0xff] %vm3867_vm5, %v5871_v2  ;;  %v4884_v37 = vadd.f32 %v4852_v7, %v9693_v11  ;;  %v9837_v11 = vld [vmem:[#allocation3 + $0x151] sm:$0xff] }
 0x554   : > { %v5749_v42 = vpop.f32.mrf.mxu3  ;;  %v9863_v2 = vld [vmem:[#allocation3 + $0x171] sm:$0xff] }
 0x555   : > { %4916 = vst.msk [vmem:[#allocation5 + $0xf8] sm:$0xff] %vm3867_vm5, %v4884_v37 }
 0x556   : > { %v5409_v6 = vpop.f32.mrf.mxu2 }
 0x557   : > { %v5109_v8 = vpop.f32.mrf.mxu1  ;;  %v5533_v12 = vadd.f32 %v5501_v19, %v5409_v6  ;;  %7334 = vmatmul.msk.f32.gmra.mxu2 %vm299_vm3, %v9837_v11  ;;  %v5504_v6 = vld [vmem:[#allocation5 + $0x28] sm:$0xff] }
 0x558   : > { %v5840_v49 = vld [vmem:[#allocation5 + $0x8] sm:$0xff]  ;;  %v5207_v41 = vadd.f32 %v5175_v32, %v5109_v8  ;;  %7367 = vmatmul.msk.f32.gmra.mxu3 %vm299_vm3, %v5615_v26 }
 0x559   : > { %v5872_v28 = vadd.f32 %v5840_v49, %v5746_v60  ;;  %5565 = vst.msk [vmem:[#allocation5 + $0x10] sm:$0xff] %vm3867_vm5, %v5533_v12 }
 0x55a   : > { %5239 = vst.msk [vmem:[#allocation5 + $0x78] sm:$0xff] %vm3867_vm5, %v5207_v41  ;;  %7313 = vmatmul.msk.f32.gmra.mxu1 %vm299_vm3, %v4948_v17  ;;  %7410 = vmatmul.msk.f32.gmra.mxu0 %vm299_vm3, %v4948_v17  ;;  %v6178_v48 = vld [vmem:[#allocation5] sm:$0xff]  ;;  %v9877_v41 = vld [vmem:[#allocation3 + $0x189] sm:$0xff]  ;;  %v9884_v26 = vpop.f32.mrf.mxu0 }
 0x55b   : > { %5904 = vst.msk [vmem:[#allocation5 + $0x8] sm:$0xff] %vm3867_vm5, %v5872_v28  ;;  %v6210_v56 = vadd.f32 %v6178_v48, %v9717_v10  ;;  %v9851_v10 = vld [vmem:[#allocation3 + $0x169] sm:$0xff] }
 0x55c   : > { %v5752_v24 = vpop.f32.mrf.mxu3 }
 0x55d   : > { %6242 = vst.msk [vmem:[#allocation5] sm:$0xff] %vm3867_vm5, %v6210_v56  ;;  %v5505_v56 = vld [vmem:[#allocation5 + $0x30] sm:$0xff] }
 0x55e   : > { %v5412_v58 = vpop.f32.mrf.mxu2 }
 0x55f   : > { %v5112_v20 = vpop.f32.mrf.mxu1  ;;  %v5534_v43 = vadd.f32 %v5502_v38, %v5412_v58  ;;  %7335 = vmatmul.msk.f32.gmra.mxu2 %vm299_vm3, %v9851_v10  ;;  %v5179_v38 = vld [vmem:[#allocation5 + $0x98] sm:$0xff] }
 0x560   : > { %v5841_v45 = vld [vmem:[#allocation5 + $0x10] sm:$0xff]  ;;  %v5208_v59 = vadd.f32 %v5176_v54, %v5112_v20  ;;  %7368 = vmatmul.msk.f32.gmra.mxu3 %vm299_vm3, %v5616_v53 }
 0x561   : > { %v5873_v61 = vadd.f32 %v5841_v45, %v5749_v42  ;;  %5566 = vst.msk [vmem:[#allocation5 + $0x18] sm:$0xff] %vm3867_vm5, %v5534_v43  ;;  %v5178_v42 = vld [vmem:[#allocation5 + $0x90] sm:$0xff] }
 0x562   : > { %5240 = vst.msk [vmem:[#allocation5 + $0x80] sm:$0xff] %vm3867_vm5, %v5208_v59  ;;  %7414 = vmatmul.msk.f32.vlgmr.msra.gmra.mxu1 %vm299_vm3, %v9575_v31  ;;  %v6179_v30 = vld [vmem:[#allocation5 + $0x8] sm:$0xff] }
 0x563   : > { %5905 = vst.msk [vmem:[#allocation5 + $0x10] sm:$0xff] %vm3867_vm5, %v5873_v61  ;;  %v6211_v52 = vadd.f32 %v6179_v30, %v9738_v62  ;;  %v5177_v31 = vld [vmem:[#allocation5 + $0x88] sm:$0xff]  ;;  %v5506_v30 = vld [vmem:[#allocation5 + $0x38] sm:$0xff] }
 0x564   : > { %v5755_v60 = vpop.f32.mrf.mxu3  ;;  %v5617_v62 = vld [vmem:[#allocation3 + $0x18f] sm:$0xff] }
 0x565   : > { %6243 = vst.msk [vmem:[#allocation5 + $0x8] sm:$0xff] %vm3867_vm5, %v6211_v52  ;;  %v5619_v45 = vld [vmem:[#allocation3 + $0x1af] sm:$0xff] }
 0x566   : > { %v5415_v47 = vpop.f32.mrf.mxu2 }
 0x567   : > { %v5115_v46 = vpop.f32.mrf.mxu1  ;;  %v5535_v14 = vadd.f32 %v5503_v25, %v5415_v47  ;;  %7336 = vmatmul.msk.f32.gmra.mxu2 %vm299_vm3, %v9863_v2  ;;  %v9899_v47 = vpop.f32.mrf.mxu0  ;;  %v5180_v25 = vld [vmem:[#allocation5 + $0xa0] sm:$0xff] }
 0x568   : > { %v5842_v40 = vld [vmem:[#allocation5 + $0x18] sm:$0xff]  ;;  %v5209_v9 = vadd.f32 %v5177_v31, %v5115_v46  ;;  %7369 = vmatmul.msk.f32.gmra.mxu3 %vm299_vm3, %v5617_v62 }
 0x569   : > { %v5874_v3 = vadd.f32 %v5842_v40, %v5752_v24  ;;  %5567 = vst.msk [vmem:[#allocation5 + $0x20] sm:$0xff] %vm3867_vm5, %v5535_v14  ;;  %v5620_v40 = vld [vmem:[#allocation3 + $0x1c7] sm:$0xff] }
 0x56a   : > { %5241 = vst.msk [vmem:[#allocation5 + $0x88] sm:$0xff] %vm3867_vm5, %v5209_v9  ;;  %7415 = vmatmul.msk.f32.gmra.mxu1 %vm299_vm3, %v9591_v51  ;;  %v6180_v16 = vld [vmem:[#allocation5 + $0x10] sm:$0xff] }
 0x56b   : > { %5906 = vst.msk [vmem:[#allocation5 + $0x18] sm:$0xff] %vm3867_vm5, %v5874_v3  ;;  %v6212_v7 = vadd.f32 %v6180_v16, %v9755_v13  ;;  %v5618_v13 = vld [vmem:[#allocation3 + $0x1a7] sm:$0xff] }
 0x56c   : > { %v5758_v51 = vpop.f32.mrf.mxu3  ;;  %v5507_v16 = vld [vmem:[#allocation5 + $0x40] sm:$0xff] }
 0x56d   : > { %6244 = vst.msk [vmem:[#allocation5 + $0x10] sm:$0xff] %vm3867_vm5, %v6212_v7 }
 0x56e   : > { %v5418_v37 = vpop.f32.mrf.mxu2 }
 0x56f   : > { %v5118_v19 = vpop.f32.mrf.mxu1  ;;  %v5536_v8 = vadd.f32 %v5504_v6, %v5418_v37  ;;  %7337 = vmatmul.msk.f32.gmra.mxu2 %vm299_vm3, %v9877_v41 }
 0x570   : > { %v5843_v32 = vld [vmem:[#allocation5 + $0x20] sm:$0xff]  ;;  %v5210_v12 = vadd.f32 %v5178_v42, %v5118_v19  ;;  %7370 = vmatmul.msk.f32.gmra.mxu3 %vm299_vm3, %v5618_v13  ;;  %v9913_v42 = vpop.f32.mrf.mxu0 }
 0x571   : > { %v5875_v49 = vadd.f32 %v5843_v32, %v5755_v60  ;;  %5568 = vst.msk [vmem:[#allocation5 + $0x28] sm:$0xff] %vm3867_vm5, %v5536_v8  ;;  %v5621_v32 = vld [vmem:[#allocation3 + $0x1cf] sm:$0xff] }
 0x572   : > { %5242 = vst.msk [vmem:[#allocation5 + $0x90] sm:$0xff] %vm3867_vm5, %v5210_v12  ;;  %7416 = vmatmul.msk.f32.gmra.mxu1 %vm299_vm3, %v9607_v5  ;;  %v6181_v28 = vld [vmem:[#allocation5 + $0x18] sm:$0xff] }
 0x573   : > { %5907 = vst.msk [vmem:[#allocation5 + $0x20] sm:$0xff] %vm3867_vm5, %v5875_v49  ;;  %v6213_v17 = vadd.f32 %v6181_v28, %v9771_v22  ;;  %v9891_v22 = vld [vmem:[#allocation3 + $0x191] sm:$0xff]  ;;  %v5508_v28 = vld [vmem:[#allocation5 + $0x48] sm:$0xff] }
 0x574   : > { %v5761_v5 = vpop.f32.mrf.mxu3 }
 0x575   : > { %6245 = vst.msk [vmem:[#allocation5 + $0x18] sm:$0xff] %vm3867_vm5, %v6213_v17 }
 0x576   : > { %v5421_v48 = vpop.f32.mrf.mxu2 }
 0x577   : > { %v5121_v58 = vpop.f32.mrf.mxu1  ;;  %v5537_v24 = vadd.f32 %v5505_v56, %v5421_v48  ;;  %7338 = vmatmul.msk.f32.gmra.mxu2 %vm299_vm3, %v9891_v22 }
 0x578   : > { %v5844_v20 = vld [vmem:[#allocation5 + $0x28] sm:$0xff]  ;;  %v5211_v54 = vadd.f32 %v5179_v38, %v5121_v58  ;;  %7371 = vmatmul.msk.f32.gmra.mxu3 %vm299_vm3, %v5619_v45 }
 0x579   : > { %v5876_v43 = vadd.f32 %v5844_v20, %v5758_v51  ;;  %5569 = vst.msk [vmem:[#allocation5 + $0x30] sm:$0xff] %vm3867_vm5, %v5537_v24  ;;  %v9931_v24 = vld [vmem:[#allocation3 + $0x1c9] sm:$0xff] }
 0x57a   : > { %5243 = vst.msk [vmem:[#allocation5 + $0x98] sm:$0xff] %vm3867_vm5, %v5211_v54  ;;  %7417 = vmatmul.msk.f32.gmra.mxu1 %vm299_vm3, %v9623_v1  ;;  %v6182_v59 = vld [vmem:[#allocation5 + $0x20] sm:$0xff]  ;;  %v9933_v54 = vpop.f32.mrf.mxu0 }
 0x57b   : > { %5908 = vst.msk [vmem:[#allocation5 + $0x28] sm:$0xff] %vm3867_vm5, %v5876_v43  ;;  %v6214_v61 = vadd.f32 %v6182_v59, %v9795_v4  ;;  %v9905_v4 = vld [vmem:[#allocation3 + $0x1a9] sm:$0xff] }
 0x57c   : > { %v5764_v52 = vpop.f32.mrf.mxu3  ;;  %v5509_v59 = vld [vmem:[#allocation5 + $0x50] sm:$0xff] }
 0x57d   : > { %6246 = vst.msk [vmem:[#allocation5 + $0x20] sm:$0xff] %vm3867_vm5, %v6214_v61 }
 0x57e   : > { %v5424_v53 = vpop.f32.mrf.mxu2 }
 0x57f   : > { %v5124_v1 = vpop.f32.mrf.mxu1  ;;  %v5538_v60 = vadd.f32 %v5506_v30, %v5424_v53  ;;  %7339 = vmatmul.msk.f32.gmra.mxu2 %vm299_vm3, %v9905_v4  ;;  %v5183_v53 = vld [vmem:[#allocation5 + $0xb8] sm:$0xff] }
 0x580   : > { %v5845_v46 = vld [vmem:[#allocation5 + $0x30] sm:$0xff]  ;;  %v5212_v31 = vadd.f32 %v5180_v25, %v5124_v1  ;;  %7372 = vmatmul.msk.f32.gmra.mxu3 %vm299_vm3, %v5620_v40 }
 0x581   : > { %v5877_v14 = vadd.f32 %v5845_v46, %v5761_v5  ;;  %5570 = vst.msk [vmem:[#allocation5 + $0x38] sm:$0xff] %vm3867_vm5, %v5538_v60  ;;  %v9945_v60 = vld [vmem:[#allocation3 + $0x1d1] sm:$0xff] }
 0x582   : > { %5244 = vst.msk [vmem:[#allocation5 + $0xa0] sm:$0xff] %vm3867_vm5, %v5212_v31  ;;  %7418 = vmatmul.msk.f32.gmra.mxu1 %vm299_vm3, %v9637_v50  ;;  %v6183_v9 = vld [vmem:[#allocation5 + $0x28] sm:$0xff] }
 0x583   : > { %5909 = vst.msk [vmem:[#allocation5 + $0x30] sm:$0xff] %vm3867_vm5, %v5877_v14  ;;  %v6215_v3 = vadd.f32 %v6183_v9, %v9816_v39  ;;  %v5181_v50 = vld [vmem:[#allocation5 + $0xa8] sm:$0xff]  ;;  %v9919_v39 = vld [vmem:[#allocation3 + $0x1b1] sm:$0xff]  ;;  %v9952_v14 = vpop.f32.mrf.mxu0 }
 0x584   : > { %v5767_v7 = vpop.f32.mrf.mxu3  ;;  %v5510_v9 = vld [vmem:[#allocation5 + $0x58] sm:$0xff] }
 0x585   : > { %6247 = vst.msk [vmem:[#allocation5 + $0x28] sm:$0xff] %vm3867_vm5, %v6215_v3 }
 0x586   : > { %v5427_v62 = vpop.f32.mrf.mxu2 }
 0x587   : > { %v5127_v37 = vpop.f32.mrf.mxu1  ;;  %v5539_v6 = vadd.f32 %v5507_v16, %v5427_v62  ;;  %7340 = vmatmul.msk.f32.gmra.mxu2 %vm299_vm3, %v9919_v39  ;;  %v5184_v62 = vld [vmem:[#allocation5 + $0xc0] sm:$0xff] }
 0x588   : > { %v5846_v51 = vld [vmem:[#allocation5 + $0x38] sm:$0xff]  ;;  %v5213_v19 = vadd.f32 %v5181_v50, %v5127_v37  ;;  %7373 = vmatmul.msk.f32.gmra.mxu3 %vm299_vm3, %v5621_v32  ;;  %v5511_v32 = vld [vmem:[#allocation5 + $0x60] sm:$0xff] }
 0x589   : > { %v5878_v8 = vadd.f32 %v5846_v51, %v5764_v52  ;;  %5571 = vst.msk [vmem:[#allocation5 + $0x40] sm:$0xff] %vm3867_vm5, %v5539_v6  ;;  %v5624_v6 = vld [vmem:[#allocation3 + $0x207] sm:$0xff] }
 0x58a   : > { %5245 = vst.msk [vmem:[#allocation5 + $0xa8] sm:$0xff] %vm3867_vm5, %v5213_v19  ;;  %7419 = vmatmul.msk.f32.gmra.mxu1 %vm299_vm3, %v9653_v44  ;;  %v6184_v12 = vld [vmem:[#allocation5 + $0x30] sm:$0xff] }
 0x58b   : > { %5910 = vst.msk [vmem:[#allocation5 + $0x38] sm:$0xff] %vm3867_vm5, %v5878_v8  ;;  %v6216_v49 = vadd.f32 %v6184_v12, %v9831_v18  ;;  %v5182_v44 = vld [vmem:[#allocation5 + $0xb0] sm:$0xff]  ;;  %v5622_v18 = vld [vmem:[#allocation3 + $0x1e7] sm:$0xff] }
 0x58c   : > { %v5770_v17 = vpop.f32.mrf.mxu3 }
 0x58d   : > { %6248 = vst.msk [vmem:[#allocation5 + $0x30] sm:$0xff] %vm3867_vm5, %v6216_v49  ;;  %v9967_v49 = vpop.f32.mrf.mxu0 }
 0x58e   : > { %v5430_v13 = vpop.f32.mrf.mxu2 }
 0x58f   : > { %v5130_v48 = vpop.f32.mrf.mxu1  ;;  %v5540_v56 = vadd.f32 %v5508_v28, %v5430_v13  ;;  %7341 = vmatmul.msk.f32.gmra.mxu2 %vm299_vm3, %v9931_v24  ;;  %v5185_v13 = vld [vmem:[#allocation5 + $0xc8] sm:$0xff] }
 0x590   : > { %v5847_v5 = vld [vmem:[#allocation5 + $0x40] sm:$0xff]  ;;  %v5214_v58 = vadd.f32 %v5182_v44, %v5130_v48  ;;  %7374 = vmatmul.msk.f32.gmra.mxu3 %vm299_vm3, %v5622_v18  ;;  %v5512_v18 = vld [vmem:[#allocation5 + $0x68] sm:$0xff] }
 0x591   : > { %v5879_v38 = vadd.f32 %v5847_v5, %v5767_v7  ;;  %5572 = vst.msk [vmem:[#allocation5 + $0x48] sm:$0xff] %vm3867_vm5, %v5540_v56  ;;  %v5625_v56 = vld [vmem:[#allocation3 + $0x20f] sm:$0xff] }
 0x592   : > { %5246 = vst.msk [vmem:[#allocation5 + $0xb0] sm:$0xff] %vm3867_vm5, %v5214_v58  ;;  %7420 = vmatmul.msk.f32.gmra.mxu1 %vm299_vm3, %v9669_v35  ;;  %v6185_v20 = vld [vmem:[#allocation5 + $0x38] sm:$0xff] }
 0x593   : > { %5911 = vst.msk [vmem:[#allocation5 + $0x40] sm:$0xff] %vm3867_vm5, %v5879_v38  ;;  %v6217_v43 = vadd.f32 %v6185_v20, %v9845_v21  ;;  %v5623_v21 = vld [vmem:[#allocation3 + $0x1ef] sm:$0xff] }
 0x594   : > { %v5773_v35 = vpop.f32.mrf.mxu3 }
 0x595   : > { %6249 = vst.msk [vmem:[#allocation5 + $0x38] sm:$0xff] %vm3867_vm5, %v6217_v43 }
 0x596   : > { %v5433_v45 = vpop.f32.mrf.mxu2 }
 0x597   : > { %v5133_v61 = vpop.f32.mrf.mxu1  ;;  %v5541_v30 = vadd.f32 %v5509_v59, %v5433_v45  ;;  %7342 = vmatmul.msk.f32.gmra.mxu2 %vm299_vm3, %v9945_v60  ;;  %v5965_v59 = vld [vmem:[#allocation3 + $0x228] sm:$0xff] }
 0x598   : > { %v5848_v52 = vld [vmem:[#allocation5 + $0x48] sm:$0xff]  ;;  %v5215_v1 = vadd.f32 %v5183_v53, %v5133_v61  ;;  %7375 = vmatmul.msk.f32.gmra.mxu3 %vm299_vm3, %v5623_v21  ;;  %7411 = vmatmul.msk.f32.gmra.mxu0 %vm299_vm3, %v5965_v59 }
 0x599   : > { %v5880_v25 = vadd.f32 %v5848_v52, %v5770_v17  ;;  %5573 = vst.msk [vmem:[#allocation5 + $0x50] sm:$0xff] %vm3867_vm5, %v5541_v30  ;;  %v5626_v53 = vld [vmem:[#allocation3 + $0x227] sm:$0xff]  ;;  %v9982_v30 = vpop.f32.mrf.mxu0 }
 0x59a   : > { %5247 = vst.msk [vmem:[#allocation5 + $0xb8] sm:$0xff] %vm3867_vm5, %v5215_v1  ;;  %7421 = vmatmul.msk.f32.gmra.mxu1 %vm299_vm3, %v9685_v15  ;;  %v6186_v46 = vld [vmem:[#allocation5 + $0x40] sm:$0xff]  ;;  %v5516_v59 = vld [vmem:[#allocation5 + $0x88] sm:$0xff] }
 0x59b   : > { %5912 = vst.msk [vmem:[#allocation5 + $0x48] sm:$0xff] %vm3867_vm5, %v5880_v25  ;;  %v6218_v31 = vadd.f32 %v6186_v46, %v9865_v27  ;;  %v9959_v27 = vld [vmem:[#allocation3 + $0x1e9] sm:$0xff] }
 0x59c   : > { %v5776_v15 = vpop.f32.mrf.mxu3  ;;  %v5513_v46 = vld [vmem:[#allocation5 + $0x70] sm:$0xff] }
 0x59d   : > { %6250 = vst.msk [vmem:[#allocation5 + $0x40] sm:$0xff] %vm3867_vm5, %v6218_v31 }
 0x59e   : > { %v5436_v40 = vpop.f32.mrf.mxu2 }
 0x59f   : > { %v5136_v3 = vpop.f32.mrf.mxu1  ;;  %v5542_v16 = vadd.f32 %v5510_v9, %v5436_v40  ;;  %7343 = vmatmul.msk.f32.gmra.mxu2 %vm299_vm3, %v9959_v27  ;;  %v5187_v9 = vld [vmem:[#allocation5 + $0xd8] sm:$0xff] }
 0x5a0   : > { %v5849_v7 = vld [vmem:[#allocation5 + $0x50] sm:$0xff]  ;;  %v5216_v37 = vadd.f32 %v5184_v62, %v5136_v3  ;;  %7376 = vmatmul.msk.f32.gmra.mxu3 %vm299_vm3, %v5624_v6 }
 0x5a1   : > { %v5881_v50 = vadd.f32 %v5849_v7, %v5773_v35  ;;  %5574 = vst.msk [vmem:[#allocation5 + $0x58] sm:$0xff] %vm3867_vm5, %v5542_v16  ;;  %v5627_v16 = vld [vmem:[#allocation3 + $0x22f] sm:$0xff] }
 0x5a2   : > { %5248 = vst.msk [vmem:[#allocation5 + $0xc0] sm:$0xff] %vm3867_vm5, %v5216_v37  ;;  %7422 = vmatmul.msk.f32.gmra.mxu1 %vm299_vm3, %v9701_v0  ;;  %v6187_v51 = vld [vmem:[#allocation5 + $0x48] sm:$0xff] }
 0x5a3   : > { %5913 = vst.msk [vmem:[#allocation5 + $0x50] sm:$0xff] %vm3867_vm5, %v5881_v50  ;;  %v6219_v19 = vadd.f32 %v6187_v51, %v9884_v26  ;;  %v9973_v26 = vld [vmem:[#allocation3 + $0x1f1] sm:$0xff]  ;;  %v10003_v50 = vpop.f32.mrf.mxu0 }
 0x5a4   : > { %v5779_v12 = vpop.f32.mrf.mxu3 }
 0x5a5   : > { %6251 = vst.msk [vmem:[#allocation5 + $0x48] sm:$0xff] %vm3867_vm5, %v6219_v19  ;;  %v5514_v19 = vld [vmem:[#allocation5 + $0x78] sm:$0xff] }
 0x5a6   : > { %v5439_v8 = vpop.f32.mrf.mxu2 }
 0x5a7   : > { %v5139_v0 = vpop.f32.mrf.mxu1  ;;  %v5543_v28 = vadd.f32 %v5511_v32, %v5439_v8  ;;  %7344 = vmatmul.msk.f32.gmra.mxu2 %vm299_vm3, %v9973_v26  ;;  %v5188_v32 = vld [vmem:[#allocation5 + $0xe0] sm:$0xff] }
 0x5a8   : > { %v5850_v17 = vld [vmem:[#allocation5 + $0x58] sm:$0xff]  ;;  %v5217_v48 = vadd.f32 %v5185_v13, %v5139_v0  ;;  %7377 = vmatmul.msk.f32.gmra.mxu3 %vm299_vm3, %v5625_v56  ;;  %v5515_v56 = vld [vmem:[#allocation5 + $0x80] sm:$0xff] }
 0x5a9   : > { %v5882_v44 = vadd.f32 %v5850_v17, %v5776_v15  ;;  %5575 = vst.msk [vmem:[#allocation5 + $0x60] sm:$0xff] %vm3867_vm5, %v5543_v28  ;;  %v5966_v15 = vld [vmem:[#allocation3 + $0x230] sm:$0xff] }
 0x5aa   : > { %5249 = vst.msk [vmem:[#allocation5 + $0xc8] sm:$0xff] %vm3867_vm5, %v5217_v48  ;;  %7423 = vmatmul.msk.f32.gmra.mxu1 %vm299_vm3, %v9715_v33  ;;  %v6188_v5 = vld [vmem:[#allocation5 + $0x50] sm:$0xff]  ;;  %7412 = vmatmul.msk.f32.gmra.mxu0 %vm299_vm3, %v5966_v15  ;;  %v5191_v15 = vld [vmem:[#allocation5 + $0xf8] sm:$0xff] }
 0x5ab   : > { %5914 = vst.msk [vmem:[#allocation5 + $0x58] sm:$0xff] %vm3867_vm5, %v5882_v44  ;;  %v6220_v58 = vadd.f32 %v6188_v5, %v9899_v47  ;;  %v5186_v33 = vld [vmem:[#allocation5 + $0xd0] sm:$0xff]  ;;  %v10017_v48 = vpop.f32.mrf.mxu0 }
 0x5ac   : > { %v5782_v20 = vpop.f32.mrf.mxu3  ;;  %v9988_v47 = vld [vmem:[#allocation3 + $0x209] sm:$0xff] }
 0x5ad   : > { %6252 = vst.msk [vmem:[#allocation5 + $0x50] sm:$0xff] %vm3867_vm5, %v6220_v58 }
 0x5ae   : > { %v5442_v38 = vpop.f32.mrf.mxu2 }
 0x5af   : > { %v5142_v43 = vpop.f32.mrf.mxu1  ;;  %v5544_v45 = vadd.f32 %v5512_v18, %v5442_v38  ;;  %7345 = vmatmul.msk.f32.gmra.mxu2 %vm299_vm3, %v9988_v47  ;;  %v5189_v38 = vld [vmem:[#allocation5 + $0xe8] sm:$0xff] }
 0x5b0   : > { %v5851_v35 = vld [vmem:[#allocation5 + $0x60] sm:$0xff]  ;;  %v5218_v61 = vadd.f32 %v5186_v33, %v5142_v43  ;;  %7378 = vmatmul.msk.f32.gmra.mxu3 %vm299_vm3, %v5626_v53 }
 0x5b1   : > { %v5883_v52 = vadd.f32 %v5851_v35, %v5779_v12  ;;  %5576 = vst.msk [vmem:[#allocation5 + $0x68] sm:$0xff] %vm3867_vm5, %v5544_v45 }
 0x5b2   : > { %5250 = vst.msk [vmem:[#allocation5 + $0xd0] sm:$0xff] %vm3867_vm5, %v5218_v61  ;;  %7424 = vmatmul.msk.f32.gmra.mxu1 %vm299_vm3, %v9731_v63  ;;  %v6189_v1 = vld [vmem:[#allocation5 + $0x58] sm:$0xff] }
 0x5b3   : > { %5915 = vst.msk [vmem:[#allocation5 + $0x60] sm:$0xff] %vm3867_vm5, %v5883_v52  ;;  %v6221_v25 = vadd.f32 %v6189_v1, %v9913_v42  ;;  %v10001_v42 = vld [vmem:[#allocation3 + $0x211] sm:$0xff]  ;;  %v10027_v61 = vpop.f32.mrf.mxu0 }
 0x5b4   : > { %v5785_v31 = vpop.f32.mrf.mxu3  ;;  %v5190_v52 = vld [vmem:[#allocation5 + $0xf0] sm:$0xff] }
 0x5b5   : > { %6253 = vst.msk [vmem:[#allocation5 + $0x58] sm:$0xff] %vm3867_vm5, %v6221_v25 }
 0x5b6   : > { %v5445_v21 = vpop.f32.mrf.mxu2 }
 0x5b7   : > { %v5145_v40 = vpop.f32.mrf.mxu1  ;;  %v5545_v63 = vadd.f32 %v5513_v46, %v5445_v21  ;;  %7346 = vmatmul.msk.f32.gmra.mxu2 %vm299_vm3, %v10001_v42 }
 0x5b8   : > { %v5852_v3 = vld [vmem:[#allocation5 + $0x68] sm:$0xff]  ;;  %v5219_v62 = vadd.f32 %v5187_v9, %v5145_v40  ;;  %7379 = vmatmul.msk.f32.gmra.mxu3 %vm299_vm3, %v5627_v16  ;;  %v5517_v40 = vld [vmem:[#allocation5 + $0x90] sm:$0xff] }
 0x5b9   : > { %v5884_v7 = vadd.f32 %v5852_v3, %v5782_v20  ;;  %5577 = vst.msk [vmem:[#allocation5 + $0x70] sm:$0xff] %vm3867_vm5, %v5545_v63 }
 0x5ba   : > { %5251 = vst.msk [vmem:[#allocation5 + $0xd8] sm:$0xff] %vm3867_vm5, %v5219_v62  ;;  %7425 = vmatmul.msk.f32.gmra.mxu1 %vm299_vm3, %v9747_v29  ;;  %v6190_v37 = vld [vmem:[#allocation5 + $0x60] sm:$0xff] }
 0x5bb   : > { %5916 = vst.msk [vmem:[#allocation5 + $0x68] sm:$0xff] %vm3867_vm5, %v5884_v7  ;;  %v6222_v6 = vadd.f32 %v6190_v37, %v9933_v54  ;;  %v10036_v7 = vpop.f32.mrf.mxu0 }
 0x5bc   : > { %v5788_v8 = vpop.f32.mrf.mxu3 }
 0x5bd   : > { %6254 = vst.msk [vmem:[#allocation5 + $0x60] sm:$0xff] %vm3867_vm5, %v6222_v6 }
 0x5be   : > { %v5448_v51 = vpop.f32.mrf.mxu2 }
 0x5bf   : > { %v5148_v29 = vpop.f32.mrf.mxu1  ;;  %v5546_v12 = vadd.f32 %v5514_v19, %v5448_v51  ;;  %v5518_v51 = vld [vmem:[#allocation5 + $0x98] sm:$0xff] }
 0x5c0   : > { %v5853_v0 = vld [vmem:[#allocation5 + $0x70] sm:$0xff]  ;;  %v5220_v13 = vadd.f32 %v5188_v32, %v5148_v29  ;;  %v6517_v32 = vld [vmem:[#allocation5] sm:$0xff] }
 0x5c1   : > { %v5885_v28 = vadd.f32 %v5853_v0, %v5785_v31  ;;  %5578 = vst.msk [vmem:[#allocation5 + $0x78] sm:$0xff] %vm3867_vm5, %v5546_v12 }
 0x5c2   : > { %5252 = vst.msk [vmem:[#allocation5 + $0xe0] sm:$0xff] %vm3867_vm5, %v5220_v13  ;;  %7426 = vmatmul.msk.f32.gmra.mxu1 %vm299_vm3, %v9763_v57  ;;  %v6191_v17 = vld [vmem:[#allocation5 + $0x68] sm:$0xff] }
 0x5c3   : > { %5917 = vst.msk [vmem:[#allocation5 + $0x70] sm:$0xff] %vm3867_vm5, %v5885_v28  ;;  %v6223_v54 = vadd.f32 %v6191_v17, %v9952_v14 }
 0x5c4   : > { %v5791_v5 = vpop.f32.mrf.mxu3 }
 0x5c5   : > { %6255 = vst.msk [vmem:[#allocation5 + $0x68] sm:$0xff] %vm3867_vm5, %v6223_v54  ;;  %v5519_v54 = vld [vmem:[#allocation5 + $0xa0] sm:$0xff] }
 0x5c6   : > { %v5451_v44 = vpop.f32.mrf.mxu2 }
 0x5c7   : > { %v5151_v58 = vpop.f32.mrf.mxu1  ;;  %v5547_v18 = vadd.f32 %v5515_v56, %v5451_v44  ;;  %v10057_v56 = vld [vmem:[%s10209_s4] ss:$0 sm:$0xff] }
 0x5c8   : > { %v5854_v20 = vld [vmem:[#allocation5 + $0x78] sm:$0xff]  ;;  %v5221_v43 = vadd.f32 %v5189_v38, %v5151_v58 }
 0x5c9   : > { %v5886_v33 = vadd.f32 %v5854_v20, %v5788_v8  ;;  %5579 = vst.msk [vmem:[#allocation5 + $0x80] sm:$0xff] %vm3867_vm5, %v5547_v18 }
 0x5ca   : > { %5253 = vst.msk [vmem:[#allocation5 + $0xe8] sm:$0xff] %vm3867_vm5, %v5221_v43  ;;  %7427 = vmatmul.msk.f32.gmra.mxu1 %vm299_vm3, %v9779_v34  ;;  %v6192_v57 = vld [vmem:[#allocation5 + $0x70] sm:$0xff] }
 0x5cb   : > { %5918 = vst.msk [vmem:[#allocation5 + $0x78] sm:$0xff] %vm3867_vm5, %v5886_v33  ;;  %v6224_v14 = vadd.f32 %v6192_v57, %v9967_v49 }
 0x5cc   : > { %v5794_v35 = vpop.f32.mrf.mxu3 }
 0x5cd   : > { %6256 = vst.msk [vmem:[#allocation5 + $0x70] sm:$0xff] %vm3867_vm5, %v6224_v14 }
 0x5ce   : > { %v5454_v45 = vpop.f32.mrf.mxu2 }
 0x5cf   : > { %v5154_v53 = vpop.f32.mrf.mxu1  ;;  %v5548_v1 = vadd.f32 %v5516_v59, %v5454_v45 }
 0x5d0   : > { %v5855_v25 = vld [vmem:[#allocation5 + $0x80] sm:$0xff]  ;;  %v5222_v21 = vadd.f32 %v5190_v52, %v5154_v53 }
 0x5d1   : > { %v5887_v46 = vadd.f32 %v5855_v25, %v5791_v5  ;;  %5580 = vst.msk [vmem:[#allocation5 + $0x88] sm:$0xff] %vm3867_vm5, %v5548_v1  ;;  %v6519_v25 = vld [vmem:[#allocation5 + $0x10] sm:$0xff] }
 0x5d2   : > { %5254 = vst.msk [vmem:[#allocation5 + $0xf0] sm:$0xff] %vm3867_vm5, %v5222_v21  ;;  %7428 = vmatmul.msk.f32.gmra.mxu1 %vm299_vm3, %v9793_v36  ;;  %v6193_v34 = vld [vmem:[#allocation5 + $0x78] sm:$0xff] }
 0x5d3   : > { %5919 = vst.msk [vmem:[#allocation5 + $0x80] sm:$0xff] %vm3867_vm5, %v5887_v46  ;;  %v6225_v49 = vadd.f32 %v6193_v34, %v9982_v30 }
 0x5d4   : > { %v5797_v9 = vpop.f32.mrf.mxu3 }
 0x5d5   : > { %6257 = vst.msk [vmem:[#allocation5 + $0x78] sm:$0xff] %vm3867_vm5, %v6225_v49 }
 0x5d6   : > { %v5457_v31 = vpop.f32.mrf.mxu2 }
 0x5d7   : > { %v5157_v63 = vpop.f32.mrf.mxu1  ;;  %v5549_v3 = vadd.f32 %v5517_v40, %v5457_v31 }
 0x5d8   : > { %v5856_v62 = vld [vmem:[#allocation5 + $0x88] sm:$0xff]  ;;  %v5223_v16 = vadd.f32 %v5191_v15, %v5157_v63  ;;  %v5521_v63 = vld [vmem:[#allocation5 + $0xb0] sm:$0xff] }
 0x5d9   : > { %v5888_v37 = vadd.f32 %v5856_v62, %v5794_v35  ;;  %5581 = vst.msk [vmem:[#allocation5 + $0x90] sm:$0xff] %vm3867_vm5, %v5549_v3  ;;  %v5520_v35 = vld [vmem:[#allocation5 + $0xa8] sm:$0xff] }
 0x5da   : > { %5255 = vst.msk [vmem:[#allocation5 + $0xf8] sm:$0xff] %vm3867_vm5, %v5223_v16  ;;  %7429 = vmatmul.msk.f32.gmra.mxu1 %vm299_vm3, %v9809_v55  ;;  %v6194_v36 = vld [vmem:[#allocation5 + $0x80] sm:$0xff] }
 0x5db   : > { %5920 = vst.msk [vmem:[#allocation5 + $0x88] sm:$0xff] %vm3867_vm5, %v5888_v37  ;;  %v6226_v30 = vadd.f32 %v6194_v36, %v10003_v50  ;;  %v10049_v50 = vpop.f32.mrf.mxu0  ;;  %v6520_v37 = vld [vmem:[#allocation5 + $0x18] sm:$0xff] }
 0x5dc   : > { %v5800_v19 = vpop.f32.mrf.mxu3 }
 0x5dd   : > { %6258 = vst.msk [vmem:[#allocation5 + $0x80] sm:$0xff] %vm3867_vm5, %v6226_v30 }
 0x5de   : > { %v5460_v6 = vpop.f32.mrf.mxu2 }
 0x5df   : > { %v5550_v8 = vadd.f32 %v5518_v51, %v5460_v6  ;;  %v6421_v29 = vpop.f32.mrf.mxu1 }
 0x5e0   : > { %v5857_v12 = vld [vmem:[#allocation5 + $0x90] sm:$0xff]  ;;  %v6549_v0 = vadd.f32 %v6517_v32, %v6421_v29  ;;  %v5522_v32 = vld [vmem:[#allocation5 + $0xb8] sm:$0xff] }
 0x5e1   : > { %v5889_v13 = vadd.f32 %v5857_v12, %v5797_v9  ;;  %5582 = vst.msk [vmem:[#allocation5 + $0x98] sm:$0xff] %vm3867_vm5, %v5550_v8 }
 0x5e2   : > { %6581 = vst.msk [vmem:[#allocation5] sm:$0xff] %vm3867_vm5, %v6549_v0  ;;  %7430 = vmatmul.msk.f32.gmra.mxu1 %vm299_vm3, %v9823_v23  ;;  %v6195_v55 = vld [vmem:[#allocation5 + $0x88] sm:$0xff] }
 0x5e3   : > { %5921 = vst.msk [vmem:[#allocation5 + $0x90] sm:$0xff] %vm3867_vm5, %v5889_v13  ;;  %v6227_v28 = vadd.f32 %v6195_v55, %v10017_v48  ;;  %v6518_v23 = vld [vmem:[#allocation5 + $0x8] sm:$0xff]  ;;  %v6145_v45 = vpop.f32.mrf.mxu0  ;;  %v6521_v55 = vld [vmem:[#allocation5 + $0x20] sm:$0xff] }
 0x5e4   : > { %v5803_v44 = vpop.f32.mrf.mxu3 }
 0x5e5   : > { %6259 = vst.msk [vmem:[#allocation5 + $0x88] sm:$0xff] %vm3867_vm5, %v6227_v28 }
 0x5e6   : > { %v5463_v17 = vpop.f32.mrf.mxu2 }
 0x5e7   : > { %v5551_v5 = vadd.f32 %v5519_v54, %v5463_v17  ;;  %v6424_v58 = vpop.f32.mrf.mxu1 }
 0x5e8   : > { %v5858_v38 = vld [vmem:[#allocation5 + $0x98] sm:$0xff]  ;;  %v6550_v18 = vadd.f32 %v6518_v23, %v6424_v58 }
 0x5e9   : > { %v5890_v20 = vadd.f32 %v5858_v38, %v5800_v19  ;;  %5583 = vst.msk [vmem:[#allocation5 + $0xa0] sm:$0xff] %vm3867_vm5, %v5551_v5  ;;  %v6613_v43 = vld [vmem:[#allocation5] sm:$0xff] }
 0x5ea   : > { %6582 = vst.msk [vmem:[#allocation5 + $0x8] sm:$0xff] %vm3867_vm5, %v6550_v18  ;;  %7431 = vmatmul.msk.f32.gmra.mxu1 %vm299_vm3, %v9837_v11  ;;  %v6649_v48 = vadd.f32 %v10057_v56, %v6613_v43  ;;  %v6196_v33 = vld [vmem:[#allocation5 + $0x90] sm:$0xff]  ;;  %v5523_v18 = vld [vmem:[#allocation5 + $0xc0] sm:$0xff] }
 0x5eb   : > { %5922 = vst.msk [vmem:[#allocation5 + $0x98] sm:$0xff] %vm3867_vm5, %v5890_v20  ;;  %v6228_v57 = vadd.f32 %v6196_v33, %v10027_v61  ;;  %v6148_v3 = vpop.f32.mrf.mxu0  ;;  %v6522_v33 = vld [vmem:[#allocation5 + $0x28] sm:$0xff] }
 0x5ec   : > { %v6681_v14 = vmax.f32 %v6649_v48, 0.0  ;;  %v5806_v53 = vpop.f32.mrf.mxu3 }
 0x5ed   : > { %6260 = vst.msk [vmem:[#allocation5 + $0x90] sm:$0xff] %vm3867_vm5, %v6228_v57 }
 0x5ee   : > { %6713 = vxpose.xlu1.b32.start [1/16] (narrow) %v6681_v14, 16  ;;  %v5466_v59 = vpop.f32.mrf.mxu2 }
 0x5ef   : > { %v5552_v52 = vadd.f32 %v5520_v35, %v5466_v59  ;;  %v6427_v1 = vpop.f32.mrf.mxu1 }
 0x5f0   : > { %v5859_v21 = vld [vmem:[#allocation5 + $0xa0] sm:$0xff]  ;;  %v6551_v11 = vadd.f32 %v6519_v25, %v6427_v1 }
 0x5f1   : > { %v5891_v46 = vadd.f32 %v5859_v21, %v5803_v44  ;;  %5584 = vst.msk [vmem:[#allocation5 + $0xa8] sm:$0xff] %vm3867_vm5, %v5552_v52  ;;  %v6614_v34 = vld [vmem:[#allocation5 + $0x8] sm:$0xff] }
 0x5f2   : > { %6583 = vst.msk [vmem:[#allocation5 + $0x10] sm:$0xff] %vm3867_vm5, %v6551_v11  ;;  %7432 = vmatmul.msk.f32.gmra.mxu1 %vm299_vm3, %v9851_v10  ;;  %v6650_v61 = vadd.f32 %v10057_v56, %v6614_v34  ;;  %v6197_v49 = vld [vmem:[#allocation5 + $0x98] sm:$0xff]  ;;  %v5524_v21 = vld [vmem:[#allocation5 + $0xc8] sm:$0xff] }
 0x5f3   : > { %5923 = vst.msk [vmem:[#allocation5 + $0xa0] sm:$0xff] %vm3867_vm5, %v5891_v46  ;;  %v6229_v31 = vadd.f32 %v6197_v49, %v10036_v7 }
 0x5f4   : > { %v6682_v40 = vmax.f32 %v6650_v61, 0.0  ;;  %v5809_v15 = vpop.f32.mrf.mxu3  ;;  %v6523_v61 = vld [vmem:[#allocation5 + $0x30] sm:$0xff] }
 0x5f5   : > { %6261 = vst.msk [vmem:[#allocation5 + $0x98] sm:$0xff] %vm3867_vm5, %v6229_v31 }
 0x5f6   : > { %6714 = vxpose.xlu1.b32.cont [2/16] (narrow) %v6682_v40, 16  ;;  %v5469_v9 = vpop.f32.mrf.mxu2 }
 0x5f7   : > { %v5553_v62 = vadd.f32 %v5521_v63, %v5469_v9  ;;  %v6430_v16 = vpop.f32.mrf.mxu1 }
 0x5f8   : > { %v5860_v36 = vld [vmem:[#allocation5 + $0xa8] sm:$0xff]  ;;  %v6552_v10 = vadd.f32 %v6520_v37, %v6430_v16  ;;  %v5525_v37 = vld [vmem:[#allocation5 + $0xd0] sm:$0xff] }
 0x5f9   : > { %v5892_v30 = vadd.f32 %v5860_v36, %v5806_v53  ;;  %5585 = vst.msk [vmem:[#allocation5 + $0xb0] sm:$0xff] %vm3867_vm5, %v5553_v62  ;;  %v6615_v6 = vld [vmem:[#allocation5 + $0x10] sm:$0xff] }
 0x5fa   : > { %6584 = vst.msk [vmem:[#allocation5 + $0x18] sm:$0xff] %vm3867_vm5, %v6552_v10  ;;  %7433 = vmatmul.msk.f32.gmra.mxu1 %vm299_vm3, %v9863_v2  ;;  %v6651_v7 = vadd.f32 %v10057_v56, %v6615_v6  ;;  %v6198_v51 = vld [vmem:[#allocation5 + $0xa0] sm:$0xff]  ;;  %v6151_v2 = vpop.f32.mrf.mxu0  ;;  %v6524_v6 = vld [vmem:[#allocation5 + $0x38] sm:$0xff] }
 0x5fb   : > { %5924 = vst.msk [vmem:[#allocation5 + $0xa8] sm:$0xff] %vm3867_vm5, %v5892_v30  ;;  %v6230_v19 = vadd.f32 %v6198_v51, %v10049_v50 }
 0x5fc   : > { %v6683_v8 = vmax.f32 %v6651_v7, 0.0  ;;  %v5812_v12 = vpop.f32.mrf.mxu3 }
 0x5fd   : > { %6262 = vst.msk [vmem:[#allocation5 + $0xa0] sm:$0xff] %vm3867_vm5, %v6230_v19 }
 0x5fe   : > { %6715 = vxpose.xlu1.b32.cont [3/16] (narrow) %v6683_v8, 16  ;;  %v5472_v29 = vpop.f32.mrf.mxu2 }
 0x5ff   : > { %v5554_v0 = vadd.f32 %v5522_v32, %v5472_v29  ;;  %v6433_v13 = vpop.f32.mrf.mxu1 }
 0x600   : > { %v5861_v28 = vld [vmem:[#allocation5 + $0xb0] sm:$0xff]  ;;  %v6553_v17 = vadd.f32 %v6521_v55, %v6433_v13  ;;  %v5526_v13 = vld [vmem:[#allocation5 + $0xd8] sm:$0xff] }
 0x601   : > { %v5893_v54 = vadd.f32 %v5861_v28, %v5809_v15  ;;  %5586 = vst.msk [vmem:[#allocation5 + $0xb8] sm:$0xff] %vm3867_vm5, %v5554_v0  ;;  %v6616_v44 = vld [vmem:[#allocation5 + $0x18] sm:$0xff] }
 0x602   : > { %6585 = vst.msk [vmem:[#allocation5 + $0x20] sm:$0xff] %vm3867_vm5, %v6553_v17  ;;  %7434 = vmatmul.msk.f32.gmra.mxu1 %vm299_vm3, %v9877_v41  ;;  %v6652_v50 = vadd.f32 %v10057_v56, %v6616_v44  ;;  %v6199_v5 = vld [vmem:[#allocation5 + $0xa8] sm:$0xff]  ;;  %v6154_v53 = vpop.f32.mrf.mxu0  ;;  %v6525_v17 = vld [vmem:[#allocation5 + $0x40] sm:$0xff] }
 0x603   : > { %5925 = vst.msk [vmem:[#allocation5 + $0xb0] sm:$0xff] %vm3867_vm5, %v5893_v54  ;;  %v6231_v58 = vadd.f32 %v6199_v5, %v6145_v45 }
 0x604   : > { %v6684_v23 = vmax.f32 %v6652_v50, 0.0  ;;  %v5815_v20 = vpop.f32.mrf.mxu3 }
 0x605   : > { %6263 = vst.msk [vmem:[#allocation5 + $0xa8] sm:$0xff] %vm3867_vm5, %v6231_v58 }
 0x606   : > { %6716 = vxpose.xlu1.b32.cont [4/16] (narrow) %v6684_v23, 16  ;;  %v5475_v38 = vpop.f32.mrf.mxu2 }
 0x607   : > { %v5555_v43 = vadd.f32 %v5523_v18, %v5475_v38  ;;  %v6436_v48 = vpop.f32.mrf.mxu1 }
 0x608   : > { %v5862_v57 = vld [vmem:[#allocation5 + $0xb8] sm:$0xff]  ;;  %v6554_v14 = vadd.f32 %v6522_v33, %v6436_v48 }
 0x609   : > { %v5894_v59 = vadd.f32 %v5862_v57, %v5812_v12  ;;  %5587 = vst.msk [vmem:[#allocation5 + $0xc0] sm:$0xff] %vm3867_vm5, %v5555_v43  ;;  %v6617_v41 = vld [vmem:[#allocation5 + $0x20] sm:$0xff]  ;;  %v6526_v57 = vld [vmem:[#allocation5 + $0x48] sm:$0xff] }
 0x60a   : > { %6586 = vst.msk [vmem:[#allocation5 + $0x28] sm:$0xff] %vm3867_vm5, %v6554_v14  ;;  %7435 = vmatmul.msk.f32.gmra.mxu1 %vm299_vm3, %v9891_v22  ;;  %v6653_v45 = vadd.f32 %v10057_v56, %v6617_v41  ;;  %v6200_v35 = vld [vmem:[#allocation5 + $0xb0] sm:$0xff]  ;;  %v6157_v62 = vpop.f32.mrf.mxu0  ;;  %v5527_v43 = vld [vmem:[#allocation5 + $0xe0] sm:$0xff] }
 0x60b   : > { %5926 = vst.msk [vmem:[#allocation5 + $0xb8] sm:$0xff] %vm3867_vm5, %v5894_v59  ;;  %v6232_v52 = vadd.f32 %v6200_v35, %v6148_v3 }
 0x60c   : > { %v6685_v1 = vmax.f32 %v6653_v45, 0.0  ;;  %v5818_v11 = vpop.f32.mrf.mxu3 }
 0x60d   : > { %6264 = vst.msk [vmem:[#allocation5 + $0xb0] sm:$0xff] %vm3867_vm5, %v6232_v52 }
 0x60e   : > { %6717 = vxpose.xlu1.b32.cont [5/16] (narrow) %v6685_v1, 16  ;;  %v5478_v25 = vpop.f32.mrf.mxu2 }
 0x60f   : > { %v5556_v46 = vadd.f32 %v5524_v21, %v5478_v25  ;;  %v6439_v34 = vpop.f32.mrf.mxu1 }
 0x610   : > { %v5863_v49 = vld [vmem:[#allocation5 + $0xc0] sm:$0xff]  ;;  %v6555_v31 = vadd.f32 %v6523_v61, %v6439_v34  ;;  %v6527_v61 = vld [vmem:[#allocation5 + $0x50] sm:$0xff] }
 0x611   : > { %v5895_v22 = vadd.f32 %v5863_v49, %v5815_v20  ;;  %5588 = vst.msk [vmem:[#allocation5 + $0xc8] sm:$0xff] %vm3867_vm5, %v5556_v46  ;;  %v6618_v40 = vld [vmem:[#allocation5 + $0x28] sm:$0xff] }
 0x612   : > { %6587 = vst.msk [vmem:[#allocation5 + $0x30] sm:$0xff] %vm3867_vm5, %v6555_v31  ;;  %7436 = vmatmul.msk.f32.gmra.mxu1 %vm299_vm3, %v9905_v4  ;;  %v6654_v9 = vadd.f32 %v10057_v56, %v6618_v40  ;;  %v6201_v63 = vld [vmem:[#allocation5 + $0xb8] sm:$0xff] }
 0x613   : > { %5927 = vst.msk [vmem:[#allocation5 + $0xc0] sm:$0xff] %vm3867_vm5, %v5895_v22  ;;  %v6233_v15 = vadd.f32 %v6201_v63, %v6151_v2  ;;  %v6160_v2 = vpop.f32.mrf.mxu0 }
 0x614   : > { %v6686_v3 = vmax.f32 %v6654_v9, 0.0  ;;  %v5821_v36 = vpop.f32.mrf.mxu3 }
 0x615   : > { %6265 = vst.msk [vmem:[#allocation5 + $0xb8] sm:$0xff] %vm3867_vm5, %v6233_v15 }
 0x616   : > { %6718 = vxpose.xlu1.b32.cont [6/16] (narrow) %v6686_v3, 16  ;;  %v5481_v16 = vpop.f32.mrf.mxu2 }
 0x617   : > { %v5557_v10 = vadd.f32 %v5525_v37, %v5481_v16  ;;  %v6442_v30 = vpop.f32.mrf.mxu1  ;;  %v5529_v37 = vld [vmem:[#allocation5 + $0xf0] sm:$0xff] }
 0x618   : > { %v5864_v7 = vld [vmem:[#allocation5 + $0xc8] sm:$0xff]  ;;  %v6556_v51 = vadd.f32 %v6524_v6, %v6442_v30  ;;  %v6528_v30 = vld [vmem:[#allocation5 + $0x58] sm:$0xff] }
 0x619   : > { %v5896_v4 = vadd.f32 %v5864_v7, %v5818_v11  ;;  %5589 = vst.msk [vmem:[#allocation5 + $0xd0] sm:$0xff] %vm3867_vm5, %v5557_v10  ;;  %v6619_v19 = vld [vmem:[#allocation5 + $0x30] sm:$0xff]  ;;  %v5528_v11 = vld [vmem:[#allocation5 + $0xe8] sm:$0xff] }
 0x61a   : > { %6588 = vst.msk [vmem:[#allocation5 + $0x38] sm:$0xff] %vm3867_vm5, %v6556_v51  ;;  %7437 = vmatmul.msk.f32.gmra.mxu1 %vm299_vm3, %v9919_v39  ;;  %v6655_v8 = vadd.f32 %v10057_v56, %v6619_v19  ;;  %v6202_v29 = vld [vmem:[#allocation5 + $0xc0] sm:$0xff] }
 0x61b   : > { %5928 = vst.msk [vmem:[#allocation5 + $0xc8] sm:$0xff] %vm3867_vm5, %v5896_v4  ;;  %v6234_v32 = vadd.f32 %v6202_v29, %v6154_v53  ;;  %v6163_v45 = vpop.f32.mrf.mxu0 }
 0x61c   : > { %v6687_v12 = vmax.f32 %v6655_v8, 0.0  ;;  %v5824_v44 = vpop.f32.mrf.mxu3 }
 0x61d   : > { %6266 = vst.msk [vmem:[#allocation5 + $0xc0] sm:$0xff] %vm3867_vm5, %v6234_v32 }
 0x61e   : > { %6719 = vxpose.xlu1.b32.cont [7/16] (narrow) %v6687_v12, 16  ;;  %v5484_v0 = vpop.f32.mrf.mxu2 }
 0x61f   : > { %v5558_v55 = vadd.f32 %v5526_v13, %v5484_v0  ;;  %v6445_v28 = vpop.f32.mrf.mxu1  ;;  %v5530_v13 = vld [vmem:[#allocation5 + $0xf8] sm:$0xff] }
 0x620   : > { %v5865_v54 = vld [vmem:[#allocation5 + $0xd0] sm:$0xff]  ;;  %v6557_v50 = vadd.f32 %v6525_v17, %v6445_v28  ;;  %v6529_v17 = vld [vmem:[#allocation5 + $0x60] sm:$0xff] }
 0x621   : > { %v5897_v39 = vadd.f32 %v5865_v54, %v5821_v36  ;;  %5590 = vst.msk [vmem:[#allocation5 + $0xd8] sm:$0xff] %vm3867_vm5, %v5558_v55  ;;  %v6620_v5 = vld [vmem:[#allocation5 + $0x38] sm:$0xff] }
 0x622   : > { %6589 = vst.msk [vmem:[#allocation5 + $0x40] sm:$0xff] %vm3867_vm5, %v6557_v50  ;;  %7438 = vmatmul.msk.f32.gmra.mxu1 %vm299_vm3, %v9931_v24  ;;  %v6656_v58 = vadd.f32 %v10057_v56, %v6620_v5  ;;  %v6203_v23 = vld [vmem:[#allocation5 + $0xc8] sm:$0xff] }
 0x623   : > { %5929 = vst.msk [vmem:[#allocation5 + $0xd0] sm:$0xff] %vm3867_vm5, %v5897_v39  ;;  %v6235_v38 = vadd.f32 %v6203_v23, %v6157_v62  ;;  %v6166_v15 = vpop.f32.mrf.mxu0 }
 0x624   : > { %v6688_v18 = vmax.f32 %v6656_v58, 0.0  ;;  %v5827_v35 = vpop.f32.mrf.mxu3 }
 0x625   : > { %6267 = vst.msk [vmem:[#allocation5 + $0xc8] sm:$0xff] %vm3867_vm5, %v6235_v38 }
 0x626   : > { %6720 = vxpose.xlu1.b32.cont [8/16] (narrow) %v6688_v18, 16  ;;  %v5487_v20 = vpop.f32.mrf.mxu2 }
 0x627   : > { %v5559_v48 = vadd.f32 %v5527_v43, %v5487_v20  ;;  %v6448_v33 = vpop.f32.mrf.mxu1  ;;  %v6530_v20 = vld [vmem:[#allocation5 + $0x68] sm:$0xff] }
 0x628   : > { %v5866_v14 = vld [vmem:[#allocation5 + $0xd8] sm:$0xff]  ;;  %v6558_v59 = vadd.f32 %v6526_v57, %v6448_v33 }
 0x629   : > { %v5898_v41 = vadd.f32 %v5866_v14, %v5824_v44  ;;  %5591 = vst.msk [vmem:[#allocation5 + $0xe0] sm:$0xff] %vm3867_vm5, %v5559_v48  ;;  %v6621_v24 = vld [vmem:[#allocation5 + $0x40] sm:$0xff] }
 0x62a   : > { %6590 = vst.msk [vmem:[#allocation5 + $0x48] sm:$0xff] %vm3867_vm5, %v6558_v59  ;;  %7439 = vmatmul.msk.f32.gmra.mxu1 %vm299_vm3, %v9945_v60  ;;  %v6657_v53 = vadd.f32 %v10057_v56, %v6621_v24  ;;  %v6204_v52 = vld [vmem:[#allocation5 + $0xd0] sm:$0xff] }
 0x62b   : > { %5930 = vst.msk [vmem:[#allocation5 + $0xd8] sm:$0xff] %vm3867_vm5, %v5898_v41  ;;  %v6236_v1 = vadd.f32 %v6204_v52, %v6160_v2  ;;  %v6169_v12 = vpop.f32.mrf.mxu0 }
 0x62c   : > { %v6689_v25 = vmax.f32 %v6657_v53, 0.0  ;;  %v5830_v3 = vpop.f32.mrf.mxu3 }
 0x62d   : > { %6268 = vst.msk [vmem:[#allocation5 + $0xd0] sm:$0xff] %vm3867_vm5, %v6236_v1 }
 0x62e   : > { %6721 = vxpose.xlu1.b32.cont [9/16] (narrow) %v6689_v25, 16  ;;  %v5490_v21 = vpop.f32.mrf.mxu2 }
 0x62f   : > { %v5560_v46 = vadd.f32 %v5528_v11, %v5490_v21  ;;  %v6451_v34 = vpop.f32.mrf.mxu1 }
 0x630   : > { %v5867_v49 = vld [vmem:[#allocation5 + $0xe0] sm:$0xff]  ;;  %v6559_v31 = vadd.f32 %v6527_v61, %v6451_v34  ;;  %v6532_v34 = vld [vmem:[#allocation5 + $0x78] sm:$0xff] }
 0x631   : > { %v5899_v22 = vadd.f32 %v5867_v49, %v5827_v35  ;;  %5592 = vst.msk [vmem:[#allocation5 + $0xe8] sm:$0xff] %vm3867_vm5, %v5560_v46  ;;  %v6622_v60 = vld [vmem:[#allocation5 + $0x48] sm:$0xff]  ;;  %v6305_v61 = vld [vmem:[#allocation3 + $0x231] sm:$0xff] }
 0x632   : > { %6591 = vst.msk [vmem:[#allocation5 + $0x50] sm:$0xff] %vm3867_vm5, %v6559_v31  ;;  %7440 = vmatmul.msk.f32.gmra.mxu1 %vm299_vm3, %v9959_v27  ;;  %v6658_v40 = vadd.f32 %v10057_v56, %v6622_v60  ;;  %v6205_v9 = vld [vmem:[#allocation5 + $0xd8] sm:$0xff]  ;;  %v6304_v35 = vld [vmem:[#allocation3 + $0x229] sm:$0xff] }
 0x633   : > { %5931 = vst.msk [vmem:[#allocation5 + $0xe0] sm:$0xff] %vm3867_vm5, %v5899_v22  ;;  %v6237_v63 = vadd.f32 %v6205_v9, %v6163_v45  ;;  %v6172_v38 = vpop.f32.mrf.mxu0  ;;  %v6531_v45 = vld [vmem:[#allocation5 + $0x70] sm:$0xff]  ;;  %v6533_v9 = vld [vmem:[#allocation5 + $0x80] sm:$0xff] }
 0x634   : > { %v6690_v62 = vmax.f32 %v6658_v40, 0.0  ;;  %v5833_v32 = vpop.f32.mrf.mxu3 }
 0x635   : > { %6269 = vst.msk [vmem:[#allocation5 + $0xd8] sm:$0xff] %vm3867_vm5, %v6237_v63 }
 0x636   : > { %6722 = vxpose.xlu1.b32.cont [10/16] (narrow) %v6690_v62, 16  ;;  %v5493_v16 = vpop.f32.mrf.mxu2 }
 0x637   : > { %v5561_v36 = vadd.f32 %v5529_v37, %v5493_v16  ;;  %v6454_v10 = vpop.f32.mrf.mxu1  ;;  %v6534_v37 = vld [vmem:[#allocation5 + $0x88] sm:$0xff] }
 0x638   : > { %v5868_v6 = vld [vmem:[#allocation5 + $0xe8] sm:$0xff]  ;;  %v6560_v7 = vadd.f32 %v6528_v30, %v6454_v10 }
 0x639   : > { %v5900_v27 = vadd.f32 %v5868_v6, %v5830_v3  ;;  %5593 = vst.msk [vmem:[#allocation5 + $0xf0] sm:$0xff] %vm3867_vm5, %v5561_v36  ;;  %v6623_v51 = vld [vmem:[#allocation5 + $0x50] sm:$0xff] }
 0x63a   : > { %6592 = vst.msk [vmem:[#allocation5 + $0x58] sm:$0xff] %vm3867_vm5, %v6560_v7  ;;  %7441 = vmatmul.msk.f32.gmra.mxu1 %vm299_vm3, %v9973_v26  ;;  %v6659_v4 = vadd.f32 %v10057_v56, %v6623_v51  ;;  %v6206_v19 = vld [vmem:[#allocation5 + $0xe0] sm:$0xff] }
 0x63b   : > { %5932 = vst.msk [vmem:[#allocation5 + $0xe8] sm:$0xff] %vm3867_vm5, %v5900_v27  ;;  %v6238_v8 = vadd.f32 %v6206_v19, %v6166_v15  ;;  %v6175_v52 = vpop.f32.mrf.mxu0  ;;  %v6535_v27 = vld [vmem:[#allocation5 + $0x90] sm:$0xff] }
 0x63c   : > { %v6691_v29 = vmax.f32 %v6659_v4, 0.0  ;;  %v5836_v23 = vpop.f32.mrf.mxu3 }
 0x63d   : > { %6270 = vst.msk [vmem:[#allocation5 + $0xe0] sm:$0xff] %vm3867_vm5, %v6238_v8 }
 0x63e   : > { %6723 = vxpose.xlu1.b32.cont [11/16] (narrow) %v6691_v29, 16  ;;  %v5496_v0 = vpop.f32.mrf.mxu2 }
 0x63f   : > { %v5562_v55 = vadd.f32 %v5530_v13, %v5496_v0  ;;  %v6457_v28 = vpop.f32.mrf.mxu1 }
 0x640   : > { %v6561_v2 = vadd.f32 %v6529_v17, %v6457_v28  ;;  %v5869_v54 = vld [vmem:[#allocation5 + $0xf0] sm:$0xff]  ;;  %v6537_v17 = vld [vmem:[#allocation5 + $0xa0] sm:$0xff] }
 0x641   : > { %5594 = vst.msk [vmem:[#allocation5 + $0xf8] sm:$0xff] %vm3867_vm5, %v5562_v55  ;;  %v5901_v26 = vadd.f32 %v5869_v54, %v5833_v32  ;;  %v6624_v44 = vld [vmem:[#allocation5 + $0x58] sm:$0xff] }
 0x642   : > { %6593 = vst.msk [vmem:[#allocation5 + $0x60] sm:$0xff] %vm3867_vm5, %v6561_v2  ;;  %7442 = vmatmul.msk.f32.gmra.mxu1 %vm299_vm3, %v9988_v47  ;;  %v6660_v50 = vadd.f32 %v10057_v56, %v6624_v44  ;;  %v6207_v39 = vld [vmem:[#allocation5 + $0xe8] sm:$0xff]  ;;  %v6536_v32 = vld [vmem:[#allocation5 + $0x98] sm:$0xff] }
 0x643   : > { %5933 = vst.msk [vmem:[#allocation5 + $0xf0] sm:$0xff] %vm3867_vm5, %v5901_v26  ;;  %v6239_v5 = vadd.f32 %v6207_v39, %v6169_v12  ;;  %v6538_v39 = vld [vmem:[#allocation5 + $0xa8] sm:$0xff] }
 0x644   : > { %v6692_v58 = vmax.f32 %v6660_v50, 0.0 }
 0x645   : > { %6271 = vst.msk [vmem:[#allocation5 + $0xe8] sm:$0xff] %vm3867_vm5, %v6239_v5 }
 0x646   : > { %6724 = vxpose.xlu1.b32.cont [12/16] (narrow) %v6692_v58, 16 }
 0x647   : > { %v6460_v18 = vpop.f32.mrf.mxu1 }
 0x648   : > { %v6562_v43 = vadd.f32 %v6530_v20, %v6460_v18  ;;  %v5870_v48 = vld [vmem:[#allocation5 + $0xf8] sm:$0xff]  ;;  %v6539_v20 = vld [vmem:[#allocation5 + $0xb0] sm:$0xff] }
 0x649   : > { %v5902_v33 = vadd.f32 %v5870_v48, %v5836_v23  ;;  %v6625_v57 = vld [vmem:[#allocation5 + $0x60] sm:$0xff] }
 0x64a   : > { %6594 = vst.msk [vmem:[#allocation5 + $0x68] sm:$0xff] %vm3867_vm5, %v6562_v43  ;;  %7443 = vmatmul.msk.f32.gmra.mxu1 %vm299_vm3, %v10001_v42  ;;  %v6208_v47 = vld [vmem:[#allocation5 + $0xf0] sm:$0xff]  ;;  %v6661_v14 = vadd.f32 %v10057_v56, %v6625_v57 }
 0x64b   : > { %5934 = vst.msk [vmem:[#allocation5 + $0xf8] sm:$0xff] %vm3867_vm5, %v5902_v33  ;;  %v6240_v59 = vadd.f32 %v6208_v47, %v6172_v38 }
 0x64c   : > { %v6693_v41 = vmax.f32 %v6661_v14, 0.0  ;;  %v6540_v14 = vld [vmem:[#allocation5 + $0xb8] sm:$0xff] }
 0x64d   : > { %6272 = vst.msk [vmem:[#allocation5 + $0xf0] sm:$0xff] %vm3867_vm5, %v6240_v59 }
 0x64e   : > { %6725 = vxpose.xlu1.b32.cont [13/16] (narrow) %v6693_v41, 16 }
 0x64f   : > { %v6463_v24 = vpop.f32.mrf.mxu1 }
 0x650   : > { %v6563_v53 = vadd.f32 %v6531_v45, %v6463_v24 }
 0x651   : > { %v6626_v1 = vld [vmem:[#allocation5 + $0x68] sm:$0xff] }
 0x652   : > { %6595 = vst.msk [vmem:[#allocation5 + $0x70] sm:$0xff] %vm3867_vm5, %v6563_v53  ;;  %7444 = vmatmul.msk.f32.gmra.mxu1 %vm299_vm3, %v6304_v35  ;;  %v6209_v42 = vld [vmem:[#allocation5 + $0xf8] sm:$0xff]  ;;  %v6662_v25 = vadd.f32 %v10057_v56, %v6626_v1  ;;  %v6541_v53 = vld [vmem:[#allocation5 + $0xc0] sm:$0xff] }
 0x653   : > { %v6241_v21 = vadd.f32 %v6209_v42, %v6175_v52 }
 0x654   : > { %v6694_v11 = vmax.f32 %v6662_v25, 0.0 }
 0x655   : > { %6273 = vst.msk [vmem:[#allocation5 + $0xf8] sm:$0xff] %vm3867_vm5, %v6241_v21 }
 0x656   : > { %6726 = vxpose.xlu1.b32.cont [14/16] (narrow) %v6694_v11, 16  ;;  %v6542_v11 = vld [vmem:[#allocation5 + $0xc8] sm:$0xff] }
 0x657   : > { %v6466_v46 = vpop.f32.mrf.mxu1 }
 0x658   : > { %v6564_v49 = vadd.f32 %v6532_v34, %v6466_v46 }
 0x659   : > { %v6627_v31 = vld [vmem:[#allocation5 + $0x70] sm:$0xff] }
 0x65a   : > { %6596 = vst.msk [vmem:[#allocation5 + $0x78] sm:$0xff] %vm3867_vm5, %v6564_v49  ;;  %7445 = vmatmul.msk.f32.gmra.mxu1 %vm299_vm3, %v6305_v61  ;;  %v6663_v22 = vadd.f32 %v10057_v56, %v6627_v31 }
 0x65c   : > { %v6695_v60 = vmax.f32 %v6663_v22, 0.0  ;;  %v6543_v22 = vld [vmem:[#allocation5 + $0xd0] sm:$0xff] }
 0x65e   : > { %6727 = vxpose.xlu1.b32.cont [15/16] (narrow) %v6695_v60, 16 }
 0x65f   : > { %v6469_v40 = vpop.f32.mrf.mxu1 }
 0x660   : > { %v6565_v63 = vadd.f32 %v6533_v9, %v6469_v40 }
 0x661   : > { %v6628_v15 = vld [vmem:[#allocation5 + $0x78] sm:$0xff] }
 0x662   : > { %6597 = vst.msk [vmem:[#allocation5 + $0x80] sm:$0xff] %vm3867_vm5, %v6565_v63  ;;  %v6664_v3 = vadd.f32 %v10057_v56, %v6628_v15 }
 0x664   : > { %v6696_v62 = vmax.f32 %v6664_v3, 0.0  ;;  %v6544_v3 = vld [vmem:[#allocation5 + $0xd8] sm:$0xff] }
 0x666   : > { %6728 = vxpose.xlu1.b32.end [16/16] (narrow) %v6696_v62, 16 }
 0x667   : > { %v6472_v16 = vpop.f32.mrf.mxu1 }
 0x668   : > { %v6566_v36 = vadd.f32 %v6534_v37, %v6472_v16 }
 0x669   : > { %v6629_v10 = vld [vmem:[#allocation5 + $0x80] sm:$0xff] }
 0x66a   : > { %6598 = vst.msk [vmem:[#allocation5 + $0x88] sm:$0xff] %vm3867_vm5, %v6566_v36  ;;  %v6665_v30 = vadd.f32 %v10057_v56, %v6629_v10 }
 0x66c   : > { %v6697_v6 = vmax.f32 %v6665_v30, 0.0  ;;  %v6545_v30 = vld [vmem:[#allocation5 + $0xe0] sm:$0xff] }
 0x66e   : > { %6745 = vxpose.xlu2.b32.start [1/16] (narrow) %v6697_v6, 16 }
 0x66f   : > { %v6475_v7 = vpop.f32.mrf.mxu1 }
 0x670   : > { %v6567_v51 = vadd.f32 %v6535_v27, %v6475_v7 }
 0x671   : > { %v6630_v4 = vld [vmem:[#allocation5 + $0x88] sm:$0xff] }
 0x672   : > { %6599 = vst.msk [vmem:[#allocation5 + $0x90] sm:$0xff] %vm3867_vm5, %v6567_v51  ;;  %v6666_v19 = vadd.f32 %v10057_v56, %v6630_v4 }
 0x674   : > { %v6698_v8 = vmax.f32 %v6666_v19, 0.0 }
 0x676   : > { %6746 = vxpose.xlu2.b32.cont [2/16] (narrow) %v6698_v8, 16  ;;  %v6546_v8 = vld [vmem:[#allocation5 + $0xe8] sm:$0xff] }
 0x677   : > { %v6478_v29 = vpop.f32.mrf.mxu1 }
 0x678   : > { %v6568_v12 = vadd.f32 %v6536_v32, %v6478_v29 }
 0x679   : > { %v6631_v0 = vld [vmem:[#allocation5 + $0x90] sm:$0xff] }
 0x67a   : > { %6600 = vst.msk [vmem:[#allocation5 + $0x98] sm:$0xff] %vm3867_vm5, %v6568_v12  ;;  %v6667_v13 = vadd.f32 %v10057_v56, %v6631_v0 }
 0x67c   : > { %v6699_v55 = vmax.f32 %v6667_v13, 0.0 }
 0x67e   : > { %6747 = vxpose.xlu2.b32.cont [3/16] (narrow) %v6699_v55, 16  ;;  %v6547_v55 = vld [vmem:[#allocation5 + $0xf0] sm:$0xff] }
 0x67f   : > { %v6481_v28 = vpop.f32.mrf.mxu1 }
 0x680   : > { %v6569_v2 = vadd.f32 %v6537_v17, %v6481_v28 }
 0x681   : > { %v6632_v54 = vld [vmem:[#allocation5 + $0x98] sm:$0xff] }
 0x682   : > { %6601 = vst.msk [vmem:[#allocation5 + $0xa0] sm:$0xff] %vm3867_vm5, %v6569_v2  ;;  %v6668_v26 = vadd.f32 %v10057_v56, %v6632_v54 }
 0x684   : > { %v6700_v44 = vmax.f32 %v6668_v26, 0.0 }
 0x686   : > { %6748 = vxpose.xlu2.b32.cont [4/16] (narrow) %v6700_v44, 16  ;;  %v6548_v44 = vld [vmem:[#allocation5 + $0xf8] sm:$0xff] }
 0x687   : > { %v6484_v50 = vpop.f32.mrf.mxu1 }
 0x688   : > { %v6570_v5 = vadd.f32 %v6538_v39, %v6484_v50 }
 0x689   : > { %v6633_v58 = vld [vmem:[#allocation5 + $0xa0] sm:$0xff] }
 0x68a   : > { %6602 = vst.msk [vmem:[#allocation5 + $0xa8] sm:$0xff] %vm3867_vm5, %v6570_v5  ;;  %v6669_v23 = vadd.f32 %v10057_v56, %v6633_v58 }
 0x68c   : > { %v6701_v38 = vmax.f32 %v6669_v23, 0.0 }
 0x68e   : > { %6749 = vxpose.xlu2.b32.cont [5/16] (narrow) %v6701_v38, 16 }
 0x68f   : > { %v6487_v18 = vpop.f32.mrf.mxu1 }
 0x690   : > { %v6571_v43 = vadd.f32 %v6539_v20, %v6487_v18 }
 0x691   : > { %v6634_v48 = vld [vmem:[#allocation5 + $0xa8] sm:$0xff] }
 0x692   : > { %6603 = vst.msk [vmem:[#allocation5 + $0xb0] sm:$0xff] %vm3867_vm5, %v6571_v43  ;;  %v6670_v33 = vadd.f32 %v10057_v56, %v6634_v48  ;;  %v6729_v4 = vpop.trf.xlu1 }
 0x693   : > { %6777 = vst [vmem:[%s10189_s23] sm:$0xff] %v6729_v4 }
 0x694   : > { %v6702_v57 = vmax.f32 %v6670_v33, 0.0 }
 0x696   : > { %6750 = vxpose.xlu2.b32.cont [6/16] (narrow) %v6702_v57, 16 }
 0x697   : > { %v6490_v47 = vpop.f32.mrf.mxu1 }
 0x698   : > { %v6572_v59 = vadd.f32 %v6540_v14, %v6490_v47 }
 0x699   : > { %v6635_v41 = vld [vmem:[#allocation5 + $0xb0] sm:$0xff] }
 0x69a   : > { %6604 = vst.msk [vmem:[#allocation5 + $0xb8] sm:$0xff] %vm3867_vm5, %v6572_v59  ;;  %v6671_v24 = vadd.f32 %v10057_v56, %v6635_v41  ;;  %v6730_v20 = vpop.trf.xlu1 }
 0x69b   : > { %6779 = vst [vmem:[%s10189_s23 + $0x10] sm:$0xff] %v6730_v20 }
 0x69c   : > { %v6703_v45 = vmax.f32 %v6671_v24, 0.0 }
 0x69e   : > { %6751 = vxpose.xlu2.b32.cont [7/16] (narrow) %v6703_v45, 16 }
 0x69f   : > { %v6493_v35 = vpop.f32.mrf.mxu1 }
 0x6a0   : > { %v6573_v52 = vadd.f32 %v6541_v53, %v6493_v35 }
 0x6a1   : > { %v6636_v1 = vld [vmem:[#allocation5 + $0xb8] sm:$0xff] }
 0x6a2   : > { %6605 = vst.msk [vmem:[#allocation5 + $0xc0] sm:$0xff] %vm3867_vm5, %v6573_v52  ;;  %v6672_v42 = vadd.f32 %v10057_v56, %v6636_v1 }
 0x6a4   : > { %v6704_v25 = vmax.f32 %v6672_v42, 0.0 }
 0x6a6   : > { %6752 = vxpose.xlu2.b32.cont [8/16] (narrow) %v6704_v25, 16 }
 0x6a7   : > { %v6496_v21 = vpop.f32.mrf.mxu1 }
 0x6a8   : > { %v6574_v46 = vadd.f32 %v6542_v11, %v6496_v21 }
 0x6a9   : > { %v6637_v34 = vld [vmem:[#allocation5 + $0xc0] sm:$0xff] }
 0x6aa   : > { %6606 = vst.msk [vmem:[#allocation5 + $0xc8] sm:$0xff] %vm3867_vm5, %v6574_v46  ;;  %v6673_v61 = vadd.f32 %v10057_v56, %v6637_v34 }
 0x6ac   : > { %v6705_v49 = vmax.f32 %v6673_v61, 0.0 }
 0x6ae   : > { %6753 = vxpose.xlu2.b32.cont [9/16] (narrow) %v6705_v49, 16 }
 0x6af   : > { %v6499_v31 = vpop.f32.mrf.mxu1 }
 0x6b0   : > { %v6575_v60 = vadd.f32 %v6543_v22, %v6499_v31 }
 0x6b1   : > { %v6638_v40 = vld [vmem:[#allocation5 + $0xc8] sm:$0xff] }
 0x6b2   : > { %6607 = vst.msk [vmem:[#allocation5 + $0xd0] sm:$0xff] %vm3867_vm5, %v6575_v60  ;;  %v6674_v9 = vadd.f32 %v10057_v56, %v6638_v40 }
 0x6b4   : > { %v6706_v63 = vmax.f32 %v6674_v9, 0.0 }
 0x6b6   : > { %6754 = vxpose.xlu2.b32.cont [10/16] (narrow) %v6706_v63, 16 }
 0x6b7   : > { %v6502_v15 = vpop.f32.mrf.mxu1 }
 0x6b8   : > { %v6576_v62 = vadd.f32 %v6544_v3, %v6502_v15 }
 0x6b9   : > { %v6639_v16 = vld [vmem:[#allocation5 + $0xd0] sm:$0xff] }
 0x6ba   : > { %6608 = vst.msk [vmem:[#allocation5 + $0xd8] sm:$0xff] %vm3867_vm5, %v6576_v62  ;;  %v6675_v37 = vadd.f32 %v10057_v56, %v6639_v16 }
 0x6bc   : > { %v6707_v36 = vmax.f32 %v6675_v37, 0.0 }
 0x6be   : > { %6755 = vxpose.xlu2.b32.cont [11/16] (narrow) %v6707_v36, 16 }
 0x6bf   : > { %v6505_v10 = vpop.f32.mrf.mxu1 }
 0x6c0   : > { %v6577_v6 = vadd.f32 %v6545_v30, %v6505_v10 }
 0x6c1   : > { %v6640_v7 = vld [vmem:[#allocation5 + $0xd8] sm:$0xff] }
 0x6c2   : > { %6609 = vst.msk [vmem:[#allocation5 + $0xe0] sm:$0xff] %vm3867_vm5, %v6577_v6  ;;  %v6676_v27 = vadd.f32 %v10057_v56, %v6640_v7 }
 0x6c4   : > { %v6708_v51 = vmax.f32 %v6676_v27, 0.0 }
 0x6c6   : > { %6756 = vxpose.xlu2.b32.cont [12/16] (narrow) %v6708_v51, 16 }
 0x6c7   : > { %v6508_v19 = vpop.f32.mrf.mxu1 }
 0x6c8   : > { %v6578_v29 = vadd.f32 %v6546_v8, %v6508_v19 }
 0x6c9   : > { %v6641_v32 = vld [vmem:[#allocation5 + $0xe0] sm:$0xff] }
 0x6ca   : > { %6610 = vst.msk [vmem:[#allocation5 + $0xe8] sm:$0xff] %vm3867_vm5, %v6578_v29  ;;  %v6677_v12 = vadd.f32 %v10057_v56, %v6641_v32 }
 0x6cc   : > { %v6709_v0 = vmax.f32 %v6677_v12, 0.0 }
 0x6ce   : > { %6757 = vxpose.xlu2.b32.cont [13/16] (narrow) %v6709_v0, 16 }
 0x6cf   : > { %v6511_v13 = vpop.f32.mrf.mxu1 }
 0x6d0   : > { %v6579_v28 = vadd.f32 %v6547_v55, %v6511_v13 }
 0x6d1   : > { %v6642_v17 = vld [vmem:[#allocation5 + $0xe8] sm:$0xff] }
 0x6d2   : > { %6611 = vst.msk [vmem:[#allocation5 + $0xf0] sm:$0xff] %vm3867_vm5, %v6579_v28  ;;  %v6678_v2 = vadd.f32 %v10057_v56, %v6642_v17 }
 0x6d4   : > { %v6710_v54 = vmax.f32 %v6678_v2, 0.0 }
 0x6d6   : > { %6758 = vxpose.xlu2.b32.cont [14/16] (narrow) %v6710_v54, 16 }
 0x6d7   : > { %v6514_v26 = vpop.f32.mrf.mxu1 }
 0x6d8   : > { %v6580_v50 = vadd.f32 %v6548_v44, %v6514_v26 }
 0x6d9   : > { %v6643_v39 = vld [vmem:[#allocation5 + $0xf0] sm:$0xff] }
 0x6da   : > { %6612 = vst.msk [vmem:[#allocation5 + $0xf8] sm:$0xff] %vm3867_vm5, %v6580_v50  ;;  %v6679_v5 = vadd.f32 %v10057_v56, %v6643_v39 }
 0x6dc   : > { %v6711_v58 = vmax.f32 %v6679_v5, 0.0 }
 0x6de   : > { %6759 = vxpose.xlu2.b32.cont [15/16] (narrow) %v6711_v58, 16 }
 0x6e1   : > { %v6644_v23 = vld [vmem:[#allocation5 + $0xf8] sm:$0xff] }
 0x6e2   : > { %v6680_v38 = vadd.f32 %v10057_v56, %v6644_v23 }
 0x6e4   : > { %v6712_v18 = vmax.f32 %v6680_v38, 0.0 }
 0x6e6   : > { %6760 = vxpose.xlu2.b32.end [16/16] (narrow) %v6712_v18, 16 }
 0x707   : > { %v6761_v43 = vpop.trf.xlu2 }
 0x708   : > { %6778 = vst [vmem:[%s10189_s23 + $0x8] sm:$0xff] %v6761_v43 }
 0x70f   : > { %v6762_v48 = vpop.trf.xlu2 }
 0x710   : > { %6780 = vst [vmem:[%s10189_s23 + $0x18] sm:$0xff] %v6762_v48 }
 0x711 PF: > { %s15_s18 = sadd.s32 1, %s7470_s18  }
 0x712   : > { %p12_p4 = scmp.ge.s32.totalorder %s15_s18, 4  }
 0x714   :  { %14 = sbr.rel (!%p12_p4) target bundleno = 1 (0x1), region = 90 }

</bundles_post_ra>
